<compile_context>
chip_gen: v6e
topology: v6e:2x2x1
jax: 0.10.0
libtpu: 0.0.40
codegen_flags: <defaults>
</compile_context>

<pallas_src>
import jax
import jax.numpy as jnp
from jax.experimental import pallas as pl
from jax.experimental.pallas import tpu as pltpu

BF16 = jnp.bfloat16
F32 = jnp.float32


# ----------------------------------------------------------------------------
# Kernel A: fused 3-layer per-point MLP (affine-BN + ReLU each) + max-pool.
# grid = (B, n_tiles); output (1, 1, 1024) block is an accumulator over the
# (innermost, "arbitrary") tile axis.
# ----------------------------------------------------------------------------
def _point_mlp3_max_kernel(x_ref, w1, s1, b1, w2, s2, b2, w3, s3, b3, o_ref):
    @pl.when(pl.program_id(1) == 0)
    def _():
        o_ref[...] = jnp.full_like(o_ref, -jnp.inf)

    x = x_ref[0]                                                  # (TN, Cin)
    h = jnp.dot(x, w1[...], preferred_element_type=jnp.float32)
    h = jnp.maximum(h * s1[...] + b1[...], 0.0)
    h = jnp.dot(h.astype(BF16), w2[...], preferred_element_type=jnp.float32)
    h = jnp.maximum(h * s2[...] + b2[...], 0.0)
    h = jnp.dot(h.astype(BF16), w3[...], preferred_element_type=jnp.float32)
    h = jnp.maximum(h * s3[...] + b3[...], 0.0)
    o_ref[0] = jnp.maximum(o_ref[0], jnp.max(h, axis=0, keepdims=True))


def point_mlp3_max(x, c1, c2, c3, tn):
    """x: (B, Np, Cin) -> (B, 1024) = max over points of relu-MLP(x)."""
    B, Np, Cin = x.shape
    d1, d2, d3 = c1["W"].shape[1], c2["W"].shape[1], c3["W"].shape[1]
    nt = Np // tn
    const = lambda b, n: (0, 0)
    flops = 2 * B * Np * (Cin * d1 + d1 * d2 + d2 * d3)
    bytes_acc = (B * Np * Cin * x.dtype.itemsize
                 + (Cin * d1 + d1 * d2 + d2 * d3) * 2 + B * d3 * 4)
    out = pl.pallas_call(
        _point_mlp3_max_kernel,
        out_shape=jax.ShapeDtypeStruct((B, 1, d3), jnp.float32),
        grid=(B, nt),
        in_specs=[
            pl.BlockSpec((1, tn, Cin), lambda b, n: (b, n, 0)),
            pl.BlockSpec((Cin, d1), const),
            pl.BlockSpec((1, d1), const), pl.BlockSpec((1, d1), const),
            pl.BlockSpec((d1, d2), const),
            pl.BlockSpec((1, d2), const), pl.BlockSpec((1, d2), const),
            pl.BlockSpec((d2, d3), const),
            pl.BlockSpec((1, d3), const), pl.BlockSpec((1, d3), const),
        ],
        out_specs=pl.BlockSpec((1, 1, d3), lambda b, n: (b, 0, 0)),
        compiler_params=pltpu.CompilerParams(
            dimension_semantics=("parallel", "arbitrary")),
        cost_estimate=pl.CostEstimate(flops=int(flops), transcendentals=0,
                                      bytes_accessed=int(bytes_acc)),
    )(x,
      c1["W"].astype(x.dtype), c1["s"], c1["b"],      # K=3 layer stays f32
      c2["W"].astype(BF16), c2["s"], c2["b"],
      c3["W"].astype(BF16), c3["s"], c3["b"])
    return out[:, 0, :]


# ----------------------------------------------------------------------------
# Kernel B: fused convp2 (per-batch folded weight, ReLU) -> convp3 (no ReLU)
# -> max-pool accumulator.
# ----------------------------------------------------------------------------
def _feat_mlp2_max_kernel(x_ref, w1_ref, s1, b1, w2, s2, b2, o_ref):
    @pl.when(pl.program_id(1) == 0)
    def _():
        o_ref[...] = jnp.full_like(o_ref, -jnp.inf)

    x = x_ref[0]                                                  # (TN, 64)
    h = jnp.dot(x, w1_ref[0], preferred_element_type=jnp.float32)
    h = jnp.maximum(h * s1[...] + b1[...], 0.0)
    h = jnp.dot(h.astype(BF16), w2[...], preferred_element_type=jnp.float32)
    h = h * s2[...] + b2[...]                                     # convp3: no ReLU
    o_ref[0] = jnp.maximum(o_ref[0], jnp.max(h, axis=0, keepdims=True))


def feat_mlp2_max(x, w1f, p2, p3, tn):
    """x: (B, Np, 64) bf16, w1f: (B, 64, 128) folded per-batch weight."""
    B, Np, Cin = x.shape
    d1 = w1f.shape[2]
    d2 = p3["W"].shape[1]
    nt = Np // tn
    const = lambda b, n: (0, 0)
    flops = 2 * B * Np * (Cin * d1 + d1 * d2)
    bytes_acc = (B * Np * Cin * 2 + B * Cin * d1 * 2 + d1 * d2 * 2 + B * d2 * 4)
    out = pl.pallas_call(
        _feat_mlp2_max_kernel,
        out_shape=jax.ShapeDtypeStruct((B, 1, d2), jnp.float32),
        grid=(B, nt),
        in_specs=[
            pl.BlockSpec((1, tn, Cin), lambda b, n: (b, n, 0)),
            pl.BlockSpec((1, Cin, d1), lambda b, n: (b, 0, 0)),
            pl.BlockSpec((1, d1), const), pl.BlockSpec((1, d1), const),
            pl.BlockSpec((d1, d2), const),
            pl.BlockSpec((1, d2), const), pl.BlockSpec((1, d2), const),
        ],
        out_specs=pl.BlockSpec((1, 1, d2), lambda b, n: (b, 0, 0)),
        compiler_params=pltpu.CompilerParams(
            dimension_semantics=("parallel", "arbitrary")),
        cost_estimate=pl.CostEstimate(flops=int(flops), transcendentals=0,
                                      bytes_accessed=int(bytes_acc)),
    )(x, w1f, p2["s"], p2["b"], p3["W"].astype(BF16), p3["s"], p3["b"])
    return out[:, 0, :]


# ----------------------------------------------------------------------------
# Kernel C: per-point linear with a per-batch (transform-folded) weight,
# affine BN + ReLU.  Tiled over (B, points); output kept in bf16.
# ----------------------------------------------------------------------------
def _pointwise_affine_relu_kernel(x_ref, w_ref, s_ref, b_ref, o_ref):
    h = jnp.dot(x_ref[0], w_ref[0], preferred_element_type=jnp.float32)
    h = jnp.maximum(h * s_ref[...] + b_ref[...], 0.0)
    o_ref[0] = h.astype(o_ref.dtype)


def pointwise_affine_relu(x, w_per_batch, s, b, tn, out_dtype=BF16):
    B, Np, Cin = x.shape
    d = w_per_batch.shape[2]
    nt = Np // tn
    const = lambda b_, n: (0, 0)
    return pl.pallas_call(
        _pointwise_affine_relu_kernel,
        out_shape=jax.ShapeDtypeStruct((B, Np, d), out_dtype),
        grid=(B, nt),
        in_specs=[
            pl.BlockSpec((1, tn, Cin), lambda b_, n: (b_, n, 0)),
            pl.BlockSpec((1, Cin, d), lambda b_, n: (b_, 0, 0)),
            pl.BlockSpec((1, d), const),
            pl.BlockSpec((1, d), const),
        ],
        out_specs=pl.BlockSpec((1, tn, d), lambda b_, n: (b_, n, 0)),
        compiler_params=pltpu.CompilerParams(
            dimension_semantics=("parallel", "parallel")),
    )(x, w_per_batch, s, b)


# ----------------------------------------------------------------------------
# Kernel D: fused STN head fc1 -> fc2 -> fc3 (+ identity).
# ----------------------------------------------------------------------------
def _stn_head_kernel(g_ref, w1, s1, b1, w2, s2, b2, w3, b3, iden_ref, o_ref):
    h = jnp.dot(g_ref[...].astype(BF16), w1[...],
                preferred_element_type=jnp.float32)
    h = jnp.maximum(h * s1[...] + b1[...], 0.0)
    h = jnp.dot(h.astype(BF16), w2[...], preferred_element_type=jnp.float32)
    h = jnp.maximum(h * s2[...] + b2[...], 0.0)
    h = jnp.dot(h.astype(BF16), w3[...], preferred_element_type=jnp.float32)
    o_ref[...] = h + b3[...] + iden_ref[...]


def stn_head(g, p, k):
    B = g.shape[0]
    kk = k * k
    iden = jnp.eye(k, dtype=jnp.float32).reshape(1, kk)
    const = lambda i: (0, 0)
    out = pl.pallas_call(
        _stn_head_kernel,
        out_shape=jax.ShapeDtypeStruct((B, kk), jnp.float32),
        grid=(1,),
        in_specs=[
            pl.BlockSpec((B, 1024), const),
            pl.BlockSpec((1024, 512), const),
            pl.BlockSpec((1, 512), const), pl.BlockSpec((1, 512), const),
            pl.BlockSpec((512, 256), const),
            pl.BlockSpec((1, 256), const), pl.BlockSpec((1, 256), const),
            pl.BlockSpec((256, kk), const), pl.BlockSpec((1, kk), const),
            pl.BlockSpec((1, kk), const),
        ],
        out_specs=pl.BlockSpec((B, kk), const),
    )(g,
      p["fc1"]["W"].astype(BF16), p["fc1"]["s"], p["fc1"]["b"],
      p["fc2"]["W"].astype(BF16), p["fc2"]["s"], p["fc2"]["b"],
      p["fc3"]["W"].astype(BF16), p["fc3"]["b"], iden)
    return out.reshape(B, k, k)


# ----------------------------------------------------------------------------
# Kernel E: fused classifier head p1 -> p2 -> p3 -> log_softmax.
# ----------------------------------------------------------------------------
def _cls_head_kernel(g_ref, w1, s1, b1, w2, s2, b2, w3, b3, o_ref):
    h = jnp.dot(g_ref[...].astype(BF16), w1[...],
                preferred_element_type=jnp.float32)
    h = jnp.maximum(h * s1[...] + b1[...], 0.0)
    h = jnp.dot(h.astype(BF16), w2[...], preferred_element_type=jnp.float32)
    h = jnp.maximum(h * s2[...] + b2[...], 0.0)
    logits = jnp.dot(h.astype(BF16), w3[...],
                     preferred_element_type=jnp.float32) + b3[...]
    m = jnp.max(logits, axis=-1, keepdims=True)
    e = jnp.exp(logits - m)
    o_ref[...] = logits - m - jnp.log(jnp.sum(e, axis=-1, keepdims=True))


def cls_head(g, params):
    B = g.shape[0]
    p1, p2, p3 = params["p1"], params["p2"], params["p3"]
    k = p3["W"].shape[1]
    const = lambda i: (0, 0)
    return pl.pallas_call(
        _cls_head_kernel,
        out_shape=jax.ShapeDtypeStruct((B, k), jnp.float32),
        grid=(1,),
        in_specs=[
            pl.BlockSpec((B, 1024), const),
            pl.BlockSpec((1024, 512), const),
            pl.BlockSpec((1, 512), const), pl.BlockSpec((1, 512), const),
            pl.BlockSpec((512, 256), const),
            pl.BlockSpec((1, 256), const), pl.BlockSpec((1, 256), const),
            pl.BlockSpec((256, k), const), pl.BlockSpec((1, k), const),
        ],
        out_specs=pl.BlockSpec((B, k), const),
    )(g,
      p1["W"].astype(BF16), p1["s"], p1["b"],
      p2["W"].astype(BF16), p2["s"], p2["b"],
      p3["W"].astype(BF16), p3["b"])


# ----------------------------------------------------------------------------
# Parameter construction (deterministic, synthetic; BN folded to scale/bias)
# ----------------------------------------------------------------------------
def init_affine(key, cin, cout):
    k1, k2, k3 = jax.random.split(key, 3)
    return {"W": 0.05 * jax.random.normal(k1, (cin, cout), F32),
            "s": 1.0 + 0.1 * jax.random.normal(k2, (1, cout), F32),
            "b": 0.1 * jax.random.normal(k3, (1, cout), F32)}


def init_linear(key, cin, cout):
    k1, k2 = jax.random.split(key, 2)
    return {"W": 0.05 * jax.random.normal(k1, (cin, cout), F32),
            "b": 0.1 * jax.random.normal(k2, (1, cout), F32)}


def init_stn(key, cin, k_out):
    ks = jax.random.split(key, 6)
    return {"conv1": init_affine(ks[0], cin, 64),
            "conv2": init_affine(ks[1], 64, 128),
            "conv3": init_affine(ks[2], 128, 1024),
            "fc1": init_affine(ks[3], 1024, 512),
            "fc2": init_affine(ks[4], 512, 256),
            "fc3": init_linear(ks[5], 256, k_out * k_out)}


def init_model(key, channel=3, num_classes=40):
    ks = jax.random.split(key, 8)
    return {"stn": init_stn(ks[0], channel, 3),
            "convp1": init_affine(ks[1], channel, 64),
            "fstn": init_stn(ks[2], 64, 64),
            "convp2": init_affine(ks[3], 64, 128),
            "convp3": init_affine(ks[4], 128, 1024),
            "p1": init_affine(ks[5], 1024, 512),
            "p2": init_affine(ks[6], 512, 256),
            "p3": init_linear(ks[7], 256, num_classes)}


# ----------------------------------------------------------------------------
# Forward pass
# ----------------------------------------------------------------------------
def _choose_point_tile(n):
    # 256-row point tiles: multiple of 8 sublanes, well under the 32 MiB
    # scoped-VMEM default even on v7x (64 MiB physical), and past the measured
    # ~85%-of-roofline knee.  v5e/v6e could use larger tiles but gain little.
    tn = min(256, max(8, -(-n // 8) * 8))
    np_ = -(-n // tn) * tn
    return tn, np_


def get_model_forward(x_bcn, params):
    """x_bcn: (B, C, N) PyTorch NCW -> (log_probs (B, k), trans_feat (B,64,64))."""
    B, C, N = x_bcn.shape
    x = jnp.transpose(x_bcn, (0, 2, 1)).astype(F32)              # (B, N, C)
    tn, Np = _choose_point_tile(N)
    if Np != N:
        # Edge-replicate points: max over points is invariant to duplicates.
        x = jnp.pad(x, ((0, 0), (0, Np - N), (0, 0)), mode="edge")

    # ---- input transform (STN3d): fused conv1/2/3 + maxpool, then fused head
    stn_p = params["stn"]
    g1 = point_mlp3_max(x, stn_p["conv1"], stn_p["conv2"], stn_p["conv3"], tn)
    trans = stn_head(g1, stn_p, 3)                               # (B, 3, 3)

    # Fold the 3x3 transform into convp1:  (x @ T) @ W == x @ (T @ W).
    # TODO(synk): original only transforms the xyz slice when channel > 3.
    w1f = jnp.einsum("bij,jk->bik", trans, params["convp1"]["W"])  # (B, C, 64) f32
    h = pointwise_affine_relu(x, w1f, params["convp1"]["s"],
                              params["convp1"]["b"], tn)           # (B, Np, 64) bf16

    # ---- feature transform (STNkd, k=64)
    fstn_p = params["fstn"]
    g2 = point_mlp3_max(h, fstn_p["conv1"], fstn_p["conv2"], fstn_p["conv3"], tn)
    trans_feat = stn_head(g2, fstn_p, 64)                        # (B, 64, 64)

    # Fold the 64x64 transform into convp2's weight, fuse convp2->convp3->max.
    w2f = jnp.einsum("bij,jk->bik", trans_feat,
                     params["convp2"]["W"]).astype(BF16)         # (B, 64, 128)
    g3 = feat_mlp2_max(h, w2f, params["convp2"], params["convp3"], tn)  # (B, 1024)

    # ---- classifier head: p1 -> p2 -> p3 -> log_softmax (one kernel)
    logp = cls_head(g3, params)
    return logp, trans_feat


# ----------------------------------------------------------------------------
if __name__ == "__main__":
    key = jax.random.PRNGKey(0)
    k_in, k_par = jax.random.split(key)

    B, CH, NPTS, NUM_CLASSES = 2, 3, 16, 40
    x = jax.random.normal(k_in, (B, CH, NPTS), jnp.float32)      # PyTorch NCW input
    params = init_model(k_par, channel=CH, num_classes=NUM_CLASSES)

    logp, trans_feat = jax.jit(get_model_forward)(x, params)
    jax.block_until_ready((logp, trans_feat))

    assert logp.shape == (B, NUM_CLASSES)
    assert trans_feat.shape == (B, 64, 64)
    print("KERNEL_OK")
</pallas_src>

<mosaic_0001>
module attributes {stable_mosaic.version = 11 : i64} {
  func.func @_point_mlp3_max_kernel(%arg0: i32, %arg1: i32, %arg2: memref<1x16x3xf32, #tpu.memory_space<vmem>>, %arg3: memref<3x64xf32, #tpu.memory_space<vmem>>, %arg4: memref<1x64xf32, #tpu.memory_space<vmem>>, %arg5: memref<1x64xf32, #tpu.memory_space<vmem>>, %arg6: memref<64x128xbf16, #tpu.memory_space<vmem>>, %arg7: memref<1x128xf32, #tpu.memory_space<vmem>>, %arg8: memref<1x128xf32, #tpu.memory_space<vmem>>, %arg9: memref<128x1024xbf16, #tpu.memory_space<vmem>>, %arg10: memref<1x1024xf32, #tpu.memory_space<vmem>>, %arg11: memref<1x1024xf32, #tpu.memory_space<vmem>>, %arg12: memref<1x1x1024xf32, #tpu.memory_space<vmem>>) attributes {dimension_semantics = [#tpu.dimension_semantics<parallel>, #tpu.dimension_semantics<arbitrary>], iteration_bounds = array<i64: 2, 1>, scalar_prefetch = 0 : i64, scratch_operands = 0 : i64, tpu.core_type = #tpu.core_type<tc>, window_params = [{transform_indices = @transform_0, window_bounds = array<i64: 1, 16, 3>}, {pipeline_mode = #tpu.pipeline_mode<synchronous>, transform_indices = @transform_1, window_bounds = array<i64: 3, 64>}, {pipeline_mode = #tpu.pipeline_mode<synchronous>, transform_indices = @transform_2, window_bounds = array<i64: 1, 64>}, {pipeline_mode = #tpu.pipeline_mode<synchronous>, transform_indices = @transform_3, window_bounds = array<i64: 1, 64>}, {pipeline_mode = #tpu.pipeline_mode<synchronous>, transform_indices = @transform_4, window_bounds = array<i64: 64, 128>}, {pipeline_mode = #tpu.pipeline_mode<synchronous>, transform_indices = @transform_5, window_bounds = array<i64: 1, 128>}, {pipeline_mode = #tpu.pipeline_mode<synchronous>, transform_indices = @transform_6, window_bounds = array<i64: 1, 128>}, {pipeline_mode = #tpu.pipeline_mode<synchronous>, transform_indices = @transform_7, window_bounds = array<i64: 128, 1024>}, {pipeline_mode = #tpu.pipeline_mode<synchronous>, transform_indices = @transform_8, window_bounds = array<i64: 1, 1024>}, {pipeline_mode = #tpu.pipeline_mode<synchronous>, transform_indices = @transform_9, window_bounds = array<i64: 1, 1024>}, {transform_indices = @transform_10, window_bounds = array<i64: 1, 1, 1024>}]} {
    %c0_i32 = arith.constant 0 : i32
    %0 = arith.cmpi eq, %arg1, %c0_i32 : i32
    %1 = arith.extui %0 : i1 to i32
    %c0_i32_0 = arith.constant 0 : i32
    %2 = arith.cmpi ne, %1, %c0_i32_0 : i32
    scf.if %2 {
      %cst_33 = arith.constant 0xFF800000 : f32
      %45 = vector.broadcast %cst_33 : f32 to vector<1x1x1024xf32>
      %c0_34 = arith.constant 0 : index
      %c0_35 = arith.constant 0 : index
      %c0_36 = arith.constant 0 : index
      %46 = vector.load %arg12[%c0_34, %c0_35, %c0_36] : memref<1x1x1024xf32, #tpu.memory_space<vmem>>, vector<1x1x1024xf32>
      tpu.vector_store %arg12[%c0_34, %c0_35, %c0_36], %45 {strides = array<i32>} : memref<1x1x1024xf32, #tpu.memory_space<vmem>>, vector<1x1x1024xf32>,
    } else {
    }
    %c0 = arith.constant 0 : index
    %c0_1 = arith.constant 0 : index
    %c0_2 = arith.constant 0 : index
    %3 = vector.load %arg2[%c0, %c0_1, %c0_2] : memref<1x16x3xf32, #tpu.memory_space<vmem>>, vector<1x16x3xf32>
    %4 = vector.shape_cast %3 : vector<1x16x3xf32> to vector<16x3xf32>
    %c0_3 = arith.constant 0 : index
    %c0_4 = arith.constant 0 : index
    %5 = vector.load %arg3[%c0_3, %c0_4] : memref<3x64xf32, #tpu.memory_space<vmem>>, vector<3x64xf32>
    %cst = arith.constant dense<0.000000e+00> : vector<16x64xf32>
    %6 = tpu.matmul %4, %5, %cst {dimension_numbers = #tpu.dot_dimension_numbers<[1], [0], [0], [1], [0, 0, 1, 1], [], []>} : vector<16x3xf32>, vector<3x64xf32>, vector<16x64xf32> -> vector<16x64xf32>
    %c0_5 = arith.constant 0 : index
    %c0_6 = arith.constant 0 : index
    %7 = vector.load %arg4[%c0_5, %c0_6] : memref<1x64xf32, #tpu.memory_space<vmem>>, vector<1x64xf32>
    %8 = vector.broadcast %7 : vector<1x64xf32> to vector<16x64xf32>
    %9 = arith.mulf %6, %8 : vector<16x64xf32>
    %c0_7 = arith.constant 0 : index
    %c0_8 = arith.constant 0 : index
    %10 = vector.load %arg5[%c0_7, %c0_8] : memref<1x64xf32, #tpu.memory_space<vmem>>, vector<1x64xf32>
    %11 = vector.broadcast %10 : vector<1x64xf32> to vector<16x64xf32>
    %12 = arith.addf %9, %11 : vector<16x64xf32>
    %cst_9 = arith.constant 0.000000e+00 : f32
    %13 = vector.broadcast %cst_9 : f32 to vector<16x64xf32>
    %14 = arith.maximumf %12, %13 : vector<16x64xf32>
    %15 = arith.truncf %14 : vector<16x64xf32> to vector<16x64xbf16>
    %c0_10 = arith.constant 0 : index
    %c0_11 = arith.constant 0 : index
    %16 = vector.load %arg6[%c0_10, %c0_11] : memref<64x128xbf16, #tpu.memory_space<vmem>>, vector<64x128xbf16>
    %cst_12 = arith.constant dense<0.000000e+00> : vector<16x128xf32>
    %17 = tpu.matmul %15, %16, %cst_12 {dimension_numbers = #tpu.dot_dimension_numbers<[1], [0], [0], [1], [0, 0, 1, 1], [], []>} : vector<16x64xbf16>, vector<64x128xbf16>, vector<16x128xf32> -> vector<16x128xf32>
    %c0_13 = arith.constant 0 : index
    %c0_14 = arith.constant 0 : index
    %18 = vector.load %arg7[%c0_13, %c0_14] : memref<1x128xf32, #tpu.memory_space<vmem>>, vector<1x128xf32>
    %19 = vector.broadcast %18 : vector<1x128xf32> to vector<16x128xf32>
    %20 = arith.mulf %17, %19 : vector<16x128xf32>
    %c0_15 = arith.constant 0 : index
    %c0_16 = arith.constant 0 : index
    %21 = vector.load %arg8[%c0_15, %c0_16] : memref<1x128xf32, #tpu.memory_space<vmem>>, vector<1x128xf32>
    %22 = vector.broadcast %21 : vector<1x128xf32> to vector<16x128xf32>
    %23 = arith.addf %20, %22 : vector<16x128xf32>
    %cst_17 = arith.constant 0.000000e+00 : f32
    %24 = vector.broadcast %cst_17 : f32 to vector<16x128xf32>
    %25 = arith.maximumf %23, %24 : vector<16x128xf32>
    %26 = arith.truncf %25 : vector<16x128xf32> to vector<16x128xbf16>
    %c0_18 = arith.constant 0 : index
    %c0_19 = arith.constant 0 : index
    %27 = vector.load %arg9[%c0_18, %c0_19] : memref<128x1024xbf16, #tpu.memory_space<vmem>>, vector<128x1024xbf16>
    %cst_20 = arith.constant dense<0.000000e+00> : vector<16x1024xf32>
    %28 = tpu.matmul %26, %27, %cst_20 {dimension_numbers = #tpu.dot_dimension_numbers<[1], [0], [0], [1], [0, 0, 1, 1], [], []>} : vector<16x128xbf16>, vector<128x1024xbf16>, vector<16x1024xf32> -> vector<16x1024xf32>
    %c0_21 = arith.constant 0 : index
    %c0_22 = arith.constant 0 : index
    %29 = vector.load %arg10[%c0_21, %c0_22] : memref<1x1024xf32, #tpu.memory_space<vmem>>, vector<1x1024xf32>
    %30 = vector.broadcast %29 : vector<1x1024xf32> to vector<16x1024xf32>
    %31 = arith.mulf %28, %30 : vector<16x1024xf32>
    %c0_23 = arith.constant 0 : index
    %c0_24 = arith.constant 0 : index
    %32 = vector.load %arg11[%c0_23, %c0_24] : memref<1x1024xf32, #tpu.memory_space<vmem>>, vector<1x1024xf32>
    %33 = vector.broadcast %32 : vector<1x1024xf32> to vector<16x1024xf32>
    %34 = arith.addf %31, %33 : vector<16x1024xf32>
    %cst_25 = arith.constant 0.000000e+00 : f32
    %35 = vector.broadcast %cst_25 : f32 to vector<16x1024xf32>
    %36 = arith.maximumf %34, %35 : vector<16x1024xf32>
    %c0_26 = arith.constant 0 : index
    %c0_27 = arith.constant 0 : index
    %c0_28 = arith.constant 0 : index
    %37 = vector.load %arg12[%c0_26, %c0_27, %c0_28] : memref<1x1x1024xf32, #tpu.memory_space<vmem>>, vector<1x1x1024xf32>
    %38 = vector.shape_cast %37 : vector<1x1x1024xf32> to vector<1x1024xf32>
    %cst_29 = arith.constant dense<0xFF800000> : vector<1024xf32>
    %39 = vector.multi_reduction <maximumf>, %36, %cst_29 [0] : vector<16x1024xf32> to vector<1024xf32>
    %40 = vector.shape_cast %39 : vector<1024xf32> to vector<1x1024xf32>
    %41 = arith.maximumf %38, %40 : vector<1x1024xf32>
    %c0_30 = arith.constant 0 : index
    %c0_31 = arith.constant 0 : index
    %c0_32 = arith.constant 0 : index
    %42 = vector.load %arg12[%c0_30, %c0_31, %c0_32] : memref<1x1x1024xf32, #tpu.memory_space<vmem>>, vector<1x1x1024xf32>
    %43 = vector.shape_cast %42 : vector<1x1x1024xf32> to vector<1x1024xf32>
    %44 = vector.shape_cast %41 : vector<1x1024xf32> to vector<1x1x1024xf32>
    tpu.vector_store %arg12[%c0_30, %c0_31, %c0_32], %44 {strides = array<i32>} : memref<1x1x1024xf32, #tpu.memory_space<vmem>>, vector<1x1x1024xf32>,
    return
  }
  func.func @transform_0(%arg0: i32, %arg1: i32) -> (i32, i32, i32) {
    %c0_i32 = arith.constant 0 : i32
    %c0_i32_0 = arith.constant 0 : i32
    return %arg0, %arg1, %c0_i32 : i32, i32, i32
  }
  func.func @transform_1(%arg0: i32, %arg1: i32) -> (i32, i32) {
    %c0_i32 = arith.constant 0 : i32
    %c0_i32_0 = arith.constant 0 : i32
    %c0_i32_1 = arith.constant 0 : i32
    return %c0_i32, %c0_i32_0 : i32, i32
  }
  func.func @transform_2(%arg0: i32, %arg1: i32) -> (i32, i32) {
    %c0_i32 = arith.constant 0 : i32
    %c0_i32_0 = arith.constant 0 : i32
    %c0_i32_1 = arith.constant 0 : i32
    return %c0_i32, %c0_i32_0 : i32, i32
  }
  func.func @transform_3(%arg0: i32, %arg1: i32) -> (i32, i32) {
    %c0_i32 = arith.constant 0 : i32
    %c0_i32_0 = arith.constant 0 : i32
    %c0_i32_1 = arith.constant 0 : i32
    return %c0_i32, %c0_i32_0 : i32, i32
  }
  func.func @transform_4(%arg0: i32, %arg1: i32) -> (i32, i32) {
    %c0_i32 = arith.constant 0 : i32
    %c0_i32_0 = arith.constant 0 : i32
    %c0_i32_1 = arith.constant 0 : i32
    return %c0_i32, %c0_i32_0 : i32, i32
  }
  func.func @transform_5(%arg0: i32, %arg1: i32) -> (i32, i32) {
    %c0_i32 = arith.constant 0 : i32
    %c0_i32_0 = arith.constant 0 : i32
    %c0_i32_1 = arith.constant 0 : i32
    return %c0_i32, %c0_i32_0 : i32, i32
  }
  func.func @transform_6(%arg0: i32, %arg1: i32) -> (i32, i32) {
    %c0_i32 = arith.constant 0 : i32
    %c0_i32_0 = arith.constant 0 : i32
    %c0_i32_1 = arith.constant 0 : i32
    return %c0_i32, %c0_i32_0 : i32, i32
  }
  func.func @transform_7(%arg0: i32, %arg1: i32) -> (i32, i32) {
    %c0_i32 = arith.constant 0 : i32
    %c0_i32_0 = arith.constant 0 : i32
    %c0_i32_1 = arith.constant 0 : i32
    return %c0_i32, %c0_i32_0 : i32, i32
  }
  func.func @transform_8(%arg0: i32, %arg1: i32) -> (i32, i32) {
    %c0_i32 = arith.constant 0 : i32
    %c0_i32_0 = arith.constant 0 : i32
    %c0_i32_1 = arith.constant 0 : i32
    return %c0_i32, %c0_i32_0 : i32, i32
  }
  func.func @transform_9(%arg0: i32, %arg1: i32) -> (i32, i32) {
    %c0_i32 = arith.constant 0 : i32
    %c0_i32_0 = arith.constant 0 : i32
    %c0_i32_1 = arith.constant 0 : i32
    return %c0_i32, %c0_i32_0 : i32, i32
  }
  func.func @transform_10(%arg0: i32, %arg1: i32) -> (i32, i32, i32) {
    %c0_i32 = arith.constant 0 : i32
    %c0_i32_0 = arith.constant 0 : i32
    %c0_i32_1 = arith.constant 0 : i32
    return %arg0, %c0_i32, %c0_i32_0 : i32, i32, i32
  }
}

module attributes {stable_mosaic.version = 11 : i64} {
  func.func @_stn_head_kernel(%arg0: i32, %arg1: memref<2x1024xf32, #tpu.memory_space<vmem>>, %arg2: memref<1024x512xbf16, #tpu.memory_space<vmem>>, %arg3: memref<1x512xf32, #tpu.memory_space<vmem>>, %arg4: memref<1x512xf32, #tpu.memory_space<vmem>>, %arg5: memref<512x256xbf16, #tpu.memory_space<vmem>>, %arg6: memref<1x256xf32, #tpu.memory_space<vmem>>, %arg7: memref<1x256xf32, #tpu.memory_space<vmem>>, %arg8: memref<256x9xbf16, #tpu.memory_space<vmem>>, %arg9: memref<1x9xf32, #tpu.memory_space<vmem>>, %arg10: memref<1x9xf32, #tpu.memory_space<vmem>>, %arg11: memref<2x9xf32, #tpu.memory_space<vmem>>) attributes {dimension_semantics = [#tpu.dimension_semantics<arbitrary>], iteration_bounds = array<i64: 1>, scalar_prefetch = 0 : i64, scratch_operands = 0 : i64, tpu.core_type = #tpu.core_type<tc>, window_params = [{pipeline_mode = #tpu.pipeline_mode<synchronous>, transform_indices = @transform_0, window_bounds = array<i64: 2, 1024>}, {pipeline_mode = #tpu.pipeline_mode<synchronous>, transform_indices = @transform_1, window_bounds = array<i64: 1024, 512>}, {pipeline_mode = #tpu.pipeline_mode<synchronous>, transform_indices = @transform_2, window_bounds = array<i64: 1, 512>}, {pipeline_mode = #tpu.pipeline_mode<synchronous>, transform_indices = @transform_3, window_bounds = array<i64: 1, 512>}, {pipeline_mode = #tpu.pipeline_mode<synchronous>, transform_indices = @transform_4, window_bounds = array<i64: 512, 256>}, {pipeline_mode = #tpu.pipeline_mode<synchronous>, transform_indices = @transform_5, window_bounds = array<i64: 1, 256>}, {pipeline_mode = #tpu.pipeline_mode<synchronous>, transform_indices = @transform_6, window_bounds = array<i64: 1, 256>}, {pipeline_mode = #tpu.pipeline_mode<synchronous>, transform_indices = @transform_7, window_bounds = array<i64: 256, 9>}, {pipeline_mode = #tpu.pipeline_mode<synchronous>, transform_indices = @transform_8, window_bounds = array<i64: 1, 9>}, {pipeline_mode = #tpu.pipeline_mode<synchronous>, transform_indices = @transform_9, window_bounds = array<i64: 1, 9>}, {pipeline_mode = #tpu.pipeline_mode<synchronous>, transform_indices = @transform_10, window_bounds = array<i64: 2, 9>}]} {
    %c0 = arith.constant 0 : index
    %c0_0 = arith.constant 0 : index
    %0 = vector.load %arg1[%c0, %c0_0] : memref<2x1024xf32, #tpu.memory_space<vmem>>, vector<2x1024xf32>
    %1 = arith.truncf %0 : vector<2x1024xf32> to vector<2x1024xbf16>
    %c0_1 = arith.constant 0 : index
    %c0_2 = arith.constant 0 : index
    %2 = vector.load %arg2[%c0_1, %c0_2] : memref<1024x512xbf16, #tpu.memory_space<vmem>>, vector<1024x512xbf16>
    %cst = arith.constant dense<0.000000e+00> : vector<2x512xf32>
    %3 = tpu.matmul %1, %2, %cst {dimension_numbers = #tpu.dot_dimension_numbers<[1], [0], [0], [1], [0, 0, 1, 1], [], []>} : vector<2x1024xbf16>, vector<1024x512xbf16>, vector<2x512xf32> -> vector<2x512xf32>
    %c0_3 = arith.constant 0 : index
    %c0_4 = arith.constant 0 : index
    %4 = vector.load %arg3[%c0_3, %c0_4] : memref<1x512xf32, #tpu.memory_space<vmem>>, vector<1x512xf32>
    %5 = vector.broadcast %4 : vector<1x512xf32> to vector<2x512xf32>
    %6 = arith.mulf %3, %5 : vector<2x512xf32>
    %c0_5 = arith.constant 0 : index
    %c0_6 = arith.constant 0 : index
    %7 = vector.load %arg4[%c0_5, %c0_6] : memref<1x512xf32, #tpu.memory_space<vmem>>, vector<1x512xf32>
    %8 = vector.broadcast %7 : vector<1x512xf32> to vector<2x512xf32>
    %9 = arith.addf %6, %8 : vector<2x512xf32>
    %cst_7 = arith.constant 0.000000e+00 : f32
    %10 = vector.broadcast %cst_7 : f32 to vector<2x512xf32>
    %11 = arith.maximumf %9, %10 : vector<2x512xf32>
    %12 = arith.truncf %11 : vector<2x512xf32> to vector<2x512xbf16>
    %c0_8 = arith.constant 0 : index
    %c0_9 = arith.constant 0 : index
    %13 = vector.load %arg5[%c0_8, %c0_9] : memref<512x256xbf16, #tpu.memory_space<vmem>>, vector<512x256xbf16>
    %cst_10 = arith.constant dense<0.000000e+00> : vector<2x256xf32>
    %14 = tpu.matmul %12, %13, %cst_10 {dimension_numbers = #tpu.dot_dimension_numbers<[1], [0], [0], [1], [0, 0, 1, 1], [], []>} : vector<2x512xbf16>, vector<512x256xbf16>, vector<2x256xf32> -> vector<2x256xf32>
    %c0_11 = arith.constant 0 : index
    %c0_12 = arith.constant 0 : index
    %15 = vector.load %arg6[%c0_11, %c0_12] : memref<1x256xf32, #tpu.memory_space<vmem>>, vector<1x256xf32>
    %16 = vector.broadcast %15 : vector<1x256xf32> to vector<2x256xf32>
    %17 = arith.mulf %14, %16 : vector<2x256xf32>
    %c0_13 = arith.constant 0 : index
    %c0_14 = arith.constant 0 : index
    %18 = vector.load %arg7[%c0_13, %c0_14] : memref<1x256xf32, #tpu.memory_space<vmem>>, vector<1x256xf32>
    %19 = vector.broadcast %18 : vector<1x256xf32> to vector<2x256xf32>
    %20 = arith.addf %17, %19 : vector<2x256xf32>
    %cst_15 = arith.constant 0.000000e+00 : f32
    %21 = vector.broadcast %cst_15 : f32 to vector<2x256xf32>
    %22 = arith.maximumf %20, %21 : vector<2x256xf32>
    %23 = arith.truncf %22 : vector<2x256xf32> to vector<2x256xbf16>
    %c0_16 = arith.constant 0 : index
    %c0_17 = arith.constant 0 : index
    %24 = vector.load %arg8[%c0_16, %c0_17] : memref<256x9xbf16, #tpu.memory_space<vmem>>, vector<256x9xbf16>
    %cst_18 = arith.constant dense<0.000000e+00> : vector<2x9xf32>
    %25 = tpu.matmul %23, %24, %cst_18 {dimension_numbers = #tpu.dot_dimension_numbers<[1], [0], [0], [1], [0, 0, 1, 1], [], []>} : vector<2x256xbf16>, vector<256x9xbf16>, vector<2x9xf32> -> vector<2x9xf32>
    %c0_19 = arith.constant 0 : index
    %c0_20 = arith.constant 0 : index
    %26 = vector.load %arg9[%c0_19, %c0_20] : memref<1x9xf32, #tpu.memory_space<vmem>>, vector<1x9xf32>
    %27 = vector.broadcast %26 : vector<1x9xf32> to vector<2x9xf32>
    %28 = arith.addf %25, %27 : vector<2x9xf32>
    %c0_21 = arith.constant 0 : index
    %c0_22 = arith.constant 0 : index
    %29 = vector.load %arg10[%c0_21, %c0_22] : memref<1x9xf32, #tpu.memory_space<vmem>>, vector<1x9xf32>
    %30 = vector.broadcast %29 : vector<1x9xf32> to vector<2x9xf32>
    %31 = arith.addf %28, %30 : vector<2x9xf32>
    %c0_23 = arith.constant 0 : index
    %c0_24 = arith.constant 0 : index
    %32 = vector.load %arg11[%c0_23, %c0_24] : memref<2x9xf32, #tpu.memory_space<vmem>>, vector<2x9xf32>
    tpu.vector_store %arg11[%c0_23, %c0_24], %31 {strides = array<i32>} : memref<2x9xf32, #tpu.memory_space<vmem>>, vector<2x9xf32>,
    return
  }
  func.func @transform_0(%arg0: i32) -> (i32, i32) {
    %c0_i32 = arith.constant 0 : i32
    %c0_i32_0 = arith.constant 0 : i32
    %c0_i32_1 = arith.constant 0 : i32
    return %c0_i32, %c0_i32_0 : i32, i32
  }
  func.func @transform_1(%arg0: i32) -> (i32, i32) {
    %c0_i32 = arith.constant 0 : i32
    %c0_i32_0 = arith.constant 0 : i32
    %c0_i32_1 = arith.constant 0 : i32
    return %c0_i32, %c0_i32_0 : i32, i32
  }
  func.func @transform_2(%arg0: i32) -> (i32, i32) {
    %c0_i32 = arith.constant 0 : i32
    %c0_i32_0 = arith.constant 0 : i32
    %c0_i32_1 = arith.constant 0 : i32
    return %c0_i32, %c0_i32_0 : i32, i32
  }
  func.func @transform_3(%arg0: i32) -> (i32, i32) {
    %c0_i32 = arith.constant 0 : i32
    %c0_i32_0 = arith.constant 0 : i32
    %c0_i32_1 = arith.constant 0 : i32
    return %c0_i32, %c0_i32_0 : i32, i32
  }
  func.func @transform_4(%arg0: i32) -> (i32, i32) {
    %c0_i32 = arith.constant 0 : i32
    %c0_i32_0 = arith.constant 0 : i32
    %c0_i32_1 = arith.constant 0 : i32
    return %c0_i32, %c0_i32_0 : i32, i32
  }
  func.func @transform_5(%arg0: i32) -> (i32, i32) {
    %c0_i32 = arith.constant 0 : i32
    %c0_i32_0 = arith.constant 0 : i32
    %c0_i32_1 = arith.constant 0 : i32
    return %c0_i32, %c0_i32_0 : i32, i32
  }
  func.func @transform_6(%arg0: i32) -> (i32, i32) {
    %c0_i32 = arith.constant 0 : i32
    %c0_i32_0 = arith.constant 0 : i32
    %c0_i32_1 = arith.constant 0 : i32
    return %c0_i32, %c0_i32_0 : i32, i32
  }
  func.func @transform_7(%arg0: i32) -> (i32, i32) {
    %c0_i32 = arith.constant 0 : i32
    %c0_i32_0 = arith.constant 0 : i32
    %c0_i32_1 = arith.constant 0 : i32
    return %c0_i32, %c0_i32_0 : i32, i32
  }
  func.func @transform_8(%arg0: i32) -> (i32, i32) {
    %c0_i32 = arith.constant 0 : i32
    %c0_i32_0 = arith.constant 0 : i32
    %c0_i32_1 = arith.constant 0 : i32
    return %c0_i32, %c0_i32_0 : i32, i32
  }
  func.func @transform_9(%arg0: i32) -> (i32, i32) {
    %c0_i32 = arith.constant 0 : i32
    %c0_i32_0 = arith.constant 0 : i32
    %c0_i32_1 = arith.constant 0 : i32
    return %c0_i32, %c0_i32_0 : i32, i32
  }
  func.func @transform_10(%arg0: i32) -> (i32, i32) {
    %c0_i32 = arith.constant 0 : i32
    %c0_i32_0 = arith.constant 0 : i32
    %c0_i32_1 = arith.constant 0 : i32
    return %c0_i32, %c0_i32_0 : i32, i32
  }
}

module attributes {stable_mosaic.version = 11 : i64} {
  func.func @_pointwise_affine_relu_kernel(%arg0: i32, %arg1: i32, %arg2: memref<1x16x3xf32, #tpu.memory_space<vmem>>, %arg3: memref<1x3x64xf32, #tpu.memory_space<vmem>>, %arg4: memref<1x64xf32, #tpu.memory_space<vmem>>, %arg5: memref<1x64xf32, #tpu.memory_space<vmem>>, %arg6: memref<1x16x64xbf16, #tpu.memory_space<vmem>>) attributes {dimension_semantics = [#tpu.dimension_semantics<parallel>, #tpu.dimension_semantics<parallel>], iteration_bounds = array<i64: 2, 1>, scalar_prefetch = 0 : i64, scratch_operands = 0 : i64, tpu.core_type = #tpu.core_type<tc>, window_params = [{transform_indices = @transform_0, window_bounds = array<i64: 1, 16, 3>}, {transform_indices = @transform_1, window_bounds = array<i64: 1, 3, 64>}, {pipeline_mode = #tpu.pipeline_mode<synchronous>, transform_indices = @transform_2, window_bounds = array<i64: 1, 64>}, {pipeline_mode = #tpu.pipeline_mode<synchronous>, transform_indices = @transform_3, window_bounds = array<i64: 1, 64>}, {transform_indices = @transform_4, window_bounds = array<i64: 1, 16, 64>}]} {
    %c0 = arith.constant 0 : index
    %c0_0 = arith.constant 0 : index
    %c0_1 = arith.constant 0 : index
    %0 = vector.load %arg2[%c0, %c0_0, %c0_1] : memref<1x16x3xf32, #tpu.memory_space<vmem>>, vector<1x16x3xf32>
    %1 = vector.shape_cast %0 : vector<1x16x3xf32> to vector<16x3xf32>
    %c0_2 = arith.constant 0 : index
    %c0_3 = arith.constant 0 : index
    %c0_4 = arith.constant 0 : index
    %2 = vector.load %arg3[%c0_2, %c0_3, %c0_4] : memref<1x3x64xf32, #tpu.memory_space<vmem>>, vector<1x3x64xf32>
    %3 = vector.shape_cast %2 : vector<1x3x64xf32> to vector<3x64xf32>
    %cst = arith.constant dense<0.000000e+00> : vector<16x64xf32>
    %4 = tpu.matmul %1, %3, %cst {dimension_numbers = #tpu.dot_dimension_numbers<[1], [0], [0], [1], [0, 0, 1, 1], [], []>} : vector<16x3xf32>, vector<3x64xf32>, vector<16x64xf32> -> vector<16x64xf32>
    %c0_5 = arith.constant 0 : index
    %c0_6 = arith.constant 0 : index
    %5 = vector.load %arg4[%c0_5, %c0_6] : memref<1x64xf32, #tpu.memory_space<vmem>>, vector<1x64xf32>
    %6 = vector.broadcast %5 : vector<1x64xf32> to vector<16x64xf32>
    %7 = arith.mulf %4, %6 : vector<16x64xf32>
    %c0_7 = arith.constant 0 : index
    %c0_8 = arith.constant 0 : index
    %8 = vector.load %arg5[%c0_7, %c0_8] : memref<1x64xf32, #tpu.memory_space<vmem>>, vector<1x64xf32>
    %9 = vector.broadcast %8 : vector<1x64xf32> to vector<16x64xf32>
    %10 = arith.addf %7, %9 : vector<16x64xf32>
    %cst_9 = arith.constant 0.000000e+00 : f32
    %11 = vector.broadcast %cst_9 : f32 to vector<16x64xf32>
    %12 = arith.maximumf %10, %11 : vector<16x64xf32>
    %13 = arith.truncf %12 : vector<16x64xf32> to vector<16x64xbf16>
    %c0_10 = arith.constant 0 : index
    %c0_11 = arith.constant 0 : index
    %c0_12 = arith.constant 0 : index
    %14 = vector.load %arg6[%c0_10, %c0_11, %c0_12] : memref<1x16x64xbf16, #tpu.memory_space<vmem>>, vector<1x16x64xbf16>
    %15 = vector.shape_cast %14 : vector<1x16x64xbf16> to vector<16x64xbf16>
    %16 = vector.shape_cast %13 : vector<16x64xbf16> to vector<1x16x64xbf16>
    tpu.vector_store %arg6[%c0_10, %c0_11, %c0_12], %16 {strides = array<i32>} : memref<1x16x64xbf16, #tpu.memory_space<vmem>>, vector<1x16x64xbf16>,
    return
  }
  func.func @transform_0(%arg0: i32, %arg1: i32) -> (i32, i32, i32) {
    %c0_i32 = arith.constant 0 : i32
    %c0_i32_0 = arith.constant 0 : i32
    return %arg0, %arg1, %c0_i32 : i32, i32, i32
  }
  func.func @transform_1(%arg0: i32, %arg1: i32) -> (i32, i32, i32) {
    %c0_i32 = arith.constant 0 : i32
    %c0_i32_0 = arith.constant 0 : i32
    %c0_i32_1 = arith.constant 0 : i32
    return %arg0, %c0_i32, %c0_i32_0 : i32, i32, i32
  }
  func.func @transform_2(%arg0: i32, %arg1: i32) -> (i32, i32) {
    %c0_i32 = arith.constant 0 : i32
    %c0_i32_0 = arith.constant 0 : i32
    %c0_i32_1 = arith.constant 0 : i32
    return %c0_i32, %c0_i32_0 : i32, i32
  }
  func.func @transform_3(%arg0: i32, %arg1: i32) -> (i32, i32) {
    %c0_i32 = arith.constant 0 : i32
    %c0_i32_0 = arith.constant 0 : i32
    %c0_i32_1 = arith.constant 0 : i32
    return %c0_i32, %c0_i32_0 : i32, i32
  }
  func.func @transform_4(%arg0: i32, %arg1: i32) -> (i32, i32, i32) {
    %c0_i32 = arith.constant 0 : i32
    %c0_i32_0 = arith.constant 0 : i32
    return %arg0, %arg1, %c0_i32 : i32, i32, i32
  }
}

module attributes {stable_mosaic.version = 11 : i64} {
  func.func @_point_mlp3_max_kernel(%arg0: i32, %arg1: i32, %arg2: memref<1x16x64xbf16, #tpu.memory_space<vmem>>, %arg3: memref<64x64xbf16, #tpu.memory_space<vmem>>, %arg4: memref<1x64xf32, #tpu.memory_space<vmem>>, %arg5: memref<1x64xf32, #tpu.memory_space<vmem>>, %arg6: memref<64x128xbf16, #tpu.memory_space<vmem>>, %arg7: memref<1x128xf32, #tpu.memory_space<vmem>>, %arg8: memref<1x128xf32, #tpu.memory_space<vmem>>, %arg9: memref<128x1024xbf16, #tpu.memory_space<vmem>>, %arg10: memref<1x1024xf32, #tpu.memory_space<vmem>>, %arg11: memref<1x1024xf32, #tpu.memory_space<vmem>>, %arg12: memref<1x1x1024xf32, #tpu.memory_space<vmem>>) attributes {dimension_semantics = [#tpu.dimension_semantics<parallel>, #tpu.dimension_semantics<arbitrary>], iteration_bounds = array<i64: 2, 1>, scalar_prefetch = 0 : i64, scratch_operands = 0 : i64, tpu.core_type = #tpu.core_type<tc>, window_params = [{transform_indices = @transform_0, window_bounds = array<i64: 1, 16, 64>}, {pipeline_mode = #tpu.pipeline_mode<synchronous>, transform_indices = @transform_1, window_bounds = array<i64: 64, 64>}, {pipeline_mode = #tpu.pipeline_mode<synchronous>, transform_indices = @transform_2, window_bounds = array<i64: 1, 64>}, {pipeline_mode = #tpu.pipeline_mode<synchronous>, transform_indices = @transform_3, window_bounds = array<i64: 1, 64>}, {pipeline_mode = #tpu.pipeline_mode<synchronous>, transform_indices = @transform_4, window_bounds = array<i64: 64, 128>}, {pipeline_mode = #tpu.pipeline_mode<synchronous>, transform_indices = @transform_5, window_bounds = array<i64: 1, 128>}, {pipeline_mode = #tpu.pipeline_mode<synchronous>, transform_indices = @transform_6, window_bounds = array<i64: 1, 128>}, {pipeline_mode = #tpu.pipeline_mode<synchronous>, transform_indices = @transform_7, window_bounds = array<i64: 128, 1024>}, {pipeline_mode = #tpu.pipeline_mode<synchronous>, transform_indices = @transform_8, window_bounds = array<i64: 1, 1024>}, {pipeline_mode = #tpu.pipeline_mode<synchronous>, transform_indices = @transform_9, window_bounds = array<i64: 1, 1024>}, {transform_indices = @transform_10, window_bounds = array<i64: 1, 1, 1024>}]} {
    %c0_i32 = arith.constant 0 : i32
    %0 = arith.cmpi eq, %arg1, %c0_i32 : i32
    %1 = arith.extui %0 : i1 to i32
    %c0_i32_0 = arith.constant 0 : i32
    %2 = arith.cmpi ne, %1, %c0_i32_0 : i32
    scf.if %2 {
      %cst_33 = arith.constant 0xFF800000 : f32
      %45 = vector.broadcast %cst_33 : f32 to vector<1x1x1024xf32>
      %c0_34 = arith.constant 0 : index
      %c0_35 = arith.constant 0 : index
      %c0_36 = arith.constant 0 : index
      %46 = vector.load %arg12[%c0_34, %c0_35, %c0_36] : memref<1x1x1024xf32, #tpu.memory_space<vmem>>, vector<1x1x1024xf32>
      tpu.vector_store %arg12[%c0_34, %c0_35, %c0_36], %45 {strides = array<i32>} : memref<1x1x1024xf32, #tpu.memory_space<vmem>>, vector<1x1x1024xf32>,
    } else {
    }
    %c0 = arith.constant 0 : index
    %c0_1 = arith.constant 0 : index
    %c0_2 = arith.constant 0 : index
    %3 = vector.load %arg2[%c0, %c0_1, %c0_2] : memref<1x16x64xbf16, #tpu.memory_space<vmem>>, vector<1x16x64xbf16>
    %4 = vector.shape_cast %3 : vector<1x16x64xbf16> to vector<16x64xbf16>
    %c0_3 = arith.constant 0 : index
    %c0_4 = arith.constant 0 : index
    %5 = vector.load %arg3[%c0_3, %c0_4] : memref<64x64xbf16, #tpu.memory_space<vmem>>, vector<64x64xbf16>
    %cst = arith.constant dense<0.000000e+00> : vector<16x64xf32>
    %6 = tpu.matmul %4, %5, %cst {dimension_numbers = #tpu.dot_dimension_numbers<[1], [0], [0], [1], [0, 0, 1, 1], [], []>} : vector<16x64xbf16>, vector<64x64xbf16>, vector<16x64xf32> -> vector<16x64xf32>
    %c0_5 = arith.constant 0 : index
    %c0_6 = arith.constant 0 : index
    %7 = vector.load %arg4[%c0_5, %c0_6] : memref<1x64xf32, #tpu.memory_space<vmem>>, vector<1x64xf32>
    %8 = vector.broadcast %7 : vector<1x64xf32> to vector<16x64xf32>
    %9 = arith.mulf %6, %8 : vector<16x64xf32>
    %c0_7 = arith.constant 0 : index
    %c0_8 = arith.constant 0 : index
    %10 = vector.load %arg5[%c0_7, %c0_8] : memref<1x64xf32, #tpu.memory_space<vmem>>, vector<1x64xf32>
    %11 = vector.broadcast %10 : vector<1x64xf32> to vector<16x64xf32>
    %12 = arith.addf %9, %11 : vector<16x64xf32>
    %cst_9 = arith.constant 0.000000e+00 : f32
    %13 = vector.broadcast %cst_9 : f32 to vector<16x64xf32>
    %14 = arith.maximumf %12, %13 : vector<16x64xf32>
    %15 = arith.truncf %14 : vector<16x64xf32> to vector<16x64xbf16>
    %c0_10 = arith.constant 0 : index
    %c0_11 = arith.constant 0 : index
    %16 = vector.load %arg6[%c0_10, %c0_11] : memref<64x128xbf16, #tpu.memory_space<vmem>>, vector<64x128xbf16>
    %cst_12 = arith.constant dense<0.000000e+00> : vector<16x128xf32>
    %17 = tpu.matmul %15, %16, %cst_12 {dimension_numbers = #tpu.dot_dimension_numbers<[1], [0], [0], [1], [0, 0, 1, 1], [], []>} : vector<16x64xbf16>, vector<64x128xbf16>, vector<16x128xf32> -> vector<16x128xf32>
    %c0_13 = arith.constant 0 : index
    %c0_14 = arith.constant 0 : index
    %18 = vector.load %arg7[%c0_13, %c0_14] : memref<1x128xf32, #tpu.memory_space<vmem>>, vector<1x128xf32>
    %19 = vector.broadcast %18 : vector<1x128xf32> to vector<16x128xf32>
    %20 = arith.mulf %17, %19 : vector<16x128xf32>
    %c0_15 = arith.constant 0 : index
    %c0_16 = arith.constant 0 : index
    %21 = vector.load %arg8[%c0_15, %c0_16] : memref<1x128xf32, #tpu.memory_space<vmem>>, vector<1x128xf32>
    %22 = vector.broadcast %21 : vector<1x128xf32> to vector<16x128xf32>
    %23 = arith.addf %20, %22 : vector<16x128xf32>
    %cst_17 = arith.constant 0.000000e+00 : f32
    %24 = vector.broadcast %cst_17 : f32 to vector<16x128xf32>
    %25 = arith.maximumf %23, %24 : vector<16x128xf32>
    %26 = arith.truncf %25 : vector<16x128xf32> to vector<16x128xbf16>
    %c0_18 = arith.constant 0 : index
    %c0_19 = arith.constant 0 : index
    %27 = vector.load %arg9[%c0_18, %c0_19] : memref<128x1024xbf16, #tpu.memory_space<vmem>>, vector<128x1024xbf16>
    %cst_20 = arith.constant dense<0.000000e+00> : vector<16x1024xf32>
    %28 = tpu.matmul %26, %27, %cst_20 {dimension_numbers = #tpu.dot_dimension_numbers<[1], [0], [0], [1], [0, 0, 1, 1], [], []>} : vector<16x128xbf16>, vector<128x1024xbf16>, vector<16x1024xf32> -> vector<16x1024xf32>
    %c0_21 = arith.constant 0 : index
    %c0_22 = arith.constant 0 : index
    %29 = vector.load %arg10[%c0_21, %c0_22] : memref<1x1024xf32, #tpu.memory_space<vmem>>, vector<1x1024xf32>
    %30 = vector.broadcast %29 : vector<1x1024xf32> to vector<16x1024xf32>
    %31 = arith.mulf %28, %30 : vector<16x1024xf32>
    %c0_23 = arith.constant 0 : index
    %c0_24 = arith.constant 0 : index
    %32 = vector.load %arg11[%c0_23, %c0_24] : memref<1x1024xf32, #tpu.memory_space<vmem>>, vector<1x1024xf32>
    %33 = vector.broadcast %32 : vector<1x1024xf32> to vector<16x1024xf32>
    %34 = arith.addf %31, %33 : vector<16x1024xf32>
    %cst_25 = arith.constant 0.000000e+00 : f32
    %35 = vector.broadcast %cst_25 : f32 to vector<16x1024xf32>
    %36 = arith.maximumf %34, %35 : vector<16x1024xf32>
    %c0_26 = arith.constant 0 : index
    %c0_27 = arith.constant 0 : index
    %c0_28 = arith.constant 0 : index
    %37 = vector.load %arg12[%c0_26, %c0_27, %c0_28] : memref<1x1x1024xf32, #tpu.memory_space<vmem>>, vector<1x1x1024xf32>
    %38 = vector.shape_cast %37 : vector<1x1x1024xf32> to vector<1x1024xf32>
    %cst_29 = arith.constant dense<0xFF800000> : vector<1024xf32>
    %39 = vector.multi_reduction <maximumf>, %36, %cst_29 [0] : vector<16x1024xf32> to vector<1024xf32>
    %40 = vector.shape_cast %39 : vector<1024xf32> to vector<1x1024xf32>
    %41 = arith.maximumf %38, %40 : vector<1x1024xf32>
    %c0_30 = arith.constant 0 : index
    %c0_31 = arith.constant 0 : index
    %c0_32 = arith.constant 0 : index
    %42 = vector.load %arg12[%c0_30, %c0_31, %c0_32] : memref<1x1x1024xf32, #tpu.memory_space<vmem>>, vector<1x1x1024xf32>
    %43 = vector.shape_cast %42 : vector<1x1x1024xf32> to vector<1x1024xf32>
    %44 = vector.shape_cast %41 : vector<1x1024xf32> to vector<1x1x1024xf32>
    tpu.vector_store %arg12[%c0_30, %c0_31, %c0_32], %44 {strides = array<i32>} : memref<1x1x1024xf32, #tpu.memory_space<vmem>>, vector<1x1x1024xf32>,
    return
  }
  func.func @transform_0(%arg0: i32, %arg1: i32) -> (i32, i32, i32) {
    %c0_i32 = arith.constant 0 : i32
    %c0_i32_0 = arith.constant 0 : i32
    return %arg0, %arg1, %c0_i32 : i32, i32, i32
  }
  func.func @transform_1(%arg0: i32, %arg1: i32) -> (i32, i32) {
    %c0_i32 = arith.constant 0 : i32
    %c0_i32_0 = arith.constant 0 : i32
    %c0_i32_1 = arith.constant 0 : i32
    return %c0_i32, %c0_i32_0 : i32, i32
  }
  func.func @transform_2(%arg0: i32, %arg1: i32) -> (i32, i32) {
    %c0_i32 = arith.constant 0 : i32
    %c0_i32_0 = arith.constant 0 : i32
    %c0_i32_1 = arith.constant 0 : i32
    return %c0_i32, %c0_i32_0 : i32, i32
  }
  func.func @transform_3(%arg0: i32, %arg1: i32) -> (i32, i32) {
    %c0_i32 = arith.constant 0 : i32
    %c0_i32_0 = arith.constant 0 : i32
    %c0_i32_1 = arith.constant 0 : i32
    return %c0_i32, %c0_i32_0 : i32, i32
  }
  func.func @transform_4(%arg0: i32, %arg1: i32) -> (i32, i32) {
    %c0_i32 = arith.constant 0 : i32
    %c0_i32_0 = arith.constant 0 : i32
    %c0_i32_1 = arith.constant 0 : i32
    return %c0_i32, %c0_i32_0 : i32, i32
  }
  func.func @transform_5(%arg0: i32, %arg1: i32) -> (i32, i32) {
    %c0_i32 = arith.constant 0 : i32
    %c0_i32_0 = arith.constant 0 : i32
    %c0_i32_1 = arith.constant 0 : i32
    return %c0_i32, %c0_i32_0 : i32, i32
  }
  func.func @transform_6(%arg0: i32, %arg1: i32) -> (i32, i32) {
    %c0_i32 = arith.constant 0 : i32
    %c0_i32_0 = arith.constant 0 : i32
    %c0_i32_1 = arith.constant 0 : i32
    return %c0_i32, %c0_i32_0 : i32, i32
  }
  func.func @transform_7(%arg0: i32, %arg1: i32) -> (i32, i32) {
    %c0_i32 = arith.constant 0 : i32
    %c0_i32_0 = arith.constant 0 : i32
    %c0_i32_1 = arith.constant 0 : i32
    return %c0_i32, %c0_i32_0 : i32, i32
  }
  func.func @transform_8(%arg0: i32, %arg1: i32) -> (i32, i32) {
    %c0_i32 = arith.constant 0 : i32
    %c0_i32_0 = arith.constant 0 : i32
    %c0_i32_1 = arith.constant 0 : i32
    return %c0_i32, %c0_i32_0 : i32, i32
  }
  func.func @transform_9(%arg0: i32, %arg1: i32) -> (i32, i32) {
    %c0_i32 = arith.constant 0 : i32
    %c0_i32_0 = arith.constant 0 : i32
    %c0_i32_1 = arith.constant 0 : i32
    return %c0_i32, %c0_i32_0 : i32, i32
  }
  func.func @transform_10(%arg0: i32, %arg1: i32) -> (i32, i32, i32) {
    %c0_i32 = arith.constant 0 : i32
    %c0_i32_0 = arith.constant 0 : i32
    %c0_i32_1 = arith.constant 0 : i32
    return %arg0, %c0_i32, %c0_i32_0 : i32, i32, i32
  }
}

module attributes {stable_mosaic.version = 11 : i64} {
  func.func @_stn_head_kernel(%arg0: i32, %arg1: memref<2x1024xf32, #tpu.memory_space<vmem>>, %arg2: memref<1024x512xbf16, #tpu.memory_space<vmem>>, %arg3: memref<1x512xf32, #tpu.memory_space<vmem>>, %arg4: memref<1x512xf32, #tpu.memory_space<vmem>>, %arg5: memref<512x256xbf16, #tpu.memory_space<vmem>>, %arg6: memref<1x256xf32, #tpu.memory_space<vmem>>, %arg7: memref<1x256xf32, #tpu.memory_space<vmem>>, %arg8: memref<256x4096xbf16, #tpu.memory_space<vmem>>, %arg9: memref<1x4096xf32, #tpu.memory_space<vmem>>, %arg10: memref<1x4096xf32, #tpu.memory_space<vmem>>, %arg11: memref<2x4096xf32, #tpu.memory_space<vmem>>) attributes {dimension_semantics = [#tpu.dimension_semantics<arbitrary>], iteration_bounds = array<i64: 1>, scalar_prefetch = 0 : i64, scratch_operands = 0 : i64, tpu.core_type = #tpu.core_type<tc>, window_params = [{pipeline_mode = #tpu.pipeline_mode<synchronous>, transform_indices = @transform_0, window_bounds = array<i64: 2, 1024>}, {pipeline_mode = #tpu.pipeline_mode<synchronous>, transform_indices = @transform_1, window_bounds = array<i64: 1024, 512>}, {pipeline_mode = #tpu.pipeline_mode<synchronous>, transform_indices = @transform_2, window_bounds = array<i64: 1, 512>}, {pipeline_mode = #tpu.pipeline_mode<synchronous>, transform_indices = @transform_3, window_bounds = array<i64: 1, 512>}, {pipeline_mode = #tpu.pipeline_mode<synchronous>, transform_indices = @transform_4, window_bounds = array<i64: 512, 256>}, {pipeline_mode = #tpu.pipeline_mode<synchronous>, transform_indices = @transform_5, window_bounds = array<i64: 1, 256>}, {pipeline_mode = #tpu.pipeline_mode<synchronous>, transform_indices = @transform_6, window_bounds = array<i64: 1, 256>}, {pipeline_mode = #tpu.pipeline_mode<synchronous>, transform_indices = @transform_7, window_bounds = array<i64: 256, 4096>}, {pipeline_mode = #tpu.pipeline_mode<synchronous>, transform_indices = @transform_8, window_bounds = array<i64: 1, 4096>}, {pipeline_mode = #tpu.pipeline_mode<synchronous>, transform_indices = @transform_9, window_bounds = array<i64: 1, 4096>}, {pipeline_mode = #tpu.pipeline_mode<synchronous>, transform_indices = @transform_10, window_bounds = array<i64: 2, 4096>}]} {
    %c0 = arith.constant 0 : index
    %c0_0 = arith.constant 0 : index
    %0 = vector.load %arg1[%c0, %c0_0] : memref<2x1024xf32, #tpu.memory_space<vmem>>, vector<2x1024xf32>
    %1 = arith.truncf %0 : vector<2x1024xf32> to vector<2x1024xbf16>
    %c0_1 = arith.constant 0 : index
    %c0_2 = arith.constant 0 : index
    %2 = vector.load %arg2[%c0_1, %c0_2] : memref<1024x512xbf16, #tpu.memory_space<vmem>>, vector<1024x512xbf16>
    %cst = arith.constant dense<0.000000e+00> : vector<2x512xf32>
    %3 = tpu.matmul %1, %2, %cst {dimension_numbers = #tpu.dot_dimension_numbers<[1], [0], [0], [1], [0, 0, 1, 1], [], []>} : vector<2x1024xbf16>, vector<1024x512xbf16>, vector<2x512xf32> -> vector<2x512xf32>
    %c0_3 = arith.constant 0 : index
    %c0_4 = arith.constant 0 : index
    %4 = vector.load %arg3[%c0_3, %c0_4] : memref<1x512xf32, #tpu.memory_space<vmem>>, vector<1x512xf32>
    %5 = vector.broadcast %4 : vector<1x512xf32> to vector<2x512xf32>
    %6 = arith.mulf %3, %5 : vector<2x512xf32>
    %c0_5 = arith.constant 0 : index
    %c0_6 = arith.constant 0 : index
    %7 = vector.load %arg4[%c0_5, %c0_6] : memref<1x512xf32, #tpu.memory_space<vmem>>, vector<1x512xf32>
    %8 = vector.broadcast %7 : vector<1x512xf32> to vector<2x512xf32>
    %9 = arith.addf %6, %8 : vector<2x512xf32>
    %cst_7 = arith.constant 0.000000e+00 : f32
    %10 = vector.broadcast %cst_7 : f32 to vector<2x512xf32>
    %11 = arith.maximumf %9, %10 : vector<2x512xf32>
    %12 = arith.truncf %11 : vector<2x512xf32> to vector<2x512xbf16>
    %c0_8 = arith.constant 0 : index
    %c0_9 = arith.constant 0 : index
    %13 = vector.load %arg5[%c0_8, %c0_9] : memref<512x256xbf16, #tpu.memory_space<vmem>>, vector<512x256xbf16>
    %cst_10 = arith.constant dense<0.000000e+00> : vector<2x256xf32>
    %14 = tpu.matmul %12, %13, %cst_10 {dimension_numbers = #tpu.dot_dimension_numbers<[1], [0], [0], [1], [0, 0, 1, 1], [], []>} : vector<2x512xbf16>, vector<512x256xbf16>, vector<2x256xf32> -> vector<2x256xf32>
    %c0_11 = arith.constant 0 : index
    %c0_12 = arith.constant 0 : index
    %15 = vector.load %arg6[%c0_11, %c0_12] : memref<1x256xf32, #tpu.memory_space<vmem>>, vector<1x256xf32>
    %16 = vector.broadcast %15 : vector<1x256xf32> to vector<2x256xf32>
    %17 = arith.mulf %14, %16 : vector<2x256xf32>
    %c0_13 = arith.constant 0 : index
    %c0_14 = arith.constant 0 : index
    %18 = vector.load %arg7[%c0_13, %c0_14] : memref<1x256xf32, #tpu.memory_space<vmem>>, vector<1x256xf32>
    %19 = vector.broadcast %18 : vector<1x256xf32> to vector<2x256xf32>
    %20 = arith.addf %17, %19 : vector<2x256xf32>
    %cst_15 = arith.constant 0.000000e+00 : f32
    %21 = vector.broadcast %cst_15 : f32 to vector<2x256xf32>
    %22 = arith.maximumf %20, %21 : vector<2x256xf32>
    %23 = arith.truncf %22 : vector<2x256xf32> to vector<2x256xbf16>
    %c0_16 = arith.constant 0 : index
    %c0_17 = arith.constant 0 : index
    %24 = vector.load %arg8[%c0_16, %c0_17] : memref<256x4096xbf16, #tpu.memory_space<vmem>>, vector<256x4096xbf16>
    %cst_18 = arith.constant dense<0.000000e+00> : vector<2x4096xf32>
    %25 = tpu.matmul %23, %24, %cst_18 {dimension_numbers = #tpu.dot_dimension_numbers<[1], [0], [0], [1], [0, 0, 1, 1], [], []>} : vector<2x256xbf16>, vector<256x4096xbf16>, vector<2x4096xf32> -> vector<2x4096xf32>
    %c0_19 = arith.constant 0 : index
    %c0_20 = arith.constant 0 : index
    %26 = vector.load %arg9[%c0_19, %c0_20] : memref<1x4096xf32, #tpu.memory_space<vmem>>, vector<1x4096xf32>
    %27 = vector.broadcast %26 : vector<1x4096xf32> to vector<2x4096xf32>
    %28 = arith.addf %25, %27 : vector<2x4096xf32>
    %c0_21 = arith.constant 0 : index
    %c0_22 = arith.constant 0 : index
    %29 = vector.load %arg10[%c0_21, %c0_22] : memref<1x4096xf32, #tpu.memory_space<vmem>>, vector<1x4096xf32>
    %30 = vector.broadcast %29 : vector<1x4096xf32> to vector<2x4096xf32>
    %31 = arith.addf %28, %30 : vector<2x4096xf32>
    %c0_23 = arith.constant 0 : index
    %c0_24 = arith.constant 0 : index
    %32 = vector.load %arg11[%c0_23, %c0_24] : memref<2x4096xf32, #tpu.memory_space<vmem>>, vector<2x4096xf32>
    tpu.vector_store %arg11[%c0_23, %c0_24], %31 {strides = array<i32>} : memref<2x4096xf32, #tpu.memory_space<vmem>>, vector<2x4096xf32>,
    return
  }
  func.func @transform_0(%arg0: i32) -> (i32, i32) {
    %c0_i32 = arith.constant 0 : i32
    %c0_i32_0 = arith.constant 0 : i32
    %c0_i32_1 = arith.constant 0 : i32
    return %c0_i32, %c0_i32_0 : i32, i32
  }
  func.func @transform_1(%arg0: i32) -> (i32, i32) {
    %c0_i32 = arith.constant 0 : i32
    %c0_i32_0 = arith.constant 0 : i32
    %c0_i32_1 = arith.constant 0 : i32
    return %c0_i32, %c0_i32_0 : i32, i32
  }
  func.func @transform_2(%arg0: i32) -> (i32, i32) {
    %c0_i32 = arith.constant 0 : i32
    %c0_i32_0 = arith.constant 0 : i32
    %c0_i32_1 = arith.constant 0 : i32
    return %c0_i32, %c0_i32_0 : i32, i32
  }
  func.func @transform_3(%arg0: i32) -> (i32, i32) {
    %c0_i32 = arith.constant 0 : i32
    %c0_i32_0 = arith.constant 0 : i32
    %c0_i32_1 = arith.constant 0 : i32
    return %c0_i32, %c0_i32_0 : i32, i32
  }
  func.func @transform_4(%arg0: i32) -> (i32, i32) {
    %c0_i32 = arith.constant 0 : i32
    %c0_i32_0 = arith.constant 0 : i32
    %c0_i32_1 = arith.constant 0 : i32
    return %c0_i32, %c0_i32_0 : i32, i32
  }
  func.func @transform_5(%arg0: i32) -> (i32, i32) {
    %c0_i32 = arith.constant 0 : i32
    %c0_i32_0 = arith.constant 0 : i32
    %c0_i32_1 = arith.constant 0 : i32
    return %c0_i32, %c0_i32_0 : i32, i32
  }
  func.func @transform_6(%arg0: i32) -> (i32, i32) {
    %c0_i32 = arith.constant 0 : i32
    %c0_i32_0 = arith.constant 0 : i32
    %c0_i32_1 = arith.constant 0 : i32
    return %c0_i32, %c0_i32_0 : i32, i32
  }
  func.func @transform_7(%arg0: i32) -> (i32, i32) {
    %c0_i32 = arith.constant 0 : i32
    %c0_i32_0 = arith.constant 0 : i32
    %c0_i32_1 = arith.constant 0 : i32
    return %c0_i32, %c0_i32_0 : i32, i32
  }
  func.func @transform_8(%arg0: i32) -> (i32, i32) {
    %c0_i32 = arith.constant 0 : i32
    %c0_i32_0 = arith.constant 0 : i32
    %c0_i32_1 = arith.constant 0 : i32
    return %c0_i32, %c0_i32_0 : i32, i32
  }
  func.func @transform_9(%arg0: i32) -> (i32, i32) {
    %c0_i32 = arith.constant 0 : i32
    %c0_i32_0 = arith.constant 0 : i32
    %c0_i32_1 = arith.constant 0 : i32
    return %c0_i32, %c0_i32_0 : i32, i32
  }
  func.func @transform_10(%arg0: i32) -> (i32, i32) {
    %c0_i32 = arith.constant 0 : i32
    %c0_i32_0 = arith.constant 0 : i32
    %c0_i32_1 = arith.constant 0 : i32
    return %c0_i32, %c0_i32_0 : i32, i32
  }
}

module attributes {stable_mosaic.version = 11 : i64} {
  func.func @_feat_mlp2_max_kernel(%arg0: i32, %arg1: i32, %arg2: memref<1x16x64xbf16, #tpu.memory_space<vmem>>, %arg3: memref<1x64x128xbf16, #tpu.memory_space<vmem>>, %arg4: memref<1x128xf32, #tpu.memory_space<vmem>>, %arg5: memref<1x128xf32, #tpu.memory_space<vmem>>, %arg6: memref<128x1024xbf16, #tpu.memory_space<vmem>>, %arg7: memref<1x1024xf32, #tpu.memory_space<vmem>>, %arg8: memref<1x1024xf32, #tpu.memory_space<vmem>>, %arg9: memref<1x1x1024xf32, #tpu.memory_space<vmem>>) attributes {dimension_semantics = [#tpu.dimension_semantics<parallel>, #tpu.dimension_semantics<arbitrary>], iteration_bounds = array<i64: 2, 1>, scalar_prefetch = 0 : i64, scratch_operands = 0 : i64, tpu.core_type = #tpu.core_type<tc>, window_params = [{transform_indices = @transform_0, window_bounds = array<i64: 1, 16, 64>}, {transform_indices = @transform_1, window_bounds = array<i64: 1, 64, 128>}, {pipeline_mode = #tpu.pipeline_mode<synchronous>, transform_indices = @transform_2, window_bounds = array<i64: 1, 128>}, {pipeline_mode = #tpu.pipeline_mode<synchronous>, transform_indices = @transform_3, window_bounds = array<i64: 1, 128>}, {pipeline_mode = #tpu.pipeline_mode<synchronous>, transform_indices = @transform_4, window_bounds = array<i64: 128, 1024>}, {pipeline_mode = #tpu.pipeline_mode<synchronous>, transform_indices = @transform_5, window_bounds = array<i64: 1, 1024>}, {pipeline_mode = #tpu.pipeline_mode<synchronous>, transform_indices = @transform_6, window_bounds = array<i64: 1, 1024>}, {transform_indices = @transform_7, window_bounds = array<i64: 1, 1, 1024>}]} {
    %c0_i32 = arith.constant 0 : i32
    %0 = arith.cmpi eq, %arg1, %c0_i32 : i32
    %1 = arith.extui %0 : i1 to i32
    %c0_i32_0 = arith.constant 0 : i32
    %2 = arith.cmpi ne, %1, %c0_i32_0 : i32
    scf.if %2 {
      %cst_25 = arith.constant 0xFF800000 : f32
      %33 = vector.broadcast %cst_25 : f32 to vector<1x1x1024xf32>
      %c0_26 = arith.constant 0 : index
      %c0_27 = arith.constant 0 : index
      %c0_28 = arith.constant 0 : index
      %34 = vector.load %arg9[%c0_26, %c0_27, %c0_28] : memref<1x1x1024xf32, #tpu.memory_space<vmem>>, vector<1x1x1024xf32>
      tpu.vector_store %arg9[%c0_26, %c0_27, %c0_28], %33 {strides = array<i32>} : memref<1x1x1024xf32, #tpu.memory_space<vmem>>, vector<1x1x1024xf32>,
    } else {
    }
    %c0 = arith.constant 0 : index
    %c0_1 = arith.constant 0 : index
    %c0_2 = arith.constant 0 : index
    %3 = vector.load %arg2[%c0, %c0_1, %c0_2] : memref<1x16x64xbf16, #tpu.memory_space<vmem>>, vector<1x16x64xbf16>
    %4 = vector.shape_cast %3 : vector<1x16x64xbf16> to vector<16x64xbf16>
    %c0_3 = arith.constant 0 : index
    %c0_4 = arith.constant 0 : index
    %c0_5 = arith.constant 0 : index
    %5 = vector.load %arg3[%c0_3, %c0_4, %c0_5] : memref<1x64x128xbf16, #tpu.memory_space<vmem>>, vector<1x64x128xbf16>
    %6 = vector.shape_cast %5 : vector<1x64x128xbf16> to vector<64x128xbf16>
    %cst = arith.constant dense<0.000000e+00> : vector<16x128xf32>
    %7 = tpu.matmul %4, %6, %cst {dimension_numbers = #tpu.dot_dimension_numbers<[1], [0], [0], [1], [0, 0, 1, 1], [], []>} : vector<16x64xbf16>, vector<64x128xbf16>, vector<16x128xf32> -> vector<16x128xf32>
    %c0_6 = arith.constant 0 : index
    %c0_7 = arith.constant 0 : index
    %8 = vector.load %arg4[%c0_6, %c0_7] : memref<1x128xf32, #tpu.memory_space<vmem>>, vector<1x128xf32>
    %9 = vector.broadcast %8 : vector<1x128xf32> to vector<16x128xf32>
    %10 = arith.mulf %7, %9 : vector<16x128xf32>
    %c0_8 = arith.constant 0 : index
    %c0_9 = arith.constant 0 : index
    %11 = vector.load %arg5[%c0_8, %c0_9] : memref<1x128xf32, #tpu.memory_space<vmem>>, vector<1x128xf32>
    %12 = vector.broadcast %11 : vector<1x128xf32> to vector<16x128xf32>
    %13 = arith.addf %10, %12 : vector<16x128xf32>
    %cst_10 = arith.constant 0.000000e+00 : f32
    %14 = vector.broadcast %cst_10 : f32 to vector<16x128xf32>
    %15 = arith.maximumf %13, %14 : vector<16x128xf32>
    %16 = arith.truncf %15 : vector<16x128xf32> to vector<16x128xbf16>
    %c0_11 = arith.constant 0 : index
    %c0_12 = arith.constant 0 : index
    %17 = vector.load %arg6[%c0_11, %c0_12] : memref<128x1024xbf16, #tpu.memory_space<vmem>>, vector<128x1024xbf16>
    %cst_13 = arith.constant dense<0.000000e+00> : vector<16x1024xf32>
    %18 = tpu.matmul %16, %17, %cst_13 {dimension_numbers = #tpu.dot_dimension_numbers<[1], [0], [0], [1], [0, 0, 1, 1], [], []>} : vector<16x128xbf16>, vector<128x1024xbf16>, vector<16x1024xf32> -> vector<16x1024xf32>
    %c0_14 = arith.constant 0 : index
    %c0_15 = arith.constant 0 : index
    %19 = vector.load %arg7[%c0_14, %c0_15] : memref<1x1024xf32, #tpu.memory_space<vmem>>, vector<1x1024xf32>
    %20 = vector.broadcast %19 : vector<1x1024xf32> to vector<16x1024xf32>
    %21 = arith.mulf %18, %20 : vector<16x1024xf32>
    %c0_16 = arith.constant 0 : index
    %c0_17 = arith.constant 0 : index
    %22 = vector.load %arg8[%c0_16, %c0_17] : memref<1x1024xf32, #tpu.memory_space<vmem>>, vector<1x1024xf32>
    %23 = vector.broadcast %22 : vector<1x1024xf32> to vector<16x1024xf32>
    %24 = arith.addf %21, %23 : vector<16x1024xf32>
    %c0_18 = arith.constant 0 : index
    %c0_19 = arith.constant 0 : index
    %c0_20 = arith.constant 0 : index
    %25 = vector.load %arg9[%c0_18, %c0_19, %c0_20] : memref<1x1x1024xf32, #tpu.memory_space<vmem>>, vector<1x1x1024xf32>
    %26 = vector.shape_cast %25 : vector<1x1x1024xf32> to vector<1x1024xf32>
    %cst_21 = arith.constant dense<0xFF800000> : vector<1024xf32>
    %27 = vector.multi_reduction <maximumf>, %24, %cst_21 [0] : vector<16x1024xf32> to vector<1024xf32>
    %28 = vector.shape_cast %27 : vector<1024xf32> to vector<1x1024xf32>
    %29 = arith.maximumf %26, %28 : vector<1x1024xf32>
    %c0_22 = arith.constant 0 : index
    %c0_23 = arith.constant 0 : index
    %c0_24 = arith.constant 0 : index
    %30 = vector.load %arg9[%c0_22, %c0_23, %c0_24] : memref<1x1x1024xf32, #tpu.memory_space<vmem>>, vector<1x1x1024xf32>
    %31 = vector.shape_cast %30 : vector<1x1x1024xf32> to vector<1x1024xf32>
    %32 = vector.shape_cast %29 : vector<1x1024xf32> to vector<1x1x1024xf32>
    tpu.vector_store %arg9[%c0_22, %c0_23, %c0_24], %32 {strides = array<i32>} : memref<1x1x1024xf32, #tpu.memory_space<vmem>>, vector<1x1x1024xf32>,
    return
  }
  func.func @transform_0(%arg0: i32, %arg1: i32) -> (i32, i32, i32) {
    %c0_i32 = arith.constant 0 : i32
    %c0_i32_0 = arith.constant 0 : i32
    return %arg0, %arg1, %c0_i32 : i32, i32, i32
  }
  func.func @transform_1(%arg0: i32, %arg1: i32) -> (i32, i32, i32) {
    %c0_i32 = arith.constant 0 : i32
    %c0_i32_0 = arith.constant 0 : i32
    %c0_i32_1 = arith.constant 0 : i32
    return %arg0, %c0_i32, %c0_i32_0 : i32, i32, i32
  }
  func.func @transform_2(%arg0: i32, %arg1: i32) -> (i32, i32) {
    %c0_i32 = arith.constant 0 : i32
    %c0_i32_0 = arith.constant 0 : i32
    %c0_i32_1 = arith.constant 0 : i32
    return %c0_i32, %c0_i32_0 : i32, i32
  }
  func.func @transform_3(%arg0: i32, %arg1: i32) -> (i32, i32) {
    %c0_i32 = arith.constant 0 : i32
    %c0_i32_0 = arith.constant 0 : i32
    %c0_i32_1 = arith.constant 0 : i32
    return %c0_i32, %c0_i32_0 : i32, i32
  }
  func.func @transform_4(%arg0: i32, %arg1: i32) -> (i32, i32) {
    %c0_i32 = arith.constant 0 : i32
    %c0_i32_0 = arith.constant 0 : i32
    %c0_i32_1 = arith.constant 0 : i32
    return %c0_i32, %c0_i32_0 : i32, i32
  }
  func.func @transform_5(%arg0: i32, %arg1: i32) -> (i32, i32) {
    %c0_i32 = arith.constant 0 : i32
    %c0_i32_0 = arith.constant 0 : i32
    %c0_i32_1 = arith.constant 0 : i32
    return %c0_i32, %c0_i32_0 : i32, i32
  }
  func.func @transform_6(%arg0: i32, %arg1: i32) -> (i32, i32) {
    %c0_i32 = arith.constant 0 : i32
    %c0_i32_0 = arith.constant 0 : i32
    %c0_i32_1 = arith.constant 0 : i32
    return %c0_i32, %c0_i32_0 : i32, i32
  }
  func.func @transform_7(%arg0: i32, %arg1: i32) -> (i32, i32, i32) {
    %c0_i32 = arith.constant 0 : i32
    %c0_i32_0 = arith.constant 0 : i32
    %c0_i32_1 = arith.constant 0 : i32
    return %arg0, %c0_i32, %c0_i32_0 : i32, i32, i32
  }
}

module attributes {stable_mosaic.version = 11 : i64} {
  func.func @_cls_head_kernel(%arg0: i32, %arg1: memref<2x1024xf32, #tpu.memory_space<vmem>>, %arg2: memref<1024x512xbf16, #tpu.memory_space<vmem>>, %arg3: memref<1x512xf32, #tpu.memory_space<vmem>>, %arg4: memref<1x512xf32, #tpu.memory_space<vmem>>, %arg5: memref<512x256xbf16, #tpu.memory_space<vmem>>, %arg6: memref<1x256xf32, #tpu.memory_space<vmem>>, %arg7: memref<1x256xf32, #tpu.memory_space<vmem>>, %arg8: memref<256x40xbf16, #tpu.memory_space<vmem>>, %arg9: memref<1x40xf32, #tpu.memory_space<vmem>>, %arg10: memref<2x40xf32, #tpu.memory_space<vmem>>) attributes {dimension_semantics = [#tpu.dimension_semantics<arbitrary>], iteration_bounds = array<i64: 1>, scalar_prefetch = 0 : i64, scratch_operands = 0 : i64, tpu.core_type = #tpu.core_type<tc>, window_params = [{pipeline_mode = #tpu.pipeline_mode<synchronous>, transform_indices = @transform_0, window_bounds = array<i64: 2, 1024>}, {pipeline_mode = #tpu.pipeline_mode<synchronous>, transform_indices = @transform_1, window_bounds = array<i64: 1024, 512>}, {pipeline_mode = #tpu.pipeline_mode<synchronous>, transform_indices = @transform_2, window_bounds = array<i64: 1, 512>}, {pipeline_mode = #tpu.pipeline_mode<synchronous>, transform_indices = @transform_3, window_bounds = array<i64: 1, 512>}, {pipeline_mode = #tpu.pipeline_mode<synchronous>, transform_indices = @transform_4, window_bounds = array<i64: 512, 256>}, {pipeline_mode = #tpu.pipeline_mode<synchronous>, transform_indices = @transform_5, window_bounds = array<i64: 1, 256>}, {pipeline_mode = #tpu.pipeline_mode<synchronous>, transform_indices = @transform_6, window_bounds = array<i64: 1, 256>}, {pipeline_mode = #tpu.pipeline_mode<synchronous>, transform_indices = @transform_7, window_bounds = array<i64: 256, 40>}, {pipeline_mode = #tpu.pipeline_mode<synchronous>, transform_indices = @transform_8, window_bounds = array<i64: 1, 40>}, {pipeline_mode = #tpu.pipeline_mode<synchronous>, transform_indices = @transform_9, window_bounds = array<i64: 2, 40>}]} {
    %c0 = arith.constant 0 : index
    %c0_0 = arith.constant 0 : index
    %0 = vector.load %arg1[%c0, %c0_0] : memref<2x1024xf32, #tpu.memory_space<vmem>>, vector<2x1024xf32>
    %1 = arith.truncf %0 : vector<2x1024xf32> to vector<2x1024xbf16>
    %c0_1 = arith.constant 0 : index
    %c0_2 = arith.constant 0 : index
    %2 = vector.load %arg2[%c0_1, %c0_2] : memref<1024x512xbf16, #tpu.memory_space<vmem>>, vector<1024x512xbf16>
    %cst = arith.constant dense<0.000000e+00> : vector<2x512xf32>
    %3 = tpu.matmul %1, %2, %cst {dimension_numbers = #tpu.dot_dimension_numbers<[1], [0], [0], [1], [0, 0, 1, 1], [], []>} : vector<2x1024xbf16>, vector<1024x512xbf16>, vector<2x512xf32> -> vector<2x512xf32>
    %c0_3 = arith.constant 0 : index
    %c0_4 = arith.constant 0 : index
    %4 = vector.load %arg3[%c0_3, %c0_4] : memref<1x512xf32, #tpu.memory_space<vmem>>, vector<1x512xf32>
    %5 = vector.broadcast %4 : vector<1x512xf32> to vector<2x512xf32>
    %6 = arith.mulf %3, %5 : vector<2x512xf32>
    %c0_5 = arith.constant 0 : index
    %c0_6 = arith.constant 0 : index
    %7 = vector.load %arg4[%c0_5, %c0_6] : memref<1x512xf32, #tpu.memory_space<vmem>>, vector<1x512xf32>
    %8 = vector.broadcast %7 : vector<1x512xf32> to vector<2x512xf32>
    %9 = arith.addf %6, %8 : vector<2x512xf32>
    %cst_7 = arith.constant 0.000000e+00 : f32
    %10 = vector.broadcast %cst_7 : f32 to vector<2x512xf32>
    %11 = arith.maximumf %9, %10 : vector<2x512xf32>
    %12 = arith.truncf %11 : vector<2x512xf32> to vector<2x512xbf16>
    %c0_8 = arith.constant 0 : index
    %c0_9 = arith.constant 0 : index
    %13 = vector.load %arg5[%c0_8, %c0_9] : memref<512x256xbf16, #tpu.memory_space<vmem>>, vector<512x256xbf16>
    %cst_10 = arith.constant dense<0.000000e+00> : vector<2x256xf32>
    %14 = tpu.matmul %12, %13, %cst_10 {dimension_numbers = #tpu.dot_dimension_numbers<[1], [0], [0], [1], [0, 0, 1, 1], [], []>} : vector<2x512xbf16>, vector<512x256xbf16>, vector<2x256xf32> -> vector<2x256xf32>
    %c0_11 = arith.constant 0 : index
    %c0_12 = arith.constant 0 : index
    %15 = vector.load %arg6[%c0_11, %c0_12] : memref<1x256xf32, #tpu.memory_space<vmem>>, vector<1x256xf32>
    %16 = vector.broadcast %15 : vector<1x256xf32> to vector<2x256xf32>
    %17 = arith.mulf %14, %16 : vector<2x256xf32>
    %c0_13 = arith.constant 0 : index
    %c0_14 = arith.constant 0 : index
    %18 = vector.load %arg7[%c0_13, %c0_14] : memref<1x256xf32, #tpu.memory_space<vmem>>, vector<1x256xf32>
    %19 = vector.broadcast %18 : vector<1x256xf32> to vector<2x256xf32>
    %20 = arith.addf %17, %19 : vector<2x256xf32>
    %cst_15 = arith.constant 0.000000e+00 : f32
    %21 = vector.broadcast %cst_15 : f32 to vector<2x256xf32>
    %22 = arith.maximumf %20, %21 : vector<2x256xf32>
    %23 = arith.truncf %22 : vector<2x256xf32> to vector<2x256xbf16>
    %c0_16 = arith.constant 0 : index
    %c0_17 = arith.constant 0 : index
    %24 = vector.load %arg8[%c0_16, %c0_17] : memref<256x40xbf16, #tpu.memory_space<vmem>>, vector<256x40xbf16>
    %cst_18 = arith.constant dense<0.000000e+00> : vector<2x40xf32>
    %25 = tpu.matmul %23, %24, %cst_18 {dimension_numbers = #tpu.dot_dimension_numbers<[1], [0], [0], [1], [0, 0, 1, 1], [], []>} : vector<2x256xbf16>, vector<256x40xbf16>, vector<2x40xf32> -> vector<2x40xf32>
    %c0_19 = arith.constant 0 : index
    %c0_20 = arith.constant 0 : index
    %26 = vector.load %arg9[%c0_19, %c0_20] : memref<1x40xf32, #tpu.memory_space<vmem>>, vector<1x40xf32>
    %27 = vector.broadcast %26 : vector<1x40xf32> to vector<2x40xf32>
    %28 = arith.addf %25, %27 : vector<2x40xf32>
    %cst_21 = arith.constant dense<0xFF800000> : vector<2xf32>
    %29 = vector.multi_reduction <maximumf>, %28, %cst_21 [1] : vector<2x40xf32> to vector<2xf32>
    %30 = vector.shape_cast %29 : vector<2xf32> to vector<2x1xf32>
    %31 = vector.broadcast %30 : vector<2x1xf32> to vector<2x40xf32>
    %32 = arith.subf %28, %31 : vector<2x40xf32>
    %33 = math.exp %32 : vector<2x40xf32>
    %34 = vector.broadcast %30 : vector<2x1xf32> to vector<2x40xf32>
    %35 = arith.subf %28, %34 : vector<2x40xf32>
    %cst_22 = arith.constant dense<0.000000e+00> : vector<2xf32>
    %36 = vector.multi_reduction <add>, %33, %cst_22 [1] : vector<2x40xf32> to vector<2xf32>
    %37 = vector.shape_cast %36 : vector<2xf32> to vector<2x1xf32>
    %38 = math.log %37 : vector<2x1xf32>
    %39 = vector.broadcast %38 : vector<2x1xf32> to vector<2x40xf32>
    %40 = arith.subf %35, %39 : vector<2x40xf32>
    %c0_23 = arith.constant 0 : index
    %c0_24 = arith.constant 0 : index
    %41 = vector.load %arg10[%c0_23, %c0_24] : memref<2x40xf32, #tpu.memory_space<vmem>>, vector<2x40xf32>
    tpu.vector_store %arg10[%c0_23, %c0_24], %40 {strides = array<i32>} : memref<2x40xf32, #tpu.memory_space<vmem>>, vector<2x40xf32>,
    return
  }
  func.func @transform_0(%arg0: i32) -> (i32, i32) {
    %c0_i32 = arith.constant 0 : i32
    %c0_i32_0 = arith.constant 0 : i32
    %c0_i32_1 = arith.constant 0 : i32
    return %c0_i32, %c0_i32_0 : i32, i32
  }
  func.func @transform_1(%arg0: i32) -> (i32, i32) {
    %c0_i32 = arith.constant 0 : i32
    %c0_i32_0 = arith.constant 0 : i32
    %c0_i32_1 = arith.constant 0 : i32
    return %c0_i32, %c0_i32_0 : i32, i32
  }
  func.func @transform_2(%arg0: i32) -> (i32, i32) {
    %c0_i32 = arith.constant 0 : i32
    %c0_i32_0 = arith.constant 0 : i32
    %c0_i32_1 = arith.constant 0 : i32
    return %c0_i32, %c0_i32_0 : i32, i32
  }
  func.func @transform_3(%arg0: i32) -> (i32, i32) {
    %c0_i32 = arith.constant 0 : i32
    %c0_i32_0 = arith.constant 0 : i32
    %c0_i32_1 = arith.constant 0 : i32
    return %c0_i32, %c0_i32_0 : i32, i32
  }
  func.func @transform_4(%arg0: i32) -> (i32, i32) {
    %c0_i32 = arith.constant 0 : i32
    %c0_i32_0 = arith.constant 0 : i32
    %c0_i32_1 = arith.constant 0 : i32
    return %c0_i32, %c0_i32_0 : i32, i32
  }
  func.func @transform_5(%arg0: i32) -> (i32, i32) {
    %c0_i32 = arith.constant 0 : i32
    %c0_i32_0 = arith.constant 0 : i32
    %c0_i32_1 = arith.constant 0 : i32
    return %c0_i32, %c0_i32_0 : i32, i32
  }
  func.func @transform_6(%arg0: i32) -> (i32, i32) {
    %c0_i32 = arith.constant 0 : i32
    %c0_i32_0 = arith.constant 0 : i32
    %c0_i32_1 = arith.constant 0 : i32
    return %c0_i32, %c0_i32_0 : i32, i32
  }
  func.func @transform_7(%arg0: i32) -> (i32, i32) {
    %c0_i32 = arith.constant 0 : i32
    %c0_i32_0 = arith.constant 0 : i32
    %c0_i32_1 = arith.constant 0 : i32
    return %c0_i32, %c0_i32_0 : i32, i32
  }
  func.func @transform_8(%arg0: i32) -> (i32, i32) {
    %c0_i32 = arith.constant 0 : i32
    %c0_i32_0 = arith.constant 0 : i32
    %c0_i32_1 = arith.constant 0 : i32
    return %c0_i32, %c0_i32_0 : i32, i32
  }
  func.func @transform_9(%arg0: i32) -> (i32, i32) {
    %c0_i32 = arith.constant 0 : i32
    %c0_i32_0 = arith.constant 0 : i32
    %c0_i32_1 = arith.constant 0 : i32
    return %c0_i32, %c0_i32_0 : i32, i32
  }
}

</mosaic_0001>

<bundles_post_ra>
// kernel: get_model_forward.9
= control target key start
LH: loop header
LB: loop body
LE: loop exit
PB: predicated region body
PF: predicated region fallthrough
CT: control target
= control target key end

     0   :  { %s577_s15 = smov 0   ;;  %s579_s16 = smov 0   ;;  %s619_s0 = inlined_call_operand.vmem [shape: f32[2,16,3], index: 0, kind: input, shape index: {}]   ;;  %s620_s1 = inlined_call_operand.vmem [shape: f32[2,3,64], index: 1, kind: input, shape index: {}]   ;;  %s621_s2 = inlined_call_operand.vmem [shape: f32[1,64], index: 2, kind: input, shape index: {}]   ;;  %s622_s3 = inlined_call_operand.vmem [shape: f32[1,64], index: 3, kind: input, shape index: {}]   ;;  %s623_s4 = inlined_call_operand.vmem [shape: bf16[2,16,64], index: 4, kind: output, shape index: {}]  }
   0x1   :  { %s581_s17 = smov 0  }
   0x2 LB: > { %s26_s18 = sadd.s32 1, %s546_s16  ;;  %p477_p0 = scmp.ge.s32.totalorder %s550_s17, 1  ;;  %s550_s17 = sphi %s581_s17, %s14_s17   ;;  %s546_s16 = sphi %s579_s16, %s625_s16   ;;  %s542_s15 = sphi %s577_s15, %s624_s15  }
   0x3   : > { %p28_p1 = scmp.ge.s32.totalorder %s26_s18, 2  ;;  %p192_p2 = scmp.lt.s32.totalorder %s550_s17, 3 }
   0x5   : > { %s627_s18 = smov (%p28_p1, %s26_s18), 0  ;;  %p193_p3 = pnand %p477_p0, %p192_p2 }
   0x6   : > { %p231_p4 = scmp.lt.s32.totalorder (!%p193_p3), %s542_s15, 1 }
   0x7   : > { %196 = sbr.rel (%p193_p3) target bundleno = 222 (0xde), region = 36 }
   0xc   : > { %s629_s15 = smov (!%p231_p4, %s542_s15), 1  ;;  %vm264_vm0 = vcmask 1042432   ;;  %vm257_vm1 = vcmask 23552   ;;  %v486_v3 = vld [vmem:[%s621_s2] ss:$0 sm:$0xff]  ;;  %vm371_vm2 = vcmask 519168  }
   0xd   : > { %s480_s19 = sshll.u32 %s629_s15, 2  ;;  %s492_s23 = sshll.u32 %s629_s15, 4  ;;  %v487_v5 = vld [vmem:[%s622_s3] ss:$0 sm:$0xff] }
   0xe   : > { %s243_s22 = scalar_lea.vmem %s620_s1, %s480_s19  ;;  %s238_s26 = scalar_lea.vmem %s619_s0, %s492_s23 }
   0xf   : > { %v256_v0 = vld [vmem:[%s243_s22] sm:$0x7]  ;;  %v255_v2 = vld [vmem:[%s238_s26 + $0x8] sm:$0xff]  ;;  %s493_s5 = sshll.u32 %s629_s15, 3 }
  0x10   : > { %499 = vmatprep.subr.msk.mxu0 %vm264_vm0, %v256_v0  ;;  %v254_v1 = vld [vmem:[%s238_s26] sm:$0xff]  ;;  %s252_s8 = scalar_lea.vmem %s623_s4, %s493_s5 }
  0x11   : > { %500 = vmatpush3.msk.msra.mxu0 %vm264_vm0, %v256_v0  ;;  %501 = vmatprep.mubr.msk.f32.mxu0 %vm257_vm1, %v254_v1 }
  0x12   : > { %502 = vmatmul.mubr.msk.f32.vlgmr.msra.gmra.mxu0 %vm257_vm1, %v255_v2 }
  0xd2   : > { %v503_v4 = vpop.f32.mrf.mxu0 }
  0xd3   : > { %v351_v6 = vmul.f32 %v503_v4, %v486_v3 }
  0xd4   : > { %v334_v7 = vpop.f32.mrf.mxu0 }
  0xd5   : > { %v360_v8 = vadd.f32 %v487_v5, %v351_v6  ;;  %v350_v9 = vmul.f32 %v486_v3, %v334_v7 }
  0xd7   : > { %v362_v10 = vmax.f32 %v360_v8, 0.0  ;;  %v359_v11 = vadd.f32 %v487_v5, %v350_v9 }
  0xd9   : > { %v495_v12 = vpack.c.bf16 %v362_v10, %v362_v10  ;;  %v361_v13 = vmax.f32 %v359_v11, 0.0 }
  0xdb   : > { %373 = vst.msk [vmem:[%s252_s8 + $0x4] sm:$0xf] %vm371_vm2, %v495_v12  ;;  %v494_v14 = vpack.c.bf16 %v361_v13, %v361_v13 }
  0xdd   : > { %372 = vst.msk [vmem:[%s252_s8] sm:$0xf] %vm371_vm2, %v494_v14 }
  0xde PF: > { %s14_s17 = sadd.s32 1, %s550_s17   ;;  %s624_s15 = smov %s546_s16 }
  0xdf   : > { %p11_p5 = scmp.ge.s32.totalorder %s14_s17, 4   ;;  %s625_s16 = smov %s627_s18 }
  0xe1   :  { %13 = sbr.rel (!%p11_p5) target bundleno = 2 (0x2), region = 69 }

// kernel: get_model_forward.7
= control target key start
LH: loop header
LB: loop body
LE: loop exit
PB: predicated region body
PF: predicated region fallthrough
CT: control target
= control target key end

     0   :  { %15 = vsyncpa [#allocation3], 0  ;;  %s2507_s0 = inlined_call_operand.vmem [shape: f32[2,16,3], index: 0, kind: input, shape index: {}]   ;;  %s2508_s1 = inlined_call_operand.hbm [shape: f32[3,64], index: 1, kind: input, shape index: {}]   ;;  %s2509_s2 = inlined_call_operand.hbm [shape: f32[1,64], index: 2, kind: input, shape index: {}]   ;;  %s2510_s3 = inlined_call_operand.hbm [shape: f32[1,64], index: 3, kind: input, shape index: {}]   ;;  %s2511_s4 = inlined_call_operand.vmem [shape: bf16[64,128], index: 4, kind: input, shape index: {}]   ;;  %s2512_s5 = inlined_call_operand.hbm [shape: f32[1,128], index: 5, kind: input, shape index: {}]   ;;  %s2513_s6 = inlined_call_operand.hbm [shape: f32[1,128], index: 6, kind: input, shape index: {}]   ;;  %s2514_s7 = inlined_call_operand.vmem [shape: bf16[128,1024], index: 7, kind: input, shape index: {}]   ;;  %s2515_s8 = inlined_call_operand.hbm [shape: f32[1,1024], index: 8, kind: input, shape index: {}]   ;;  %s2516_s9 = inlined_call_operand.hbm [shape: f32[1,1024], index: 9, kind: input, shape index: {}]   ;;  %s2517_s10 = inlined_call_operand.vmem [shape: f32[2,1,1024], index: 10, kind: output, shape index: {}]  }
   0x1   :  { %16 = vsyncpa [#allocation5], 0 }
   0x2   :  { %17 = vsyncpa [#allocation8], 0 }
   0x3   :  { %18 = vsyncpa [#allocation11], 0  ;;  %s2148_s13 = smov 0   ;;  %s2150_s14 = smov 0  }
   0x4   :  { %s2152_s15 = smov 0  }
   0x5 LB: > { %s2082_s16 = smov [#allocation4]   ;;  %s1630_s18 = sadd.s32 4294967295, %s2080_s15   ;;  %s2080_s15 = sphi %s2152_s15, %s24_s15   ;;  %s2076_s14 = sphi %s2150_s14, %s2528_s14   ;;  %s2072_s13 = sphi %s2148_s13, %s2527_s13  }
   0x6   : > { %s308_s17 = sshll.u32 %s2082_s16, 4  ;;  %p1632_p0 = scmp.ge.s32.totalorder %s2080_s15, 1  ;;  %s309_s17 = int_to_ptr.vmem [resolvable:$true] %s308_s17 }
   0x7   : > { %p284_p1 = scmp.lt.s32.totalorder %s2080_s15, 3  ;;  %p2166_p2 = scmp.eq.s32.totalorder %s1630_s18, 0 }
   0x8   : > { %s2083_s21 = smov [#allocation7]   ;;  %s2084_s23 = smov [#allocation10]  }
   0x9   : > { %s2521_s19 = scalar_select %p2166_p2, 1, 0 }
   0xa   : > { %p2170_p3 = pnand %p1632_p0, %p284_p1  ;;  %s333_s22 = sshll.u32 %s2083_s21, 4  ;;  %s334_s22 = int_to_ptr.vmem [resolvable:$true] %s333_s22 }
   0xb   : > { %s358_s24 = sshll.u32 %s2084_s23, 4  ;;  %s1871_s27 = scalar_lea.vmem %s309_s17, 16  ;;  %s2182_s24 = int_to_ptr.vmem [resolvable:$true] %s358_s24 }
   0xc   : > { %s2522_s20 = scalar_select %p2170_p3, 1, 0 }
   0xd   : > { %p1784_p4 = pneg %p2170_p3  ;;  %p1872_p7 = scmp.ne.s32.totalorder %s309_s17, %s1871_s27 }
   0xe   : > { %s1878_s28 = scalar_lea.vmem %s309_s17, 32  ;;  %p1879_p10 = scmp.lt.s32.totalorder %s309_s17, %s309_s17 }
   0xf   : > { %p2178_p5 = pnand %p2166_p2, %p1784_p4  ;;  %p1880_p11 = scmp.lt.s32.totalorder %s1878_s28, %s1871_s27 }
  0x11   : > { %p2186_p6 = pneg %p2178_p5  ;;  %p1881_p12 = por %p1880_p11, %p1879_p10 }
  0x13   : > { %p1874_p8 = pnand %p1872_p7, %p2186_p6 }
  0x15   : > { %p1875_p9 = pneg %p1874_p8 }
  0x17   : > { %p1882_p13 = pnand %p1881_p12, %p1875_p9 }
  0x19   : > { %1885 = shalt.err (!%p1882_p13)
}
  0x1a   : > { %1790 = dma.hbm_to_vmem [thread:$0]  (!%p2178_p5), %s2509_s2, 16, %s309_s17, [#allocation5]  }
  0x1b   : > { %s1897_s11 = scalar_lea.vmem %s334_s22, 16  ;;  %s1904_s12 = scalar_lea.vmem %s334_s22, 32 }
  0x1c   : > { %p1898_p0 = scmp.ne.s32.totalorder %s334_s22, %s1897_s11  ;;  %p1905_p7 = scmp.lt.s32.totalorder %s334_s22, %s334_s22 }
  0x1d   : > { %p1906_p8 = scmp.lt.s32.totalorder %s1904_s12, %s1897_s11 }
  0x1e   : > { %p1900_p1 = pnand %p1898_p0, %p2186_p6 }
  0x1f   : > { %p1907_p2 = por %p1906_p8, %p1905_p7 }
  0x20   : > { %p1901_p4 = pneg %p1900_p1 }
  0x22   : > { %p1908_p3 = pnand %p1907_p2, %p1901_p4 }
  0x24   : > { %1911 = shalt.err (!%p1908_p3)
}
  0x25   : > { %1796 = dma.hbm_to_vmem [thread:$0]  (!%p2178_p5), %s2512_s5, 16, %s334_s22, [#allocation8]  }
  0x26   : > { %s1923_s17 = scalar_lea.vmem %s2182_s24, 128  ;;  %p1931_p12 = scmp.lt.s32.totalorder %s2182_s24, %s2182_s24 }
  0x27   : > { %p1924_p9 = scmp.ne.s32.totalorder %s2182_s24, %s1923_s17  ;;  %p1932_p13 = scmp.lt.s32.totalorder %s1923_s17, %s1923_s17 }
  0x29   : > { %p1926_p10 = pnand %p1924_p9, %p2186_p6  ;;  %p1933_p2 = por %p1932_p13, %p1931_p12 }
  0x2b   : > { %p1927_p11 = pneg %p1926_p10 }
  0x2d   : > { %p1934_p3 = pnand %p1933_p2, %p1927_p11 }
  0x2f   : > { %1937 = shalt.err (!%p1934_p3)
}
  0x30   : > { %1802 = dma.hbm_to_vmem [thread:$0]  (!%p2178_p5), %s2515_s8, 128, %s2182_s24, [#allocation11]  }
  0x31   : > { %s36_s22 = sadd.s32 1, %s2076_s14  ;;  %s2085_s27 = smov [#allocation2]  }
  0x32   : > { %p38_p0 = scmp.ge.s32.totalorder %s36_s22, 2  ;;  %s297_s28 = sshll.u32 %s2085_s27, 4  ;;  %s298_s28 = int_to_ptr.vmem [resolvable:$true] %s297_s28 }
  0x33   : > { %s1949_s29 = scalar_lea.vmem %s298_s28, 64  ;;  %p1957_p8 = scmp.lt.s32.totalorder %s298_s28, %s298_s28 }
  0x34   : > { %s2530_s22 = smov (%p38_p0, %s36_s22), 0  ;;  %p1950_p1 = scmp.ne.s32.totalorder %s298_s28, %s1949_s29 }
  0x35   : > { %p1958_p9 = scmp.lt.s32.totalorder %s1949_s29, %s1949_s29 }
  0x36   : > { %p1952_p4 = pnand %p1950_p1, %p2186_p6 }
  0x37   : > { %p1959_p10 = por %p1958_p9, %p1957_p8 }
  0x38   : > { %p1953_p7 = pneg %p1952_p4 }
  0x3a   : > { %p1960_p11 = pnand %p1959_p10, %p1953_p7 }
  0x3c   : > { %1963 = shalt.err (!%p1960_p11)
}
  0x3d   : > { %1787 = dma.hbm_to_vmem [thread:$0]  (!%p2178_p5), %s2508_s1, 64, %s298_s28, [#allocation3]  }
  0x3e   : > { %s2086_s11 = smov [#allocation6]   ;;  %s2087_s16 = smov [#allocation9]  }
  0x3f   : > { %s319_s12 = sshll.u32 %s2086_s11, 4  ;;  %s344_s18 = sshll.u32 %s2087_s16, 4  ;;  %s320_s12 = int_to_ptr.vmem [resolvable:$true] %s319_s12  ;;  %s345_s18 = int_to_ptr.vmem [resolvable:$true] %s344_s18 }
  0x40   : > { %s1975_s17 = scalar_lea.vmem %s320_s12, 16  ;;  %s1982_s21 = scalar_lea.vmem %s320_s12, 32 }
  0x41   : > { %p1976_p12 = scmp.ne.s32.totalorder %s320_s12, %s1975_s17  ;;  %p1983_p3 = scmp.lt.s32.totalorder %s320_s12, %s320_s12 }
  0x42   : > { %p1984_p0 = scmp.lt.s32.totalorder %s1982_s21, %s1975_s17 }
  0x43   : > { %p1978_p13 = pnand %p1976_p12, %p2186_p6 }
  0x44   : > { %p1985_p1 = por %p1984_p0, %p1983_p3 }
  0x45   : > { %p1979_p2 = pneg %p1978_p13 }
  0x47   : > { %p1986_p4 = pnand %p1985_p1, %p1979_p2 }
  0x49   : > { %1989 = shalt.err (!%p1986_p4)
}
  0x4a   : > { %1793 = dma.hbm_to_vmem [thread:$0]  (!%p2178_p5), %s2510_s3, 16, %s320_s12, [#allocation5]  }
  0x4b   : > { %s2001_s28 = scalar_lea.vmem %s345_s18, 16  ;;  %s2008_s29 = scalar_lea.vmem %s345_s18, 32 }
  0x4c   : > { %p2002_p7 = scmp.ne.s32.totalorder %s345_s18, %s2001_s28  ;;  %p2009_p10 = scmp.lt.s32.totalorder %s345_s18, %s345_s18 }
  0x4d   : > { %p2010_p11 = scmp.lt.s32.totalorder %s2008_s29, %s2001_s28 }
  0x4e   : > { %p2004_p8 = pnand %p2002_p7, %p2186_p6 }
  0x4f   : > { %p2011_p12 = por %p2010_p11, %p2009_p10 }
  0x50   : > { %p2005_p9 = pneg %p2004_p8 }
  0x52   : > { %p2012_p13 = pnand %p2011_p12, %p2005_p9 }
  0x54   : > { %2015 = shalt.err (!%p2012_p13)
}
  0x55   : > { %1799 = dma.hbm_to_vmem [thread:$0]  (!%p2178_p5), %s2513_s6, 16, %s345_s18, [#allocation8]  }
  0x56   : > { %s2088_s11 = smov [#allocation12]  }
  0x57   : > { %s369_s12 = sshll.u32 %s2088_s11, 4  ;;  %s370_s12 = int_to_ptr.vmem [resolvable:$true] %s369_s12 }
  0x58   : > { %s2027_s16 = scalar_lea.vmem %s370_s12, 128  ;;  %p2035_p1 = scmp.lt.s32.totalorder %s370_s12, %s370_s12 }
  0x59   : > { %p2028_p2 = scmp.ne.s32.totalorder %s370_s12, %s2027_s16  ;;  %p2036_p4 = scmp.lt.s32.totalorder %s2027_s16, %s2027_s16 }
  0x5b   : > { %p2030_p3 = pnand %p2028_p2, %p2186_p6  ;;  %p2037_p7 = por %p2036_p4, %p2035_p1 }
  0x5d   : > { %p2031_p0 = pneg %p2030_p3 }
  0x5f   : > { %p2038_p8 = pnand %p2037_p7, %p2031_p0 }
  0x61   : > { %2041 = shalt.err (!%p2038_p8)
}
  0x62   : > { %1805 = dma.hbm_to_vmem [thread:$0]  (!%p2178_p5), %s2516_s9, 128, %s370_s12, [#allocation11]  }
  0x63   : > { %p2525_p9 = scmp.ne.s32.totalorder %s2522_s20, 0 }
  0x64   : > { %p2526_p10 = scmp.ne.s32.totalorder (!%p2525_p9), %s2521_s19, 0 }
  0x65   : > { %395 = sbr.rel (%p2525_p9) target bundleno = 790 (0x316), region = 60 }
  0x6a   : > { %2055 = dma.done.wait (%p2526_p10), [#allocation3], 64  }
  0x6b   : > { %2057 = vsyncadd (%p2526_p10), [#allocation3], 4294967232 }
  0x6c   : > { %2059 = dma.done.wait (%p2526_p10), [#allocation5], 32  }
  0x6d   : > { %2061 = vsyncadd (%p2526_p10), [#allocation5], 4294967264 }
  0x6e   : > { %2063 = dma.done.wait (%p2526_p10), [#allocation8], 32  }
  0x6f   : > { %2065 = vsyncadd (%p2526_p10), [#allocation8], 4294967264 }
  0x70   : > { %2067 = dma.done.wait (%p2526_p10), [#allocation11], 256  }
  0x71   : > { %2069 = vsyncadd (%p2526_p10), [#allocation11], 4294967040  ;;  %p461_p5 = scmp.lt.s32.totalorder %s2072_s13, 1  ;;  %v2089_v0 = vmov 0.0   ;;  %vm490_vm0 = vcmask 1042432   ;;  %vm483_vm1 = vcmask 23552  }
  0x72   : > { %1744 = vmatprep.subr.bf16.mxu1 %v2089_v0  ;;  %v482_v1 = vld [vmem:[#allocation2] sm:$0x7]  ;;  %v1856_v4 = vld [vmem:[%s2511_s4 + $0x18] sm:$0xff]   ;;  %v1857_v5 = vld [vmem:[%s2511_s4 + $0x10] sm:$0xff]   ;;  %vm2090_vm2 = vmmov 0   ;;  %vm622_vm3 = vcmask 523264  }
  0x73   : > { %s2532_s13 = smov (!%p461_p5, %s2072_s13), 1  ;;  %1739 = vmatprep.subr.msk.mxu0 %vm490_vm0, %v482_v1  ;;  %1745 = vmatpush3.bf16.msra.mxu1 %v1856_v4  ;;  %v1858_v6 = vld [vmem:[%s2511_s4 + $0x8] sm:$0xff]   ;;  %v1859_v7 = vld [vmem:[%s2511_s4] sm:$0xff]  }
  0x74   : > { %s1730_s20 = sshll.u32 %s2532_s13, 4  ;;  %1740 = vmatpush3.msk.msra.mxu0 %vm490_vm0, %v482_v1  ;;  %1746 = vmatprep.subr.bf16.mxu1 %v2089_v0  ;;  %v744_v8 = vld [vmem:[%s2514_s7 + $0x1c0] sm:$0xff]  ;;  %v745_v10 = vld [vmem:[%s2514_s7 + $0x1c8] sm:$0xff]  ;;  %s1651_s12 = sshll.u32 %s2532_s13, 3 }
  0x75   : > { %s468_s18 = scalar_lea.vmem %s2507_s0, %s1730_s20  ;;  %1752 = vmatprep.mubr.msk.bf16.mxu1 %vm2090_vm2, %v2089_v0  ;;  %v748_v9 = vld [vmem:[%s2514_s7 + $0x1e0] sm:$0xff]  ;;  %v749_v13 = vld [vmem:[%s2514_s7 + $0x1e8] sm:$0xff]  ;;  %s473_s21 = scalar_lea.vmem %s2517_s10, %s1651_s12 }
  0x76   : > { %v480_v2 = vld [vmem:[%s468_s18] sm:$0xff]  ;;  %v481_v3 = vld [vmem:[%s468_s18 + $0x8] sm:$0xff]  ;;  %v1720_v11 = vcombine.low %v744_v8, %v748_v9  ;;  %v1721_v12 = vcombine.high %v744_v8, %v748_v9  ;;  %v1722_v16 = vcombine.low %v745_v10, %v749_v13  ;;  %v1723_v17 = vcombine.high %v745_v10, %v749_v13 }
  0x77   : > { %1741 = vmatprep.mubr.msk.f32.mxu0 %vm483_vm1, %v480_v2  ;;  %1747 = vmatpush3.bf16.msra.mxu1 %v1857_v5  ;;  %v736_v14 = vld [vmem:[%s2514_s7 + $0x180] sm:$0xff]  ;;  %v737_v40 = vld [vmem:[%s2514_s7 + $0x188] sm:$0xff] }
  0x78   : > { %1742 = vmatmul.mubr.msk.f32.vlgmr.msra.gmra.mxu0 %vm483_vm1, %v481_v3  ;;  %1748 = vmatprep.subr.bf16.mxu1 %v2089_v0  ;;  %v740_v15 = vld [vmem:[%s2514_s7 + $0x1a0] sm:$0xff]  ;;  %v741_v41 = vld [vmem:[%s2514_s7 + $0x1a8] sm:$0xff] }
  0x79   : > { %v1713_v18 = vcombine.high %v736_v14, %v740_v15  ;;  %1072 = vmatprep.subr.bf16.mxu0 %v1721_v12  ;;  %v1712_v19 = vcombine.low %v736_v14, %v740_v15  ;;  %v728_v20 = vld [vmem:[%s2514_s7 + $0x140] sm:$0xff]  ;;  %v1715_v45 = vcombine.high %v737_v40, %v741_v41  ;;  %v729_v46 = vld [vmem:[%s2514_s7 + $0x148] sm:$0xff]  ;;  %v1714_v48 = vcombine.low %v737_v40, %v741_v41  ;;  %v739_v40 = vld [vmem:[%s2514_s7 + $0x198] sm:$0xff] }
  0x7a   : > { %1073 = vmatpush1.bf16.msra.mxu0 %v1720_v11  ;;  %v732_v21 = vld [vmem:[%s2514_s7 + $0x160] sm:$0xff]  ;;  %v733_v47 = vld [vmem:[%s2514_s7 + $0x168] sm:$0xff]  ;;  %v743_v41 = vld [vmem:[%s2514_s7 + $0x1b8] sm:$0xff] }
  0x7b   : > { %1749 = vmatpush3.bf16.msra.mxu1 %v1858_v6  ;;  %1074 = vmatprep.subr.bf16.mxu0 %v1713_v18  ;;  %v1705_v22 = vcombine.high %v728_v20, %v732_v21  ;;  %v1704_v23 = vcombine.low %v728_v20, %v732_v21  ;;  %v720_v24 = vld [vmem:[%s2514_s7 + $0x100] sm:$0xff]  ;;  %v1707_v49 = vcombine.high %v729_v46, %v733_v47  ;;  %v721_v50 = vld [vmem:[%s2514_s7 + $0x108] sm:$0xff]  ;;  %v750_v20 = vld [vmem:[%s2514_s7 + $0x1f0] sm:$0xff] }
  0x7c   : > { %1750 = vmatprep.subr.bf16.mxu1 %v2089_v0  ;;  %v724_v25 = vld [vmem:[%s2514_s7 + $0x120] sm:$0xff]  ;;  %v725_v51 = vld [vmem:[%s2514_s7 + $0x128] sm:$0xff]  ;;  %v1706_v52 = vcombine.low %v729_v46, %v733_v47  ;;  %v747_v21 = vld [vmem:[%s2514_s7 + $0x1d8] sm:$0xff]  ;;  %v1719_v46 = vcombine.high %v739_v40, %v743_v41 }
  0x7d   : > { %v1697_v26 = vcombine.high %v720_v24, %v724_v25  ;;  %v1696_v27 = vcombine.low %v720_v24, %v724_v25  ;;  %v712_v28 = vld [vmem:[%s2514_s7 + $0xc0] sm:$0xff]  ;;  %v1699_v53 = vcombine.high %v721_v50, %v725_v51  ;;  %v713_v54 = vld [vmem:[%s2514_s7 + $0xc8] sm:$0xff]  ;;  %v1698_v56 = vcombine.low %v721_v50, %v725_v51  ;;  %v730_v47 = vld [vmem:[%s2514_s7 + $0x150] sm:$0xff] }
  0x7e   : > { %1075 = vmatpush1.bf16.msra.mxu0 %v1712_v19  ;;  %v716_v29 = vld [vmem:[%s2514_s7 + $0xe0] sm:$0xff]  ;;  %v717_v55 = vld [vmem:[%s2514_s7 + $0xe8] sm:$0xff]  ;;  %v746_v19 = vld [vmem:[%s2514_s7 + $0x1d0] sm:$0xff] }
  0x7f   : > { %1751 = vmatpush3.bf16.msra.mxu1 %v1859_v7  ;;  %1076 = vmatprep.subr.bf16.mxu0 %v1705_v22  ;;  %v1689_v30 = vcombine.high %v712_v28, %v716_v29  ;;  %v1688_v31 = vcombine.low %v712_v28, %v716_v29  ;;  %v1655_v32 = vld [vmem:[#allocation4] ss:$0 sm:$0xff]  ;;  %v1656_v34 = vld [vmem:[#allocation6] ss:$0 sm:$0xff]  ;;  %v1691_v57 = vcombine.high %v713_v54, %v717_v55  ;;  %v705_v61 = vld [vmem:[%s2514_s7 + $0x88] sm:$0xff] }
  0x80   : > { %1115 = vmatprep.subr.bf16.mxu1 %v1723_v17  ;;  %v1690_v58 = vcombine.low %v713_v54, %v717_v55  ;;  %v704_v59 = vld [vmem:[%s2514_s7 + $0x80] sm:$0xff]  ;;  %v709_v63 = vld [vmem:[%s2514_s7 + $0xa8] sm:$0xff]  ;;  %v1725_v22 = vcombine.high %v746_v19, %v750_v20  ;;  %v1724_v24 = vcombine.low %v746_v19, %v750_v20  ;;  %v735_v50 = vld [vmem:[%s2514_s7 + $0x178] sm:$0xff] }
  0x81   : > { %v708_v60 = vld [vmem:[%s2514_s7 + $0xa0] sm:$0xff]  ;;  %v1682_v1 = vcombine.low %v705_v61, %v709_v63  ;;  %v1683_v2 = vcombine.high %v705_v61, %v709_v63  ;;  %v697_v6 = vld [vmem:[%s2514_s7 + $0x48] sm:$0xff]  ;;  %v722_v55 = vld [vmem:[%s2514_s7 + $0x110] sm:$0xff] }
  0x82   : > { %1077 = vmatpush1.bf16.msra.mxu0 %v1704_v23  ;;  %v1681_v62 = vcombine.high %v704_v59, %v708_v60  ;;  %v1680_v0 = vcombine.low %v704_v59, %v708_v60  ;;  %v696_v3 = vld [vmem:[%s2514_s7 + $0x40] sm:$0xff]  ;;  %v701_v7 = vld [vmem:[%s2514_s7 + $0x68] sm:$0xff]  ;;  %v751_v23 = vld [vmem:[%s2514_s7 + $0x1f8] sm:$0xff] }
  0x83   : > { %1078 = vmatprep.subr.bf16.mxu0 %v1697_v26  ;;  %v700_v4 = vld [vmem:[%s2514_s7 + $0x60] sm:$0xff]  ;;  %v1674_v9 = vcombine.low %v697_v6, %v701_v7  ;;  %v1675_v10 = vcombine.high %v697_v6, %v701_v7  ;;  %v689_v13 = vld [vmem:[%s2514_s7 + $0x8] sm:$0xff]  ;;  %v1726_v25 = vcombine.low %v747_v21, %v751_v23  ;;  %v1727_v26 = vcombine.high %v747_v21, %v751_v23  ;;  %v714_v63 = vld [vmem:[%s2514_s7 + $0xd0] sm:$0xff] }
  0x84   : > { %v1673_v5 = vcombine.high %v696_v3, %v700_v4  ;;  %v1672_v8 = vcombine.low %v696_v3, %v700_v4  ;;  %v688_v11 = vld [vmem:[%s2514_s7] sm:$0xff]  ;;  %v693_v15 = vld [vmem:[%s2514_s7 + $0x28] sm:$0xff]  ;;  %v706_v7 = vld [vmem:[%s2514_s7 + $0x90] sm:$0xff] }
  0x85   : > { %v692_v12 = vld [vmem:[%s2514_s7 + $0x20] sm:$0xff]  ;;  %v1666_v17 = vcombine.low %v689_v13, %v693_v15  ;;  %v1667_v18 = vcombine.high %v689_v13, %v693_v15  ;;  %v1662_v28 = vld [vmem:[#allocation7] ss:$0 sm:$0xff]  ;;  %v698_v15 = vld [vmem:[%s2514_s7 + $0x50] sm:$0xff] }
  0x86   : > { %1079 = vmatpush1.bf16.msra.mxu0 %v1696_v27  ;;  %v1665_v14 = vcombine.high %v688_v11, %v692_v12  ;;  %v2091_v27 = vmov 0   ;;  %v690_v23 = vld [vmem:[%s2514_s7 + $0x10] sm:$0xff] }
  0x87   : > { %1080 = vmatprep.subr.bf16.mxu0 %v1689_v30  ;;  %1104 = vmatprep.mubr.bf16.mxu0 %v2091_v27 }
  0x8a   : > { %1081 = vmatpush1.bf16.msra.mxu0 %v1688_v31  ;;  %v1663_v31 = vld [vmem:[#allocation9] ss:$0 sm:$0xff] }
  0x8b   : > { %1082 = vmatprep.subr.bf16.mxu0 %v1681_v62 }
  0x8e   : > { %1083 = vmatpush1.bf16.msra.mxu0 %v1680_v0  ;;  %v718_v0 = vld [vmem:[%s2514_s7 + $0xf0] sm:$0xff] }
  0x8f   : > { %1084 = vmatprep.subr.bf16.mxu0 %v1673_v5  ;;  %v1693_v5 = vcombine.high %v714_v63, %v718_v0 }
  0x92   : > { %1085 = vmatpush1.bf16.msra.mxu0 %v1672_v8  ;;  %v710_v8 = vld [vmem:[%s2514_s7 + $0xb0] sm:$0xff] }
  0x93   : > { %1086 = vmatprep.subr.bf16.mxu0 %v1665_v14  ;;  %v1685_v13 = vcombine.high %v706_v7, %v710_v8  ;;  %v1684_v19 = vcombine.low %v706_v7, %v710_v8 }
 0x138   : > { %v1743_v33 = vpop.f32.mrf.mxu0 }
 0x139   : > { %v577_v35 = vmul.f32 %v1743_v33, %v1655_v32 }
 0x13a   : > { %v560_v36 = vpop.f32.mrf.mxu0 }
 0x13b   : > { %v586_v37 = vadd.f32 %v1656_v34, %v577_v35  ;;  %v576_v38 = vmul.f32 %v1655_v32, %v560_v36 }
 0x13d   : > { %v585_v39 = vadd.f32 %v1656_v34, %v576_v38  ;;  %v588_v42 = vmax.f32 %v586_v37, 0.0  ;;  %v738_v38 = vld [vmem:[%s2514_s7 + $0x190] sm:$0xff] }
 0x13f   : > { %v587_v43 = vmax.f32 %v585_v39, 0.0  ;;  %v742_v39 = vld [vmem:[%s2514_s7 + $0x1b0] sm:$0xff] }
 0x140   : > { %v1716_v51 = vcombine.low %v738_v38, %v742_v39 }
 0x141   : > { %v589_v44 = vpack.c.bf16 %v588_v42, %v587_v43 }
 0x143   : > { %1753 = vmatmul.mubr.msk.bf16.vlgmr.msra.gmra.mxu1 %vm622_vm3, %v589_v44 }
 0x144   : > { %1116 = vmatpush1.bf16.msra.mxu1 %v1722_v16  ;;  %v1664_v16 = vcombine.low %v688_v11, %v692_v12  ;;  %1147 = vmatprep.mubr.bf16.mxu1 %v2091_v27  ;;  %v1692_v11 = vcombine.low %v714_v63, %v718_v0 }
 0x145   : > { %1117 = vmatprep.subr.bf16.mxu1 %v1715_v45  ;;  %v1717_v45 = vcombine.high %v738_v38, %v742_v39 }
 0x146   : > { %1087 = vmatpush1.bf16.msra.mxu0 %v1664_v16  ;;  %v702_v16 = vld [vmem:[%s2514_s7 + $0x70] sm:$0xff] }
 0x147   : > { %1158 = vmatprep.subr.bf16.mxu0 %v1725_v22  ;;  %v1677_v21 = vcombine.high %v698_v15, %v702_v16 }
 0x148   : > { %1118 = vmatpush1.bf16.msra.mxu1 %v1714_v48  ;;  %v734_v48 = vld [vmem:[%s2514_s7 + $0x170] sm:$0xff] }
 0x149   : > { %1119 = vmatprep.subr.bf16.mxu1 %v1707_v49  ;;  %v731_v49 = vld [vmem:[%s2514_s7 + $0x158] sm:$0xff]  ;;  %v1708_v59 = vcombine.low %v730_v47, %v734_v48 }
 0x14a   : > { %v1711_v54 = vcombine.high %v731_v49, %v735_v50  ;;  %v1710_v60 = vcombine.low %v731_v49, %v735_v50 }
 0x14c   : > { %1120 = vmatpush1.bf16.msra.mxu1 %v1706_v52  ;;  %v1718_v52 = vcombine.low %v739_v40, %v743_v41 }
 0x14d   : > { %1121 = vmatprep.subr.bf16.mxu1 %v1699_v53  ;;  %v1709_v53 = vcombine.high %v730_v47, %v734_v48 }
 0x150   : > { %1122 = vmatpush1.bf16.msra.mxu1 %v1698_v56  ;;  %v726_v56 = vld [vmem:[%s2514_s7 + $0x130] sm:$0xff] }
 0x151   : > { %1123 = vmatprep.subr.bf16.mxu1 %v1691_v57  ;;  %v723_v57 = vld [vmem:[%s2514_s7 + $0x118] sm:$0xff]  ;;  %v1701_v61 = vcombine.high %v722_v55, %v726_v56  ;;  %v1700_v3 = vcombine.low %v722_v55, %v726_v56 }
 0x154   : > { %1124 = vmatpush1.bf16.msra.mxu1 %v1690_v58  ;;  %v727_v58 = vld [vmem:[%s2514_s7 + $0x138] sm:$0xff] }
 0x155   : > { %1125 = vmatprep.subr.bf16.mxu1 %v1683_v2  ;;  %v1703_v62 = vcombine.high %v723_v57, %v727_v58  ;;  %v719_v2 = vld [vmem:[%s2514_s7 + $0xf8] sm:$0xff]  ;;  %v1702_v4 = vcombine.low %v723_v57, %v727_v58 }
 0x158   : > { %1126 = vmatpush1.bf16.msra.mxu1 %v1682_v1  ;;  %v715_v1 = vld [vmem:[%s2514_s7 + $0xd8] sm:$0xff] }
 0x159   : > { %1127 = vmatprep.subr.bf16.mxu1 %v1675_v10  ;;  %v1695_v6 = vcombine.high %v715_v1, %v719_v2  ;;  %v711_v10 = vld [vmem:[%s2514_s7 + $0xb8] sm:$0xff]  ;;  %v1694_v12 = vcombine.low %v715_v1, %v719_v2 }
 0x15c   : > { %1128 = vmatpush1.bf16.msra.mxu1 %v1674_v9  ;;  %v707_v9 = vld [vmem:[%s2514_s7 + $0x98] sm:$0xff] }
 0x15d   : > { %1129 = vmatprep.subr.bf16.mxu1 %v1667_v18  ;;  %v1687_v14 = vcombine.high %v707_v9, %v711_v10  ;;  %v703_v18 = vld [vmem:[%s2514_s7 + $0x78] sm:$0xff]  ;;  %v1686_v20 = vcombine.low %v707_v9, %v711_v10 }
 0x160   : > { %1130 = vmatpush1.bf16.msra.mxu1 %v1666_v17  ;;  %v699_v17 = vld [vmem:[%s2514_s7 + $0x58] sm:$0xff] }
 0x161   : > { %1201 = vmatprep.subr.bf16.mxu1 %v1727_v26  ;;  %v1679_v22 = vcombine.high %v699_v17, %v703_v18  ;;  %v695_v26 = vld [vmem:[%s2514_s7 + $0x38] sm:$0xff] }
 0x203   : > { %v660_v29 = vpop.f32.mrf.mxu1 }
 0x204   : > { %v674_v30 = vmul.f32 %v1662_v28, %v660_v29 }
 0x205   : > { %v1754_v32 = vpop.f32.mrf.mxu1 }
 0x206   : > { %v683_v34 = vadd.f32 %v1663_v31, %v674_v30 }
 0x207   : > { %v663_v33 = vpop.f32.mrf.mxu1 }
 0x208   : > { %v675_v35 = vmul.f32 %v1662_v28, %v663_v33  ;;  %v685_v42 = vmax.f32 %v683_v34, 0.0  ;;  %v1678_v28 = vcombine.low %v699_v17, %v703_v18  ;;  %v1246_v33 = vlaneseq }
 0x209   : > { %v1755_v36 = vpop.f32.mrf.mxu1 }
 0x20a   : > { %v684_v37 = vadd.f32 %v1663_v31, %v675_v35  ;;  %v2483_v38 = vshrl.u32 %v1246_v33, 7 }
 0x20c   : > { %v686_v43 = vmax.f32 %v684_v37, 0.0  ;;  %v1252_v41 = vsub.s32 1, %v2483_v38 }
 0x20e   : > { %v2405_v44 = vpack.c.bf16 %v686_v43, %v685_v42  ;;  %v1260_v42 = vsub.s32 3, %v2483_v38  ;;  %v1248_v43 = vsub.s32 0, %v2483_v38 }
 0x210   : > { %1105 = vmatmul.mubr.bf16.vlgmr.msra.gmra.mxu0 %v2405_v44  ;;  %1148 = vmatmul.mubr.bf16.vlgmr.msra.gmra.mxu1 %v2405_v44 }
 0x211   : > { %1159 = vmatpush1.bf16.msra.mxu0 %v1724_v24  ;;  %1202 = vmatpush1.bf16.msra.mxu1 %v1726_v25  ;;  %v694_v24 = vld [vmem:[%s2514_s7 + $0x30] sm:$0xff]  ;;  %v691_v25 = vld [vmem:[%s2514_s7 + $0x18] sm:$0xff] }
 0x212   : > { %1160 = vmatprep.subr.bf16.mxu0 %v1717_v45  ;;  %1203 = vmatprep.subr.bf16.mxu1 %v1719_v46  ;;  %v1669_v29 = vcombine.high %v690_v23, %v694_v24  ;;  %v1671_v30 = vcombine.high %v691_v25, %v695_v26  ;;  %v1668_v31 = vcombine.low %v690_v23, %v694_v24  ;;  %v1256_v45 = vsub.s32 2, %v2483_v38  ;;  %v1244_v46 = vld [vmem:[#allocation10] sm:$0xff] }
 0x213   : > { %1190 = vmatprep.mubr.bf16.mxu0 %v2091_v27  ;;  %1233 = vmatprep.mubr.bf16.mxu1 %v2091_v27  ;;  %v1676_v27 = vcombine.low %v698_v15, %v702_v16  ;;  %v1670_v32 = vcombine.low %v691_v25, %v695_v26  ;;  %v1253_v48 = vrot.slane %v1244_v46, %v1252_v41  ;;  %v1268_v23 = vsub.s32 5, %v2483_v38 }
 0x214   : > { %v1261_v49 = vrot.slane %v1244_v46, %v1260_v42  ;;  %v1249_v50 = vrot.slane %v1244_v46, %v1248_v43  ;;  %v1276_v24 = vsub.s32 7, %v2483_v38 }
 0x215   : > { %1161 = vmatpush1.bf16.msra.mxu0 %v1716_v51  ;;  %1204 = vmatpush1.bf16.msra.mxu1 %v1718_v52  ;;  %v1257_v51 = vrot.slane %v1244_v46, %v1256_v45  ;;  %v1302_v52 = vld [vmem:[#allocation12] sm:$0xff] }
 0x216   : > { %1162 = vmatprep.subr.bf16.mxu0 %v1709_v53  ;;  %1205 = vmatprep.subr.bf16.mxu1 %v1711_v54  ;;  %v1311_v58 = vrot.slane %v1302_v52, %v1252_v41  ;;  %v1315_v0 = vrot.slane %v1302_v52, %v1256_v45 }
 0x219   : > { %1163 = vmatpush1.bf16.msra.mxu0 %v1708_v59  ;;  %1206 = vmatpush1.bf16.msra.mxu1 %v1710_v60  ;;  %v1319_v60 = vrot.slane %v1302_v52, %v1260_v42 }
 0x21a   : > { %1164 = vmatprep.subr.bf16.mxu0 %v1701_v61  ;;  %1207 = vmatprep.subr.bf16.mxu1 %v1703_v62  ;;  %v1307_v62 = vrot.slane %v1302_v52, %v1248_v43 }
 0x21d   : > { %1165 = vmatpush1.bf16.msra.mxu0 %v1700_v3  ;;  %1208 = vmatpush1.bf16.msra.mxu1 %v1702_v4 }
 0x21e   : > { %1166 = vmatprep.subr.bf16.mxu0 %v1693_v5  ;;  %1209 = vmatprep.subr.bf16.mxu1 %v1695_v6 }
 0x221   : > { %1167 = vmatpush1.bf16.msra.mxu0 %v1692_v11  ;;  %1210 = vmatpush1.bf16.msra.mxu1 %v1694_v12 }
 0x222   : > { %1168 = vmatprep.subr.bf16.mxu0 %v1685_v13  ;;  %1211 = vmatprep.subr.bf16.mxu1 %v1687_v14 }
 0x225   : > { %1169 = vmatpush1.bf16.msra.mxu0 %v1684_v19  ;;  %1212 = vmatpush1.bf16.msra.mxu1 %v1686_v20 }
 0x226   : > { %1170 = vmatprep.subr.bf16.mxu0 %v1677_v21  ;;  %1213 = vmatprep.subr.bf16.mxu1 %v1679_v22  ;;  %v1264_v21 = vsub.s32 4, %v2483_v38  ;;  %v1272_v22 = vsub.s32 6, %v2483_v38 }
 0x228   : > { %v1323_v41 = vrot.slane %v1302_v52, %v1264_v21  ;;  %v1331_v43 = vrot.slane %v1302_v52, %v1272_v22 }
 0x229   : > { %1171 = vmatpush1.bf16.msra.mxu0 %v1676_v27  ;;  %1214 = vmatpush1.bf16.msra.mxu1 %v1678_v28 }
 0x22a   : > { %1172 = vmatprep.subr.bf16.mxu0 %v1669_v29  ;;  %1215 = vmatprep.subr.bf16.mxu1 %v1671_v30  ;;  %v1265_v29 = vrot.slane %v1244_v46, %v1264_v21  ;;  %v1273_v30 = vrot.slane %v1244_v46, %v1272_v22 }
 0x22d   : > { %1173 = vmatpush1.bf16.msra.mxu0 %v1668_v31  ;;  %1216 = vmatpush1.bf16.msra.mxu1 %v1670_v32  ;;  %v1269_v31 = vrot.slane %v1244_v46, %v1268_v23  ;;  %v1277_v32 = vrot.slane %v1244_v46, %v1276_v24 }
 0x230   : > { %1191 = vmatmul.mubr.bf16.vlgmr.msra.gmra.mxu0 %v2405_v44  ;;  %1234 = vmatmul.mubr.bf16.vlgmr.msra.gmra.mxu1 %v2405_v44 }
 0x2d0   : > { %v1106_v34 = vpop.f32.mrf.mxu0  ;;  %v1149_v35 = vpop.f32.mrf.mxu1 }
 0x2d1   : > { %v1286_v61 = vmul.f32 %v1249_v50, %v1106_v34  ;;  %v1288_v63 = vmul.f32 %v1257_v51, %v1149_v35 }
 0x2d2   : > { %v1108_v36 = vpop.f32.mrf.mxu0  ;;  %v1151_v37 = vpop.f32.mrf.mxu1 }
 0x2d3   : > { %v1287_v57 = vmul.f32 %v1253_v48, %v1108_v36  ;;  %v1289_v59 = vmul.f32 %v1261_v49, %v1151_v37  ;;  %v1344_v7 = vadd.f32 %v1307_v62, %v1286_v61  ;;  %v1346_v8 = vadd.f32 %v1315_v0, %v1288_v63 }
 0x2d4   : > { %v1110_v39 = vpop.f32.mrf.mxu0  ;;  %v1153_v40 = vpop.f32.mrf.mxu1 }
 0x2d5   : > { %v1294_v55 = vmul.f32 %v1249_v50, %v1110_v39  ;;  %v1296_v56 = vmul.f32 %v1257_v51, %v1153_v40  ;;  %v1345_v5 = vadd.f32 %v1311_v58, %v1287_v57  ;;  %v1347_v6 = vadd.f32 %v1319_v60, %v1289_v59 }
 0x2d6   : > { %v1112_v47 = vpop.f32.mrf.mxu0  ;;  %v1155_v44 = vpop.f32.mrf.mxu1  ;;  %v1360_v15 = vmax.f32 %v1344_v7, 0.0  ;;  %v1362_v16 = vmax.f32 %v1346_v8, 0.0  ;;  %v1335_v50 = vrot.slane %v1302_v52, %v1276_v24  ;;  %v2092_v57 = vmov 1966171168  }
 0x2d7   : > { %v1295_v53 = vmul.f32 %v1253_v48, %v1112_v47  ;;  %v1297_v54 = vmul.f32 %v1261_v49, %v1155_v44  ;;  %v1352_v3 = vadd.f32 %v1307_v62, %v1294_v55  ;;  %v1354_v4 = vadd.f32 %v1315_v0, %v1296_v56 }
 0x2d8   : > { %v1361_v13 = vmax.f32 %v1345_v5, 0.0  ;;  %v1363_v14 = vmax.f32 %v1347_v6, 0.0  ;;  %v1327_v48 = vrot.slane %v1302_v52, %v1268_v23 }
 0x2d9   : > { %v1353_v1 = vadd.f32 %v1311_v58, %v1295_v53  ;;  %v1355_v2 = vadd.f32 %v1319_v60, %v1297_v54  ;;  %v1368_v11 = vmax.f32 %v1352_v3, 0.0  ;;  %v1370_v12 = vmax.f32 %v1354_v4, 0.0 }
 0x2da   : > { %v1446_v58 = vunpack.c.l.s4 %v2092_v57 }
 0x2db   : > { %v1369_v9 = vmax.f32 %v1353_v1, 0.0  ;;  %v1371_v10 = vmax.f32 %v1355_v2, 0.0  ;;  %v1377_v19 = vmax.f32 %v1360_v15, %v1368_v11  ;;  %v1391_v20 = vmax.f32 %v1362_v16, %v1370_v12 }
 0x2dd   : > { %v1384_v17 = vmax.f32 %v1361_v13, %v1369_v9  ;;  %v1398_v18 = vmax.f32 %v1363_v14, %v1371_v10  ;;  %v1378_v27 = vrot.slane %v1377_v19, 4  ;;  %v1392_v28 = vrot.slane %v1391_v20, 4 }
 0x2df   : > { %v1385_v25 = vrot.slane %v1384_v17, 4  ;;  %v1399_v26 = vrot.slane %v1398_v18, 4  ;;  %v1379_v37 = vmax.f32 %v1377_v19, %v1378_v27  ;;  %v1393_v39 = vmax.f32 %v1391_v20, %v1392_v28 }
 0x2e1   : > { %v1386_v33 = vmax.f32 %v1384_v17, %v1385_v25  ;;  %v1400_v34 = vmax.f32 %v1398_v18, %v1399_v26  ;;  %v1380_v55 = vrot.slane %v1379_v37, 2  ;;  %v1394_v56 = vrot.slane %v1393_v39, 2 }
 0x2e3   : > { %v1387_v51 = vrot.slane %v1386_v33, 2  ;;  %v1401_v53 = vrot.slane %v1400_v34, 2  ;;  %v1381_v8 = vmax.f32 %v1379_v37, %v1380_v55  ;;  %v1395_v9 = vmax.f32 %v1393_v39, %v1394_v56 }
 0x2e5   : > { %v1388_v5 = vmax.f32 %v1386_v33, %v1387_v51  ;;  %v1402_v52 = vmax.f32 %v1400_v34, %v1401_v53  ;;  %v1382_v26 = vrot.slane %v1381_v8, 1  ;;  %v1396_v27 = vrot.slane %v1395_v9, 1 }
 0x2e7   : > { %v1389_v20 = vrot.slane %v1388_v5, 1  ;;  %v1403_v21 = vrot.slane %v1402_v52, 1 }
 0x2e9   : > { %v1390_v33 = vmax.f32 %v1388_v5, %v1389_v20  ;;  %v1404_v34 = vmax.f32 %v1402_v52, %v1403_v21 }
 0x2f0   : > { %v1192_v35 = vpop.f32.mrf.mxu0  ;;  %v1235_v36 = vpop.f32.mrf.mxu1 }
 0x2f1   : > { %v1290_v40 = vmul.f32 %v1265_v29, %v1192_v35  ;;  %v1292_v42 = vmul.f32 %v1273_v30, %v1235_v36 }
 0x2f2   : > { %v1194_v45 = vpop.f32.mrf.mxu0  ;;  %v1237_v47 = vpop.f32.mrf.mxu1 }
 0x2f3   : > { %v1291_v44 = vmul.f32 %v1269_v31, %v1194_v45  ;;  %v1293_v49 = vmul.f32 %v1277_v32, %v1237_v47  ;;  %v1348_v59 = vadd.f32 %v1323_v41, %v1290_v40  ;;  %v1350_v60 = vadd.f32 %v1331_v43, %v1292_v42 }
 0x2f4   : > { %v1196_v54 = vpop.f32.mrf.mxu0  ;;  %v1239_v46 = vpop.f32.mrf.mxu1  ;;  %v1383_v40 = vmax.f32 %v1381_v8, %v1382_v26 }
 0x2f5   : > { %v1298_v61 = vmul.f32 %v1265_v29, %v1196_v54  ;;  %v1300_v62 = vmul.f32 %v1273_v30, %v1239_v46  ;;  %v1349_v1 = vadd.f32 %v1327_v48, %v1291_v44  ;;  %v1351_v2 = vadd.f32 %v1335_v50, %v1293_v49 }
 0x2f6   : > { %v1198_v63 = vpop.f32.mrf.mxu0  ;;  %v1241_v0 = vpop.f32.mrf.mxu1  ;;  %v1364_v12 = vmax.f32 %v1348_v59, 0.0  ;;  %v1366_v13 = vmax.f32 %v1350_v60, 0.0  ;;  %v1447_v30 = vunpack.c.0.s8 %v1446_v58 }
 0x2f7   : > { %v1299_v3 = vmul.f32 %v1269_v31, %v1198_v63  ;;  %v1301_v4 = vmul.f32 %v1277_v32, %v1241_v0  ;;  %v1356_v6 = vadd.f32 %v1323_v41, %v1298_v61  ;;  %v1358_v7 = vadd.f32 %v1331_v43, %v1300_v62 }
 0x2f8   : > { %v1365_v16 = vmax.f32 %v1349_v1, 0.0  ;;  %v1367_v17 = vmax.f32 %v1351_v2, 0.0  ;;  %v1397_v41 = vmax.f32 %v1395_v9, %v1396_v27  ;;  %v1450_v45 = vsub.s32 %v1447_v30, %v2483_v38 }
 0x2f9   : > { %v1357_v10 = vadd.f32 %v1327_v48, %v1299_v3  ;;  %v1359_v11 = vadd.f32 %v1335_v50, %v1301_v4  ;;  %v1372_v14 = vmax.f32 %v1356_v6, 0.0  ;;  %v1374_v15 = vmax.f32 %v1358_v7, 0.0 }
 0x2fa   : > { %v1441_v48 = vcombine.low %v1383_v40, %v1390_v33  ;;  %v1442_v49 = vcombine.low %v1397_v41, %v1404_v34 }
 0x2fb   : > { %v1373_v18 = vmax.f32 %v1357_v10, 0.0  ;;  %v1375_v19 = vmax.f32 %v1359_v11, 0.0  ;;  %v1405_v22 = vmax.f32 %v1364_v12, %v1372_v14  ;;  %v1419_v23 = vmax.f32 %v1366_v13, %v1374_v15 }
 0x2fc   : > { %v1451_v58 = vrot.slane %v1441_v48, %v1450_v45  ;;  %v1458_v59 = vrot.slane %v1442_v49, %v1450_v45 }
 0x2fd   : > { %v1412_v24 = vmax.f32 %v1365_v16, %v1373_v18  ;;  %v1426_v25 = vmax.f32 %v1367_v17, %v1375_v19  ;;  %v1406_v28 = vrot.slane %v1405_v22, 4  ;;  %v1420_v29 = vrot.slane %v1419_v23, 4 }
 0x2fe   : > { %v1473_v1 = vcombine.low %v1451_v58, %v1458_v59 }
 0x2ff   : > { %v1413_v31 = vrot.slane %v1412_v24, 4  ;;  %v1427_v32 = vrot.slane %v1426_v25, 4  ;;  %v1407_v35 = vmax.f32 %v1405_v22, %v1406_v28  ;;  %v1421_v36 = vmax.f32 %v1419_v23, %v1420_v29 }
 0x300   : > { %v1481_v5 = vrot.slane %v1473_v1, %v1450_v45 }
 0x301   : > { %v1414_v37 = vmax.f32 %v1412_v24, %v1413_v31  ;;  %v1428_v39 = vmax.f32 %v1426_v25, %v1427_v32  ;;  %v1408_v42 = vrot.slane %v1407_v35, 2  ;;  %v1422_v43 = vrot.slane %v1421_v36, 2 }
 0x303   : > { %v1415_v47 = vrot.slane %v1414_v37, 2  ;;  %v1429_v44 = vrot.slane %v1428_v39, 2  ;;  %v1409_v50 = vmax.f32 %v1407_v35, %v1408_v42  ;;  %v1423_v51 = vmax.f32 %v1421_v36, %v1422_v43 }
 0x305   : > { %v1416_v53 = vmax.f32 %v1414_v37, %v1415_v47  ;;  %v1430_v54 = vmax.f32 %v1428_v39, %v1429_v44  ;;  %v1410_v46 = vrot.slane %v1409_v50, 1  ;;  %v1424_v55 = vrot.slane %v1423_v51, 1 }
 0x307   : > { %v1417_v56 = vrot.slane %v1416_v53, 1  ;;  %v1431_v57 = vrot.slane %v1430_v54, 1  ;;  %v1411_v60 = vmax.f32 %v1409_v50, %v1410_v46  ;;  %v1425_v61 = vmax.f32 %v1423_v51, %v1424_v55 }
 0x309   : > { %v1418_v62 = vmax.f32 %v1416_v53, %v1417_v56  ;;  %v1432_v63 = vmax.f32 %v1430_v54, %v1431_v57 }
 0x30b   : > { %v1443_v38 = vcombine.low %v1411_v60, %v1418_v62  ;;  %v1444_v0 = vcombine.low %v1425_v61, %v1432_v63 }
 0x30d   : > { %v1465_v2 = vrot.slane %v1443_v38, %v1450_v45  ;;  %v1472_v3 = vrot.slane %v1444_v0, %v1450_v45 }
 0x30f   : > { %v1474_v4 = vcombine.low %v1465_v2, %v1472_v3 }
 0x311   : > { %v1488_v52 = vrot.slane %v1474_v4, %v1450_v45 }
 0x313   : > { %v1489_v6 = vcombine.low %v1481_v5, %v1488_v52 }
 0x315   : > { %1492 = vst [vmem:[%s473_s21] sm:$0xff] %v1489_v6 }
 0x316 PF: > { %s24_s15 = sadd.s32 1, %s2080_s15   ;;  %s2527_s13 = smov %s2076_s14 }
 0x317   : > { %p21_p6 = scmp.ge.s32.totalorder %s24_s15, 4   ;;  %s2528_s14 = smov %s2530_s22 }
 0x319   :  { %23 = sbr.rel (!%p21_p6) target bundleno = 5 (0x5), region = 123 }
 0x31e   :  { %1512 = vsyncpa [#allocation3], 1 }
 0x31f   :  { %1514 = vsyncpa [#allocation3 + $0x1], 1 }
 0x320   :  { %1515 = vsyncpa [#allocation5], 1 }
 0x321   :  { %1516 = vsyncpa [#allocation8], 1 }
 0x322   :  { %1517 = vsyncpa [#allocation11], 1 }

// kernel: get_model_forward.8
= control target key start
LH: loop header
LB: loop body
LE: loop exit
PB: predicated region body
PF: predicated region fallthrough
CT: control target
= control target key end

     0   :  { %v3560_v36 = vmov 1983009808   ;;  %v44_v38 = vlaneseq  ;;  %vm2695_vm0 = vcmask 66560   ;;  %s4735_s1 = inlined_call_operand.vmem [shape: bf16[1024,512], index: 1, kind: input, shape index: {}]   ;;  %s4736_s0 = inlined_call_operand.vmem [shape: f32[2,1024], index: 0, kind: input, shape index: {}]   ;;  %s4737_s4 = inlined_call_operand.vmem [shape: bf16[512,256], index: 4, kind: input, shape index: {}]   ;;  %s4738_s2 = inlined_call_operand.vmem [shape: f32[1,512], index: 2, kind: input, shape index: {}]   ;;  %s4739_s3 = inlined_call_operand.vmem [shape: f32[1,512], index: 3, kind: input, shape index: {}]   ;;  %s4740_s7 = inlined_call_operand.vmem [shape: bf16[256,9], index: 7, kind: input, shape index: {}]   ;;  %s4741_s5 = inlined_call_operand.vmem [shape: f32[1,256], index: 5, kind: input, shape index: {}]   ;;  %s4742_s6 = inlined_call_operand.vmem [shape: f32[1,256], index: 6, kind: input, shape index: {}]   ;;  %s4743_s8 = inlined_call_operand.vmem [shape: f32[1,9], index: 8, kind: input, shape index: {}]   ;;  %s4744_s9 = inlined_call_operand.vmem [shape: f32[1,9], index: 9, kind: input, shape index: {}]   ;;  %s4745_s10 = inlined_call_operand.vmem [shape: f32[2,9], index: 10, kind: output, shape index: {}]  }
   0x1   :  { %v3062_v0 = vld [vmem:[%s4735_s1 + $0xe4] ss:$16 sps:$4 sm:$0xff]   ;;  %v3066_v2 = vld [vmem:[%s4735_s1 + $0xe0] ss:$16 sps:$4 sm:$0xff]   ;;  %v42_v37 = vunpack.c.l.s4 %v3560_v36 }
   0x2   :  { %v3064_v1 = vld [vmem:[%s4735_s1 + $0x2e4] ss:$16 sps:$4 sm:$0xff]   ;;  %1626 = vmatprep.subr.bf16.mxu0 %v3062_v0  ;;  %v3067_v3 = vld [vmem:[%s4735_s1 + $0x2e0] ss:$16 sps:$4 sm:$0xff]   ;;  %v3733_v43 = vshrl.u32 %v44_v38, 7 }
   0x3   :  { %1667 = vmatprep.subr.bf16.mxu1 %v3064_v1  ;;  %v3068_v4 = vld [vmem:[%s4735_s1 + $0xc4] ss:$16 sps:$4 sm:$0xff]   ;;  %1627 = vmatpush1.bf16.msra.mxu0 %v3066_v2  ;;  %v3072_v6 = vld [vmem:[%s4735_s1 + $0xc0] ss:$16 sps:$4 sm:$0xff]   ;;  %v43_v42 = vunpack.c.0.s8 %v42_v37 }
   0x4   :  { %1668 = vmatpush1.bf16.msra.mxu1 %v3067_v3  ;;  %v3070_v5 = vld [vmem:[%s4735_s1 + $0x2c4] ss:$16 sps:$4 sm:$0xff]   ;;  %1628 = vmatprep.subr.bf16.mxu0 %v3068_v4  ;;  %v3073_v7 = vld [vmem:[%s4735_s1 + $0x2c0] ss:$16 sps:$4 sm:$0xff]   ;;  %v37_v4 = vld [vmem:[%s4736_s0 + $0x8] sm:$0xff] }
   0x5   :  { %1669 = vmatprep.subr.bf16.mxu1 %v3070_v5  ;;  %v3074_v8 = vld [vmem:[%s4735_s1 + $0xa4] ss:$16 sps:$4 sm:$0xff]   ;;  %v3078_v10 = vld [vmem:[%s4735_s1 + $0xa0] ss:$16 sps:$4 sm:$0xff]   ;;  %v46_v49 = vsub.s32 %v43_v42, %v3733_v43 }
   0x6   :  { %v3076_v9 = vld [vmem:[%s4735_s1 + $0x2a4] ss:$16 sps:$4 sm:$0xff]   ;;  %v3079_v11 = vld [vmem:[%s4735_s1 + $0x2a0] ss:$16 sps:$4 sm:$0xff]  }
   0x7   :  { %1629 = vmatpush1.bf16.msra.mxu0 %v3072_v6  ;;  %v3080_v12 = vld [vmem:[%s4735_s1 + $0x84] ss:$16 sps:$4 sm:$0xff]   ;;  %v3084_v14 = vld [vmem:[%s4735_s1 + $0x80] ss:$16 sps:$4 sm:$0xff]  }
   0x8   :  { %1670 = vmatpush1.bf16.msra.mxu1 %v3073_v7  ;;  %1630 = vmatprep.subr.bf16.mxu0 %v3074_v8  ;;  %v3082_v13 = vld [vmem:[%s4735_s1 + $0x284] ss:$16 sps:$4 sm:$0xff]   ;;  %v3085_v15 = vld [vmem:[%s4735_s1 + $0x280] ss:$16 sps:$4 sm:$0xff]  }
   0x9   :  { %1671 = vmatprep.subr.bf16.mxu1 %v3076_v9  ;;  %v3086_v16 = vld [vmem:[%s4735_s1 + $0x64] ss:$16 sps:$4 sm:$0xff]   ;;  %v3090_v18 = vld [vmem:[%s4735_s1 + $0x60] ss:$16 sps:$4 sm:$0xff]   ;;  %v57_v9 = vcombine.high %v37_v4, %v37_v4 }
   0xa   :  { %v3088_v17 = vld [vmem:[%s4735_s1 + $0x264] ss:$16 sps:$4 sm:$0xff]   ;;  %v3091_v19 = vld [vmem:[%s4735_s1 + $0x260] ss:$16 sps:$4 sm:$0xff]  }
   0xb   :  { %1631 = vmatpush1.bf16.msra.mxu0 %v3078_v10  ;;  %v3092_v20 = vld [vmem:[%s4735_s1 + $0x44] ss:$16 sps:$4 sm:$0xff]   ;;  %v3096_v22 = vld [vmem:[%s4735_s1 + $0x40] ss:$16 sps:$4 sm:$0xff]  }
   0xc   :  { %1672 = vmatpush1.bf16.msra.mxu1 %v3079_v11  ;;  %1632 = vmatprep.subr.bf16.mxu0 %v3080_v12  ;;  %v3094_v21 = vld [vmem:[%s4735_s1 + $0x244] ss:$16 sps:$4 sm:$0xff]   ;;  %v3097_v23 = vld [vmem:[%s4735_s1 + $0x240] ss:$16 sps:$4 sm:$0xff]  }
   0xd   :  { %1673 = vmatprep.subr.bf16.mxu1 %v3082_v13  ;;  %v3098_v24 = vld [vmem:[%s4735_s1 + $0x24] ss:$16 sps:$4 sm:$0xff]   ;;  %v3102_v26 = vld [vmem:[%s4735_s1 + $0x20] ss:$16 sps:$4 sm:$0xff]  }
   0xe   :  { %v3100_v25 = vld [vmem:[%s4735_s1 + $0x224] ss:$16 sps:$4 sm:$0xff]   ;;  %v3103_v27 = vld [vmem:[%s4735_s1 + $0x220] ss:$16 sps:$4 sm:$0xff]  }
   0xf   :  { %1633 = vmatpush1.bf16.msra.mxu0 %v3084_v14  ;;  %v3104_v28 = vld [vmem:[%s4735_s1 + $0x4] ss:$16 sps:$4 sm:$0xff]   ;;  %v3108_v30 = vld [vmem:[%s4735_s1] ss:$16 sps:$4 sm:$0xff]   ;;  %v3817_v14 = vrot.slane %v37_v4, %v46_v49 }
  0x10   :  { %1674 = vmatpush1.bf16.msra.mxu1 %v3085_v15  ;;  %1634 = vmatprep.subr.bf16.mxu0 %v3086_v16  ;;  %v3106_v29 = vld [vmem:[%s4735_s1 + $0x204] ss:$16 sps:$4 sm:$0xff]   ;;  %v3109_v31 = vld [vmem:[%s4735_s1 + $0x200] ss:$16 sps:$4 sm:$0xff]   ;;  %v3819_v15 = vrot.slane %v57_v9, %v46_v49 }
  0x11   :  { %1675 = vmatprep.subr.bf16.mxu1 %v3088_v17  ;;  %v3110_v32 = vld [vmem:[%s4735_s1 + $0x1e4] ss:$16 sps:$4 sm:$0xff]   ;;  %v3114_v34 = vld [vmem:[%s4735_s1 + $0x1e0] ss:$16 sps:$4 sm:$0xff]  }
  0x12   :  { %v3112_v33 = vld [vmem:[%s4735_s1 + $0x3e4] ss:$16 sps:$4 sm:$0xff]   ;;  %v3115_v35 = vld [vmem:[%s4735_s1 + $0x3e0] ss:$16 sps:$4 sm:$0xff]  }
  0x13   :  { %1635 = vmatpush1.bf16.msra.mxu0 %v3090_v18  ;;  %v3116_v39 = vld [vmem:[%s4735_s1 + $0x1c4] ss:$16 sps:$4 sm:$0xff]   ;;  %v3120_v41 = vld [vmem:[%s4735_s1 + $0x1c0] ss:$16 sps:$4 sm:$0xff]  }
  0x14   :  { %1676 = vmatpush1.bf16.msra.mxu1 %v3091_v19  ;;  %1636 = vmatprep.subr.bf16.mxu0 %v3092_v20  ;;  %v3118_v40 = vld [vmem:[%s4735_s1 + $0x3c4] ss:$16 sps:$4 sm:$0xff]   ;;  %v3121_v44 = vld [vmem:[%s4735_s1 + $0x3c0] ss:$16 sps:$4 sm:$0xff]   ;;  %v72_v20 = vcombine.high %v3817_v14, %v3817_v14 }
  0x15   :  { %1677 = vmatprep.subr.bf16.mxu1 %v3094_v21  ;;  %v3122_v45 = vld [vmem:[%s4735_s1 + $0x1a4] ss:$16 sps:$4 sm:$0xff]   ;;  %v3126_v47 = vld [vmem:[%s4735_s1 + $0x1a0] ss:$16 sps:$4 sm:$0xff]   ;;  %v73_v21 = vcombine.high %v3819_v15, %v3819_v15 }
  0x16   :  { %v3124_v46 = vld [vmem:[%s4735_s1 + $0x3a4] ss:$16 sps:$4 sm:$0xff]   ;;  %v3127_v48 = vld [vmem:[%s4735_s1 + $0x3a0] ss:$16 sps:$4 sm:$0xff]  }
  0x17   :  { %1637 = vmatpush1.bf16.msra.mxu0 %v3096_v22  ;;  %v3128_v50 = vld [vmem:[%s4735_s1 + $0x184] ss:$16 sps:$4 sm:$0xff]   ;;  %v3132_v55 = vld [vmem:[%s4735_s1 + $0x180] ss:$16 sps:$4 sm:$0xff]  }
  0x18   :  { %1678 = vmatpush1.bf16.msra.mxu1 %v3097_v23  ;;  %1638 = vmatprep.subr.bf16.mxu0 %v3098_v24  ;;  %v3130_v51 = vld [vmem:[%s4735_s1 + $0x384] ss:$16 sps:$4 sm:$0xff]   ;;  %v3133_v56 = vld [vmem:[%s4735_s1 + $0x380] ss:$16 sps:$4 sm:$0xff]  }
  0x19   :  { %1679 = vmatprep.subr.bf16.mxu1 %v3100_v25  ;;  %v36_v52 = vld [vmem:[%s4736_s0] sm:$0xff] }
  0x1a   :  { %v47_v53 = vrot.slane %v36_v52, %v46_v49  ;;  %v40_v54 = vcombine.high %v36_v52, %v36_v52  ;;  %v3134_v57 = vld [vmem:[%s4735_s1 + $0x164] ss:$16 sps:$4 sm:$0xff]   ;;  %v3138_v63 = vld [vmem:[%s4735_s1 + $0x160] ss:$16 sps:$4 sm:$0xff]  }
  0x1b   :  { %1639 = vmatpush1.bf16.msra.mxu0 %v3102_v26  ;;  %v3136_v58 = vld [vmem:[%s4735_s1 + $0x364] ss:$16 sps:$4 sm:$0xff]   ;;  %v3139_v0 = vld [vmem:[%s4735_s1 + $0x360] ss:$16 sps:$4 sm:$0xff]  }
  0x1c   :  { %1680 = vmatpush1.bf16.msra.mxu1 %v3103_v27  ;;  %1640 = vmatprep.subr.bf16.mxu0 %v3104_v28  ;;  %v55_v59 = vcombine.high %v47_v53, %v47_v53  ;;  %v54_v60 = vrot.slane %v40_v54, %v46_v49  ;;  %v3140_v1 = vld [vmem:[%s4735_s1 + $0x144] ss:$16 sps:$4 sm:$0xff]   ;;  %v3144_v5 = vld [vmem:[%s4735_s1 + $0x140] ss:$16 sps:$4 sm:$0xff]   ;;  %v3837_v22 = vpack.c.bf16 %v47_v53, %v47_v53 }
  0x1d   :  { %1681 = vmatprep.subr.bf16.mxu1 %v3106_v29  ;;  %v3142_v2 = vld [vmem:[%s4735_s1 + $0x344] ss:$16 sps:$4 sm:$0xff]   ;;  %v3145_v6 = vld [vmem:[%s4735_s1 + $0x340] ss:$16 sps:$4 sm:$0xff]   ;;  %v3853_v28 = vpack.c.bf16 %v72_v20, %v72_v20  ;;  %v3855_v29 = vpack.c.bf16 %v73_v21, %v73_v21 }
  0x1e   :  { %v3772_v61 = vpack.c.bf16 %v55_v59, %v55_v59  ;;  %v56_v62 = vcombine.high %v54_v60, %v54_v60  ;;  %v3146_v7 = vld [vmem:[%s4735_s1 + $0x124] ss:$16 sps:$4 sm:$0xff]   ;;  %v3150_v10 = vld [vmem:[%s4735_s1 + $0x120] ss:$16 sps:$4 sm:$0xff]   ;;  %v3839_v23 = vpack.c.bf16 %v54_v60, %v54_v60 }
  0x1f   :  { %1641 = vmatpush1.bf16.msra.mxu0 %v3108_v30  ;;  %v3148_v8 = vld [vmem:[%s4735_s1 + $0x324] ss:$16 sps:$4 sm:$0xff]   ;;  %v3151_v11 = vld [vmem:[%s4735_s1 + $0x320] ss:$16 sps:$4 sm:$0xff]  }
  0x20   :  { %1682 = vmatpush1.bf16.msra.mxu1 %v3109_v31  ;;  %1642 = vmatprep.subr.bf16.mxu0 %v3110_v32  ;;  %v3786_v3 = vpack.c.bf16 %v56_v62, %v56_v62  ;;  %v3152_v12 = vld [vmem:[%s4735_s1 + $0x104] ss:$16 sps:$4 sm:$0xff]   ;;  %v3156_v16 = vld [vmem:[%s4735_s1 + $0x100] ss:$16 sps:$4 sm:$0xff]  }
  0x21   :  { %1683 = vmatprep.subr.bf16.mxu1 %v3112_v33  ;;  %1658 = vmatprep.mubr.bf16.mxu0 %v3772_v61  ;;  %v3154_v13 = vld [vmem:[%s4735_s1 + $0x304] ss:$16 sps:$4 sm:$0xff]   ;;  %v3157_v17 = vld [vmem:[%s4735_s1 + $0x300] ss:$16 sps:$4 sm:$0xff]  }
  0x22   :  { %1699 = vmatprep.mubr.bf16.mxu1 %v3786_v3  ;;  %v3162_v18 = vld [vmem:[%s4735_s1 + $0x4e4] ss:$16 sps:$4 sm:$0xff]   ;;  %v3160_v24 = vld [vmem:[%s4735_s1 + $0x4e0] ss:$16 sps:$4 sm:$0xff]  }
  0x23   :  { %1643 = vmatpush2.bf16.msra.mxu0 %v3114_v34  ;;  %v3165_v19 = vld [vmem:[%s4735_s1 + $0x6e4] ss:$16 sps:$4 sm:$0xff]   ;;  %v3163_v25 = vld [vmem:[%s4735_s1 + $0x6e0] ss:$16 sps:$4 sm:$0xff]  }
  0x24   :  { %1684 = vmatpush2.bf16.msra.mxu1 %v3115_v35  ;;  %1644 = vmatprep.subr.bf16.mxu0 %v3116_v39  ;;  %v3168_v26 = vld [vmem:[%s4735_s1 + $0x4c4] ss:$16 sps:$4 sm:$0xff]   ;;  %v3166_v30 = vld [vmem:[%s4735_s1 + $0x4c0] ss:$16 sps:$4 sm:$0xff]  }
  0x25   :  { %1685 = vmatprep.subr.bf16.mxu1 %v3118_v40  ;;  %v3171_v27 = vld [vmem:[%s4735_s1 + $0x6c4] ss:$16 sps:$4 sm:$0xff]   ;;  %v3169_v31 = vld [vmem:[%s4735_s1 + $0x6c0] ss:$16 sps:$4 sm:$0xff]  }
  0x26   :  { %v3174_v32 = vld [vmem:[%s4735_s1 + $0x4a4] ss:$16 sps:$4 sm:$0xff]   ;;  %v3172_v34 = vld [vmem:[%s4735_s1 + $0x4a0] ss:$16 sps:$4 sm:$0xff]  }
  0x27   :  { %1645 = vmatpush2.bf16.msra.mxu0 %v3120_v41  ;;  %v3177_v33 = vld [vmem:[%s4735_s1 + $0x6a4] ss:$16 sps:$4 sm:$0xff]   ;;  %v3175_v35 = vld [vmem:[%s4735_s1 + $0x6a0] ss:$16 sps:$4 sm:$0xff]  }
  0x28   :  { %1686 = vmatpush2.bf16.msra.mxu1 %v3121_v44  ;;  %1646 = vmatprep.subr.bf16.mxu0 %v3122_v45  ;;  %v3180_v36 = vld [vmem:[%s4735_s1 + $0x484] ss:$16 sps:$4 sm:$0xff]   ;;  %v3178_v38 = vld [vmem:[%s4735_s1 + $0x480] ss:$16 sps:$4 sm:$0xff]  }
  0x29   :  { %1687 = vmatprep.subr.bf16.mxu1 %v3124_v46  ;;  %v3183_v37 = vld [vmem:[%s4735_s1 + $0x684] ss:$16 sps:$4 sm:$0xff]   ;;  %v3181_v39 = vld [vmem:[%s4735_s1 + $0x680] ss:$16 sps:$4 sm:$0xff]  }
  0x2a   :  { %v3186_v40 = vld [vmem:[%s4735_s1 + $0x464] ss:$16 sps:$4 sm:$0xff]   ;;  %v3184_v42 = vld [vmem:[%s4735_s1 + $0x460] ss:$16 sps:$4 sm:$0xff]  }
  0x2b   :  { %1647 = vmatpush2.bf16.msra.mxu0 %v3126_v47  ;;  %v3189_v41 = vld [vmem:[%s4735_s1 + $0x664] ss:$16 sps:$4 sm:$0xff]   ;;  %v3187_v44 = vld [vmem:[%s4735_s1 + $0x660] ss:$16 sps:$4 sm:$0xff]  }
  0x2c   :  { %1688 = vmatpush2.bf16.msra.mxu1 %v3127_v48  ;;  %1648 = vmatprep.subr.bf16.mxu0 %v3128_v50  ;;  %v3192_v45 = vld [vmem:[%s4735_s1 + $0x444] ss:$16 sps:$4 sm:$0xff]   ;;  %v3190_v47 = vld [vmem:[%s4735_s1 + $0x440] ss:$16 sps:$4 sm:$0xff]  }
  0x2d   :  { %1689 = vmatprep.subr.bf16.mxu1 %v3130_v51  ;;  %v3195_v46 = vld [vmem:[%s4735_s1 + $0x644] ss:$16 sps:$4 sm:$0xff]   ;;  %v3193_v48 = vld [vmem:[%s4735_s1 + $0x640] ss:$16 sps:$4 sm:$0xff]  }
  0x2e   :  { %v3198_v49 = vld [vmem:[%s4735_s1 + $0x424] ss:$16 sps:$4 sm:$0xff]   ;;  %v3196_v51 = vld [vmem:[%s4735_s1 + $0x420] ss:$16 sps:$4 sm:$0xff]  }
  0x2f   :  { %1649 = vmatpush2.bf16.msra.mxu0 %v3132_v55  ;;  %v3201_v50 = vld [vmem:[%s4735_s1 + $0x624] ss:$16 sps:$4 sm:$0xff]   ;;  %v3199_v52 = vld [vmem:[%s4735_s1 + $0x620] ss:$16 sps:$4 sm:$0xff]  }
  0x30   :  { %1690 = vmatpush2.bf16.msra.mxu1 %v3133_v56  ;;  %1650 = vmatprep.subr.bf16.mxu0 %v3134_v57  ;;  %v3204_v53 = vld [vmem:[%s4735_s1 + $0x404] ss:$16 sps:$4 sm:$0xff]   ;;  %v3202_v55 = vld [vmem:[%s4735_s1 + $0x400] ss:$16 sps:$4 sm:$0xff]  }
  0x31   :  { %1691 = vmatprep.subr.bf16.mxu1 %v3136_v58  ;;  %v3207_v54 = vld [vmem:[%s4735_s1 + $0x604] ss:$16 sps:$4 sm:$0xff]   ;;  %v3205_v56 = vld [vmem:[%s4735_s1 + $0x600] ss:$16 sps:$4 sm:$0xff]  }
  0x32   :  { %v3210_v57 = vld [vmem:[%s4735_s1 + $0x5e4] ss:$16 sps:$4 sm:$0xff]   ;;  %v3208_v59 = vld [vmem:[%s4735_s1 + $0x5e0] ss:$16 sps:$4 sm:$0xff]  }
  0x33   :  { %1651 = vmatpush2.bf16.msra.mxu0 %v3138_v63  ;;  %v3213_v58 = vld [vmem:[%s4735_s1 + $0x7e4] ss:$16 sps:$4 sm:$0xff]   ;;  %v3211_v60 = vld [vmem:[%s4735_s1 + $0x7e0] ss:$16 sps:$4 sm:$0xff]  }
  0x34   :  { %1692 = vmatpush2.bf16.msra.mxu1 %v3139_v0  ;;  %1652 = vmatprep.subr.bf16.mxu0 %v3140_v1  ;;  %v3216_v62 = vld [vmem:[%s4735_s1 + $0x5c4] ss:$16 sps:$4 sm:$0xff]   ;;  %v3214_v0 = vld [vmem:[%s4735_s1 + $0x5c0] ss:$16 sps:$4 sm:$0xff]  }
  0x35   :  { %1693 = vmatprep.subr.bf16.mxu1 %v3142_v2  ;;  %v3219_v63 = vld [vmem:[%s4735_s1 + $0x7c4] ss:$16 sps:$4 sm:$0xff]   ;;  %v3217_v1 = vld [vmem:[%s4735_s1 + $0x7c0] ss:$16 sps:$4 sm:$0xff]  }
  0x36   :  { %v3222_v2 = vld [vmem:[%s4735_s1 + $0x5a4] ss:$16 sps:$4 sm:$0xff]   ;;  %v3226_v9 = vld [vmem:[%s4735_s1 + $0x580] ss:$16 sps:$4 sm:$0xff]  }
  0x37   :  { %1653 = vmatpush2.bf16.msra.mxu0 %v3144_v5  ;;  %v3225_v4 = vld [vmem:[%s4735_s1 + $0x7a4] ss:$16 sps:$4 sm:$0xff]   ;;  %v3220_v5 = vld [vmem:[%s4735_s1 + $0x5a0] ss:$16 sps:$4 sm:$0xff]  }
  0x38   :  { %1694 = vmatpush2.bf16.msra.mxu1 %v3145_v6  ;;  %1654 = vmatprep.subr.bf16.mxu0 %v3146_v7  ;;  %v3223_v6 = vld [vmem:[%s4735_s1 + $0x7a0] ss:$16 sps:$4 sm:$0xff]   ;;  %v3228_v7 = vld [vmem:[%s4735_s1 + $0x584] ss:$16 sps:$4 sm:$0xff]  }
  0x39   :  { %1695 = vmatprep.subr.bf16.mxu1 %v3148_v8  ;;  %v3231_v8 = vld [vmem:[%s4735_s1 + $0x784] ss:$16 sps:$4 sm:$0xff]   ;;  %v3241_v20 = vld [vmem:[%s4735_s1 + $0x740] ss:$16 sps:$4 sm:$0xff]  }
  0x3a   :  { %v3246_v21 = vld [vmem:[%s4735_s1 + $0x524] ss:$16 sps:$4 sm:$0xff]  }
  0x3b   :  { %1655 = vmatpush2.bf16.msra.mxu0 %v3150_v10  ;;  %v3229_v10 = vld [vmem:[%s4735_s1 + $0x780] ss:$16 sps:$4 sm:$0xff]  }
  0x3c   :  { %1696 = vmatpush2.bf16.msra.mxu1 %v3151_v11  ;;  %1656 = vmatprep.subr.bf16.mxu0 %v3152_v12  ;;  %v3234_v11 = vld [vmem:[%s4735_s1 + $0x564] ss:$16 sps:$4 sm:$0xff]  }
  0x3d   :  { %1697 = vmatprep.subr.bf16.mxu1 %v3154_v13  ;;  %v3237_v12 = vld [vmem:[%s4735_s1 + $0x764] ss:$16 sps:$4 sm:$0xff]   ;;  %v3232_v13 = vld [vmem:[%s4735_s1 + $0x560] ss:$16 sps:$4 sm:$0xff]  }
  0x3f   :  { %1657 = vmatpush2.bf16.msra.mxu0 %v3156_v16  ;;  %v3235_v16 = vld [vmem:[%s4735_s1 + $0x760] ss:$16 sps:$4 sm:$0xff]  }
  0x40   :  { %1698 = vmatpush2.bf16.msra.mxu1 %v3157_v17  ;;  %1708 = vmatprep.subr.bf16.mxu0 %v3162_v18  ;;  %v3240_v17 = vld [vmem:[%s4735_s1 + $0x544] ss:$16 sps:$4 sm:$0xff]  }
  0x41   :  { %1749 = vmatprep.subr.bf16.mxu1 %v3165_v19  ;;  %v3243_v18 = vld [vmem:[%s4735_s1 + $0x744] ss:$16 sps:$4 sm:$0xff]   ;;  %v3238_v19 = vld [vmem:[%s4735_s1 + $0x540] ss:$16 sps:$4 sm:$0xff]  }
  0x42   :  { %1659 = vmatmul.mubr.bf16.vlgmr.msra.gmra.mxu0 %v3837_v22 }
  0x43   :  { %1700 = vmatmul.mubr.bf16.vlgmr.msra.gmra.mxu1 %v3839_v23  ;;  %1709 = vmatpush1.bf16.msra.mxu0 %v3160_v24  ;;  %v3249_v24 = vld [vmem:[%s4735_s1 + $0x724] ss:$16 sps:$4 sm:$0xff]  }
  0x44   :  { %1750 = vmatpush1.bf16.msra.mxu1 %v3163_v25  ;;  %1710 = vmatprep.subr.bf16.mxu0 %v3168_v26  ;;  %v3244_v25 = vld [vmem:[%s4735_s1 + $0x520] ss:$16 sps:$4 sm:$0xff]  }
  0x45   :  { %1751 = vmatprep.subr.bf16.mxu1 %v3171_v27  ;;  %1740 = vmatprep.mubr.bf16.mxu0 %v3853_v28  ;;  %v3247_v26 = vld [vmem:[%s4735_s1 + $0x720] ss:$16 sps:$4 sm:$0xff]   ;;  %v3252_v27 = vld [vmem:[%s4735_s1 + $0x504] ss:$16 sps:$4 sm:$0xff]  }
  0x46   :  { %1781 = vmatprep.mubr.bf16.mxu1 %v3855_v29 }
  0x47   :  { %1711 = vmatpush1.bf16.msra.mxu0 %v3166_v30  ;;  %v3255_v30 = vld [vmem:[%s4735_s1 + $0x704] ss:$16 sps:$4 sm:$0xff]  }
  0x48   :  { %1752 = vmatpush1.bf16.msra.mxu1 %v3169_v31  ;;  %1712 = vmatprep.subr.bf16.mxu0 %v3174_v32  ;;  %v3250_v31 = vld [vmem:[%s4735_s1 + $0x500] ss:$16 sps:$4 sm:$0xff]  }
  0x49   :  { %1753 = vmatprep.subr.bf16.mxu1 %v3177_v33  ;;  %v3253_v32 = vld [vmem:[%s4735_s1 + $0x700] ss:$16 sps:$4 sm:$0xff]   ;;  %v3258_v33 = vld [vmem:[%s4735_s1 + $0xec] ss:$16 sps:$4 sm:$0xff]  }
  0x4b   :  { %1713 = vmatpush1.bf16.msra.mxu0 %v3172_v34  ;;  %v3261_v34 = vld [vmem:[%s4735_s1 + $0x2ec] ss:$16 sps:$4 sm:$0xff]  }
  0x4c   :  { %1754 = vmatpush1.bf16.msra.mxu1 %v3175_v35  ;;  %1714 = vmatprep.subr.bf16.mxu0 %v3180_v36  ;;  %v4043_v35 = vpack.c.bf16 %v3817_v14, %v3817_v14  ;;  %v4047_v36 = vpack.c.bf16 %v3819_v15, %v3819_v15  ;;  %v3264_v14 = vld [vmem:[%s4735_s1 + $0xcc] ss:$16 sps:$4 sm:$0xff]  }
  0x4d   :  { %1755 = vmatprep.subr.bf16.mxu1 %v3183_v37  ;;  %v3256_v37 = vld [vmem:[%s4735_s1 + $0xe8] ss:$16 sps:$4 sm:$0xff]   ;;  %v3267_v15 = vld [vmem:[%s4735_s1 + $0x2cc] ss:$16 sps:$4 sm:$0xff]  }
  0x4f   :  { %1715 = vmatpush1.bf16.msra.mxu0 %v3178_v38  ;;  %v3259_v38 = vld [vmem:[%s4735_s1 + $0x2e8] ss:$16 sps:$4 sm:$0xff]  }
  0x50   :  { %1756 = vmatpush1.bf16.msra.mxu1 %v3181_v39  ;;  %1716 = vmatprep.subr.bf16.mxu0 %v3186_v40  ;;  %v3262_v39 = vld [vmem:[%s4735_s1 + $0xc8] ss:$16 sps:$4 sm:$0xff]  }
  0x51   :  { %1757 = vmatprep.subr.bf16.mxu1 %v3189_v41  ;;  %v3265_v40 = vld [vmem:[%s4735_s1 + $0x2c8] ss:$16 sps:$4 sm:$0xff]   ;;  %v3270_v41 = vld [vmem:[%s4735_s1 + $0xac] ss:$16 sps:$4 sm:$0xff]  }
  0x53   :  { %1717 = vmatpush1.bf16.msra.mxu0 %v3184_v42  ;;  %v3273_v42 = vld [vmem:[%s4735_s1 + $0x2ac] ss:$16 sps:$4 sm:$0xff]  }
  0x54   :  { %1758 = vmatpush1.bf16.msra.mxu1 %v3187_v44  ;;  %1718 = vmatprep.subr.bf16.mxu0 %v3192_v45  ;;  %v3268_v44 = vld [vmem:[%s4735_s1 + $0xa8] ss:$16 sps:$4 sm:$0xff]  }
  0x55   :  { %1759 = vmatprep.subr.bf16.mxu1 %v3195_v46  ;;  %v3271_v45 = vld [vmem:[%s4735_s1 + $0x2a8] ss:$16 sps:$4 sm:$0xff]   ;;  %v3276_v46 = vld [vmem:[%s4735_s1 + $0x8c] ss:$16 sps:$4 sm:$0xff]  }
  0x57   :  { %1719 = vmatpush1.bf16.msra.mxu0 %v3190_v47  ;;  %v3277_v47 = vld [vmem:[%s4735_s1 + $0x288] ss:$16 sps:$4 sm:$0xff]  }
  0x58   :  { %1760 = vmatpush1.bf16.msra.mxu1 %v3193_v48  ;;  %1720 = vmatprep.subr.bf16.mxu0 %v3198_v49  ;;  %v3282_v48 = vld [vmem:[%s4735_s1 + $0x6c] ss:$16 sps:$4 sm:$0xff]  }
  0x59   :  { %1761 = vmatprep.subr.bf16.mxu1 %v3201_v50  ;;  %v3285_v49 = vld [vmem:[%s4735_s1 + $0x26c] ss:$16 sps:$4 sm:$0xff]   ;;  %v3280_v50 = vld [vmem:[%s4735_s1 + $0x68] ss:$16 sps:$4 sm:$0xff]  }
  0x5b   :  { %1721 = vmatpush1.bf16.msra.mxu0 %v3196_v51  ;;  %v3283_v51 = vld [vmem:[%s4735_s1 + $0x268] ss:$16 sps:$4 sm:$0xff]  }
  0x5c   :  { %1762 = vmatpush1.bf16.msra.mxu1 %v3199_v52  ;;  %1722 = vmatprep.subr.bf16.mxu0 %v3204_v53  ;;  %v3288_v52 = vld [vmem:[%s4735_s1 + $0x4c] ss:$16 sps:$4 sm:$0xff]  }
  0x5d   :  { %1763 = vmatprep.subr.bf16.mxu1 %v3207_v54  ;;  %v3291_v53 = vld [vmem:[%s4735_s1 + $0x24c] ss:$16 sps:$4 sm:$0xff]   ;;  %v3286_v54 = vld [vmem:[%s4735_s1 + $0x48] ss:$16 sps:$4 sm:$0xff]  }
  0x5f   :  { %1723 = vmatpush1.bf16.msra.mxu0 %v3202_v55  ;;  %v3289_v55 = vld [vmem:[%s4735_s1 + $0x248] ss:$16 sps:$4 sm:$0xff]  }
  0x60   :  { %1764 = vmatpush1.bf16.msra.mxu1 %v3205_v56  ;;  %1724 = vmatprep.subr.bf16.mxu0 %v3210_v57  ;;  %v3294_v56 = vld [vmem:[%s4735_s1 + $0x2c] ss:$16 sps:$4 sm:$0xff]  }
  0x61   :  { %1765 = vmatprep.subr.bf16.mxu1 %v3213_v58  ;;  %v3297_v57 = vld [vmem:[%s4735_s1 + $0x22c] ss:$16 sps:$4 sm:$0xff]   ;;  %v3292_v58 = vld [vmem:[%s4735_s1 + $0x28] ss:$16 sps:$4 sm:$0xff]  }
  0x63   :  { %1725 = vmatpush2.bf16.msra.mxu0 %v3208_v59  ;;  %v3295_v59 = vld [vmem:[%s4735_s1 + $0x228] ss:$16 sps:$4 sm:$0xff]  }
  0x64   :  { %1766 = vmatpush2.bf16.msra.mxu1 %v3211_v60  ;;  %1726 = vmatprep.subr.bf16.mxu0 %v3216_v62  ;;  %v3300_v60 = vld [vmem:[%s4735_s1 + $0xc] ss:$16 sps:$4 sm:$0xff]  }
  0x65   :  { %1767 = vmatprep.subr.bf16.mxu1 %v3219_v63  ;;  %v3303_v62 = vld [vmem:[%s4735_s1 + $0x20c] ss:$16 sps:$4 sm:$0xff]   ;;  %v3298_v63 = vld [vmem:[%s4735_s1 + $0x8] ss:$16 sps:$4 sm:$0xff]  }
  0x67   :  { %1727 = vmatpush2.bf16.msra.mxu0 %v3214_v0  ;;  %v3301_v0 = vld [vmem:[%s4735_s1 + $0x208] ss:$16 sps:$4 sm:$0xff]  }
  0x68   :  { %1768 = vmatpush2.bf16.msra.mxu1 %v3217_v1  ;;  %1728 = vmatprep.subr.bf16.mxu0 %v3222_v2  ;;  %v3306_v1 = vld [vmem:[%s4735_s1 + $0x1ec] ss:$16 sps:$4 sm:$0xff]  }
  0x69   :  { %1769 = vmatprep.subr.bf16.mxu1 %v3225_v4  ;;  %v3309_v2 = vld [vmem:[%s4735_s1 + $0x3ec] ss:$16 sps:$4 sm:$0xff]   ;;  %v3304_v4 = vld [vmem:[%s4735_s1 + $0x1e8] ss:$16 sps:$4 sm:$0xff]  }
  0x6b   :  { %1729 = vmatpush2.bf16.msra.mxu0 %v3220_v5  ;;  %v3307_v5 = vld [vmem:[%s4735_s1 + $0x3e8] ss:$16 sps:$4 sm:$0xff]  }
  0x6c   :  { %1770 = vmatpush2.bf16.msra.mxu1 %v3223_v6  ;;  %1730 = vmatprep.subr.bf16.mxu0 %v3228_v7  ;;  %v3312_v6 = vld [vmem:[%s4735_s1 + $0x1cc] ss:$16 sps:$4 sm:$0xff]  }
  0x6d   :  { %1771 = vmatprep.subr.bf16.mxu1 %v3231_v8  ;;  %v3315_v7 = vld [vmem:[%s4735_s1 + $0x3cc] ss:$16 sps:$4 sm:$0xff]   ;;  %v3310_v8 = vld [vmem:[%s4735_s1 + $0x1c8] ss:$16 sps:$4 sm:$0xff]  }
  0x6f   :  { %1731 = vmatpush2.bf16.msra.mxu0 %v3226_v9  ;;  %v3313_v9 = vld [vmem:[%s4735_s1 + $0x3c8] ss:$16 sps:$4 sm:$0xff]  }
  0x70   :  { %1772 = vmatpush2.bf16.msra.mxu1 %v3229_v10  ;;  %1732 = vmatprep.subr.bf16.mxu0 %v3234_v11  ;;  %v3318_v10 = vld [vmem:[%s4735_s1 + $0x1ac] ss:$16 sps:$4 sm:$0xff]  }
  0x71   :  { %1773 = vmatprep.subr.bf16.mxu1 %v3237_v12  ;;  %v3321_v11 = vld [vmem:[%s4735_s1 + $0x3ac] ss:$16 sps:$4 sm:$0xff]   ;;  %v3316_v12 = vld [vmem:[%s4735_s1 + $0x1a8] ss:$16 sps:$4 sm:$0xff]  }
  0x73   :  { %1733 = vmatpush2.bf16.msra.mxu0 %v3232_v13  ;;  %v3319_v13 = vld [vmem:[%s4735_s1 + $0x3a8] ss:$16 sps:$4 sm:$0xff]  }
  0x74   :  { %1774 = vmatpush2.bf16.msra.mxu1 %v3235_v16  ;;  %1734 = vmatprep.subr.bf16.mxu0 %v3240_v17  ;;  %v3324_v16 = vld [vmem:[%s4735_s1 + $0x18c] ss:$16 sps:$4 sm:$0xff]  }
  0x75   :  { %1775 = vmatprep.subr.bf16.mxu1 %v3243_v18  ;;  %v3327_v17 = vld [vmem:[%s4735_s1 + $0x38c] ss:$16 sps:$4 sm:$0xff]   ;;  %v3322_v18 = vld [vmem:[%s4735_s1 + $0x188] ss:$16 sps:$4 sm:$0xff]  }
  0x77   :  { %1735 = vmatpush2.bf16.msra.mxu0 %v3238_v19  ;;  %v3325_v19 = vld [vmem:[%s4735_s1 + $0x388] ss:$16 sps:$4 sm:$0xff]  }
  0x78   :  { %1776 = vmatpush2.bf16.msra.mxu1 %v3241_v20  ;;  %1736 = vmatprep.subr.bf16.mxu0 %v3246_v21  ;;  %v3330_v20 = vld [vmem:[%s4735_s1 + $0x16c] ss:$16 sps:$4 sm:$0xff]  }
  0x79   :  { %1777 = vmatprep.subr.bf16.mxu1 %v3249_v24  ;;  %v3333_v21 = vld [vmem:[%s4735_s1 + $0x36c] ss:$16 sps:$4 sm:$0xff]   ;;  %v3328_v24 = vld [vmem:[%s4735_s1 + $0x168] ss:$16 sps:$4 sm:$0xff]  }
  0x7b   :  { %1737 = vmatpush2.bf16.msra.mxu0 %v3244_v25  ;;  %v3331_v25 = vld [vmem:[%s4735_s1 + $0x368] ss:$16 sps:$4 sm:$0xff]  }
  0x7c   :  { %1778 = vmatpush2.bf16.msra.mxu1 %v3247_v26  ;;  %1738 = vmatprep.subr.bf16.mxu0 %v3252_v27  ;;  %v3336_v26 = vld [vmem:[%s4735_s1 + $0x14c] ss:$16 sps:$4 sm:$0xff]  }
  0x7d   :  { %1779 = vmatprep.subr.bf16.mxu1 %v3255_v30  ;;  %v3339_v27 = vld [vmem:[%s4735_s1 + $0x34c] ss:$16 sps:$4 sm:$0xff]   ;;  %v3334_v30 = vld [vmem:[%s4735_s1 + $0x148] ss:$16 sps:$4 sm:$0xff]  }
  0x7f   :  { %1739 = vmatpush2.bf16.msra.mxu0 %v3250_v31  ;;  %v3337_v31 = vld [vmem:[%s4735_s1 + $0x348] ss:$16 sps:$4 sm:$0xff]  }
  0x80   :  { %1780 = vmatpush2.bf16.msra.mxu1 %v3253_v32  ;;  %1790 = vmatprep.subr.bf16.mxu0 %v3258_v33  ;;  %v3342_v32 = vld [vmem:[%s4735_s1 + $0x12c] ss:$16 sps:$4 sm:$0xff]  }
  0x81   :  { %1831 = vmatprep.subr.bf16.mxu1 %v3261_v34  ;;  %v3345_v33 = vld [vmem:[%s4735_s1 + $0x32c] ss:$16 sps:$4 sm:$0xff]   ;;  %v3340_v34 = vld [vmem:[%s4735_s1 + $0x128] ss:$16 sps:$4 sm:$0xff]  }
  0x82   :  { %1741 = vmatmul.mubr.bf16.vlgmr.msra.gmra.mxu0 %v4043_v35 }
  0x83   :  { %1782 = vmatmul.mubr.bf16.vlgmr.msra.gmra.mxu1 %v4047_v36  ;;  %1791 = vmatpush1.bf16.msra.mxu0 %v3256_v37  ;;  %v3343_v37 = vld [vmem:[%s4735_s1 + $0x328] ss:$16 sps:$4 sm:$0xff]  }
  0x84   :  { %1832 = vmatpush1.bf16.msra.mxu1 %v3259_v38  ;;  %1792 = vmatprep.subr.bf16.mxu0 %v3264_v14  ;;  %v3348_v38 = vld [vmem:[%s4735_s1 + $0x10c] ss:$16 sps:$4 sm:$0xff]  }
  0x85   :  { %1833 = vmatprep.subr.bf16.mxu1 %v3267_v15  ;;  %1822 = vmatprep.mubr.bf16.mxu0 %v3772_v61  ;;  %v3279_v61 = vld [vmem:[%s4735_s1 + $0x28c] ss:$16 sps:$4 sm:$0xff]   ;;  %v3346_v15 = vld [vmem:[%s4735_s1 + $0x108] ss:$16 sps:$4 sm:$0xff]  }
  0x86   :  { %1863 = vmatprep.mubr.bf16.mxu1 %v3786_v3  ;;  %v3274_v3 = vld [vmem:[%s4735_s1 + $0x88] ss:$16 sps:$4 sm:$0xff]   ;;  %v3351_v14 = vld [vmem:[%s4735_s1 + $0x30c] ss:$16 sps:$4 sm:$0xff]  }
  0x87   :  { %1793 = vmatpush1.bf16.msra.mxu0 %v3262_v39  ;;  %v3349_v39 = vld [vmem:[%s4735_s1 + $0x308] ss:$16 sps:$4 sm:$0xff]  }
  0x88   :  { %1834 = vmatpush1.bf16.msra.mxu1 %v3265_v40  ;;  %1794 = vmatprep.subr.bf16.mxu0 %v3270_v41  ;;  %v3354_v40 = vld [vmem:[%s4735_s1 + $0x4ec] ss:$16 sps:$4 sm:$0xff]  }
  0x89   :  { %1835 = vmatprep.subr.bf16.mxu1 %v3273_v42  ;;  %v3357_v41 = vld [vmem:[%s4735_s1 + $0x6ec] ss:$16 sps:$4 sm:$0xff]   ;;  %v3352_v42 = vld [vmem:[%s4735_s1 + $0x4e8] ss:$16 sps:$4 sm:$0xff]  }
  0x8b   :  { %1795 = vmatpush1.bf16.msra.mxu0 %v3268_v44  ;;  %v3355_v44 = vld [vmem:[%s4735_s1 + $0x6e8] ss:$16 sps:$4 sm:$0xff]  }
  0x8c   :  { %1836 = vmatpush1.bf16.msra.mxu1 %v3271_v45  ;;  %1796 = vmatprep.subr.bf16.mxu0 %v3276_v46  ;;  %v3360_v45 = vld [vmem:[%s4735_s1 + $0x4cc] ss:$16 sps:$4 sm:$0xff]  }
  0x8d   :  { %1837 = vmatprep.subr.bf16.mxu1 %v3279_v61  ;;  %v3363_v46 = vld [vmem:[%s4735_s1 + $0x6cc] ss:$16 sps:$4 sm:$0xff]   ;;  %v3358_v61 = vld [vmem:[%s4735_s1 + $0x4c8] ss:$16 sps:$4 sm:$0xff]  }
  0x8f   :  { %1797 = vmatpush1.bf16.msra.mxu0 %v3274_v3  ;;  %v3361_v3 = vld [vmem:[%s4735_s1 + $0x6c8] ss:$16 sps:$4 sm:$0xff]  }
  0x90   :  { %1838 = vmatpush1.bf16.msra.mxu1 %v3277_v47  ;;  %1798 = vmatprep.subr.bf16.mxu0 %v3282_v48  ;;  %v3366_v47 = vld [vmem:[%s4735_s1 + $0x4ac] ss:$16 sps:$4 sm:$0xff]  }
  0x91   :  { %1839 = vmatprep.subr.bf16.mxu1 %v3285_v49  ;;  %v3369_v48 = vld [vmem:[%s4735_s1 + $0x6ac] ss:$16 sps:$4 sm:$0xff]   ;;  %v3364_v49 = vld [vmem:[%s4735_s1 + $0x4a8] ss:$16 sps:$4 sm:$0xff]  }
  0x93   :  { %1799 = vmatpush1.bf16.msra.mxu0 %v3280_v50  ;;  %v3375_v50 = vld [vmem:[%s4735_s1 + $0x68c] ss:$16 sps:$4 sm:$0xff]  }
  0x94   :  { %1840 = vmatpush1.bf16.msra.mxu1 %v3283_v51  ;;  %1800 = vmatprep.subr.bf16.mxu0 %v3288_v52  ;;  %v3378_v51 = vld [vmem:[%s4735_s1 + $0x46c] ss:$16 sps:$4 sm:$0xff]  }
  0x95   :  { %1841 = vmatprep.subr.bf16.mxu1 %v3291_v53  ;;  %v3381_v52 = vld [vmem:[%s4735_s1 + $0x66c] ss:$16 sps:$4 sm:$0xff]   ;;  %v3376_v53 = vld [vmem:[%s4735_s1 + $0x468] ss:$16 sps:$4 sm:$0xff]  }
  0x97   :  { %1801 = vmatpush1.bf16.msra.mxu0 %v3286_v54  ;;  %v3379_v54 = vld [vmem:[%s4735_s1 + $0x668] ss:$16 sps:$4 sm:$0xff]  }
  0x98   :  { %1842 = vmatpush1.bf16.msra.mxu1 %v3289_v55  ;;  %1802 = vmatprep.subr.bf16.mxu0 %v3294_v56  ;;  %v3384_v55 = vld [vmem:[%s4735_s1 + $0x44c] ss:$16 sps:$4 sm:$0xff]  }
  0x99   :  { %1843 = vmatprep.subr.bf16.mxu1 %v3297_v57  ;;  %v3387_v56 = vld [vmem:[%s4735_s1 + $0x64c] ss:$16 sps:$4 sm:$0xff]   ;;  %v3382_v57 = vld [vmem:[%s4735_s1 + $0x448] ss:$16 sps:$4 sm:$0xff]  }
  0x9b   :  { %1803 = vmatpush1.bf16.msra.mxu0 %v3292_v58  ;;  %v3385_v58 = vld [vmem:[%s4735_s1 + $0x648] ss:$16 sps:$4 sm:$0xff]  }
  0x9c   :  { %1844 = vmatpush1.bf16.msra.mxu1 %v3295_v59  ;;  %1804 = vmatprep.subr.bf16.mxu0 %v3300_v60  ;;  %v3390_v59 = vld [vmem:[%s4735_s1 + $0x42c] ss:$16 sps:$4 sm:$0xff]  }
  0x9d   :  { %1845 = vmatprep.subr.bf16.mxu1 %v3303_v62  ;;  %v3393_v60 = vld [vmem:[%s4735_s1 + $0x62c] ss:$16 sps:$4 sm:$0xff]   ;;  %v3388_v62 = vld [vmem:[%s4735_s1 + $0x428] ss:$16 sps:$4 sm:$0xff]  }
  0x9f   :  { %1805 = vmatpush1.bf16.msra.mxu0 %v3298_v63  ;;  %v3391_v63 = vld [vmem:[%s4735_s1 + $0x628] ss:$16 sps:$4 sm:$0xff]  }
  0xa0   :  { %1846 = vmatpush1.bf16.msra.mxu1 %v3301_v0  ;;  %1806 = vmatprep.subr.bf16.mxu0 %v3306_v1  ;;  %v3396_v0 = vld [vmem:[%s4735_s1 + $0x40c] ss:$16 sps:$4 sm:$0xff]  }
  0xa1   :  { %1847 = vmatprep.subr.bf16.mxu1 %v3309_v2  ;;  %v3399_v1 = vld [vmem:[%s4735_s1 + $0x60c] ss:$16 sps:$4 sm:$0xff]   ;;  %v3394_v2 = vld [vmem:[%s4735_s1 + $0x408] ss:$16 sps:$4 sm:$0xff]  }
  0xa3   :  { %1807 = vmatpush2.bf16.msra.mxu0 %v3304_v4  ;;  %v3397_v4 = vld [vmem:[%s4735_s1 + $0x608] ss:$16 sps:$4 sm:$0xff]  }
  0xa4   :  { %1848 = vmatpush2.bf16.msra.mxu1 %v3307_v5  ;;  %1808 = vmatprep.subr.bf16.mxu0 %v3312_v6  ;;  %v3402_v5 = vld [vmem:[%s4735_s1 + $0x5ec] ss:$16 sps:$4 sm:$0xff]  }
  0xa5   :  { %1849 = vmatprep.subr.bf16.mxu1 %v3315_v7  ;;  %v3405_v6 = vld [vmem:[%s4735_s1 + $0x7ec] ss:$16 sps:$4 sm:$0xff]   ;;  %v3400_v7 = vld [vmem:[%s4735_s1 + $0x5e8] ss:$16 sps:$4 sm:$0xff]  }
  0xa7   :  { %1809 = vmatpush2.bf16.msra.mxu0 %v3310_v8  ;;  %v3403_v8 = vld [vmem:[%s4735_s1 + $0x7e8] ss:$16 sps:$4 sm:$0xff]  }
  0xa8   :  { %1850 = vmatpush2.bf16.msra.mxu1 %v3313_v9  ;;  %1810 = vmatprep.subr.bf16.mxu0 %v3318_v10  ;;  %v3408_v9 = vld [vmem:[%s4735_s1 + $0x5cc] ss:$16 sps:$4 sm:$0xff]  }
  0xa9   :  { %1851 = vmatprep.subr.bf16.mxu1 %v3321_v11  ;;  %v3411_v10 = vld [vmem:[%s4735_s1 + $0x7cc] ss:$16 sps:$4 sm:$0xff]   ;;  %v3406_v11 = vld [vmem:[%s4735_s1 + $0x5c8] ss:$16 sps:$4 sm:$0xff]  }
  0xab   :  { %1811 = vmatpush2.bf16.msra.mxu0 %v3316_v12  ;;  %v3409_v12 = vld [vmem:[%s4735_s1 + $0x7c8] ss:$16 sps:$4 sm:$0xff]  }
  0xac   :  { %1852 = vmatpush2.bf16.msra.mxu1 %v3319_v13  ;;  %1812 = vmatprep.subr.bf16.mxu0 %v3324_v16  ;;  %v3414_v13 = vld [vmem:[%s4735_s1 + $0x5ac] ss:$16 sps:$4 sm:$0xff]  }
  0xad   :  { %1853 = vmatprep.subr.bf16.mxu1 %v3327_v17  ;;  %v3417_v16 = vld [vmem:[%s4735_s1 + $0x7ac] ss:$16 sps:$4 sm:$0xff]   ;;  %v3412_v17 = vld [vmem:[%s4735_s1 + $0x5a8] ss:$16 sps:$4 sm:$0xff]  }
  0xaf   :  { %1813 = vmatpush2.bf16.msra.mxu0 %v3322_v18  ;;  %v3415_v18 = vld [vmem:[%s4735_s1 + $0x7a8] ss:$16 sps:$4 sm:$0xff]  }
  0xb0   :  { %1854 = vmatpush2.bf16.msra.mxu1 %v3325_v19  ;;  %1814 = vmatprep.subr.bf16.mxu0 %v3330_v20  ;;  %v3420_v19 = vld [vmem:[%s4735_s1 + $0x58c] ss:$16 sps:$4 sm:$0xff]  }
  0xb1   :  { %1855 = vmatprep.subr.bf16.mxu1 %v3333_v21  ;;  %v3423_v20 = vld [vmem:[%s4735_s1 + $0x78c] ss:$16 sps:$4 sm:$0xff]   ;;  %v3418_v21 = vld [vmem:[%s4735_s1 + $0x588] ss:$16 sps:$4 sm:$0xff]  }
  0xb3   :  { %1815 = vmatpush2.bf16.msra.mxu0 %v3328_v24  ;;  %v3421_v24 = vld [vmem:[%s4735_s1 + $0x788] ss:$16 sps:$4 sm:$0xff]  }
  0xb4   :  { %1856 = vmatpush2.bf16.msra.mxu1 %v3331_v25  ;;  %1816 = vmatprep.subr.bf16.mxu0 %v3336_v26  ;;  %v3426_v25 = vld [vmem:[%s4735_s1 + $0x56c] ss:$16 sps:$4 sm:$0xff]  }
  0xb5   :  { %1857 = vmatprep.subr.bf16.mxu1 %v3339_v27  ;;  %v3429_v26 = vld [vmem:[%s4735_s1 + $0x76c] ss:$16 sps:$4 sm:$0xff]   ;;  %v3424_v27 = vld [vmem:[%s4735_s1 + $0x568] ss:$16 sps:$4 sm:$0xff]  }
  0xb7   :  { %1817 = vmatpush2.bf16.msra.mxu0 %v3334_v30  ;;  %v3427_v30 = vld [vmem:[%s4735_s1 + $0x768] ss:$16 sps:$4 sm:$0xff]  }
  0xb8   :  { %1858 = vmatpush2.bf16.msra.mxu1 %v3337_v31  ;;  %1818 = vmatprep.subr.bf16.mxu0 %v3342_v32  ;;  %v3432_v31 = vld [vmem:[%s4735_s1 + $0x54c] ss:$16 sps:$4 sm:$0xff]  }
  0xb9   :  { %1859 = vmatprep.subr.bf16.mxu1 %v3345_v33  ;;  %v3435_v32 = vld [vmem:[%s4735_s1 + $0x74c] ss:$16 sps:$4 sm:$0xff]   ;;  %v3430_v33 = vld [vmem:[%s4735_s1 + $0x548] ss:$16 sps:$4 sm:$0xff]  }
  0xbb   :  { %1819 = vmatpush2.bf16.msra.mxu0 %v3340_v34  ;;  %v3433_v34 = vld [vmem:[%s4735_s1 + $0x748] ss:$16 sps:$4 sm:$0xff]  }
  0xbc   :  { %1860 = vmatpush2.bf16.msra.mxu1 %v3343_v37  ;;  %1820 = vmatprep.subr.bf16.mxu0 %v3348_v38  ;;  %v3438_v37 = vld [vmem:[%s4735_s1 + $0x52c] ss:$16 sps:$4 sm:$0xff]  }
  0xbd   :  { %1861 = vmatprep.subr.bf16.mxu1 %v3351_v14  ;;  %v3441_v38 = vld [vmem:[%s4735_s1 + $0x72c] ss:$16 sps:$4 sm:$0xff]   ;;  %v3436_v14 = vld [vmem:[%s4735_s1 + $0x528] ss:$16 sps:$4 sm:$0xff]  }
  0xbf   :  { %1821 = vmatpush2.bf16.msra.mxu0 %v3346_v15  ;;  %v3439_v15 = vld [vmem:[%s4735_s1 + $0x728] ss:$16 sps:$4 sm:$0xff]  }
  0xc0   :  { %1862 = vmatpush2.bf16.msra.mxu1 %v3349_v39  ;;  %1872 = vmatprep.subr.bf16.mxu0 %v3354_v40  ;;  %v3444_v39 = vld [vmem:[%s4735_s1 + $0x50c] ss:$16 sps:$4 sm:$0xff]  }
  0xc1   :  { %1913 = vmatprep.subr.bf16.mxu1 %v3357_v41  ;;  %v3447_v40 = vld [vmem:[%s4735_s1 + $0x70c] ss:$16 sps:$4 sm:$0xff]   ;;  %v3442_v41 = vld [vmem:[%s4735_s1 + $0x508] ss:$16 sps:$4 sm:$0xff]  }
  0xc2   :  { %1823 = vmatmul.mubr.bf16.vlgmr.msra.gmra.mxu0 %v3837_v22  ;;  %v3367_v22 = vld [vmem:[%s4735_s1 + $0x6a8] ss:$16 sps:$4 sm:$0xff]  }
  0xc3   :  { %1864 = vmatmul.mubr.bf16.vlgmr.msra.gmra.mxu1 %v3839_v23  ;;  %1873 = vmatpush1.bf16.msra.mxu0 %v3352_v42  ;;  %v3372_v23 = vld [vmem:[%s4735_s1 + $0x48c] ss:$16 sps:$4 sm:$0xff]   ;;  %v3445_v42 = vld [vmem:[%s4735_s1 + $0x708] ss:$16 sps:$4 sm:$0xff]  }
  0xc4   :  { %1914 = vmatpush1.bf16.msra.mxu1 %v3355_v44  ;;  %1874 = vmatprep.subr.bf16.mxu0 %v3360_v45  ;;  %v3450_v44 = vld [vmem:[%s4737_s4 + $0x74] ss:$8 sps:$4 sm:$0xff]   ;;  %v3448_v45 = vld [vmem:[%s4737_s4 + $0x70] ss:$8 sps:$4 sm:$0xff]  }
  0xc5   :  { %1915 = vmatprep.subr.bf16.mxu1 %v3363_v46  ;;  %1904 = vmatprep.mubr.bf16.mxu0 %v3853_v28  ;;  %v3370_v28 = vld [vmem:[%s4735_s1 + $0x488] ss:$16 sps:$4 sm:$0xff]   ;;  %v3453_v46 = vld [vmem:[%s4737_s4 + $0x64] ss:$8 sps:$4 sm:$0xff]  }
  0xc6   :  { %1945 = vmatprep.mubr.bf16.mxu1 %v3855_v29  ;;  %v3373_v29 = vld [vmem:[%s4735_s1 + $0x688] ss:$16 sps:$4 sm:$0xff]  }
  0xc7   :  { %1875 = vmatpush1.bf16.msra.mxu0 %v3358_v61 }
  0xc8   :  { %1916 = vmatpush1.bf16.msra.mxu1 %v3361_v3  ;;  %1876 = vmatprep.subr.bf16.mxu0 %v3366_v47 }
  0xc9   :  { %1917 = vmatprep.subr.bf16.mxu1 %v3369_v48  ;;  %v3451_v48 = vld [vmem:[%s4737_s4 + $0x60] ss:$8 sps:$4 sm:$0xff]  }
  0xcb   :  { %1877 = vmatpush1.bf16.msra.mxu0 %v3364_v49 }
  0xcc   :  { %1918 = vmatpush1.bf16.msra.mxu1 %v3367_v22  ;;  %1878 = vmatprep.subr.bf16.mxu0 %v3372_v23  ;;  %v3456_v23 = vld [vmem:[%s4737_s4 + $0x54] ss:$8 sps:$4 sm:$0xff]  }
  0xcd   :  { %1919 = vmatprep.subr.bf16.mxu1 %v3375_v50 }
  0xcf   :  { %1879 = vmatpush1.bf16.msra.mxu0 %v3370_v28 }
  0xd0   :  { %1920 = vmatpush1.bf16.msra.mxu1 %v3373_v29  ;;  %1880 = vmatprep.subr.bf16.mxu0 %v3378_v51  ;;  %v3459_v51 = vld [vmem:[%s4737_s4 + $0x44] ss:$8 sps:$4 sm:$0xff]  }
  0xd1   :  { %1921 = vmatprep.subr.bf16.mxu1 %v3381_v52  ;;  %v3496_v52 = vld [vmem:[%s4737_s4 + $0x170] ss:$8 sps:$4 sm:$0xff]  }
  0xd3   :  { %1881 = vmatpush1.bf16.msra.mxu0 %v3376_v53  ;;  %v3498_v53 = vld [vmem:[%s4737_s4 + $0x174] ss:$8 sps:$4 sm:$0xff]  }
  0xd4   :  { %1922 = vmatpush1.bf16.msra.mxu1 %v3379_v54  ;;  %1882 = vmatprep.subr.bf16.mxu0 %v3384_v55  ;;  %v3501_v54 = vld [vmem:[%s4737_s4 + $0x164] ss:$8 sps:$4 sm:$0xff]   ;;  %v3457_v55 = vld [vmem:[%s4737_s4 + $0x40] ss:$8 sps:$4 sm:$0xff]  }
  0xd5   :  { %1923 = vmatprep.subr.bf16.mxu1 %v3387_v56  ;;  %v3499_v56 = vld [vmem:[%s4737_s4 + $0x160] ss:$8 sps:$4 sm:$0xff]  }
  0xd7   :  { %1883 = vmatpush1.bf16.msra.mxu0 %v3382_v57  ;;  %v3462_v57 = vld [vmem:[%s4737_s4 + $0x34] ss:$8 sps:$4 sm:$0xff]  }
  0xd8   :  { %1924 = vmatpush1.bf16.msra.mxu1 %v3385_v58  ;;  %1884 = vmatprep.subr.bf16.mxu0 %v3390_v59  ;;  %v3504_v58 = vld [vmem:[%s4737_s4 + $0x154] ss:$8 sps:$4 sm:$0xff]   ;;  %v3460_v59 = vld [vmem:[%s4737_s4 + $0x30] ss:$8 sps:$4 sm:$0xff]  }
  0xd9   :  { %1925 = vmatprep.subr.bf16.mxu1 %v3393_v60  ;;  %v3502_v60 = vld [vmem:[%s4737_s4 + $0x150] ss:$8 sps:$4 sm:$0xff]  }
  0xdb   :  { %1885 = vmatpush1.bf16.msra.mxu0 %v3388_v62  ;;  %v3465_v62 = vld [vmem:[%s4737_s4 + $0x24] ss:$8 sps:$4 sm:$0xff]  }
  0xdc   :  { %1926 = vmatpush1.bf16.msra.mxu1 %v3391_v63  ;;  %1886 = vmatprep.subr.bf16.mxu0 %v3396_v0  ;;  %v3507_v63 = vld [vmem:[%s4737_s4 + $0x144] ss:$8 sps:$4 sm:$0xff]   ;;  %v3463_v0 = vld [vmem:[%s4737_s4 + $0x20] ss:$8 sps:$4 sm:$0xff]  }
  0xdd   :  { %1927 = vmatprep.subr.bf16.mxu1 %v3399_v1  ;;  %v3505_v1 = vld [vmem:[%s4737_s4 + $0x140] ss:$8 sps:$4 sm:$0xff]  }
  0xdf   :  { %1887 = vmatpush1.bf16.msra.mxu0 %v3394_v2  ;;  %v3468_v2 = vld [vmem:[%s4737_s4 + $0x14] ss:$8 sps:$4 sm:$0xff]  }
  0xe0   :  { %1928 = vmatpush1.bf16.msra.mxu1 %v3397_v4  ;;  %1888 = vmatprep.subr.bf16.mxu0 %v3402_v5  ;;  %v3510_v4 = vld [vmem:[%s4737_s4 + $0x134] ss:$8 sps:$4 sm:$0xff]   ;;  %v3466_v5 = vld [vmem:[%s4737_s4 + $0x10] ss:$8 sps:$4 sm:$0xff]  }
  0xe1   :  { %1929 = vmatprep.subr.bf16.mxu1 %v3405_v6  ;;  %v3508_v6 = vld [vmem:[%s4737_s4 + $0x130] ss:$8 sps:$4 sm:$0xff]  }
  0xe3   :  { %1889 = vmatpush2.bf16.msra.mxu0 %v3400_v7  ;;  %v3471_v7 = vld [vmem:[%s4737_s4 + $0x4] ss:$8 sps:$4 sm:$0xff]  }
  0xe4   :  { %1930 = vmatpush2.bf16.msra.mxu1 %v3403_v8  ;;  %1890 = vmatprep.subr.bf16.mxu0 %v3408_v9  ;;  %v3513_v8 = vld [vmem:[%s4737_s4 + $0x124] ss:$8 sps:$4 sm:$0xff]   ;;  %v3469_v9 = vld [vmem:[%s4737_s4] ss:$8 sps:$4 sm:$0xff]  }
  0xe5   :  { %1931 = vmatprep.subr.bf16.mxu1 %v3411_v10  ;;  %v3511_v10 = vld [vmem:[%s4737_s4 + $0x120] ss:$8 sps:$4 sm:$0xff]  }
  0xe7   :  { %1891 = vmatpush2.bf16.msra.mxu0 %v3406_v11  ;;  %v3474_v11 = vld [vmem:[%s4737_s4 + $0xf4] ss:$8 sps:$4 sm:$0xff]  }
  0xe8   :  { %1932 = vmatpush2.bf16.msra.mxu1 %v3409_v12  ;;  %1892 = vmatprep.subr.bf16.mxu0 %v3414_v13  ;;  %v3516_v12 = vld [vmem:[%s4737_s4 + $0x114] ss:$8 sps:$4 sm:$0xff]   ;;  %v3472_v13 = vld [vmem:[%s4737_s4 + $0xf0] ss:$8 sps:$4 sm:$0xff]  }
  0xe9   :  { %1933 = vmatprep.subr.bf16.mxu1 %v3417_v16  ;;  %v3514_v16 = vld [vmem:[%s4737_s4 + $0x110] ss:$8 sps:$4 sm:$0xff]  }
  0xeb   :  { %1893 = vmatpush2.bf16.msra.mxu0 %v3412_v17  ;;  %v3477_v17 = vld [vmem:[%s4737_s4 + $0xe4] ss:$8 sps:$4 sm:$0xff]  }
  0xec   :  { %1934 = vmatpush2.bf16.msra.mxu1 %v3415_v18  ;;  %1894 = vmatprep.subr.bf16.mxu0 %v3420_v19  ;;  %v3519_v18 = vld [vmem:[%s4737_s4 + $0x104] ss:$8 sps:$4 sm:$0xff]   ;;  %v3475_v19 = vld [vmem:[%s4737_s4 + $0xe0] ss:$8 sps:$4 sm:$0xff]  }
  0xed   :  { %1935 = vmatprep.subr.bf16.mxu1 %v3423_v20  ;;  %v3517_v20 = vld [vmem:[%s4737_s4 + $0x100] ss:$8 sps:$4 sm:$0xff]  }
  0xef   :  { %1895 = vmatpush2.bf16.msra.mxu0 %v3418_v21  ;;  %v3480_v21 = vld [vmem:[%s4737_s4 + $0xd4] ss:$8 sps:$4 sm:$0xff]  }
  0xf0   :  { %1936 = vmatpush2.bf16.msra.mxu1 %v3421_v24  ;;  %1896 = vmatprep.subr.bf16.mxu0 %v3426_v25  ;;  %v3522_v24 = vld [vmem:[%s4737_s4 + $0x1f4] ss:$8 sps:$4 sm:$0xff]   ;;  %v3478_v25 = vld [vmem:[%s4737_s4 + $0xd0] ss:$8 sps:$4 sm:$0xff]  }
  0xf1   :  { %1937 = vmatprep.subr.bf16.mxu1 %v3429_v26  ;;  %v3520_v26 = vld [vmem:[%s4737_s4 + $0x1f0] ss:$8 sps:$4 sm:$0xff]  }
  0xf3   :  { %1897 = vmatpush2.bf16.msra.mxu0 %v3424_v27  ;;  %v3483_v27 = vld [vmem:[%s4737_s4 + $0xc4] ss:$8 sps:$4 sm:$0xff]  }
  0xf4   :  { %1938 = vmatpush2.bf16.msra.mxu1 %v3427_v30  ;;  %1898 = vmatprep.subr.bf16.mxu0 %v3432_v31  ;;  %v3525_v30 = vld [vmem:[%s4737_s4 + $0x1e4] ss:$8 sps:$4 sm:$0xff]   ;;  %v3481_v31 = vld [vmem:[%s4737_s4 + $0xc0] ss:$8 sps:$4 sm:$0xff]  }
  0xf5   :  { %1939 = vmatprep.subr.bf16.mxu1 %v3435_v32  ;;  %v3523_v32 = vld [vmem:[%s4737_s4 + $0x1e0] ss:$8 sps:$4 sm:$0xff]  }
  0xf7   :  { %1899 = vmatpush2.bf16.msra.mxu0 %v3430_v33  ;;  %v3486_v33 = vld [vmem:[%s4737_s4 + $0xb4] ss:$8 sps:$4 sm:$0xff]  }
  0xf8   :  { %1940 = vmatpush2.bf16.msra.mxu1 %v3433_v34  ;;  %1900 = vmatprep.subr.bf16.mxu0 %v3438_v37  ;;  %v3528_v34 = vld [vmem:[%s4737_s4 + $0x1d4] ss:$8 sps:$4 sm:$0xff]   ;;  %v3484_v37 = vld [vmem:[%s4737_s4 + $0xb0] ss:$8 sps:$4 sm:$0xff]  }
  0xf9   :  { %1941 = vmatprep.subr.bf16.mxu1 %v3441_v38  ;;  %v3526_v38 = vld [vmem:[%s4737_s4 + $0x1d0] ss:$8 sps:$4 sm:$0xff]  }
  0xfb   :  { %1901 = vmatpush2.bf16.msra.mxu0 %v3436_v14  ;;  %v3489_v14 = vld [vmem:[%s4737_s4 + $0xa4] ss:$8 sps:$4 sm:$0xff]  }
  0xfc   :  { %1942 = vmatpush2.bf16.msra.mxu1 %v3439_v15  ;;  %1902 = vmatprep.subr.bf16.mxu0 %v3444_v39  ;;  %v3531_v15 = vld [vmem:[%s4737_s4 + $0x1c4] ss:$8 sps:$4 sm:$0xff]   ;;  %v3487_v39 = vld [vmem:[%s4737_s4 + $0xa0] ss:$8 sps:$4 sm:$0xff]  }
  0xfd   :  { %1943 = vmatprep.subr.bf16.mxu1 %v3447_v40  ;;  %v3529_v40 = vld [vmem:[%s4737_s4 + $0x1c0] ss:$8 sps:$4 sm:$0xff]  }
  0xff   :  { %1903 = vmatpush2.bf16.msra.mxu0 %v3442_v41  ;;  %v3492_v41 = vld [vmem:[%s4737_s4 + $0x94] ss:$8 sps:$4 sm:$0xff]  }
 0x100   :  { %1944 = vmatpush2.bf16.msra.mxu1 %v3445_v42  ;;  %2398 = vmatprep.subr.bf16.mxu0 %v3450_v44  ;;  %v3490_v42 = vld [vmem:[%s4737_s4 + $0x90] ss:$8 sps:$4 sm:$0xff]   ;;  %v3495_v44 = vld [vmem:[%s4737_s4 + $0x84] ss:$8 sps:$4 sm:$0xff]  }
 0x101   :  { %2439 = vmatprep.subr.bf16.mxu1 %v3498_v53 }
 0x102   :  { %v1660_v61 = vpop.f32.mrf.mxu0  ;;  %1905 = vmatmul.mubr.bf16.vlgmr.msra.gmra.mxu0 %v4043_v35 }
 0x103   :  { %v1701_v3 = vpop.f32.mrf.mxu1  ;;  %1946 = vmatmul.mubr.bf16.vlgmr.msra.gmra.mxu1 %v4047_v36  ;;  %2399 = vmatpush1.bf16.msra.mxu0 %v3448_v45  ;;  %v3454_v36 = vld [vmem:[%s4737_s4 + $0x50] ss:$8 sps:$4 sm:$0xff]   ;;  %v3493_v45 = vld [vmem:[%s4737_s4 + $0x80] ss:$8 sps:$4 sm:$0xff]  }
 0x104   :  { %v4446_v47 = vadd.f32 %v1701_v3, %v1660_v61  ;;  %v4451_v49 = vpop.f32.mrf.mxu0  ;;  %2400 = vmatprep.subr.bf16.mxu0 %v3453_v46  ;;  %2440 = vmatpush1.bf16.msra.mxu1 %v3496_v52  ;;  %v4612_v46 = vsub.s32 0, %v3733_v43  ;;  %v4617_v61 = vld [vmem:[%s4738_s2] sm:$0xf]  ;;  %v3534_v3 = vld [vmem:[%s4737_s4 + $0x1b4] ss:$8 sps:$4 sm:$0xff]  }
 0x105   :  { %v4453_v22 = vpop.f32.mrf.mxu1  ;;  %2441 = vmatprep.subr.bf16.mxu1 %v3501_v54  ;;  %v3537_v54 = vld [vmem:[%s4737_s4 + $0x1a4] ss:$8 sps:$4 sm:$0xff]  }
 0x106   :  { %v1664_v50 = vpop.f32.mrf.mxu0 }
 0x107   :  { %v1705_v35 = vpop.f32.mrf.mxu1  ;;  %2401 = vmatpush1.bf16.msra.mxu0 %v3451_v48  ;;  %v4623_v48 = vsub.s32 1, %v3733_v43 }
 0x108   :  { %v1665_v28 = vpop.f32.mrf.mxu0  ;;  %2402 = vmatprep.subr.bf16.mxu0 %v3456_v23  ;;  %2442 = vmatpush1.bf16.msra.mxu1 %v3499_v56  ;;  %v3532_v23 = vld [vmem:[%s4737_s4 + $0x1b0] ss:$8 sps:$4 sm:$0xff]  }
 0x109   :  { %v1706_v29 = vpop.f32.mrf.mxu1  ;;  %2443 = vmatprep.subr.bf16.mxu1 %v3504_v58  ;;  %v1704_v28 = vadd.f32 %v4453_v22, %v4451_v49  ;;  %v1963_v49 = vrot.slane %v4617_v61, %v4623_v48 }
 0x10b   :  { %2403 = vmatpush1.bf16.msra.mxu0 %v3454_v36  ;;  %v4631_v36 = vld [vmem:[%s4739_s3] sm:$0xf] }
 0x10c   :  { %2404 = vmatprep.subr.bf16.mxu0 %v3459_v51  ;;  %2444 = vmatpush1.bf16.msra.mxu1 %v3502_v60  ;;  %v1959_v51 = vrot.slane %v4617_v61, %v4612_v46  ;;  %v1985_v56 = vrot.slane %v4631_v36, %v4612_v46 }
 0x10d   :  { %2445 = vmatprep.subr.bf16.mxu1 %v3507_v63 }
 0x10f   :  { %2405 = vmatpush1.bf16.msra.mxu0 %v3457_v55 }
 0x110   :  { %2406 = vmatprep.subr.bf16.mxu0 %v3462_v57  ;;  %2446 = vmatpush1.bf16.msra.mxu1 %v3505_v1  ;;  %v3540_v1 = vld [vmem:[%s4737_s4 + $0x194] ss:$8 sps:$4 sm:$0xff]  }
 0x111   :  { %2447 = vmatprep.subr.bf16.mxu1 %v3510_v4 }
 0x113   :  { %2407 = vmatpush1.bf16.msra.mxu0 %v3460_v59 }
 0x114   :  { %2408 = vmatprep.subr.bf16.mxu0 %v3465_v62  ;;  %2448 = vmatpush1.bf16.msra.mxu1 %v3508_v6  ;;  %v1989_v62 = vrot.slane %v4631_v36, %v4623_v48 }
 0x115   :  { %2449 = vmatprep.subr.bf16.mxu1 %v3513_v8  ;;  %v3543_v8 = vld [vmem:[%s4737_s4 + $0x184] ss:$8 sps:$4 sm:$0xff]  }
 0x117   :  { %2409 = vmatpush1.bf16.msra.mxu0 %v3463_v0 }
 0x118   :  { %2410 = vmatprep.subr.bf16.mxu0 %v3468_v2  ;;  %2450 = vmatpush1.bf16.msra.mxu1 %v3511_v10  ;;  %v3541_v10 = vld [vmem:[%s4737_s4 + $0x180] ss:$8 sps:$4 sm:$0xff]  }
 0x119   :  { %2451 = vmatprep.subr.bf16.mxu1 %v3516_v12 }
 0x11b   :  { %2411 = vmatpush1.bf16.msra.mxu0 %v3466_v5  ;;  %v3538_v5 = vld [vmem:[%s4737_s4 + $0x190] ss:$8 sps:$4 sm:$0xff]  }
 0x11c   :  { %2412 = vmatprep.subr.bf16.mxu0 %v3471_v7  ;;  %2452 = vmatpush1.bf16.msra.mxu1 %v3514_v16 }
 0x11d   :  { %2453 = vmatprep.subr.bf16.mxu1 %v3519_v18 }
 0x11f   :  { %2413 = vmatpush1.bf16.msra.mxu0 %v3469_v9 }
 0x120   :  { %2414 = vmatprep.subr.bf16.mxu0 %v3474_v11  ;;  %2454 = vmatpush1.bf16.msra.mxu1 %v3517_v20 }
 0x121   :  { %2455 = vmatprep.subr.bf16.mxu1 %v3522_v24 }
 0x123   :  { %2415 = vmatpush2.bf16.msra.mxu0 %v3472_v13 }
 0x124   :  { %2416 = vmatprep.subr.bf16.mxu0 %v3477_v17  ;;  %2456 = vmatpush2.bf16.msra.mxu1 %v3520_v26  ;;  %v3544_v26 = vld [vmem:[%s4740_s7 + $0x78] sm:$0xff]  }
 0x125   :  { %2457 = vmatprep.subr.bf16.mxu1 %v3525_v30  ;;  %v3546_v30 = vld [vmem:[%s4740_s7 + $0x70] sm:$0xff]  }
 0x127   :  { %2417 = vmatpush2.bf16.msra.mxu0 %v3475_v19 }
 0x128   :  { %2418 = vmatprep.subr.bf16.mxu0 %v3480_v21  ;;  %2458 = vmatpush2.bf16.msra.mxu1 %v3523_v32  ;;  %v3548_v32 = vld [vmem:[%s4740_s7 + $0x68] sm:$0xff]  }
 0x129   :  { %2459 = vmatprep.subr.bf16.mxu1 %v3528_v34  ;;  %v3550_v34 = vld [vmem:[%s4740_s7 + $0x60] sm:$0xff]  }
 0x12b   :  { %2419 = vmatpush2.bf16.msra.mxu0 %v3478_v25 }
 0x12c   :  { %2420 = vmatprep.subr.bf16.mxu0 %v3483_v27  ;;  %2460 = vmatpush2.bf16.msra.mxu1 %v3526_v38  ;;  %v3545_v27 = vld [vmem:[%s4740_s7 + $0x38] sm:$0xff]  }
 0x12d   :  { %2461 = vmatprep.subr.bf16.mxu1 %v3531_v15  ;;  %v3552_v38 = vld [vmem:[%s4740_s7 + $0x58] sm:$0xff]   ;;  %v1966_v15 = vsub.s32 2, %v3733_v43 }
 0x12f   :  { %2421 = vmatpush2.bf16.msra.mxu0 %v3481_v31  ;;  %v3547_v31 = vld [vmem:[%s4740_s7 + $0x30] sm:$0xff]  }
 0x130   :  { %2422 = vmatprep.subr.bf16.mxu0 %v3486_v33  ;;  %2462 = vmatpush2.bf16.msra.mxu1 %v3529_v40  ;;  %v3549_v33 = vld [vmem:[%s4740_s7 + $0x28] sm:$0xff]  }
 0x131   :  { %2463 = vmatprep.subr.bf16.mxu1 %v3534_v3 }
 0x133   :  { %2423 = vmatpush2.bf16.msra.mxu0 %v3484_v37  ;;  %v3551_v37 = vld [vmem:[%s4740_s7 + $0x20] sm:$0xff]  }
 0x134   :  { %2424 = vmatprep.subr.bf16.mxu0 %v3489_v14  ;;  %2464 = vmatpush2.bf16.msra.mxu1 %v3532_v23  ;;  %v3553_v14 = vld [vmem:[%s4740_s7 + $0x18] sm:$0xff]  }
 0x135   :  { %2465 = vmatprep.subr.bf16.mxu1 %v3537_v54 }
 0x137   :  { %2425 = vmatpush2.bf16.msra.mxu0 %v3487_v39  ;;  %v1970_v39 = vsub.s32 3, %v3733_v43 }
 0x138   :  { %2426 = vmatprep.subr.bf16.mxu0 %v3492_v41 }
 0x139   :  { %v1997_v43 = vrot.slane %v4631_v36, %v1970_v39 }
 0x13b   :  { %2427 = vmatpush2.bf16.msra.mxu0 %v3490_v42 }
 0x13c   :  { %2428 = vmatprep.subr.bf16.mxu0 %v3495_v44 }
 0x13f   :  { %2429 = vmatpush2.bf16.msra.mxu0 %v3493_v45  ;;  %v1967_v45 = vrot.slane %v4617_v61, %v1966_v15 }
 0x140   :  { %3039 = vmatprep.subr.bf16.mxu0 %v3544_v26 }
 0x142   :  { %v1742_v50 = vpop.f32.mrf.mxu0 }
 0x143   :  { %v1783_v35 = vpop.f32.mrf.mxu1  ;;  %v1743_v29 = vadd.f32 %v1742_v50, %v4446_v47  ;;  %v3535_v47 = vld [vmem:[%s4737_s4 + $0x1a0] ss:$8 sps:$4 sm:$0xff]  }
 0x144   :  { %v1744_v52 = vpop.f32.mrf.mxu0  ;;  %2466 = vmatpush2.bf16.msra.mxu1 %v3535_v47 }
 0x145   :  { %v1785_v53 = vpop.f32.mrf.mxu1  ;;  %v1784_v55 = vadd.f32 %v1783_v35, %v1743_v29  ;;  %v1745_v57 = vadd.f32 %v1744_v52, %v1704_v28  ;;  %2467 = vmatprep.subr.bf16.mxu1 %v3540_v1  ;;  %v1993_v35 = vrot.slane %v4631_v36, %v1966_v15  ;;  %v1971_v29 = vrot.slane %v4617_v61, %v1970_v39  ;;  %v3554_v61 = vld [vmem:[%s4740_s7 + $0x50] sm:$0xff]   ;;  %v3556_v1 = vld [vmem:[%s4740_s7 + $0x48] sm:$0xff]  }
 0x146   :  { %v1746_v22 = vpop.f32.mrf.mxu0  ;;  %v3555_v36 = vld [vmem:[%s4740_s7 + $0x10] sm:$0xff]  }
 0x147   :  { %v1787_v58 = vpop.f32.mrf.mxu1  ;;  %v1976_v59 = vmul.f32 %v1959_v51, %v1784_v55  ;;  %v1786_v60 = vadd.f32 %v1785_v53, %v1745_v57 }
 0x148   :  { %v1747_v63 = vpop.f32.mrf.mxu0  ;;  %2468 = vmatpush2.bf16.msra.mxu1 %v3538_v5  ;;  %v3558_v5 = vld [vmem:[%s4740_s7 + $0x40] sm:$0xff]  }
 0x149   :  { %v1788_v0 = vpop.f32.mrf.mxu1  ;;  %v2002_v2 = vadd.f32 %v1985_v56, %v1976_v59  ;;  %v1977_v4 = vmul.f32 %v1963_v49, %v1786_v60  ;;  %2469 = vmatprep.subr.bf16.mxu1 %v3543_v8  ;;  %v2494_v8 = vld [vmem:[%s4742_s6] sm:$0x3] }
 0x14b   :  { %v2003_v6 = vadd.f32 %v1989_v62, %v1977_v4  ;;  %v2006_v7 = vmax.f32 %v2002_v2, 0.0  ;;  %v3557_v2 = vld [vmem:[%s4740_s7 + $0x8] sm:$0xff]  }
 0x14c   :  { %2470 = vmatpush2.bf16.msra.mxu1 %v3541_v10 }
 0x14d   :  { %v2007_v9 = vmax.f32 %v2003_v6, 0.0  ;;  %v2010_v12 = vpack.c.bf16 %v2006_v7, %v2006_v7  ;;  %v3559_v6 = vld [vmem:[%s4740_s7] sm:$0xff]  }
 0x14e   :  { %v2480_v7 = vld [vmem:[%s4741_s5] sm:$0x3] }
 0x14f   :  { %v2011_v11 = vpack.c.bf16 %v2007_v9, %v2007_v9  ;;  %v2485_v9 = vrot.slane %v2480_v7, %v4612_v46 }
 0x151   :  { %2430 = vmatprep.mubr.bf16.mxu0 %v2011_v11 }
 0x152   :  { %2431 = vmatmul.mubr.bf16.vlgmr.msra.gmra.mxu0 %v2010_v12  ;;  %v2499_v12 = vrot.slane %v2494_v8, %v4612_v46  ;;  %v3021_v46 = vld [vmem:[%s4743_s8] ss:$0 sm:$0xff] }
 0x153   :  { %3040 = vmatpush3.bf16.msra.mxu0 %v3545_v27 }
 0x154   :  { %3041 = vmatprep.subr.bf16.mxu0 %v3546_v30 }
 0x157   :  { %3042 = vmatpush3.bf16.msra.mxu0 %v3547_v31 }
 0x158   :  { %3043 = vmatprep.subr.bf16.mxu0 %v3548_v32 }
 0x15b   :  { %3044 = vmatpush3.bf16.msra.mxu0 %v3549_v33 }
 0x15c   :  { %3045 = vmatprep.subr.bf16.mxu0 %v3550_v34 }
 0x15f   :  { %3046 = vmatpush3.bf16.msra.mxu0 %v3551_v37 }
 0x160   :  { %3047 = vmatprep.subr.bf16.mxu0 %v3552_v38 }
 0x163   :  { %3048 = vmatpush3.bf16.msra.mxu0 %v3553_v14 }
 0x164   :  { %3049 = vmatprep.subr.bf16.mxu0 %v3554_v61 }
 0x167   :  { %3050 = vmatpush3.bf16.msra.mxu0 %v3555_v36 }
 0x168   :  { %3051 = vmatprep.subr.bf16.mxu0 %v3556_v1 }
 0x16b   :  { %3052 = vmatpush3.bf16.msra.mxu0 %v3557_v2 }
 0x16c   :  { %3053 = vmatprep.subr.bf16.mxu0 %v3558_v5 }
 0x16f   :  { %3054 = vmatpush3.bf16.msra.mxu0 %v3559_v6 }
 0x182   :  { %v1824_v13 = vpop.f32.mrf.mxu0 }
 0x183   :  { %v1865_v16 = vpop.f32.mrf.mxu1 }
 0x184   :  { %v1866_v17 = vadd.f32 %v1865_v16, %v1824_v13  ;;  %v1826_v18 = vpop.f32.mrf.mxu0  ;;  %v2489_v13 = vrot.slane %v2480_v7, %v4623_v48 }
 0x185   :  { %v1867_v19 = vpop.f32.mrf.mxu1 }
 0x186   :  { %v1828_v20 = vpop.f32.mrf.mxu0  ;;  %v1868_v42 = vadd.f32 %v1867_v19, %v1826_v18  ;;  %v2503_v19 = vrot.slane %v2494_v8, %v4623_v48  ;;  %v3038_v48 = vld [vmem:[%s4744_s9] ss:$0 sm:$0xff] }
 0x187   :  { %v1869_v21 = vpop.f32.mrf.mxu1 }
 0x188   :  { %v1829_v24 = vpop.f32.mrf.mxu0 }
 0x189   :  { %v1870_v25 = vpop.f32.mrf.mxu1 }
 0x1c2   :  { %v1906_v40 = vpop.f32.mrf.mxu0 }
 0x1c3   :  { %v1947_v41 = vpop.f32.mrf.mxu1  ;;  %v1907_v44 = vadd.f32 %v1906_v40, %v1866_v17 }
 0x1c4   :  { %v1908_v3 = vpop.f32.mrf.mxu0 }
 0x1c5   :  { %v1949_v23 = vpop.f32.mrf.mxu1  ;;  %v1948_v50 = vadd.f32 %v1947_v41, %v1907_v44  ;;  %v1909_v28 = vadd.f32 %v1908_v3, %v1868_v42 }
 0x1c6   :  { %v1910_v51 = vpop.f32.mrf.mxu0 }
 0x1c7   :  { %v1951_v52 = vpop.f32.mrf.mxu1  ;;  %v1978_v53 = vmul.f32 %v1967_v45, %v1948_v50  ;;  %v1950_v54 = vadd.f32 %v1949_v23, %v1909_v28 }
 0x1c8   :  { %v1911_v55 = vpop.f32.mrf.mxu0 }
 0x1c9   :  { %v1952_v56 = vpop.f32.mrf.mxu1  ;;  %v2004_v57 = vadd.f32 %v1993_v35, %v1978_v53  ;;  %v1979_v49 = vmul.f32 %v1971_v29, %v1950_v54 }
 0x1cb   :  { %v2005_v47 = vadd.f32 %v1997_v43, %v1979_v49  ;;  %v2008_v22 = vmax.f32 %v2004_v57, 0.0 }
 0x1cd   :  { %v2009_v58 = vmax.f32 %v2005_v47, 0.0  ;;  %v2012_v60 = vpack.c.bf16 %v2008_v22, %v2008_v22 }
 0x1cf   :  { %v2013_v59 = vpack.c.bf16 %v2009_v58, %v2009_v58 }
 0x1d1   :  { %2471 = vmatprep.mubr.bf16.mxu1 %v2013_v59 }
 0x1d2   :  { %2472 = vmatmul.mubr.bf16.vlgmr.msra.gmra.mxu1 %v2012_v60 }
 0x212   :  { %v2432_v62 = vpop.f32.mrf.mxu0 }
 0x214   :  { %v2434_v63 = vpop.f32.mrf.mxu0 }
 0x216   :  { %v2436_v0 = vpop.f32.mrf.mxu0 }
 0x218   :  { %v2437_v4 = vpop.f32.mrf.mxu0 }
 0x292   :  { %v2473_v10 = vpop.f32.mrf.mxu1 }
 0x293   :  { %v2474_v11 = vadd.f32 %v2473_v10, %v2432_v62 }
 0x294   :  { %v2475_v16 = vpop.f32.mrf.mxu1 }
 0x295   :  { %v2492_v17 = vmul.f32 %v2485_v9, %v2474_v11  ;;  %v2476_v18 = vadd.f32 %v2475_v16, %v2434_v63 }
 0x296   :  { %v2477_v20 = vpop.f32.mrf.mxu1 }
 0x297   :  { %v2506_v21 = vadd.f32 %v2499_v12, %v2492_v17  ;;  %v2493_v24 = vmul.f32 %v2489_v13, %v2476_v18 }
 0x298   :  { %v2478_v25 = vpop.f32.mrf.mxu1 }
 0x299   :  { %v2507_v26 = vadd.f32 %v2503_v19, %v2493_v24  ;;  %v2508_v27 = vmax.f32 %v2506_v21, 0.0 }
 0x29b   :  { %v2509_v30 = vmax.f32 %v2507_v26, 0.0  ;;  %v2510_v32 = vpack.c.bf16 %v2508_v27, %v2508_v27 }
 0x29d   :  { %v2511_v31 = vpack.c.bf16 %v2509_v30, %v2509_v30 }
 0x29f   :  { %2679 = vmatprep.mubr.bf16.mxu0 %v2511_v31 }
 0x2a0   :  { %2680 = vmatmul.mubr.bf16.vlgmr.msra.gmra.mxu0 %v2510_v32 }
 0x360   :  { %v3055_v33 = vpop.f32.mrf.mxu0 }
 0x362   :  { %v3056_v34 = vpop.f32.mrf.mxu0 }
 0x363   :  { %v3057_v37 = vadd.f32 %v3056_v34, %v3055_v33 }
 0x364   :  { %v3058_v38 = vpop.f32.mrf.mxu0 }
 0x365   :  { %v2682_v14 = vadd.f32 %v3057_v37, %v3021_v46 }
 0x366   :  { %v3059_v15 = vpop.f32.mrf.mxu0 }
 0x367   :  { %v2694_v39 = vadd.f32 %v3038_v48, %v2682_v14 }
 0x369   :  { %2696 = vst.msk [vmem:[%s4745_s10] sm:$0x3] %vm2695_vm0, %v2694_v39 }

// kernel: get_model_forward.10
= control target key start
LH: loop header
LB: loop body
LE: loop exit
PB: predicated region body
PF: predicated region fallthrough
CT: control target
= control target key end

     0   :  { %s1711_s13 = smov 0   ;;  %s1713_s14 = smov 0   ;;  %s2004_s0 = inlined_call_operand.vmem [shape: bf16[2,16,64], index: 0, kind: input, shape index: {}]   ;;  %s2005_s1 = inlined_call_operand.vmem [shape: bf16[64,64], index: 1, kind: input, shape index: {}]   ;;  %s2006_s2 = inlined_call_operand.vmem [shape: f32[1,64], index: 2, kind: input, shape index: {}]   ;;  %s2007_s3 = inlined_call_operand.vmem [shape: f32[1,64], index: 3, kind: input, shape index: {}]   ;;  %s2008_s4 = inlined_call_operand.vmem [shape: bf16[64,128], index: 4, kind: input, shape index: {}]   ;;  %s2009_s5 = inlined_call_operand.vmem [shape: f32[1,128], index: 5, kind: input, shape index: {}]   ;;  %s2010_s6 = inlined_call_operand.vmem [shape: f32[1,128], index: 6, kind: input, shape index: {}]   ;;  %s2011_s7 = inlined_call_operand.vmem [shape: bf16[128,1024], index: 7, kind: input, shape index: {}]   ;;  %s2012_s8 = inlined_call_operand.vmem [shape: f32[1,1024], index: 8, kind: input, shape index: {}]   ;;  %s2013_s9 = inlined_call_operand.vmem [shape: f32[1,1024], index: 9, kind: input, shape index: {}]   ;;  %s2014_s10 = inlined_call_operand.vmem [shape: f32[2,1,1024], index: 10, kind: output, shape index: {}]  }
   0x1   :  { %s1715_s15 = smov 0  }
   0x2 LB: > { %s32_s16 = sadd.s32 1, %s1646_s14  ;;  %p1470_p0 = scmp.ge.s32.totalorder %s1650_s15, 1  ;;  %s1650_s15 = sphi %s1715_s15, %s20_s15   ;;  %s1646_s14 = sphi %s1713_s14, %s2016_s14   ;;  %s1642_s13 = sphi %s1711_s13, %s2015_s13  }
   0x3   : > { %p34_p1 = scmp.ge.s32.totalorder %s32_s16, 2  ;;  %p331_p2 = scmp.lt.s32.totalorder %s1650_s15, 3 }
   0x5   : > { %s2018_s16 = smov (%p34_p1, %s32_s16), 0  ;;  %p332_p3 = pnand %p1470_p0, %p331_p2 }
   0x6   : > { %p373_p4 = scmp.lt.s32.totalorder (!%p332_p3), %s1642_s13, 1 }
   0x7   : > { %335 = sbr.rel (%p332_p3) target bundleno = 701 (0x2bd), region = 60 }
   0xc   : > { %v1619_v0 = vld [vmem:[%s2005_s1 + $0x18] sm:$0xff]   ;;  %v1652_v1 = vmov 0.0   ;;  %v1620_v2 = vld [vmem:[%s2005_s1 + $0x10] sm:$0xff]   ;;  %vm1653_vm0 = vmmov 0   ;;  %s2020_s13 = smov (!%p373_p4, %s1642_s13), 1  ;;  %v1621_v4 = vld [vmem:[%s2005_s1 + $0x8] sm:$0xff]  }
   0xd   : > { %1566 = vmatprep.subr.bf16.mxu0 %v1652_v1  ;;  %1578 = vmatprep.subr.bf16.mxu1 %v1652_v1  ;;  %v1624_v3 = vld [vmem:[%s2008_s4 + $0x18] sm:$0xff]   ;;  %s1555_s25 = sshll.u32 %s2020_s13, 3  ;;  %v1622_v5 = vld [vmem:[%s2005_s1] sm:$0xff]   ;;  %vm431_vm1 = vcmask 523264   ;;  %v1625_v7 = vld [vmem:[%s2008_s4 + $0x10] sm:$0xff]  }
   0xe   : > { %1567 = vmatpush3.bf16.msra.mxu0 %v1619_v0  ;;  %1574 = vmatprep.mubr.msk.bf16.mxu0 %vm1653_vm0, %v1652_v1  ;;  %s380_s28 = scalar_lea.vmem %s2004_s0, %s1555_s25  ;;  %v1626_v8 = vld [vmem:[%s2008_s4 + $0x8] sm:$0xff]   ;;  %v1627_v9 = vld [vmem:[%s2008_s4] sm:$0xff]   ;;  %s385_s29 = scalar_lea.vmem %s2014_s10, %s1555_s25 }
   0xf   : > { %1568 = vmatprep.subr.bf16.mxu0 %v1652_v1  ;;  %1586 = vmatprep.mubr.msk.bf16.mxu1 %vm1653_vm0, %v1652_v1  ;;  %v1623_v6 = vld [vmem:[%s380_s28] sm:$0xff]   ;;  %v651_v12 = vld [vmem:[%s2011_s7 + $0x1c8] sm:$0xff] }
  0x10   : > { %1579 = vmatpush3.bf16.msra.mxu1 %v1624_v3  ;;  %v650_v10 = vld [vmem:[%s2011_s7 + $0x1c0] sm:$0xff]  ;;  %v655_v15 = vld [vmem:[%s2011_s7 + $0x1e8] sm:$0xff] }
  0x11   : > { %1580 = vmatprep.subr.bf16.mxu1 %v1652_v1  ;;  %v654_v11 = vld [vmem:[%s2011_s7 + $0x1e0] sm:$0xff]  ;;  %v1547_v18 = vcombine.low %v651_v12, %v655_v15  ;;  %v1548_v19 = vcombine.high %v651_v12, %v655_v15  ;;  %v643_v44 = vld [vmem:[%s2011_s7 + $0x188] sm:$0xff] }
  0x12   : > { %1569 = vmatpush3.bf16.msra.mxu0 %v1620_v2  ;;  %v1545_v13 = vcombine.low %v650_v10, %v654_v11  ;;  %v1546_v14 = vcombine.high %v650_v10, %v654_v11  ;;  %v642_v16 = vld [vmem:[%s2011_s7 + $0x180] sm:$0xff]  ;;  %v647_v45 = vld [vmem:[%s2011_s7 + $0x1a8] sm:$0xff] }
  0x13   : > { %1570 = vmatprep.subr.bf16.mxu0 %v1652_v1  ;;  %v646_v17 = vld [vmem:[%s2011_s7 + $0x1a0] sm:$0xff]  ;;  %v1540_v49 = vcombine.high %v643_v44, %v647_v45  ;;  %v635_v50 = vld [vmem:[%s2011_s7 + $0x148] sm:$0xff]  ;;  %v1539_v52 = vcombine.low %v643_v44, %v647_v45  ;;  %v645_v44 = vld [vmem:[%s2011_s7 + $0x198] sm:$0xff] }
  0x14   : > { %1581 = vmatpush3.bf16.msra.mxu1 %v1625_v7  ;;  %v1538_v20 = vcombine.high %v642_v16, %v646_v17  ;;  %v1537_v21 = vcombine.low %v642_v16, %v646_v17  ;;  %v634_v22 = vld [vmem:[%s2011_s7 + $0x140] sm:$0xff]  ;;  %v639_v51 = vld [vmem:[%s2011_s7 + $0x168] sm:$0xff]  ;;  %v649_v45 = vld [vmem:[%s2011_s7 + $0x1b8] sm:$0xff] }
  0x15   : > { %1582 = vmatprep.subr.bf16.mxu1 %v1652_v1  ;;  %v638_v23 = vld [vmem:[%s2011_s7 + $0x160] sm:$0xff]  ;;  %v1532_v53 = vcombine.high %v635_v50, %v639_v51  ;;  %v627_v54 = vld [vmem:[%s2011_s7 + $0x108] sm:$0xff]  ;;  %v1531_v56 = vcombine.low %v635_v50, %v639_v51  ;;  %v1544_v50 = vcombine.high %v645_v44, %v649_v45  ;;  %v636_v51 = vld [vmem:[%s2011_s7 + $0x150] sm:$0xff] }
  0x16   : > { %1571 = vmatpush3.bf16.msra.mxu0 %v1621_v4  ;;  %v1530_v24 = vcombine.high %v634_v22, %v638_v23  ;;  %v1529_v25 = vcombine.low %v634_v22, %v638_v23  ;;  %v626_v26 = vld [vmem:[%s2011_s7 + $0x100] sm:$0xff]  ;;  %v631_v55 = vld [vmem:[%s2011_s7 + $0x128] sm:$0xff]  ;;  %v652_v23 = vld [vmem:[%s2011_s7 + $0x1d0] sm:$0xff] }
  0x17   : > { %1572 = vmatprep.subr.bf16.mxu0 %v1652_v1  ;;  %v630_v27 = vld [vmem:[%s2011_s7 + $0x120] sm:$0xff]  ;;  %v1524_v57 = vcombine.high %v627_v54, %v631_v55  ;;  %v619_v58 = vld [vmem:[%s2011_s7 + $0xc8] sm:$0xff]  ;;  %v1523_v60 = vcombine.low %v627_v54, %v631_v55  ;;  %v641_v54 = vld [vmem:[%s2011_s7 + $0x178] sm:$0xff] }
  0x18   : > { %1583 = vmatpush3.bf16.msra.mxu1 %v1626_v8  ;;  %v1522_v28 = vcombine.high %v626_v26, %v630_v27  ;;  %v1521_v29 = vcombine.low %v626_v26, %v630_v27  ;;  %v618_v30 = vld [vmem:[%s2011_s7 + $0xc0] sm:$0xff]  ;;  %v623_v59 = vld [vmem:[%s2011_s7 + $0xe8] sm:$0xff]  ;;  %v657_v27 = vld [vmem:[%s2011_s7 + $0x1f8] sm:$0xff] }
  0x19   : > { %1584 = vmatprep.subr.bf16.mxu1 %v1652_v1  ;;  %v622_v31 = vld [vmem:[%s2011_s7 + $0xe0] sm:$0xff]  ;;  %v1516_v61 = vcombine.high %v619_v58, %v623_v59  ;;  %v1515_v62 = vcombine.low %v619_v58, %v623_v59  ;;  %v611_v1 = vld [vmem:[%s2011_s7 + $0x88] sm:$0xff]  ;;  %v628_v59 = vld [vmem:[%s2011_s7 + $0x110] sm:$0xff] }
  0x1a   : > { %1573 = vmatpush3.bf16.msra.mxu0 %v1622_v5  ;;  %v1514_v32 = vcombine.high %v618_v30, %v622_v31  ;;  %v1513_v33 = vcombine.low %v618_v30, %v622_v31  ;;  %v1480_v34 = vld [vmem:[%s2006_s2] ss:$0 sm:$0xff]  ;;  %v615_v3 = vld [vmem:[%s2011_s7 + $0xa8] sm:$0xff]  ;;  %v1654_v31 = vmov 0  }
  0x1b   : > { %978 = vmatprep.subr.bf16.mxu0 %v1546_v14  ;;  %v1481_v37 = vld [vmem:[%s2007_s3] ss:$0 sm:$0xff]  ;;  %v1507_v5 = vcombine.low %v611_v1, %v615_v3  ;;  %v603_v10 = vld [vmem:[%s2011_s7 + $0x48] sm:$0xff] }
  0x1c   : > { %1585 = vmatpush3.bf16.msra.mxu1 %v1627_v9  ;;  %v610_v63 = vld [vmem:[%s2011_s7 + $0x80] sm:$0xff]  ;;  %v607_v11 = vld [vmem:[%s2011_s7 + $0x68] sm:$0xff] }
  0x1d   : > { %1575 = vmatmul.mubr.msk.bf16.vlgmr.msra.gmra.mxu0 %vm431_vm1, %v1623_v6  ;;  %1021 = vmatprep.subr.bf16.mxu1 %v1548_v19  ;;  %v614_v0 = vld [vmem:[%s2011_s7 + $0xa0] sm:$0xff]  ;;  %v1508_v6 = vcombine.high %v611_v1, %v615_v3  ;;  %v1500_v14 = vcombine.high %v603_v10, %v607_v11  ;;  %v595_v17 = vld [vmem:[%s2011_s7 + $0x8] sm:$0xff]  ;;  %v620_v3 = vld [vmem:[%s2011_s7 + $0xd0] sm:$0xff] }
  0x1e   : > { %979 = vmatpush1.bf16.msra.mxu0 %v1545_v13  ;;  %v1506_v2 = vcombine.high %v610_v63, %v614_v0  ;;  %v1505_v4 = vcombine.low %v610_v63, %v614_v0  ;;  %v602_v7 = vld [vmem:[%s2011_s7 + $0x40] sm:$0xff]  ;;  %v1499_v13 = vcombine.low %v603_v10, %v607_v11  ;;  %v599_v19 = vld [vmem:[%s2011_s7 + $0x28] sm:$0xff]  ;;  %1010 = vmatprep.mubr.bf16.mxu0 %v1654_v31  ;;  %v612_v11 = vld [vmem:[%s2011_s7 + $0x90] sm:$0xff] }
  0x1f   : > { %980 = vmatprep.subr.bf16.mxu0 %v1538_v20  ;;  %v606_v8 = vld [vmem:[%s2011_s7 + $0x60] sm:$0xff]  ;;  %v1492_v22 = vcombine.high %v595_v17, %v599_v19 }
  0x20   : > { %v1498_v9 = vcombine.high %v602_v7, %v606_v8  ;;  %v1497_v12 = vcombine.low %v602_v7, %v606_v8  ;;  %v594_v15 = vld [vmem:[%s2011_s7] sm:$0xff] }
  0x21   : > { %v598_v16 = vld [vmem:[%s2011_s7 + $0x20] sm:$0xff] }
  0x22   : > { %981 = vmatpush1.bf16.msra.mxu0 %v1537_v21  ;;  %v1489_v20 = vcombine.low %v594_v15, %v598_v16  ;;  %v1491_v21 = vcombine.low %v595_v17, %v599_v19  ;;  %v604_v19 = vld [vmem:[%s2011_s7 + $0x50] sm:$0xff] }
  0x23   : > { %982 = vmatprep.subr.bf16.mxu0 %v1530_v24  ;;  %v656_v24 = vld [vmem:[%s2011_s7 + $0x1f0] sm:$0xff] }
  0x24   : > { %v1550_v26 = vcombine.high %v652_v23, %v656_v24 }
  0x26   : > { %983 = vmatpush1.bf16.msra.mxu0 %v1529_v25  ;;  %v653_v25 = vld [vmem:[%s2011_s7 + $0x1d8] sm:$0xff] }
  0x27   : > { %984 = vmatprep.subr.bf16.mxu0 %v1522_v28  ;;  %v1549_v28 = vcombine.low %v652_v23, %v656_v24  ;;  %v1552_v30 = vcombine.high %v653_v25, %v657_v27 }
  0x2a   : > { %985 = vmatpush1.bf16.msra.mxu0 %v1521_v29  ;;  %v1551_v29 = vcombine.low %v653_v25, %v657_v27  ;;  %v596_v27 = vld [vmem:[%s2011_s7 + $0x10] sm:$0xff] }
  0x2b   : > { %986 = vmatprep.subr.bf16.mxu0 %v1514_v32  ;;  %v1487_v32 = vld [vmem:[%s2009_s5] ss:$0 sm:$0xff] }
  0x2e   : > { %987 = vmatpush1.bf16.msra.mxu0 %v1513_v33 }
  0x2f   : > { %988 = vmatprep.subr.bf16.mxu0 %v1506_v2 }
  0x32   : > { %989 = vmatpush1.bf16.msra.mxu0 %v1505_v4  ;;  %v624_v4 = vld [vmem:[%s2011_s7 + $0xf0] sm:$0xff] }
  0x33   : > { %990 = vmatprep.subr.bf16.mxu0 %v1498_v9  ;;  %v1518_v9 = vcombine.high %v620_v3, %v624_v4 }
  0x36   : > { %991 = vmatpush1.bf16.msra.mxu0 %v1497_v12  ;;  %v616_v12 = vld [vmem:[%s2011_s7 + $0xb0] sm:$0xff] }
  0x37   : > { %v1510_v17 = vcombine.high %v612_v11, %v616_v12  ;;  %v1509_v23 = vcombine.low %v612_v11, %v616_v12 }
  0xdd   : > { %v469_v35 = vpop.f32.mrf.mxu0 }
  0xde   : > { %v483_v36 = vmul.f32 %v1480_v34, %v469_v35  ;;  %v1488_v35 = vld [vmem:[%s2010_s6] ss:$0 sm:$0xff] }
  0xdf   : > { %v1576_v38 = vpop.f32.mrf.mxu0 }
  0xe0   : > { %v492_v40 = vadd.f32 %v1481_v37, %v483_v36 }
  0xe1   : > { %v472_v39 = vpop.f32.mrf.mxu0 }
  0xe2   : > { %v484_v41 = vmul.f32 %v1480_v34, %v472_v39  ;;  %v494_v46 = vmax.f32 %v492_v40, 0.0 }
  0xe3   : > { %v1577_v42 = vpop.f32.mrf.mxu0 }
  0xe4   : > { %v493_v43 = vadd.f32 %v1481_v37, %v484_v41  ;;  %v644_v42 = vld [vmem:[%s2011_s7 + $0x190] sm:$0xff] }
  0xe6   : > { %v495_v47 = vmax.f32 %v493_v43, 0.0  ;;  %v648_v43 = vld [vmem:[%s2011_s7 + $0x1b0] sm:$0xff] }
  0xe7   : > { %v1541_v55 = vcombine.low %v644_v42, %v648_v43 }
  0xe8   : > { %v496_v48 = vpack.c.bf16 %v495_v47, %v494_v46 }
  0xea   : > { %1587 = vmatmul.mubr.msk.bf16.vlgmr.msra.gmra.mxu1 %vm431_vm1, %v496_v48 }
  0xeb   : > { %1022 = vmatpush1.bf16.msra.mxu1 %v1547_v18  ;;  %v1490_v18 = vcombine.high %v594_v15, %v598_v16  ;;  %1053 = vmatprep.mubr.bf16.mxu1 %v1654_v31  ;;  %v1517_v15 = vcombine.low %v620_v3, %v624_v4 }
  0xec   : > { %1023 = vmatprep.subr.bf16.mxu1 %v1540_v49  ;;  %v1542_v49 = vcombine.high %v644_v42, %v648_v43 }
  0xed   : > { %992 = vmatprep.subr.bf16.mxu0 %v1490_v18 }
  0xee   : > { %993 = vmatpush1.bf16.msra.mxu0 %v1489_v20  ;;  %v608_v20 = vld [vmem:[%s2011_s7 + $0x70] sm:$0xff] }
  0xef   : > { %1024 = vmatpush1.bf16.msra.mxu1 %v1539_v52  ;;  %1064 = vmatprep.subr.bf16.mxu0 %v1550_v26  ;;  %v640_v52 = vld [vmem:[%s2011_s7 + $0x170] sm:$0xff]  ;;  %v1502_v25 = vcombine.high %v604_v19, %v608_v20 }
  0xf0   : > { %1025 = vmatprep.subr.bf16.mxu1 %v1532_v53  ;;  %v637_v53 = vld [vmem:[%s2011_s7 + $0x158] sm:$0xff]  ;;  %v1533_v63 = vcombine.low %v636_v51, %v640_v52 }
  0xf1   : > { %v1536_v58 = vcombine.high %v637_v53, %v641_v54  ;;  %v1535_v0 = vcombine.low %v637_v53, %v641_v54 }
  0xf3   : > { %1026 = vmatpush1.bf16.msra.mxu1 %v1531_v56  ;;  %v1543_v56 = vcombine.low %v645_v44, %v649_v45 }
  0xf4   : > { %1027 = vmatprep.subr.bf16.mxu1 %v1524_v57  ;;  %v1534_v57 = vcombine.high %v636_v51, %v640_v52 }
  0xf7   : > { %1028 = vmatpush1.bf16.msra.mxu1 %v1523_v60  ;;  %v632_v60 = vld [vmem:[%s2011_s7 + $0x130] sm:$0xff] }
  0xf8   : > { %1029 = vmatprep.subr.bf16.mxu1 %v1516_v61  ;;  %v629_v61 = vld [vmem:[%s2011_s7 + $0x118] sm:$0xff]  ;;  %v1526_v1 = vcombine.high %v628_v59, %v632_v60  ;;  %v1525_v7 = vcombine.low %v628_v59, %v632_v60 }
  0xfb   : > { %1030 = vmatpush1.bf16.msra.mxu1 %v1515_v62  ;;  %v633_v62 = vld [vmem:[%s2011_s7 + $0x138] sm:$0xff] }
  0xfc   : > { %1031 = vmatprep.subr.bf16.mxu1 %v1508_v6  ;;  %v1528_v2 = vcombine.high %v629_v61, %v633_v62  ;;  %v625_v6 = vld [vmem:[%s2011_s7 + $0xf8] sm:$0xff]  ;;  %v1527_v8 = vcombine.low %v629_v61, %v633_v62 }
  0xff   : > { %1032 = vmatpush1.bf16.msra.mxu1 %v1507_v5  ;;  %v621_v5 = vld [vmem:[%s2011_s7 + $0xd8] sm:$0xff] }
 0x100   : > { %1033 = vmatprep.subr.bf16.mxu1 %v1500_v14  ;;  %v1520_v10 = vcombine.high %v621_v5, %v625_v6  ;;  %v617_v14 = vld [vmem:[%s2011_s7 + $0xb8] sm:$0xff]  ;;  %v1519_v16 = vcombine.low %v621_v5, %v625_v6 }
 0x103   : > { %1034 = vmatpush1.bf16.msra.mxu1 %v1499_v13  ;;  %v613_v13 = vld [vmem:[%s2011_s7 + $0x98] sm:$0xff] }
 0x104   : > { %1035 = vmatprep.subr.bf16.mxu1 %v1492_v22  ;;  %v1512_v18 = vcombine.high %v613_v13, %v617_v14  ;;  %v609_v22 = vld [vmem:[%s2011_s7 + $0x78] sm:$0xff]  ;;  %v1511_v24 = vcombine.low %v613_v13, %v617_v14 }
 0x107   : > { %1036 = vmatpush1.bf16.msra.mxu1 %v1491_v21  ;;  %v605_v21 = vld [vmem:[%s2011_s7 + $0x58] sm:$0xff] }
 0x108   : > { %1107 = vmatprep.subr.bf16.mxu1 %v1552_v30  ;;  %v1504_v26 = vcombine.high %v605_v21, %v609_v22  ;;  %v601_v30 = vld [vmem:[%s2011_s7 + $0x38] sm:$0xff] }
 0x1aa   : > { %v566_v33 = vpop.f32.mrf.mxu1 }
 0x1ab   : > { %v580_v34 = vmul.f32 %v1487_v32, %v566_v33 }
 0x1ac   : > { %v1588_v36 = vpop.f32.mrf.mxu1 }
 0x1ad   : > { %v589_v38 = vadd.f32 %v1488_v35, %v580_v34 }
 0x1ae   : > { %v569_v37 = vpop.f32.mrf.mxu1 }
 0x1af   : > { %v581_v39 = vmul.f32 %v1487_v32, %v569_v37  ;;  %v591_v46 = vmax.f32 %v589_v38, 0.0  ;;  %v1503_v32 = vcombine.low %v605_v21, %v609_v22  ;;  %v1152_v37 = vlaneseq }
 0x1b0   : > { %v1589_v40 = vpop.f32.mrf.mxu1 }
 0x1b1   : > { %v590_v41 = vadd.f32 %v1488_v35, %v581_v39  ;;  %v1973_v42 = vshrl.u32 %v1152_v37, 7 }
 0x1b3   : > { %v592_v47 = vmax.f32 %v590_v41, 0.0  ;;  %v1158_v45 = vsub.s32 1, %v1973_v42 }
 0x1b5   : > { %v1895_v48 = vpack.c.bf16 %v592_v47, %v591_v46  ;;  %v1166_v46 = vsub.s32 3, %v1973_v42  ;;  %v1154_v47 = vsub.s32 0, %v1973_v42 }
 0x1b7   : > { %1011 = vmatmul.mubr.bf16.vlgmr.msra.gmra.mxu0 %v1895_v48  ;;  %1054 = vmatmul.mubr.bf16.vlgmr.msra.gmra.mxu1 %v1895_v48 }
 0x1b8   : > { %1065 = vmatpush1.bf16.msra.mxu0 %v1549_v28  ;;  %1108 = vmatpush1.bf16.msra.mxu1 %v1551_v29  ;;  %v600_v28 = vld [vmem:[%s2011_s7 + $0x30] sm:$0xff]  ;;  %v597_v29 = vld [vmem:[%s2011_s7 + $0x18] sm:$0xff] }
 0x1b9   : > { %1066 = vmatprep.subr.bf16.mxu0 %v1542_v49  ;;  %1109 = vmatprep.subr.bf16.mxu1 %v1544_v50  ;;  %v1494_v33 = vcombine.high %v596_v27, %v600_v28  ;;  %v1496_v34 = vcombine.high %v597_v29, %v601_v30  ;;  %v1493_v35 = vcombine.low %v596_v27, %v600_v28  ;;  %v1162_v49 = vsub.s32 2, %v1973_v42 }
 0x1ba   : > { %1096 = vmatprep.mubr.bf16.mxu0 %v1654_v31  ;;  %1139 = vmatprep.mubr.bf16.mxu1 %v1654_v31  ;;  %v1501_v31 = vcombine.low %v604_v19, %v608_v20  ;;  %v1495_v36 = vcombine.low %v597_v29, %v601_v30  ;;  %v1174_v27 = vsub.s32 5, %v1973_v42  ;;  %v1182_v28 = vsub.s32 7, %v1973_v42 }
 0x1bc   : > { %1067 = vmatpush1.bf16.msra.mxu0 %v1541_v55  ;;  %1110 = vmatpush1.bf16.msra.mxu1 %v1543_v56  ;;  %v1208_v56 = vld [vmem:[%s2013_s9] sm:$0xff] }
 0x1bd   : > { %1068 = vmatprep.subr.bf16.mxu0 %v1534_v57  ;;  %1111 = vmatprep.subr.bf16.mxu1 %v1536_v58  ;;  %v1217_v62 = vrot.slane %v1208_v56, %v1158_v45  ;;  %v1221_v4 = vrot.slane %v1208_v56, %v1162_v49 }
 0x1c0   : > { %1069 = vmatpush1.bf16.msra.mxu0 %v1533_v63  ;;  %1112 = vmatpush1.bf16.msra.mxu1 %v1535_v0  ;;  %v1225_v0 = vrot.slane %v1208_v56, %v1166_v46 }
 0x1c1   : > { %1070 = vmatprep.subr.bf16.mxu0 %v1526_v1  ;;  %1113 = vmatprep.subr.bf16.mxu1 %v1528_v2  ;;  %v1213_v2 = vrot.slane %v1208_v56, %v1154_v47 }
 0x1c4   : > { %1071 = vmatpush1.bf16.msra.mxu0 %v1525_v7  ;;  %1114 = vmatpush1.bf16.msra.mxu1 %v1527_v8 }
 0x1c5   : > { %1072 = vmatprep.subr.bf16.mxu0 %v1518_v9  ;;  %1115 = vmatprep.subr.bf16.mxu1 %v1520_v10 }
 0x1c8   : > { %1073 = vmatpush1.bf16.msra.mxu0 %v1517_v15  ;;  %1116 = vmatpush1.bf16.msra.mxu1 %v1519_v16 }
 0x1c9   : > { %1074 = vmatprep.subr.bf16.mxu0 %v1510_v17  ;;  %1117 = vmatprep.subr.bf16.mxu1 %v1512_v18 }
 0x1cc   : > { %1075 = vmatpush1.bf16.msra.mxu0 %v1509_v23  ;;  %1118 = vmatpush1.bf16.msra.mxu1 %v1511_v24 }
 0x1cd   : > { %1076 = vmatprep.subr.bf16.mxu0 %v1502_v25  ;;  %1119 = vmatprep.subr.bf16.mxu1 %v1504_v26  ;;  %v1170_v25 = vsub.s32 4, %v1973_v42  ;;  %v1178_v26 = vsub.s32 6, %v1973_v42 }
 0x1d0   : > { %1077 = vmatpush1.bf16.msra.mxu0 %v1501_v31  ;;  %1120 = vmatpush1.bf16.msra.mxu1 %v1503_v32 }
 0x1d1   : > { %1078 = vmatprep.subr.bf16.mxu0 %v1494_v33  ;;  %1121 = vmatprep.subr.bf16.mxu1 %v1496_v34 }
 0x1d4   : > { %1079 = vmatpush1.bf16.msra.mxu0 %v1493_v35  ;;  %1122 = vmatpush1.bf16.msra.mxu1 %v1495_v36 }
 0x1d7   : > { %1097 = vmatmul.mubr.bf16.vlgmr.msra.gmra.mxu0 %v1895_v48  ;;  %1140 = vmatmul.mubr.bf16.vlgmr.msra.gmra.mxu1 %v1895_v48  ;;  %v1150_v48 = vld [vmem:[%s2012_s8] sm:$0xff] }
 0x1d8   : > { %v1159_v52 = vrot.slane %v1150_v48, %v1158_v45  ;;  %v1167_v53 = vrot.slane %v1150_v48, %v1166_v46  ;;  %v1155_v54 = vrot.slane %v1150_v48, %v1154_v47  ;;  %v1163_v55 = vrot.slane %v1150_v48, %v1162_v49 }
 0x1d9   : > { %v1171_v33 = vrot.slane %v1150_v48, %v1170_v25  ;;  %v1179_v34 = vrot.slane %v1150_v48, %v1178_v26  ;;  %v1175_v35 = vrot.slane %v1150_v48, %v1174_v27  ;;  %v1183_v36 = vrot.slane %v1150_v48, %v1182_v28 }
 0x1da   : > { %v1229_v45 = vrot.slane %v1208_v56, %v1170_v25  ;;  %v1237_v47 = vrot.slane %v1208_v56, %v1178_v26 }
 0x277   : > { %v1012_v38 = vpop.f32.mrf.mxu0  ;;  %v1055_v39 = vpop.f32.mrf.mxu1 }
 0x278   : > { %v1192_v1 = vmul.f32 %v1155_v54, %v1012_v38  ;;  %v1194_v3 = vmul.f32 %v1163_v55, %v1055_v39 }
 0x279   : > { %v1014_v40 = vpop.f32.mrf.mxu0  ;;  %v1057_v41 = vpop.f32.mrf.mxu1 }
 0x27a   : > { %v1193_v61 = vmul.f32 %v1159_v52, %v1014_v40  ;;  %v1195_v63 = vmul.f32 %v1167_v53, %v1057_v41  ;;  %v1250_v11 = vadd.f32 %v1213_v2, %v1192_v1  ;;  %v1252_v12 = vadd.f32 %v1221_v4, %v1194_v3 }
 0x27b   : > { %v1016_v43 = vpop.f32.mrf.mxu0  ;;  %v1059_v44 = vpop.f32.mrf.mxu1 }
 0x27c   : > { %v1200_v59 = vmul.f32 %v1155_v54, %v1016_v43  ;;  %v1202_v60 = vmul.f32 %v1163_v55, %v1059_v44  ;;  %v1251_v9 = vadd.f32 %v1217_v62, %v1193_v61  ;;  %v1253_v10 = vadd.f32 %v1225_v0, %v1195_v63 }
 0x27d   : > { %v1018_v50 = vpop.f32.mrf.mxu0  ;;  %v1061_v51 = vpop.f32.mrf.mxu1  ;;  %v1266_v19 = vmax.f32 %v1250_v11, 0.0  ;;  %v1268_v20 = vmax.f32 %v1252_v12, 0.0  ;;  %v1241_v54 = vrot.slane %v1208_v56, %v1182_v28  ;;  %v1655_v61 = vmov 1966171168  }
 0x27e   : > { %v1201_v57 = vmul.f32 %v1159_v52, %v1018_v50  ;;  %v1203_v58 = vmul.f32 %v1167_v53, %v1061_v51  ;;  %v1258_v7 = vadd.f32 %v1213_v2, %v1200_v59  ;;  %v1260_v8 = vadd.f32 %v1221_v4, %v1202_v60 }
 0x27f   : > { %v1267_v17 = vmax.f32 %v1251_v9, 0.0  ;;  %v1269_v18 = vmax.f32 %v1253_v10, 0.0  ;;  %v1233_v52 = vrot.slane %v1208_v56, %v1174_v27 }
 0x280   : > { %v1259_v5 = vadd.f32 %v1217_v62, %v1201_v57  ;;  %v1261_v6 = vadd.f32 %v1225_v0, %v1203_v58  ;;  %v1274_v15 = vmax.f32 %v1258_v7, 0.0  ;;  %v1276_v16 = vmax.f32 %v1260_v8, 0.0 }
 0x281   : > { %v1352_v62 = vunpack.c.l.s4 %v1655_v61 }
 0x282   : > { %v1275_v13 = vmax.f32 %v1259_v5, 0.0  ;;  %v1277_v14 = vmax.f32 %v1261_v6, 0.0  ;;  %v1283_v23 = vmax.f32 %v1266_v19, %v1274_v15  ;;  %v1297_v24 = vmax.f32 %v1268_v20, %v1276_v16 }
 0x284   : > { %v1290_v21 = vmax.f32 %v1267_v17, %v1275_v13  ;;  %v1304_v22 = vmax.f32 %v1269_v18, %v1277_v14  ;;  %v1284_v31 = vrot.slane %v1283_v23, 4  ;;  %v1298_v32 = vrot.slane %v1297_v24, 4 }
 0x286   : > { %v1291_v29 = vrot.slane %v1290_v21, 4  ;;  %v1305_v30 = vrot.slane %v1304_v22, 4  ;;  %v1285_v41 = vmax.f32 %v1283_v23, %v1284_v31  ;;  %v1299_v43 = vmax.f32 %v1297_v24, %v1298_v32 }
 0x288   : > { %v1292_v37 = vmax.f32 %v1290_v21, %v1291_v29  ;;  %v1306_v38 = vmax.f32 %v1304_v22, %v1305_v30  ;;  %v1286_v59 = vrot.slane %v1285_v41, 2  ;;  %v1300_v60 = vrot.slane %v1299_v43, 2 }
 0x28a   : > { %v1293_v55 = vrot.slane %v1292_v37, 2  ;;  %v1307_v57 = vrot.slane %v1306_v38, 2  ;;  %v1287_v12 = vmax.f32 %v1285_v41, %v1286_v59  ;;  %v1301_v13 = vmax.f32 %v1299_v43, %v1300_v60 }
 0x28c   : > { %v1294_v9 = vmax.f32 %v1292_v37, %v1293_v55  ;;  %v1308_v56 = vmax.f32 %v1306_v38, %v1307_v57  ;;  %v1288_v30 = vrot.slane %v1287_v12, 1  ;;  %v1302_v31 = vrot.slane %v1301_v13, 1 }
 0x28e   : > { %v1295_v24 = vrot.slane %v1294_v9, 1  ;;  %v1309_v25 = vrot.slane %v1308_v56, 1 }
 0x290   : > { %v1296_v37 = vmax.f32 %v1294_v9, %v1295_v24  ;;  %v1310_v38 = vmax.f32 %v1308_v56, %v1309_v25 }
 0x297   : > { %v1098_v39 = vpop.f32.mrf.mxu0  ;;  %v1141_v40 = vpop.f32.mrf.mxu1 }
 0x298   : > { %v1196_v44 = vmul.f32 %v1171_v33, %v1098_v39  ;;  %v1198_v46 = vmul.f32 %v1179_v34, %v1141_v40 }
 0x299   : > { %v1100_v49 = vpop.f32.mrf.mxu0  ;;  %v1143_v50 = vpop.f32.mrf.mxu1 }
 0x29a   : > { %v1197_v51 = vmul.f32 %v1175_v35, %v1100_v49  ;;  %v1199_v53 = vmul.f32 %v1183_v36, %v1143_v50  ;;  %v1254_v63 = vadd.f32 %v1229_v45, %v1196_v44  ;;  %v1256_v0 = vadd.f32 %v1237_v47, %v1198_v46 }
 0x29b   : > { %v1102_v58 = vpop.f32.mrf.mxu0  ;;  %v1145_v48 = vpop.f32.mrf.mxu1  ;;  %v1289_v44 = vmax.f32 %v1287_v12, %v1288_v30 }
 0x29c   : > { %v1204_v1 = vmul.f32 %v1171_v33, %v1102_v58  ;;  %v1206_v2 = vmul.f32 %v1179_v34, %v1145_v48  ;;  %v1255_v5 = vadd.f32 %v1233_v52, %v1197_v51  ;;  %v1257_v6 = vadd.f32 %v1241_v54, %v1199_v53 }
 0x29d   : > { %v1104_v3 = vpop.f32.mrf.mxu0  ;;  %v1147_v4 = vpop.f32.mrf.mxu1  ;;  %v1270_v16 = vmax.f32 %v1254_v63, 0.0  ;;  %v1272_v17 = vmax.f32 %v1256_v0, 0.0  ;;  %v1353_v34 = vunpack.c.0.s8 %v1352_v62 }
 0x29e   : > { %v1205_v7 = vmul.f32 %v1175_v35, %v1104_v3  ;;  %v1207_v8 = vmul.f32 %v1183_v36, %v1147_v4  ;;  %v1262_v10 = vadd.f32 %v1229_v45, %v1204_v1  ;;  %v1264_v11 = vadd.f32 %v1237_v47, %v1206_v2 }
 0x29f   : > { %v1271_v20 = vmax.f32 %v1255_v5, 0.0  ;;  %v1273_v21 = vmax.f32 %v1257_v6, 0.0  ;;  %v1303_v45 = vmax.f32 %v1301_v13, %v1302_v31  ;;  %v1356_v49 = vsub.s32 %v1353_v34, %v1973_v42 }
 0x2a0   : > { %v1263_v14 = vadd.f32 %v1233_v52, %v1205_v7  ;;  %v1265_v15 = vadd.f32 %v1241_v54, %v1207_v8  ;;  %v1278_v18 = vmax.f32 %v1262_v10, 0.0  ;;  %v1280_v19 = vmax.f32 %v1264_v11, 0.0 }
 0x2a1   : > { %v1347_v52 = vcombine.low %v1289_v44, %v1296_v37  ;;  %v1348_v53 = vcombine.low %v1303_v45, %v1310_v38 }
 0x2a2   : > { %v1279_v22 = vmax.f32 %v1263_v14, 0.0  ;;  %v1281_v23 = vmax.f32 %v1265_v15, 0.0  ;;  %v1311_v26 = vmax.f32 %v1270_v16, %v1278_v18  ;;  %v1325_v27 = vmax.f32 %v1272_v17, %v1280_v19 }
 0x2a3   : > { %v1357_v62 = vrot.slane %v1347_v52, %v1356_v49  ;;  %v1364_v63 = vrot.slane %v1348_v53, %v1356_v49 }
 0x2a4   : > { %v1318_v28 = vmax.f32 %v1271_v20, %v1279_v22  ;;  %v1332_v29 = vmax.f32 %v1273_v21, %v1281_v23  ;;  %v1312_v32 = vrot.slane %v1311_v26, 4  ;;  %v1326_v33 = vrot.slane %v1325_v27, 4 }
 0x2a5   : > { %v1379_v5 = vcombine.low %v1357_v62, %v1364_v63 }
 0x2a6   : > { %v1319_v35 = vrot.slane %v1318_v28, 4  ;;  %v1333_v36 = vrot.slane %v1332_v29, 4  ;;  %v1313_v39 = vmax.f32 %v1311_v26, %v1312_v32  ;;  %v1327_v40 = vmax.f32 %v1325_v27, %v1326_v33 }
 0x2a7   : > { %v1387_v9 = vrot.slane %v1379_v5, %v1356_v49 }
 0x2a8   : > { %v1320_v41 = vmax.f32 %v1318_v28, %v1319_v35  ;;  %v1334_v43 = vmax.f32 %v1332_v29, %v1333_v36  ;;  %v1314_v46 = vrot.slane %v1313_v39, 2  ;;  %v1328_v47 = vrot.slane %v1327_v40, 2 }
 0x2aa   : > { %v1321_v50 = vrot.slane %v1320_v41, 2  ;;  %v1335_v51 = vrot.slane %v1334_v43, 2  ;;  %v1315_v54 = vmax.f32 %v1313_v39, %v1314_v46  ;;  %v1329_v55 = vmax.f32 %v1327_v40, %v1328_v47 }
 0x2ac   : > { %v1322_v57 = vmax.f32 %v1320_v41, %v1321_v50  ;;  %v1336_v58 = vmax.f32 %v1334_v43, %v1335_v51  ;;  %v1316_v48 = vrot.slane %v1315_v54, 1  ;;  %v1330_v59 = vrot.slane %v1329_v55, 1 }
 0x2ae   : > { %v1323_v60 = vrot.slane %v1322_v57, 1  ;;  %v1337_v61 = vrot.slane %v1336_v58, 1  ;;  %v1317_v0 = vmax.f32 %v1315_v54, %v1316_v48  ;;  %v1331_v1 = vmax.f32 %v1329_v55, %v1330_v59 }
 0x2b0   : > { %v1324_v2 = vmax.f32 %v1322_v57, %v1323_v60  ;;  %v1338_v3 = vmax.f32 %v1336_v58, %v1337_v61 }
 0x2b2   : > { %v1349_v42 = vcombine.low %v1317_v0, %v1324_v2  ;;  %v1350_v4 = vcombine.low %v1331_v1, %v1338_v3 }
 0x2b4   : > { %v1371_v6 = vrot.slane %v1349_v42, %v1356_v49  ;;  %v1378_v7 = vrot.slane %v1350_v4, %v1356_v49 }
 0x2b6   : > { %v1380_v8 = vcombine.low %v1371_v6, %v1378_v7 }
 0x2b8   : > { %v1394_v56 = vrot.slane %v1380_v8, %v1356_v49 }
 0x2ba   : > { %v1395_v10 = vcombine.low %v1387_v9, %v1394_v56 }
 0x2bc   : > { %1398 = vst [vmem:[%s385_s29] sm:$0xff] %v1395_v10 }
 0x2bd PF: > { %s20_s15 = sadd.s32 1, %s1650_s15   ;;  %s2015_s13 = smov %s1646_s14 }
 0x2be   : > { %p17_p5 = scmp.ge.s32.totalorder %s20_s15, 4   ;;  %s2016_s14 = smov %s2018_s16 }
 0x2c0   :  { %19 = sbr.rel (!%p17_p5) target bundleno = 2 (0x2), region = 94 }

// kernel: get_model_forward.12
= control target key start
LH: loop header
LB: loop body
LE: loop exit
PB: predicated region body
PF: predicated region fallthrough
CT: control target
= control target key end

     0   :  { %s1509_s24 = smov 0   ;;  %s1511_s25 = smov 0   ;;  %s1774_s0 = inlined_call_operand.vmem [shape: bf16[2,16,64], index: 0, kind: input, shape index: {}]   ;;  %s1775_s1 = inlined_call_operand.vmem [shape: bf16[2,64,128], index: 1, kind: input, shape index: {}]   ;;  %s1776_s2 = inlined_call_operand.vmem [shape: f32[1,128], index: 2, kind: input, shape index: {}]   ;;  %s1777_s3 = inlined_call_operand.vmem [shape: f32[1,128], index: 3, kind: input, shape index: {}]   ;;  %s1778_s4 = inlined_call_operand.vmem [shape: bf16[128,1024], index: 4, kind: input, shape index: {}]   ;;  %s1779_s5 = inlined_call_operand.vmem [shape: f32[1,1024], index: 5, kind: input, shape index: {}]   ;;  %s1780_s6 = inlined_call_operand.vmem [shape: f32[1,1024], index: 6, kind: input, shape index: {}]   ;;  %s1781_s7 = inlined_call_operand.vmem [shape: f32[2,1,1024], index: 7, kind: output, shape index: {}]  }
   0x1   :  { %s1513_s26 = smov 0  }
   0x2 LB: > { %s29_s27 = sadd.s32 1, %s1459_s25  ;;  %p1308_p0 = scmp.ge.s32.totalorder %s1463_s26, 1  ;;  %s1463_s26 = sphi %s1513_s26, %s17_s26   ;;  %s1459_s25 = sphi %s1511_s25, %s1783_s25   ;;  %s1455_s24 = sphi %s1509_s24, %s1782_s24  }
   0x3   : > { %p31_p1 = scmp.ge.s32.totalorder %s29_s27, 2  ;;  %p266_p2 = scmp.lt.s32.totalorder %s1463_s26, 3 }
   0x5   : > { %s1785_s27 = smov (%p31_p1, %s29_s27), 0  ;;  %p267_p3 = pnand %p1308_p0, %p266_p2 }
   0x6   : > { %p307_p4 = scmp.lt.s32.totalorder (!%p267_p3), %s1455_s24, 1 }
   0x7   : > { %270 = sbr.rel (%p267_p3) target bundleno = 496 (0x1f0), region = 48 }
   0xc   : > { %v492_v0 = vld [vmem:[%s1778_s4 + $0x1c0] sm:$0xff]  ;;  %v1465_v1 = vmov 0.0   ;;  %vm1466_vm0 = vmmov 0   ;;  %s1787_s24 = smov (!%p307_p4, %s1455_s24), 1  ;;  %v493_v22 = vld [vmem:[%s1778_s4 + $0x1c8] sm:$0xff]  ;;  %vm370_vm1 = vcmask 523264  }
   0xd   : > { %1395 = vmatprep.subr.bf16.mxu0 %v1465_v1  ;;  %1403 = vmatprep.mubr.msk.bf16.mxu0 %vm1466_vm0, %v1465_v1  ;;  %v496_v2 = vld [vmem:[%s1778_s4 + $0x1e0] sm:$0xff]  ;;  %s1389_s17 = sshll.u32 %s1787_s24, 5  ;;  %s1388_s23 = sshll.u32 %s1787_s24, 3  ;;  %v497_v23 = vld [vmem:[%s1778_s4 + $0x1e8] sm:$0xff] }
   0xe   : > { %v1379_v3 = vcombine.high %v492_v0, %v496_v2  ;;  %v1378_v4 = vcombine.low %v492_v0, %v496_v2  ;;  %v484_v5 = vld [vmem:[%s1778_s4 + $0x180] sm:$0xff]  ;;  %s320_s20 = scalar_lea.vmem %s1775_s1, %s1389_s17  ;;  %s314_s9 = scalar_lea.vmem %s1774_s0, %s1388_s23  ;;  %v1381_v26 = vcombine.high %v493_v22, %v497_v23  ;;  %v485_v28 = vld [vmem:[%s1778_s4 + $0x188] sm:$0xff]  ;;  %v1380_v31 = vcombine.low %v493_v22, %v497_v23 }
   0xf   : > { %v488_v6 = vld [vmem:[%s1778_s4 + $0x1a0] sm:$0xff]  ;;  %v1436_v12 = vld [vmem:[%s320_s20 + $0x18] sm:$0xff]   ;;  %v1437_v15 = vld [vmem:[%s320_s20 + $0x10] sm:$0xff]   ;;  %s324_s29 = scalar_lea.vmem %s1781_s7, %s1388_s23 }
  0x10   : > { %v1371_v7 = vcombine.high %v484_v5, %v488_v6  ;;  %v476_v8 = vld [vmem:[%s1778_s4 + $0x140] sm:$0xff]  ;;  %820 = vmatprep.subr.bf16.mxu1 %v1379_v3  ;;  %v1370_v10 = vcombine.low %v484_v5, %v488_v6  ;;  %1396 = vmatpush3.bf16.msra.mxu0 %v1436_v12  ;;  %v1438_v20 = vld [vmem:[%s320_s20 + $0x8] sm:$0xff]   ;;  %v494_v6 = vld [vmem:[%s1778_s4 + $0x1d0] sm:$0xff] }
  0x11   : > { %v480_v9 = vld [vmem:[%s1778_s4 + $0x160] sm:$0xff]  ;;  %821 = vmatpush1.bf16.msra.mxu1 %v1378_v4  ;;  %1397 = vmatprep.subr.bf16.mxu0 %v1465_v1  ;;  %v489_v29 = vld [vmem:[%s1778_s4 + $0x1a8] sm:$0xff] }
  0x12   : > { %v468_v11 = vld [vmem:[%s1778_s4 + $0x100] sm:$0xff]  ;;  %822 = vmatprep.subr.bf16.mxu1 %v1371_v7  ;;  %v1363_v13 = vcombine.high %v476_v8, %v480_v9  ;;  %v1362_v16 = vcombine.low %v476_v8, %v480_v9  ;;  %v1373_v32 = vcombine.high %v485_v28, %v489_v29  ;;  %v477_v33 = vld [vmem:[%s1778_s4 + $0x148] sm:$0xff]  ;;  %v1372_v35 = vcombine.low %v485_v28, %v489_v29  ;;  %v498_v7 = vld [vmem:[%s1778_s4 + $0x1f0] sm:$0xff] }
  0x13   : > { %v472_v14 = vld [vmem:[%s1778_s4 + $0x120] sm:$0xff]  ;;  %v481_v34 = vld [vmem:[%s1778_s4 + $0x168] sm:$0xff]  ;;  %v495_v8 = vld [vmem:[%s1778_s4 + $0x1d8] sm:$0xff]  ;;  %v1383_v9 = vcombine.high %v494_v6, %v498_v7 }
  0x14   : > { %v1355_v17 = vcombine.high %v468_v11, %v472_v14  ;;  %v460_v18 = vld [vmem:[%s1778_s4 + $0xc0] sm:$0xff]  ;;  %1398 = vmatpush3.bf16.msra.mxu0 %v1437_v15  ;;  %v1354_v21 = vcombine.low %v468_v11, %v472_v14  ;;  %v1365_v36 = vcombine.high %v477_v33, %v481_v34  ;;  %v469_v37 = vld [vmem:[%s1778_s4 + $0x108] sm:$0xff]  ;;  %v1364_v39 = vcombine.low %v477_v33, %v481_v34  ;;  %v491_v28 = vld [vmem:[%s1778_s4 + $0x1b8] sm:$0xff] }
  0x15   : > { %823 = vmatpush1.bf16.msra.mxu1 %v1370_v10  ;;  %v464_v19 = vld [vmem:[%s1778_s4 + $0xe0] sm:$0xff]  ;;  %1399 = vmatprep.subr.bf16.mxu0 %v1465_v1  ;;  %v473_v38 = vld [vmem:[%s1778_s4 + $0x128] sm:$0xff]  ;;  %v499_v10 = vld [vmem:[%s1778_s4 + $0x1f8] sm:$0xff]  ;;  %v1382_v11 = vcombine.low %v494_v6, %v498_v7  ;;  %v1467_v14 = vmov 0  }
  0x16   : > { %824 = vmatprep.subr.bf16.mxu1 %v1363_v13  ;;  %v1347_v24 = vcombine.high %v460_v18, %v464_v19  ;;  %v1439_v25 = vld [vmem:[%s320_s20] sm:$0xff]   ;;  %v1346_v27 = vcombine.low %v460_v18, %v464_v19  ;;  %v1357_v40 = vcombine.high %v469_v37, %v473_v38  ;;  %v461_v41 = vld [vmem:[%s1778_s4 + $0xc8] sm:$0xff]  ;;  %v1356_v43 = vcombine.low %v469_v37, %v473_v38  ;;  %v478_v34 = vld [vmem:[%s1778_s4 + $0x150] sm:$0xff] }
  0x17   : > { %v1440_v30 = vld [vmem:[%s314_s9] sm:$0xff]   ;;  %v465_v42 = vld [vmem:[%s1778_s4 + $0xe8] sm:$0xff]  ;;  %v1384_v12 = vcombine.low %v495_v8, %v499_v10  ;;  %v1385_v13 = vcombine.high %v495_v8, %v499_v10  ;;  %852 = vmatprep.mubr.bf16.mxu1 %v1467_v14  ;;  %v483_v37 = vld [vmem:[%s1778_s4 + $0x178] sm:$0xff] }
  0x18   : > { %1400 = vmatpush3.bf16.msra.mxu0 %v1438_v20  ;;  %v1349_v44 = vcombine.high %v461_v41, %v465_v42  ;;  %v1348_v45 = vcombine.low %v461_v41, %v465_v42  ;;  %v452_v46 = vld [vmem:[%s1778_s4 + $0x80] sm:$0xff]  ;;  %v453_v48 = vld [vmem:[%s1778_s4 + $0x88] sm:$0xff]  ;;  %v470_v42 = vld [vmem:[%s1778_s4 + $0x110] sm:$0xff] }
  0x19   : > { %825 = vmatpush1.bf16.msra.mxu1 %v1362_v16  ;;  %1401 = vmatprep.subr.bf16.mxu0 %v1465_v1  ;;  %v456_v47 = vld [vmem:[%s1778_s4 + $0xa0] sm:$0xff]  ;;  %v457_v50 = vld [vmem:[%s1778_s4 + $0xa8] sm:$0xff]  ;;  %v438_v10 = vld [vmem:[%s1778_s4 + $0x10] sm:$0xff] }
  0x1a   : > { %826 = vmatprep.subr.bf16.mxu1 %v1355_v17  ;;  %v1339_v49 = vcombine.high %v452_v46, %v456_v47  ;;  %v1340_v51 = vcombine.low %v453_v48, %v457_v50  ;;  %v1341_v52 = vcombine.high %v453_v48, %v457_v50  ;;  %v1338_v53 = vcombine.low %v452_v46, %v456_v47  ;;  %v444_v54 = vld [vmem:[%s1778_s4 + $0x40] sm:$0xff]  ;;  %v445_v57 = vld [vmem:[%s1778_s4 + $0x48] sm:$0xff]  ;;  %v462_v50 = vld [vmem:[%s1778_s4 + $0xd0] sm:$0xff] }
  0x1b   : > { %v448_v55 = vld [vmem:[%s1778_s4 + $0x60] sm:$0xff]  ;;  %v449_v58 = vld [vmem:[%s1778_s4 + $0x68] sm:$0xff] }
  0x1c   : > { %1402 = vmatpush3.bf16.msra.mxu0 %v1439_v25  ;;  %v1331_v56 = vcombine.high %v444_v54, %v448_v55  ;;  %v1332_v59 = vcombine.low %v445_v57, %v449_v58  ;;  %v1333_v60 = vcombine.high %v445_v57, %v449_v58  ;;  %v1330_v61 = vcombine.low %v444_v54, %v448_v55  ;;  %v436_v62 = vld [vmem:[%s1778_s4] sm:$0xff]  ;;  %v437_v0 = vld [vmem:[%s1778_s4 + $0x8] sm:$0xff]  ;;  %v486_v25 = vld [vmem:[%s1778_s4 + $0x190] sm:$0xff] }
  0x1d   : > { %827 = vmatpush1.bf16.msra.mxu1 %v1354_v21  ;;  %863 = vmatprep.subr.bf16.mxu0 %v1381_v26  ;;  %v440_v63 = vld [vmem:[%s1778_s4 + $0x20] sm:$0xff]  ;;  %v441_v2 = vld [vmem:[%s1778_s4 + $0x28] sm:$0xff]  ;;  %v490_v26 = vld [vmem:[%s1778_s4 + $0x1b0] sm:$0xff] }
  0x1e   : > { %828 = vmatprep.subr.bf16.mxu1 %v1347_v24  ;;  %v1323_v1 = vcombine.high %v436_v62, %v440_v63  ;;  %v1324_v3 = vcombine.low %v437_v0, %v441_v2  ;;  %v1325_v4 = vcombine.high %v437_v0, %v441_v2  ;;  %v1322_v5 = vcombine.low %v436_v62, %v440_v63  ;;  %v1320_v15 = vld [vmem:[%s1776_s2] ss:$0 sm:$0xff]  ;;  %v454_v58 = vld [vmem:[%s1778_s4 + $0x90] sm:$0xff] }
  0x1f   : > { %1404 = vmatmul.mubr.msk.bf16.vlgmr.msra.gmra.mxu0 %vm370_vm1, %v1440_v30  ;;  %v1321_v18 = vld [vmem:[%s1777_s3] ss:$0 sm:$0xff]  ;;  %v1374_v38 = vcombine.low %v486_v25, %v490_v26  ;;  %v446_v2 = vld [vmem:[%s1778_s4 + $0x50] sm:$0xff] }
  0x20   : > { %864 = vmatpush1.bf16.msra.mxu0 %v1380_v31  ;;  %895 = vmatprep.mubr.bf16.mxu0 %v1467_v14 }
  0x21   : > { %829 = vmatpush1.bf16.msra.mxu1 %v1346_v27  ;;  %865 = vmatprep.subr.bf16.mxu0 %v1373_v32  ;;  %v487_v27 = vld [vmem:[%s1778_s4 + $0x198] sm:$0xff]  ;;  %v1375_v32 = vcombine.high %v486_v25, %v490_v26 }
  0x22   : > { %830 = vmatprep.subr.bf16.mxu1 %v1339_v49  ;;  %v1377_v33 = vcombine.high %v487_v27, %v491_v28 }
  0x24   : > { %866 = vmatpush1.bf16.msra.mxu0 %v1372_v35  ;;  %v482_v35 = vld [vmem:[%s1778_s4 + $0x170] sm:$0xff] }
  0x25   : > { %867 = vmatprep.subr.bf16.mxu0 %v1365_v36  ;;  %831 = vmatpush1.bf16.msra.mxu1 %v1338_v53  ;;  %v479_v36 = vld [vmem:[%s1778_s4 + $0x158] sm:$0xff]  ;;  %v1366_v46 = vcombine.low %v478_v34, %v482_v35 }
  0x26   : > { %832 = vmatprep.subr.bf16.mxu1 %v1331_v56  ;;  %v1369_v41 = vcombine.high %v479_v36, %v483_v37  ;;  %v1368_v47 = vcombine.low %v479_v36, %v483_v37  ;;  %v467_v53 = vld [vmem:[%s1778_s4 + $0xf8] sm:$0xff] }
  0x28   : > { %868 = vmatpush1.bf16.msra.mxu0 %v1364_v39  ;;  %v1376_v39 = vcombine.low %v487_v27, %v491_v28 }
  0x29   : > { %869 = vmatprep.subr.bf16.mxu0 %v1357_v40  ;;  %833 = vmatpush1.bf16.msra.mxu1 %v1330_v61  ;;  %v1367_v40 = vcombine.high %v478_v34, %v482_v35  ;;  %v459_v61 = vld [vmem:[%s1778_s4 + $0xb8] sm:$0xff] }
  0x2a   : > { %834 = vmatprep.subr.bf16.mxu1 %v1323_v1 }
  0x2c   : > { %870 = vmatpush1.bf16.msra.mxu0 %v1356_v43  ;;  %v474_v43 = vld [vmem:[%s1778_s4 + $0x130] sm:$0xff] }
  0x2d   : > { %871 = vmatprep.subr.bf16.mxu0 %v1349_v44  ;;  %835 = vmatpush1.bf16.msra.mxu1 %v1322_v5  ;;  %v471_v44 = vld [vmem:[%s1778_s4 + $0x118] sm:$0xff]  ;;  %v1359_v48 = vcombine.high %v470_v42, %v474_v43  ;;  %v1358_v54 = vcombine.low %v470_v42, %v474_v43 }
  0x2e   : > { %906 = vmatprep.subr.bf16.mxu1 %v1383_v9  ;;  %v451_v5 = vld [vmem:[%s1778_s4 + $0x78] sm:$0xff] }
  0x30   : > { %872 = vmatpush1.bf16.msra.mxu0 %v1348_v45  ;;  %v475_v45 = vld [vmem:[%s1778_s4 + $0x138] sm:$0xff] }
  0x31   : > { %873 = vmatprep.subr.bf16.mxu0 %v1341_v52  ;;  %v1361_v49 = vcombine.high %v471_v44, %v475_v45  ;;  %v463_v52 = vld [vmem:[%s1778_s4 + $0xd8] sm:$0xff]  ;;  %v1360_v55 = vcombine.low %v471_v44, %v475_v45 }
  0x32   : > { %v1353_v57 = vcombine.high %v463_v52, %v467_v53  ;;  %v1352_v63 = vcombine.low %v463_v52, %v467_v53 }
  0x34   : > { %874 = vmatpush1.bf16.msra.mxu0 %v1340_v51  ;;  %v466_v51 = vld [vmem:[%s1778_s4 + $0xf0] sm:$0xff] }
  0x35   : > { %875 = vmatprep.subr.bf16.mxu0 %v1333_v60  ;;  %v1351_v56 = vcombine.high %v462_v50, %v466_v51  ;;  %v455_v60 = vld [vmem:[%s1778_s4 + $0x98] sm:$0xff]  ;;  %v1350_v62 = vcombine.low %v462_v50, %v466_v51 }
  0x36   : > { %v1345_v1 = vcombine.high %v455_v60, %v459_v61  ;;  %v1344_v7 = vcombine.low %v455_v60, %v459_v61 }
  0x38   : > { %876 = vmatpush1.bf16.msra.mxu0 %v1332_v59  ;;  %v458_v59 = vld [vmem:[%s1778_s4 + $0xb0] sm:$0xff] }
  0x39   : > { %877 = vmatprep.subr.bf16.mxu0 %v1325_v4  ;;  %v1343_v0 = vcombine.high %v454_v58, %v458_v59  ;;  %v447_v4 = vld [vmem:[%s1778_s4 + $0x58] sm:$0xff]  ;;  %v1342_v6 = vcombine.low %v454_v58, %v458_v59 }
  0x3a   : > { %v1337_v9 = vcombine.high %v447_v4, %v451_v5 }
  0x3c   : > { %878 = vmatpush1.bf16.msra.mxu0 %v1324_v3  ;;  %v450_v3 = vld [vmem:[%s1778_s4 + $0x70] sm:$0xff] }
  0x3d   : > { %949 = vmatprep.subr.bf16.mxu0 %v1385_v13  ;;  %v1335_v8 = vcombine.high %v446_v2, %v450_v3  ;;  %v443_v13 = vld [vmem:[%s1778_s4 + $0x38] sm:$0xff] }
  0xdf   : > { %v408_v16 = vpop.f32.mrf.mxu0 }
  0xe0   : > { %v422_v17 = vmul.f32 %v1320_v15, %v408_v16 }
  0xe1   : > { %v1405_v19 = vpop.f32.mrf.mxu0 }
  0xe2   : > { %v431_v21 = vadd.f32 %v1321_v18, %v422_v17 }
  0xe3   : > { %v411_v20 = vpop.f32.mrf.mxu0 }
  0xe4   : > { %v423_v22 = vmul.f32 %v1320_v15, %v411_v20  ;;  %v433_v29 = vmax.f32 %v431_v21, 0.0  ;;  %v1336_v15 = vcombine.low %v447_v4, %v451_v5 }
  0xe5   : > { %v1406_v23 = vpop.f32.mrf.mxu0 }
  0xe6   : > { %v432_v24 = vadd.f32 %v1321_v18, %v423_v22  ;;  %v994_v22 = vlaneseq }
  0xe8   : > { %v434_v30 = vmax.f32 %v432_v24, 0.0  ;;  %v1743_v25 = vshrl.u32 %v994_v22, 7 }
  0xea   : > { %v1665_v31 = vpack.c.bf16 %v434_v30, %v433_v29  ;;  %v1000_v28 = vsub.s32 1, %v1743_v25  ;;  %v1008_v29 = vsub.s32 3, %v1743_v25  ;;  %v996_v30 = vsub.s32 0, %v1743_v25 }
  0xec   : > { %853 = vmatmul.mubr.bf16.vlgmr.msra.gmra.mxu1 %v1665_v31  ;;  %896 = vmatmul.mubr.bf16.vlgmr.msra.gmra.mxu0 %v1665_v31 }
  0xed   : > { %907 = vmatpush1.bf16.msra.mxu1 %v1382_v11  ;;  %950 = vmatpush1.bf16.msra.mxu0 %v1384_v12  ;;  %v442_v11 = vld [vmem:[%s1778_s4 + $0x30] sm:$0xff]  ;;  %v439_v12 = vld [vmem:[%s1778_s4 + $0x18] sm:$0xff] }
  0xee   : > { %908 = vmatprep.subr.bf16.mxu1 %v1375_v32  ;;  %951 = vmatprep.subr.bf16.mxu0 %v1377_v33  ;;  %v1327_v16 = vcombine.high %v438_v10, %v442_v11  ;;  %v1329_v17 = vcombine.high %v439_v12, %v443_v13  ;;  %v1326_v18 = vcombine.low %v438_v10, %v442_v11  ;;  %v1004_v32 = vsub.s32 2, %v1743_v25 }
  0xef   : > { %938 = vmatprep.mubr.bf16.mxu1 %v1467_v14  ;;  %981 = vmatprep.mubr.bf16.mxu0 %v1467_v14  ;;  %v1334_v14 = vcombine.low %v446_v2, %v450_v3  ;;  %v1328_v19 = vcombine.low %v439_v12, %v443_v13  ;;  %v1012_v2 = vsub.s32 4, %v1743_v25  ;;  %v1020_v3 = vsub.s32 6, %v1743_v25 }
  0xf1   : > { %909 = vmatpush1.bf16.msra.mxu1 %v1374_v38  ;;  %952 = vmatpush1.bf16.msra.mxu0 %v1376_v39  ;;  %v1050_v38 = vld [vmem:[%s1780_s6] sm:$0xff] }
  0xf2   : > { %910 = vmatprep.subr.bf16.mxu1 %v1367_v40  ;;  %953 = vmatprep.subr.bf16.mxu0 %v1369_v41  ;;  %v1059_v42 = vrot.slane %v1050_v38, %v1000_v28  ;;  %v1067_v43 = vrot.slane %v1050_v38, %v1008_v29 }
  0xf5   : > { %911 = vmatpush1.bf16.msra.mxu1 %v1366_v46  ;;  %954 = vmatpush1.bf16.msra.mxu0 %v1368_v47 }
  0xf6   : > { %912 = vmatprep.subr.bf16.mxu1 %v1359_v48  ;;  %955 = vmatprep.subr.bf16.mxu0 %v1361_v49  ;;  %v1055_v48 = vrot.slane %v1050_v38, %v996_v30  ;;  %v1063_v49 = vrot.slane %v1050_v38, %v1004_v32 }
  0xf9   : > { %913 = vmatpush1.bf16.msra.mxu1 %v1358_v54  ;;  %956 = vmatpush1.bf16.msra.mxu0 %v1360_v55 }
  0xfa   : > { %914 = vmatprep.subr.bf16.mxu1 %v1351_v56  ;;  %957 = vmatprep.subr.bf16.mxu0 %v1353_v57 }
  0xfd   : > { %915 = vmatpush1.bf16.msra.mxu1 %v1350_v62  ;;  %958 = vmatpush1.bf16.msra.mxu0 %v1352_v63 }
  0xfe   : > { %916 = vmatprep.subr.bf16.mxu1 %v1343_v0  ;;  %959 = vmatprep.subr.bf16.mxu0 %v1345_v1 }
 0x101   : > { %917 = vmatpush1.bf16.msra.mxu1 %v1342_v6  ;;  %960 = vmatpush1.bf16.msra.mxu0 %v1344_v7  ;;  %v1016_v6 = vsub.s32 5, %v1743_v25  ;;  %v1024_v7 = vsub.s32 7, %v1743_v25 }
 0x102   : > { %918 = vmatprep.subr.bf16.mxu1 %v1335_v8  ;;  %961 = vmatprep.subr.bf16.mxu0 %v1337_v9 }
 0x105   : > { %919 = vmatpush1.bf16.msra.mxu1 %v1334_v14  ;;  %962 = vmatpush1.bf16.msra.mxu0 %v1336_v15 }
 0x106   : > { %920 = vmatprep.subr.bf16.mxu1 %v1327_v16  ;;  %963 = vmatprep.subr.bf16.mxu0 %v1329_v17 }
 0x109   : > { %921 = vmatpush1.bf16.msra.mxu1 %v1326_v18  ;;  %964 = vmatpush1.bf16.msra.mxu0 %v1328_v19  ;;  %v1071_v18 = vrot.slane %v1050_v38, %v1012_v2  ;;  %v1079_v19 = vrot.slane %v1050_v38, %v1020_v3 }
 0x10c   : > { %939 = vmatmul.mubr.bf16.vlgmr.msra.gmra.mxu1 %v1665_v31  ;;  %982 = vmatmul.mubr.bf16.vlgmr.msra.gmra.mxu0 %v1665_v31  ;;  %v992_v31 = vld [vmem:[%s1779_s5] sm:$0xff] }
 0x10d   : > { %v1001_v35 = vrot.slane %v992_v31, %v1000_v28  ;;  %v1009_v36 = vrot.slane %v992_v31, %v1008_v29  ;;  %v997_v37 = vrot.slane %v992_v31, %v996_v30  ;;  %v1005_v39 = vrot.slane %v992_v31, %v1004_v32 }
 0x10e   : > { %v1013_v10 = vrot.slane %v992_v31, %v1012_v2  ;;  %v1021_v11 = vrot.slane %v992_v31, %v1020_v3  ;;  %v1017_v16 = vrot.slane %v992_v31, %v1016_v6  ;;  %v1025_v17 = vrot.slane %v992_v31, %v1024_v7 }
 0x10f   : > { %v1083_v28 = vrot.slane %v1050_v38, %v1024_v7 }
 0x1ac   : > { %v854_v20 = vpop.f32.mrf.mxu1  ;;  %v897_v21 = vpop.f32.mrf.mxu0 }
 0x1ad   : > { %v1034_v50 = vmul.f32 %v997_v37, %v854_v20  ;;  %v1036_v51 = vmul.f32 %v1005_v39, %v897_v21 }
 0x1ae   : > { %v856_v23 = vpop.f32.mrf.mxu1  ;;  %v899_v24 = vpop.f32.mrf.mxu0 }
 0x1af   : > { %v1035_v44 = vmul.f32 %v1001_v35, %v856_v23  ;;  %v1037_v45 = vmul.f32 %v1009_v36, %v899_v24  ;;  %v1092_v58 = vadd.f32 %v1055_v48, %v1034_v50  ;;  %v1094_v59 = vadd.f32 %v1063_v49, %v1036_v51 }
 0x1b0   : > { %v858_v26 = vpop.f32.mrf.mxu1  ;;  %v901_v27 = vpop.f32.mrf.mxu0 }
 0x1b1   : > { %v1042_v46 = vmul.f32 %v997_v37, %v858_v26  ;;  %v1044_v47 = vmul.f32 %v1005_v39, %v901_v27  ;;  %v1093_v54 = vadd.f32 %v1059_v42, %v1035_v44  ;;  %v1095_v55 = vadd.f32 %v1067_v43, %v1037_v45 }
 0x1b2   : > { %v860_v33 = vpop.f32.mrf.mxu1  ;;  %v903_v34 = vpop.f32.mrf.mxu0  ;;  %v1075_v27 = vrot.slane %v1050_v38, %v1016_v6 }
 0x1b3   : > { %v1043_v40 = vmul.f32 %v1001_v35, %v860_v33  ;;  %v1045_v41 = vmul.f32 %v1009_v36, %v903_v34  ;;  %v1100_v56 = vadd.f32 %v1055_v48, %v1042_v46  ;;  %v1102_v57 = vadd.f32 %v1063_v49, %v1044_v47 }
 0x1b5   : > { %v1101_v52 = vadd.f32 %v1059_v42, %v1043_v40  ;;  %v1103_v53 = vadd.f32 %v1067_v43, %v1045_v41  ;;  %v1109_v62 = vmax.f32 %v1092_v58, %v1100_v56  ;;  %v1123_v63 = vmax.f32 %v1094_v59, %v1102_v57 }
 0x1b6   : > { %v1468_v56 = vmov 1966171168  }
 0x1b7   : > { %v1116_v60 = vmax.f32 %v1093_v54, %v1101_v52  ;;  %v1130_v61 = vmax.f32 %v1095_v55, %v1103_v53  ;;  %v1110_v4 = vrot.slane %v1109_v62, 4  ;;  %v1124_v5 = vrot.slane %v1123_v63, 4 }
 0x1b8   : > { %v1178_v57 = vunpack.c.l.s4 %v1468_v56 }
 0x1b9   : > { %v1117_v0 = vrot.slane %v1116_v60, 4  ;;  %v1131_v1 = vrot.slane %v1130_v61, 4  ;;  %v1111_v12 = vmax.f32 %v1109_v62, %v1110_v4  ;;  %v1125_v13 = vmax.f32 %v1123_v63, %v1124_v5 }
 0x1ba   : > { %v1179_v6 = vunpack.c.0.s8 %v1178_v57 }
 0x1bb   : > { %v1118_v8 = vmax.f32 %v1116_v60, %v1117_v0  ;;  %v1132_v9 = vmax.f32 %v1130_v61, %v1131_v1  ;;  %v1112_v29 = vrot.slane %v1111_v12, 2  ;;  %v1126_v30 = vrot.slane %v1125_v13, 2 }
 0x1bd   : > { %v1119_v20 = vrot.slane %v1118_v8, 2  ;;  %v1133_v21 = vrot.slane %v1132_v9, 2  ;;  %v1113_v48 = vmax.f32 %v1111_v12, %v1112_v29  ;;  %v1127_v38 = vmax.f32 %v1125_v13, %v1126_v30 }
 0x1bf   : > { %v1120_v39 = vmax.f32 %v1118_v8, %v1119_v20  ;;  %v1134_v31 = vmax.f32 %v1132_v9, %v1133_v21  ;;  %v1114_v63 = vrot.slane %v1113_v48, 1  ;;  %v1128_v0 = vrot.slane %v1127_v38, 1 }
 0x1c1   : > { %v1121_v55 = vrot.slane %v1120_v39, 1  ;;  %v1135_v58 = vrot.slane %v1134_v31, 1  ;;  %v1115_v12 = vmax.f32 %v1113_v48, %v1114_v63  ;;  %v1129_v13 = vmax.f32 %v1127_v38, %v1128_v0 }
 0x1c3   : > { %v1122_v5 = vmax.f32 %v1120_v39, %v1121_v55  ;;  %v1136_v7 = vmax.f32 %v1134_v31, %v1135_v58 }
 0x1c5   : > { %v1174_v20 = vcombine.low %v1129_v13, %v1136_v7 }
 0x1cc   : > { %v940_v14 = vpop.f32.mrf.mxu1  ;;  %v983_v15 = vpop.f32.mrf.mxu0 }
 0x1cd   : > { %v1038_v22 = vmul.f32 %v1013_v10, %v940_v14  ;;  %v1040_v23 = vmul.f32 %v1021_v11, %v983_v15 }
 0x1ce   : > { %v942_v24 = vpop.f32.mrf.mxu1  ;;  %v985_v26 = vpop.f32.mrf.mxu0 }
 0x1cf   : > { %v1039_v32 = vmul.f32 %v1017_v16, %v942_v24  ;;  %v1041_v33 = vmul.f32 %v1025_v17, %v985_v26  ;;  %v1096_v40 = vadd.f32 %v1071_v18, %v1038_v22  ;;  %v1098_v41 = vadd.f32 %v1079_v19, %v1040_v23 }
 0x1d0   : > { %v944_v34 = vpop.f32.mrf.mxu1  ;;  %v987_v35 = vpop.f32.mrf.mxu0 }
 0x1d1   : > { %v1046_v36 = vmul.f32 %v1013_v10, %v944_v34  ;;  %v1048_v37 = vmul.f32 %v1021_v11, %v987_v35  ;;  %v1097_v49 = vadd.f32 %v1075_v27, %v1039_v32  ;;  %v1099_v50 = vadd.f32 %v1083_v28, %v1041_v33 }
 0x1d2   : > { %v946_v42 = vpop.f32.mrf.mxu1  ;;  %v989_v43 = vpop.f32.mrf.mxu0 }
 0x1d3   : > { %v1104_v44 = vadd.f32 %v1071_v18, %v1046_v36  ;;  %v1106_v45 = vadd.f32 %v1079_v19, %v1048_v37  ;;  %v1047_v46 = vmul.f32 %v1017_v16, %v946_v42  ;;  %v1049_v47 = vmul.f32 %v1025_v17, %v989_v43 }
 0x1d4   : > { %v1173_v18 = vcombine.low %v1115_v12, %v1122_v5  ;;  %v1182_v19 = vsub.s32 %v1179_v6, %v1743_v25 }
 0x1d5   : > { %v1137_v51 = vmax.f32 %v1096_v40, %v1104_v44  ;;  %v1151_v52 = vmax.f32 %v1098_v41, %v1106_v45  ;;  %v1105_v53 = vadd.f32 %v1075_v27, %v1047_v46  ;;  %v1107_v54 = vadd.f32 %v1083_v28, %v1049_v47 }
 0x1d6   : > { %v1183_v28 = vrot.slane %v1173_v18, %v1182_v19  ;;  %v1190_v29 = vrot.slane %v1174_v20, %v1182_v19 }
 0x1d7   : > { %v1138_v59 = vrot.slane %v1137_v51, 4  ;;  %v1152_v60 = vrot.slane %v1151_v52, 4  ;;  %v1144_v61 = vmax.f32 %v1097_v49, %v1105_v53  ;;  %v1158_v62 = vmax.f32 %v1099_v50, %v1107_v54 }
 0x1d8   : > { %v1205_v37 = vcombine.low %v1183_v28, %v1190_v29 }
 0x1d9   : > { %v1139_v1 = vmax.f32 %v1137_v51, %v1138_v59  ;;  %v1153_v2 = vmax.f32 %v1151_v52, %v1152_v60  ;;  %v1145_v3 = vrot.slane %v1144_v61, 4  ;;  %v1159_v4 = vrot.slane %v1158_v62, 4 }
 0x1da   : > { %v1213_v40 = vrot.slane %v1205_v37, %v1182_v19 }
 0x1db   : > { %v1140_v8 = vrot.slane %v1139_v1, 2  ;;  %v1154_v9 = vrot.slane %v1153_v2, 2  ;;  %v1146_v10 = vmax.f32 %v1144_v61, %v1145_v3  ;;  %v1160_v11 = vmax.f32 %v1158_v62, %v1159_v4 }
 0x1dd   : > { %v1141_v14 = vmax.f32 %v1139_v1, %v1140_v8  ;;  %v1155_v15 = vmax.f32 %v1153_v2, %v1154_v9  ;;  %v1147_v16 = vrot.slane %v1146_v10, 2  ;;  %v1161_v17 = vrot.slane %v1160_v11, 2 }
 0x1df   : > { %v1142_v21 = vrot.slane %v1141_v14, 1  ;;  %v1156_v22 = vrot.slane %v1155_v15, 1  ;;  %v1148_v23 = vmax.f32 %v1146_v10, %v1147_v16  ;;  %v1162_v24 = vmax.f32 %v1160_v11, %v1161_v17 }
 0x1e1   : > { %v1149_v26 = vrot.slane %v1148_v23, 1  ;;  %v1163_v27 = vrot.slane %v1162_v24, 1  ;;  %v1143_v30 = vmax.f32 %v1141_v14, %v1142_v21  ;;  %v1157_v32 = vmax.f32 %v1155_v15, %v1156_v22 }
 0x1e3   : > { %v1150_v33 = vmax.f32 %v1148_v23, %v1149_v26  ;;  %v1164_v34 = vmax.f32 %v1162_v24, %v1163_v27 }
 0x1e5   : > { %v1175_v35 = vcombine.low %v1143_v30, %v1150_v33  ;;  %v1176_v36 = vcombine.low %v1157_v32, %v1164_v34 }
 0x1e7   : > { %v1197_v39 = vrot.slane %v1175_v35, %v1182_v19  ;;  %v1204_v31 = vrot.slane %v1176_v36, %v1182_v19 }
 0x1e9   : > { %v1206_v25 = vcombine.low %v1197_v39, %v1204_v31 }
 0x1eb   : > { %v1220_v41 = vrot.slane %v1206_v25, %v1182_v19 }
 0x1ed   : > { %v1221_v42 = vcombine.low %v1213_v40, %v1220_v41 }
 0x1ef   : > { %1224 = vst [vmem:[%s324_s29] sm:$0xff] %v1221_v42 }
 0x1f0 PF: > { %s17_s26 = sadd.s32 1, %s1463_s26   ;;  %s1782_s24 = smov %s1459_s25 }
 0x1f1   : > { %p14_p5 = scmp.ge.s32.totalorder %s17_s26, 4   ;;  %s1783_s25 = smov %s1785_s27 }
 0x1f3   :  { %16 = sbr.rel (!%p14_p5) target bundleno = 2 (0x2), region = 85 }

// kernel: get_model_forward.13
= control target key start
LH: loop header
LB: loop body
LE: loop exit
PB: predicated region body
PF: predicated region fallthrough
CT: control target
= control target key end

     0   :  { %v3598_v36 = vmov 1983009808   ;;  %v42_v38 = vlaneseq  ;;  %s4775_s0 = inlined_call_operand.vmem [shape: f32[2,1024], index: 0, kind: input, shape index: {}]   ;;  %s4776_s1 = inlined_call_operand.vmem [shape: bf16[1024,512], index: 1, kind: input, shape index: {}]   ;;  %s4777_s2 = inlined_call_operand.vmem [shape: f32[1,512], index: 2, kind: input, shape index: {}]   ;;  %s4778_s3 = inlined_call_operand.vmem [shape: f32[1,512], index: 3, kind: input, shape index: {}]   ;;  %s4779_s4 = inlined_call_operand.vmem [shape: bf16[512,256], index: 4, kind: input, shape index: {}]   ;;  %s4780_s5 = inlined_call_operand.vmem [shape: f32[1,256], index: 5, kind: input, shape index: {}]   ;;  %s4781_s6 = inlined_call_operand.vmem [shape: f32[1,256], index: 6, kind: input, shape index: {}]   ;;  %s4782_s7 = inlined_call_operand.vmem [shape: bf16[256,40], index: 7, kind: input, shape index: {}]   ;;  %s4783_s8 = inlined_call_operand.vmem [shape: f32[1,40], index: 8, kind: input, shape index: {}]   ;;  %s4784_s9 = inlined_call_operand.hbm [shape: f32[2,40], index: 9, kind: output, shape index: {}]  }
   0x1   :  { %v3074_v0 = vld [vmem:[%s4776_s1 + $0xe4] ss:$16 sps:$4 sm:$0xff]   ;;  %v3078_v2 = vld [vmem:[%s4776_s1 + $0xe0] ss:$16 sps:$4 sm:$0xff]   ;;  %v40_v37 = vunpack.c.l.s4 %v3598_v36 }
   0x2   :  { %v3076_v1 = vld [vmem:[%s4776_s1 + $0x2e4] ss:$16 sps:$4 sm:$0xff]   ;;  %1624 = vmatprep.subr.bf16.mxu0 %v3074_v0  ;;  %v3079_v3 = vld [vmem:[%s4776_s1 + $0x2e0] ss:$16 sps:$4 sm:$0xff]   ;;  %v3767_v43 = vshrl.u32 %v42_v38, 7 }
   0x3   :  { %1665 = vmatprep.subr.bf16.mxu1 %v3076_v1  ;;  %v3080_v4 = vld [vmem:[%s4776_s1 + $0xc4] ss:$16 sps:$4 sm:$0xff]   ;;  %1625 = vmatpush1.bf16.msra.mxu0 %v3078_v2  ;;  %v3084_v6 = vld [vmem:[%s4776_s1 + $0xc0] ss:$16 sps:$4 sm:$0xff]   ;;  %v41_v42 = vunpack.c.0.s8 %v40_v37 }
   0x4   :  { %1666 = vmatpush1.bf16.msra.mxu1 %v3079_v3  ;;  %v3082_v5 = vld [vmem:[%s4776_s1 + $0x2c4] ss:$16 sps:$4 sm:$0xff]   ;;  %1626 = vmatprep.subr.bf16.mxu0 %v3080_v4  ;;  %v3085_v7 = vld [vmem:[%s4776_s1 + $0x2c0] ss:$16 sps:$4 sm:$0xff]  }
   0x5   :  { %1667 = vmatprep.subr.bf16.mxu1 %v3082_v5  ;;  %v3086_v8 = vld [vmem:[%s4776_s1 + $0xa4] ss:$16 sps:$4 sm:$0xff]   ;;  %v3090_v10 = vld [vmem:[%s4776_s1 + $0xa0] ss:$16 sps:$4 sm:$0xff]   ;;  %v3785_v49 = vsub.s32 %v41_v42, %v3767_v43  ;;  %v35_v42 = vld [vmem:[%s4775_s0 + $0x8] sm:$0xff] }
   0x6   :  { %v3088_v9 = vld [vmem:[%s4776_s1 + $0x2a4] ss:$16 sps:$4 sm:$0xff]   ;;  %v3091_v11 = vld [vmem:[%s4776_s1 + $0x2a0] ss:$16 sps:$4 sm:$0xff]  }
   0x7   :  { %1627 = vmatpush1.bf16.msra.mxu0 %v3084_v6  ;;  %v3092_v12 = vld [vmem:[%s4776_s1 + $0x84] ss:$16 sps:$4 sm:$0xff]   ;;  %v3096_v14 = vld [vmem:[%s4776_s1 + $0x80] ss:$16 sps:$4 sm:$0xff]  }
   0x8   :  { %1668 = vmatpush1.bf16.msra.mxu1 %v3085_v7  ;;  %1628 = vmatprep.subr.bf16.mxu0 %v3086_v8  ;;  %v3094_v13 = vld [vmem:[%s4776_s1 + $0x284] ss:$16 sps:$4 sm:$0xff]   ;;  %v3097_v15 = vld [vmem:[%s4776_s1 + $0x280] ss:$16 sps:$4 sm:$0xff]  }
   0x9   :  { %1669 = vmatprep.subr.bf16.mxu1 %v3088_v9  ;;  %v3098_v16 = vld [vmem:[%s4776_s1 + $0x64] ss:$16 sps:$4 sm:$0xff]   ;;  %v3102_v18 = vld [vmem:[%s4776_s1 + $0x60] ss:$16 sps:$4 sm:$0xff]  }
   0xa   :  { %v3100_v17 = vld [vmem:[%s4776_s1 + $0x264] ss:$16 sps:$4 sm:$0xff]   ;;  %v3103_v19 = vld [vmem:[%s4776_s1 + $0x260] ss:$16 sps:$4 sm:$0xff]  }
   0xb   :  { %1629 = vmatpush1.bf16.msra.mxu0 %v3090_v10  ;;  %v3104_v20 = vld [vmem:[%s4776_s1 + $0x44] ss:$16 sps:$4 sm:$0xff]   ;;  %v3108_v22 = vld [vmem:[%s4776_s1 + $0x40] ss:$16 sps:$4 sm:$0xff]  }
   0xc   :  { %1670 = vmatpush1.bf16.msra.mxu1 %v3091_v11  ;;  %1630 = vmatprep.subr.bf16.mxu0 %v3092_v12  ;;  %v3106_v21 = vld [vmem:[%s4776_s1 + $0x244] ss:$16 sps:$4 sm:$0xff]   ;;  %v3109_v23 = vld [vmem:[%s4776_s1 + $0x240] ss:$16 sps:$4 sm:$0xff]  }
   0xd   :  { %1671 = vmatprep.subr.bf16.mxu1 %v3094_v13  ;;  %v3110_v24 = vld [vmem:[%s4776_s1 + $0x24] ss:$16 sps:$4 sm:$0xff]   ;;  %v3114_v26 = vld [vmem:[%s4776_s1 + $0x20] ss:$16 sps:$4 sm:$0xff]  }
   0xe   :  { %v3112_v25 = vld [vmem:[%s4776_s1 + $0x224] ss:$16 sps:$4 sm:$0xff]   ;;  %v3115_v27 = vld [vmem:[%s4776_s1 + $0x220] ss:$16 sps:$4 sm:$0xff]  }
   0xf   :  { %1631 = vmatpush1.bf16.msra.mxu0 %v3096_v14  ;;  %v3116_v28 = vld [vmem:[%s4776_s1 + $0x4] ss:$16 sps:$4 sm:$0xff]   ;;  %v3120_v30 = vld [vmem:[%s4776_s1] ss:$16 sps:$4 sm:$0xff]  }
  0x10   :  { %1672 = vmatpush1.bf16.msra.mxu1 %v3097_v15  ;;  %1632 = vmatprep.subr.bf16.mxu0 %v3098_v16  ;;  %v3118_v29 = vld [vmem:[%s4776_s1 + $0x204] ss:$16 sps:$4 sm:$0xff]   ;;  %v3121_v31 = vld [vmem:[%s4776_s1 + $0x200] ss:$16 sps:$4 sm:$0xff]  }
  0x11   :  { %1673 = vmatprep.subr.bf16.mxu1 %v3100_v17  ;;  %v3122_v32 = vld [vmem:[%s4776_s1 + $0x1e4] ss:$16 sps:$4 sm:$0xff]   ;;  %v3126_v34 = vld [vmem:[%s4776_s1 + $0x1e0] ss:$16 sps:$4 sm:$0xff]  }
  0x12   :  { %v3124_v33 = vld [vmem:[%s4776_s1 + $0x3e4] ss:$16 sps:$4 sm:$0xff]   ;;  %v3127_v35 = vld [vmem:[%s4776_s1 + $0x3e0] ss:$16 sps:$4 sm:$0xff]  }
  0x13   :  { %1633 = vmatpush1.bf16.msra.mxu0 %v3102_v18  ;;  %v3128_v39 = vld [vmem:[%s4776_s1 + $0x1c4] ss:$16 sps:$4 sm:$0xff]   ;;  %v3132_v41 = vld [vmem:[%s4776_s1 + $0x1c0] ss:$16 sps:$4 sm:$0xff]  }
  0x14   :  { %1674 = vmatpush1.bf16.msra.mxu1 %v3103_v19  ;;  %1634 = vmatprep.subr.bf16.mxu0 %v3104_v20  ;;  %v3130_v40 = vld [vmem:[%s4776_s1 + $0x3c4] ss:$16 sps:$4 sm:$0xff]   ;;  %v3133_v44 = vld [vmem:[%s4776_s1 + $0x3c0] ss:$16 sps:$4 sm:$0xff]  }
  0x15   :  { %1675 = vmatprep.subr.bf16.mxu1 %v3106_v21  ;;  %v3134_v45 = vld [vmem:[%s4776_s1 + $0x1a4] ss:$16 sps:$4 sm:$0xff]   ;;  %v3138_v47 = vld [vmem:[%s4776_s1 + $0x1a0] ss:$16 sps:$4 sm:$0xff]  }
  0x16   :  { %v3136_v46 = vld [vmem:[%s4776_s1 + $0x3a4] ss:$16 sps:$4 sm:$0xff]   ;;  %v3139_v48 = vld [vmem:[%s4776_s1 + $0x3a0] ss:$16 sps:$4 sm:$0xff]  }
  0x17   :  { %1635 = vmatpush1.bf16.msra.mxu0 %v3108_v22  ;;  %v3140_v50 = vld [vmem:[%s4776_s1 + $0x184] ss:$16 sps:$4 sm:$0xff]   ;;  %v3144_v53 = vld [vmem:[%s4776_s1 + $0x180] ss:$16 sps:$4 sm:$0xff]  }
  0x18   :  { %1676 = vmatpush1.bf16.msra.mxu1 %v3109_v23  ;;  %1636 = vmatprep.subr.bf16.mxu0 %v3110_v24  ;;  %v3142_v51 = vld [vmem:[%s4776_s1 + $0x384] ss:$16 sps:$4 sm:$0xff]   ;;  %v3145_v56 = vld [vmem:[%s4776_s1 + $0x380] ss:$16 sps:$4 sm:$0xff]  }
  0x19   :  { %1677 = vmatprep.subr.bf16.mxu1 %v3112_v25  ;;  %v34_v52 = vld [vmem:[%s4775_s0] sm:$0xff] }
  0x1a   :  { %v45_v54 = vrot.slane %v34_v52, %v3785_v49  ;;  %v38_v55 = vcombine.high %v34_v52, %v34_v52  ;;  %v3146_v57 = vld [vmem:[%s4776_s1 + $0x164] ss:$16 sps:$4 sm:$0xff]   ;;  %v3150_v61 = vld [vmem:[%s4776_s1 + $0x160] ss:$16 sps:$4 sm:$0xff]  }
  0x1b   :  { %1637 = vmatpush1.bf16.msra.mxu0 %v3114_v26  ;;  %v3148_v58 = vld [vmem:[%s4776_s1 + $0x364] ss:$16 sps:$4 sm:$0xff]   ;;  %v3151_v0 = vld [vmem:[%s4776_s1 + $0x360] ss:$16 sps:$4 sm:$0xff]  }
  0x1c   :  { %1678 = vmatpush1.bf16.msra.mxu1 %v3115_v27  ;;  %1638 = vmatprep.subr.bf16.mxu0 %v3116_v28  ;;  %v53_v59 = vcombine.high %v45_v54, %v45_v54  ;;  %v52_v60 = vrot.slane %v38_v55, %v3785_v49  ;;  %v3152_v1 = vld [vmem:[%s4776_s1 + $0x144] ss:$16 sps:$4 sm:$0xff]   ;;  %v3156_v4 = vld [vmem:[%s4776_s1 + $0x140] ss:$16 sps:$4 sm:$0xff]   ;;  %v3864_v16 = vpack.c.bf16 %v45_v54, %v45_v54 }
  0x1d   :  { %1679 = vmatprep.subr.bf16.mxu1 %v3118_v29  ;;  %v3154_v2 = vld [vmem:[%s4776_s1 + $0x344] ss:$16 sps:$4 sm:$0xff]   ;;  %v3157_v5 = vld [vmem:[%s4776_s1 + $0x340] ss:$16 sps:$4 sm:$0xff]  }
  0x1e   :  { %v3813_v62 = vpack.c.bf16 %v53_v59, %v53_v59  ;;  %v54_v63 = vcombine.high %v52_v60, %v52_v60  ;;  %v3158_v6 = vld [vmem:[%s4776_s1 + $0x124] ss:$16 sps:$4 sm:$0xff]   ;;  %v3162_v8 = vld [vmem:[%s4776_s1 + $0x120] ss:$16 sps:$4 sm:$0xff]   ;;  %v3866_v17 = vpack.c.bf16 %v52_v60, %v52_v60 }
  0x1f   :  { %1639 = vmatpush1.bf16.msra.mxu0 %v3120_v30  ;;  %v3160_v7 = vld [vmem:[%s4776_s1 + $0x324] ss:$16 sps:$4 sm:$0xff]   ;;  %v3163_v9 = vld [vmem:[%s4776_s1 + $0x320] ss:$16 sps:$4 sm:$0xff]  }
  0x20   :  { %1680 = vmatpush1.bf16.msra.mxu1 %v3121_v31  ;;  %1640 = vmatprep.subr.bf16.mxu0 %v3122_v32  ;;  %v3824_v3 = vpack.c.bf16 %v54_v63, %v54_v63  ;;  %v3164_v10 = vld [vmem:[%s4776_s1 + $0x104] ss:$16 sps:$4 sm:$0xff]   ;;  %v3168_v12 = vld [vmem:[%s4776_s1 + $0x100] ss:$16 sps:$4 sm:$0xff]  }
  0x21   :  { %1681 = vmatprep.subr.bf16.mxu1 %v3124_v33  ;;  %1656 = vmatprep.mubr.bf16.mxu0 %v3813_v62  ;;  %v3166_v11 = vld [vmem:[%s4776_s1 + $0x304] ss:$16 sps:$4 sm:$0xff]   ;;  %v3169_v13 = vld [vmem:[%s4776_s1 + $0x300] ss:$16 sps:$4 sm:$0xff]  }
  0x22   :  { %1697 = vmatprep.mubr.bf16.mxu1 %v3824_v3  ;;  %v3173_v14 = vld [vmem:[%s4776_s1 + $0x4e4] ss:$16 sps:$4 sm:$0xff]   ;;  %v3171_v18 = vld [vmem:[%s4776_s1 + $0x4e0] ss:$16 sps:$4 sm:$0xff]  }
  0x23   :  { %1641 = vmatpush2.bf16.msra.mxu0 %v3126_v34  ;;  %v3176_v15 = vld [vmem:[%s4776_s1 + $0x6e4] ss:$16 sps:$4 sm:$0xff]   ;;  %v3174_v19 = vld [vmem:[%s4776_s1 + $0x6e0] ss:$16 sps:$4 sm:$0xff]  }
  0x24   :  { %1682 = vmatpush2.bf16.msra.mxu1 %v3127_v35  ;;  %1642 = vmatprep.subr.bf16.mxu0 %v3128_v39  ;;  %v3179_v20 = vld [vmem:[%s4776_s1 + $0x4c4] ss:$16 sps:$4 sm:$0xff]   ;;  %v3177_v22 = vld [vmem:[%s4776_s1 + $0x4c0] ss:$16 sps:$4 sm:$0xff]  }
  0x25   :  { %1683 = vmatprep.subr.bf16.mxu1 %v3130_v40  ;;  %v3182_v21 = vld [vmem:[%s4776_s1 + $0x6c4] ss:$16 sps:$4 sm:$0xff]   ;;  %v3180_v23 = vld [vmem:[%s4776_s1 + $0x6c0] ss:$16 sps:$4 sm:$0xff]  }
  0x26   :  { %v3185_v24 = vld [vmem:[%s4776_s1 + $0x4a4] ss:$16 sps:$4 sm:$0xff]   ;;  %v3183_v26 = vld [vmem:[%s4776_s1 + $0x4a0] ss:$16 sps:$4 sm:$0xff]  }
  0x27   :  { %1643 = vmatpush2.bf16.msra.mxu0 %v3132_v41  ;;  %v3188_v25 = vld [vmem:[%s4776_s1 + $0x6a4] ss:$16 sps:$4 sm:$0xff]   ;;  %v3186_v27 = vld [vmem:[%s4776_s1 + $0x6a0] ss:$16 sps:$4 sm:$0xff]  }
  0x28   :  { %1684 = vmatpush2.bf16.msra.mxu1 %v3133_v44  ;;  %1644 = vmatprep.subr.bf16.mxu0 %v3134_v45  ;;  %v3191_v28 = vld [vmem:[%s4776_s1 + $0x484] ss:$16 sps:$4 sm:$0xff]   ;;  %v3189_v30 = vld [vmem:[%s4776_s1 + $0x480] ss:$16 sps:$4 sm:$0xff]   ;;  %v3946_v44 = vrot.slane %v35_v42, %v3785_v49  ;;  %v55_v45 = vcombine.high %v35_v42, %v35_v42  ;;  %v3283_v42 = vld [vmem:[%s4776_s1 + $0x2a8] ss:$16 sps:$4 sm:$0xff]  }
  0x29   :  { %1685 = vmatprep.subr.bf16.mxu1 %v3136_v46  ;;  %v3194_v29 = vld [vmem:[%s4776_s1 + $0x684] ss:$16 sps:$4 sm:$0xff]   ;;  %v3192_v31 = vld [vmem:[%s4776_s1 + $0x680] ss:$16 sps:$4 sm:$0xff]  }
  0x2a   :  { %v3197_v32 = vld [vmem:[%s4776_s1 + $0x464] ss:$16 sps:$4 sm:$0xff]   ;;  %v3195_v34 = vld [vmem:[%s4776_s1 + $0x460] ss:$16 sps:$4 sm:$0xff]  }
  0x2b   :  { %1645 = vmatpush2.bf16.msra.mxu0 %v3138_v47  ;;  %v3200_v33 = vld [vmem:[%s4776_s1 + $0x664] ss:$16 sps:$4 sm:$0xff]   ;;  %v3198_v35 = vld [vmem:[%s4776_s1 + $0x660] ss:$16 sps:$4 sm:$0xff]  }
  0x2c   :  { %1686 = vmatpush2.bf16.msra.mxu1 %v3139_v48  ;;  %1646 = vmatprep.subr.bf16.mxu0 %v3140_v50  ;;  %v3203_v36 = vld [vmem:[%s4776_s1 + $0x444] ss:$16 sps:$4 sm:$0xff]   ;;  %v3201_v38 = vld [vmem:[%s4776_s1 + $0x440] ss:$16 sps:$4 sm:$0xff]   ;;  %v70_v48 = vcombine.high %v3946_v44, %v3946_v44  ;;  %v3957_v50 = vrot.slane %v55_v45, %v3785_v49  ;;  %v3289_v45 = vld [vmem:[%s4776_s1 + $0x288] ss:$16 sps:$4 sm:$0xff]  }
  0x2d   :  { %1687 = vmatprep.subr.bf16.mxu1 %v3142_v51  ;;  %v3206_v37 = vld [vmem:[%s4776_s1 + $0x644] ss:$16 sps:$4 sm:$0xff]   ;;  %v3204_v39 = vld [vmem:[%s4776_s1 + $0x640] ss:$16 sps:$4 sm:$0xff]  }
  0x2e   :  { %v3209_v40 = vld [vmem:[%s4776_s1 + $0x424] ss:$16 sps:$4 sm:$0xff]   ;;  %v3207_v46 = vld [vmem:[%s4776_s1 + $0x420] ss:$16 sps:$4 sm:$0xff]   ;;  %v71_v54 = vcombine.high %v3957_v50, %v3957_v50 }
  0x2f   :  { %1647 = vmatpush2.bf16.msra.mxu0 %v3144_v53  ;;  %v3212_v41 = vld [vmem:[%s4776_s1 + $0x624] ss:$16 sps:$4 sm:$0xff]   ;;  %v3210_v47 = vld [vmem:[%s4776_s1 + $0x620] ss:$16 sps:$4 sm:$0xff]   ;;  %v3965_v53 = vpack.c.bf16 %v70_v48, %v70_v48  ;;  %v3292_v48 = vld [vmem:[%s4776_s1 + $0x68] ss:$16 sps:$4 sm:$0xff]  }
  0x30   :  { %1688 = vmatpush2.bf16.msra.mxu1 %v3145_v56  ;;  %1648 = vmatprep.subr.bf16.mxu0 %v3146_v57  ;;  %v3215_v51 = vld [vmem:[%s4776_s1 + $0x404] ss:$16 sps:$4 sm:$0xff]   ;;  %v3213_v49 = vld [vmem:[%s4776_s1 + $0x400] ss:$16 sps:$4 sm:$0xff]   ;;  %v3975_v56 = vpack.c.bf16 %v71_v54, %v71_v54  ;;  %v3298_v54 = vld [vmem:[%s4776_s1 + $0x48] ss:$16 sps:$4 sm:$0xff]  }
  0x31   :  { %1689 = vmatprep.subr.bf16.mxu1 %v3148_v58  ;;  %v3218_v52 = vld [vmem:[%s4776_s1 + $0x604] ss:$16 sps:$4 sm:$0xff]   ;;  %v3216_v55 = vld [vmem:[%s4776_s1 + $0x600] ss:$16 sps:$4 sm:$0xff]  }
  0x32   :  { %v3221_v57 = vld [vmem:[%s4776_s1 + $0x5e4] ss:$16 sps:$4 sm:$0xff]   ;;  %v3219_v59 = vld [vmem:[%s4776_s1 + $0x5e0] ss:$16 sps:$4 sm:$0xff]  }
  0x33   :  { %1649 = vmatpush2.bf16.msra.mxu0 %v3150_v61  ;;  %v3224_v58 = vld [vmem:[%s4776_s1 + $0x7e4] ss:$16 sps:$4 sm:$0xff]   ;;  %v3222_v60 = vld [vmem:[%s4776_s1 + $0x7e0] ss:$16 sps:$4 sm:$0xff]  }
  0x34   :  { %1690 = vmatpush2.bf16.msra.mxu1 %v3151_v0  ;;  %1650 = vmatprep.subr.bf16.mxu0 %v3152_v1  ;;  %v3227_v61 = vld [vmem:[%s4776_s1 + $0x5c4] ss:$16 sps:$4 sm:$0xff]   ;;  %v3225_v0 = vld [vmem:[%s4776_s1 + $0x5c0] ss:$16 sps:$4 sm:$0xff]  }
  0x35   :  { %1691 = vmatprep.subr.bf16.mxu1 %v3154_v2  ;;  %v3230_v63 = vld [vmem:[%s4776_s1 + $0x7c4] ss:$16 sps:$4 sm:$0xff]   ;;  %v3228_v1 = vld [vmem:[%s4776_s1 + $0x7c0] ss:$16 sps:$4 sm:$0xff]  }
  0x36   :  { %v3233_v2 = vld [vmem:[%s4776_s1 + $0x5a4] ss:$16 sps:$4 sm:$0xff]  }
  0x37   :  { %1651 = vmatpush2.bf16.msra.mxu0 %v3156_v4  ;;  %v3236_v4 = vld [vmem:[%s4776_s1 + $0x7a4] ss:$16 sps:$4 sm:$0xff]  }
  0x38   :  { %1692 = vmatpush2.bf16.msra.mxu1 %v3157_v5  ;;  %1652 = vmatprep.subr.bf16.mxu0 %v3158_v6  ;;  %v3231_v5 = vld [vmem:[%s4776_s1 + $0x5a0] ss:$16 sps:$4 sm:$0xff]  }
  0x39   :  { %1693 = vmatprep.subr.bf16.mxu1 %v3160_v7  ;;  %v3234_v6 = vld [vmem:[%s4776_s1 + $0x7a0] ss:$16 sps:$4 sm:$0xff]   ;;  %v3239_v7 = vld [vmem:[%s4776_s1 + $0x584] ss:$16 sps:$4 sm:$0xff]  }
  0x3b   :  { %1653 = vmatpush2.bf16.msra.mxu0 %v3162_v8  ;;  %v3242_v8 = vld [vmem:[%s4776_s1 + $0x784] ss:$16 sps:$4 sm:$0xff]  }
  0x3c   :  { %1694 = vmatpush2.bf16.msra.mxu1 %v3163_v9  ;;  %1654 = vmatprep.subr.bf16.mxu0 %v3164_v10  ;;  %v3237_v9 = vld [vmem:[%s4776_s1 + $0x580] ss:$16 sps:$4 sm:$0xff]  }
  0x3d   :  { %1695 = vmatprep.subr.bf16.mxu1 %v3166_v11  ;;  %v3240_v10 = vld [vmem:[%s4776_s1 + $0x780] ss:$16 sps:$4 sm:$0xff]   ;;  %v3245_v11 = vld [vmem:[%s4776_s1 + $0x564] ss:$16 sps:$4 sm:$0xff]  }
  0x3f   :  { %1655 = vmatpush2.bf16.msra.mxu0 %v3168_v12  ;;  %v3248_v12 = vld [vmem:[%s4776_s1 + $0x764] ss:$16 sps:$4 sm:$0xff]  }
  0x40   :  { %1696 = vmatpush2.bf16.msra.mxu1 %v3169_v13  ;;  %1706 = vmatprep.subr.bf16.mxu0 %v3173_v14  ;;  %v3243_v13 = vld [vmem:[%s4776_s1 + $0x560] ss:$16 sps:$4 sm:$0xff]  }
  0x41   :  { %1747 = vmatprep.subr.bf16.mxu1 %v3176_v15  ;;  %v3246_v14 = vld [vmem:[%s4776_s1 + $0x760] ss:$16 sps:$4 sm:$0xff]   ;;  %v3251_v15 = vld [vmem:[%s4776_s1 + $0x544] ss:$16 sps:$4 sm:$0xff]  }
  0x42   :  { %1657 = vmatmul.mubr.bf16.vlgmr.msra.gmra.mxu0 %v3864_v16 }
  0x43   :  { %1698 = vmatmul.mubr.bf16.vlgmr.msra.gmra.mxu1 %v3866_v17  ;;  %1707 = vmatpush1.bf16.msra.mxu0 %v3171_v18  ;;  %v3254_v18 = vld [vmem:[%s4776_s1 + $0x744] ss:$16 sps:$4 sm:$0xff]  }
  0x44   :  { %1748 = vmatpush1.bf16.msra.mxu1 %v3174_v19  ;;  %1708 = vmatprep.subr.bf16.mxu0 %v3179_v20  ;;  %v3249_v19 = vld [vmem:[%s4776_s1 + $0x540] ss:$16 sps:$4 sm:$0xff]  }
  0x45   :  { %1749 = vmatprep.subr.bf16.mxu1 %v3182_v21  ;;  %1738 = vmatprep.mubr.bf16.mxu0 %v3965_v53  ;;  %v3252_v20 = vld [vmem:[%s4776_s1 + $0x740] ss:$16 sps:$4 sm:$0xff]   ;;  %v3257_v21 = vld [vmem:[%s4776_s1 + $0x524] ss:$16 sps:$4 sm:$0xff]  }
  0x46   :  { %1779 = vmatprep.mubr.bf16.mxu1 %v3975_v56 }
  0x47   :  { %1709 = vmatpush1.bf16.msra.mxu0 %v3177_v22  ;;  %v3260_v22 = vld [vmem:[%s4776_s1 + $0x724] ss:$16 sps:$4 sm:$0xff]  }
  0x48   :  { %1750 = vmatpush1.bf16.msra.mxu1 %v3180_v23  ;;  %1710 = vmatprep.subr.bf16.mxu0 %v3185_v24  ;;  %v3255_v23 = vld [vmem:[%s4776_s1 + $0x520] ss:$16 sps:$4 sm:$0xff]  }
  0x49   :  { %1751 = vmatprep.subr.bf16.mxu1 %v3188_v25  ;;  %v3258_v24 = vld [vmem:[%s4776_s1 + $0x720] ss:$16 sps:$4 sm:$0xff]   ;;  %v3263_v25 = vld [vmem:[%s4776_s1 + $0x504] ss:$16 sps:$4 sm:$0xff]  }
  0x4b   :  { %1711 = vmatpush1.bf16.msra.mxu0 %v3183_v26  ;;  %v3266_v26 = vld [vmem:[%s4776_s1 + $0x704] ss:$16 sps:$4 sm:$0xff]  }
  0x4c   :  { %1752 = vmatpush1.bf16.msra.mxu1 %v3186_v27  ;;  %1712 = vmatprep.subr.bf16.mxu0 %v3191_v28  ;;  %v3261_v27 = vld [vmem:[%s4776_s1 + $0x500] ss:$16 sps:$4 sm:$0xff]  }
  0x4d   :  { %1753 = vmatprep.subr.bf16.mxu1 %v3194_v29  ;;  %v3264_v28 = vld [vmem:[%s4776_s1 + $0x700] ss:$16 sps:$4 sm:$0xff]   ;;  %v3270_v29 = vld [vmem:[%s4776_s1 + $0xec] ss:$16 sps:$4 sm:$0xff]  }
  0x4f   :  { %1713 = vmatpush1.bf16.msra.mxu0 %v3189_v30  ;;  %v3273_v30 = vld [vmem:[%s4776_s1 + $0x2ec] ss:$16 sps:$4 sm:$0xff]  }
  0x50   :  { %1754 = vmatpush1.bf16.msra.mxu1 %v3192_v31  ;;  %1714 = vmatprep.subr.bf16.mxu0 %v3197_v32  ;;  %v4083_v31 = vpack.c.bf16 %v3946_v44, %v3946_v44  ;;  %v4087_v32 = vpack.c.bf16 %v3957_v50, %v3957_v50  ;;  %v3288_v44 = vld [vmem:[%s4776_s1 + $0x8c] ss:$16 sps:$4 sm:$0xff]   ;;  %v3295_v50 = vld [vmem:[%s4776_s1 + $0x268] ss:$16 sps:$4 sm:$0xff]  }
  0x51   :  { %1755 = vmatprep.subr.bf16.mxu1 %v3200_v33  ;;  %v3268_v33 = vld [vmem:[%s4776_s1 + $0xe8] ss:$16 sps:$4 sm:$0xff]  }
  0x53   :  { %1715 = vmatpush1.bf16.msra.mxu0 %v3195_v34  ;;  %v3271_v34 = vld [vmem:[%s4776_s1 + $0x2e8] ss:$16 sps:$4 sm:$0xff]  }
  0x54   :  { %1756 = vmatpush1.bf16.msra.mxu1 %v3198_v35  ;;  %1716 = vmatprep.subr.bf16.mxu0 %v3203_v36  ;;  %v3276_v35 = vld [vmem:[%s4776_s1 + $0xcc] ss:$16 sps:$4 sm:$0xff]  }
  0x55   :  { %1757 = vmatprep.subr.bf16.mxu1 %v3206_v37  ;;  %v3279_v36 = vld [vmem:[%s4776_s1 + $0x2cc] ss:$16 sps:$4 sm:$0xff]   ;;  %v3274_v37 = vld [vmem:[%s4776_s1 + $0xc8] ss:$16 sps:$4 sm:$0xff]  }
  0x57   :  { %1717 = vmatpush1.bf16.msra.mxu0 %v3201_v38  ;;  %v3277_v38 = vld [vmem:[%s4776_s1 + $0x2c8] ss:$16 sps:$4 sm:$0xff]  }
  0x58   :  { %1758 = vmatpush1.bf16.msra.mxu1 %v3204_v39  ;;  %1718 = vmatprep.subr.bf16.mxu0 %v3209_v40  ;;  %v3282_v39 = vld [vmem:[%s4776_s1 + $0xac] ss:$16 sps:$4 sm:$0xff]  }
  0x59   :  { %1759 = vmatprep.subr.bf16.mxu1 %v3212_v41  ;;  %v3285_v40 = vld [vmem:[%s4776_s1 + $0x2ac] ss:$16 sps:$4 sm:$0xff]   ;;  %v3280_v41 = vld [vmem:[%s4776_s1 + $0xa8] ss:$16 sps:$4 sm:$0xff]  }
  0x5b   :  { %1719 = vmatpush1.bf16.msra.mxu0 %v3207_v46  ;;  %v3294_v46 = vld [vmem:[%s4776_s1 + $0x6c] ss:$16 sps:$4 sm:$0xff]  }
  0x5c   :  { %1760 = vmatpush1.bf16.msra.mxu1 %v3210_v47  ;;  %1720 = vmatprep.subr.bf16.mxu0 %v3215_v51  ;;  %v3297_v47 = vld [vmem:[%s4776_s1 + $0x26c] ss:$16 sps:$4 sm:$0xff]  }
  0x5d   :  { %1761 = vmatprep.subr.bf16.mxu1 %v3218_v52  ;;  %v3300_v51 = vld [vmem:[%s4776_s1 + $0x4c] ss:$16 sps:$4 sm:$0xff]  }
  0x5e   :  { %v3303_v52 = vld [vmem:[%s4776_s1 + $0x24c] ss:$16 sps:$4 sm:$0xff]  }
  0x5f   :  { %1721 = vmatpush1.bf16.msra.mxu0 %v3213_v49  ;;  %v3301_v49 = vld [vmem:[%s4776_s1 + $0x248] ss:$16 sps:$4 sm:$0xff]  }
  0x60   :  { %1762 = vmatpush1.bf16.msra.mxu1 %v3216_v55  ;;  %1722 = vmatprep.subr.bf16.mxu0 %v3221_v57  ;;  %v3306_v55 = vld [vmem:[%s4776_s1 + $0x2c] ss:$16 sps:$4 sm:$0xff]  }
  0x61   :  { %1763 = vmatprep.subr.bf16.mxu1 %v3224_v58  ;;  %v3309_v57 = vld [vmem:[%s4776_s1 + $0x22c] ss:$16 sps:$4 sm:$0xff]   ;;  %v3304_v58 = vld [vmem:[%s4776_s1 + $0x28] ss:$16 sps:$4 sm:$0xff]  }
  0x63   :  { %1723 = vmatpush2.bf16.msra.mxu0 %v3219_v59  ;;  %v3307_v59 = vld [vmem:[%s4776_s1 + $0x228] ss:$16 sps:$4 sm:$0xff]  }
  0x64   :  { %1764 = vmatpush2.bf16.msra.mxu1 %v3222_v60  ;;  %1724 = vmatprep.subr.bf16.mxu0 %v3227_v61  ;;  %v3312_v60 = vld [vmem:[%s4776_s1 + $0xc] ss:$16 sps:$4 sm:$0xff]  }
  0x65   :  { %1765 = vmatprep.subr.bf16.mxu1 %v3230_v63  ;;  %v3315_v61 = vld [vmem:[%s4776_s1 + $0x20c] ss:$16 sps:$4 sm:$0xff]   ;;  %v3310_v63 = vld [vmem:[%s4776_s1 + $0x8] ss:$16 sps:$4 sm:$0xff]  }
  0x67   :  { %1725 = vmatpush2.bf16.msra.mxu0 %v3225_v0  ;;  %v3313_v0 = vld [vmem:[%s4776_s1 + $0x208] ss:$16 sps:$4 sm:$0xff]  }
  0x68   :  { %1766 = vmatpush2.bf16.msra.mxu1 %v3228_v1  ;;  %1726 = vmatprep.subr.bf16.mxu0 %v3233_v2  ;;  %v3318_v1 = vld [vmem:[%s4776_s1 + $0x1ec] ss:$16 sps:$4 sm:$0xff]  }
  0x69   :  { %1767 = vmatprep.subr.bf16.mxu1 %v3236_v4  ;;  %v3321_v2 = vld [vmem:[%s4776_s1 + $0x3ec] ss:$16 sps:$4 sm:$0xff]   ;;  %v3316_v4 = vld [vmem:[%s4776_s1 + $0x1e8] ss:$16 sps:$4 sm:$0xff]  }
  0x6b   :  { %1727 = vmatpush2.bf16.msra.mxu0 %v3231_v5  ;;  %v3319_v5 = vld [vmem:[%s4776_s1 + $0x3e8] ss:$16 sps:$4 sm:$0xff]  }
  0x6c   :  { %1768 = vmatpush2.bf16.msra.mxu1 %v3234_v6  ;;  %1728 = vmatprep.subr.bf16.mxu0 %v3239_v7  ;;  %v3324_v6 = vld [vmem:[%s4776_s1 + $0x1cc] ss:$16 sps:$4 sm:$0xff]  }
  0x6d   :  { %1769 = vmatprep.subr.bf16.mxu1 %v3242_v8  ;;  %v3327_v7 = vld [vmem:[%s4776_s1 + $0x3cc] ss:$16 sps:$4 sm:$0xff]   ;;  %v3322_v8 = vld [vmem:[%s4776_s1 + $0x1c8] ss:$16 sps:$4 sm:$0xff]  }
  0x6f   :  { %1729 = vmatpush2.bf16.msra.mxu0 %v3237_v9  ;;  %v3325_v9 = vld [vmem:[%s4776_s1 + $0x3c8] ss:$16 sps:$4 sm:$0xff]  }
  0x70   :  { %1770 = vmatpush2.bf16.msra.mxu1 %v3240_v10  ;;  %1730 = vmatprep.subr.bf16.mxu0 %v3245_v11  ;;  %v3330_v10 = vld [vmem:[%s4776_s1 + $0x1ac] ss:$16 sps:$4 sm:$0xff]  }
  0x71   :  { %1771 = vmatprep.subr.bf16.mxu1 %v3248_v12  ;;  %v3333_v11 = vld [vmem:[%s4776_s1 + $0x3ac] ss:$16 sps:$4 sm:$0xff]   ;;  %v3328_v12 = vld [vmem:[%s4776_s1 + $0x1a8] ss:$16 sps:$4 sm:$0xff]  }
  0x73   :  { %1731 = vmatpush2.bf16.msra.mxu0 %v3243_v13  ;;  %v3331_v13 = vld [vmem:[%s4776_s1 + $0x3a8] ss:$16 sps:$4 sm:$0xff]  }
  0x74   :  { %1772 = vmatpush2.bf16.msra.mxu1 %v3246_v14  ;;  %1732 = vmatprep.subr.bf16.mxu0 %v3251_v15  ;;  %v3336_v14 = vld [vmem:[%s4776_s1 + $0x18c] ss:$16 sps:$4 sm:$0xff]  }
  0x75   :  { %1773 = vmatprep.subr.bf16.mxu1 %v3254_v18  ;;  %v3339_v15 = vld [vmem:[%s4776_s1 + $0x38c] ss:$16 sps:$4 sm:$0xff]   ;;  %v3334_v18 = vld [vmem:[%s4776_s1 + $0x188] ss:$16 sps:$4 sm:$0xff]  }
  0x77   :  { %1733 = vmatpush2.bf16.msra.mxu0 %v3249_v19  ;;  %v3337_v19 = vld [vmem:[%s4776_s1 + $0x388] ss:$16 sps:$4 sm:$0xff]  }
  0x78   :  { %1774 = vmatpush2.bf16.msra.mxu1 %v3252_v20  ;;  %1734 = vmatprep.subr.bf16.mxu0 %v3257_v21  ;;  %v3342_v20 = vld [vmem:[%s4776_s1 + $0x16c] ss:$16 sps:$4 sm:$0xff]  }
  0x79   :  { %1775 = vmatprep.subr.bf16.mxu1 %v3260_v22  ;;  %v3345_v21 = vld [vmem:[%s4776_s1 + $0x36c] ss:$16 sps:$4 sm:$0xff]   ;;  %v3340_v22 = vld [vmem:[%s4776_s1 + $0x168] ss:$16 sps:$4 sm:$0xff]  }
  0x7b   :  { %1735 = vmatpush2.bf16.msra.mxu0 %v3255_v23  ;;  %v3343_v23 = vld [vmem:[%s4776_s1 + $0x368] ss:$16 sps:$4 sm:$0xff]  }
  0x7c   :  { %1776 = vmatpush2.bf16.msra.mxu1 %v3258_v24  ;;  %1736 = vmatprep.subr.bf16.mxu0 %v3263_v25  ;;  %v3348_v24 = vld [vmem:[%s4776_s1 + $0x14c] ss:$16 sps:$4 sm:$0xff]  }
  0x7d   :  { %1777 = vmatprep.subr.bf16.mxu1 %v3266_v26  ;;  %v3351_v25 = vld [vmem:[%s4776_s1 + $0x34c] ss:$16 sps:$4 sm:$0xff]   ;;  %v3346_v26 = vld [vmem:[%s4776_s1 + $0x148] ss:$16 sps:$4 sm:$0xff]  }
  0x7f   :  { %1737 = vmatpush2.bf16.msra.mxu0 %v3261_v27  ;;  %v3349_v27 = vld [vmem:[%s4776_s1 + $0x348] ss:$16 sps:$4 sm:$0xff]  }
  0x80   :  { %1778 = vmatpush2.bf16.msra.mxu1 %v3264_v28  ;;  %1788 = vmatprep.subr.bf16.mxu0 %v3270_v29  ;;  %v3354_v28 = vld [vmem:[%s4776_s1 + $0x12c] ss:$16 sps:$4 sm:$0xff]  }
  0x81   :  { %1829 = vmatprep.subr.bf16.mxu1 %v3273_v30  ;;  %v3357_v29 = vld [vmem:[%s4776_s1 + $0x32c] ss:$16 sps:$4 sm:$0xff]   ;;  %v3352_v30 = vld [vmem:[%s4776_s1 + $0x128] ss:$16 sps:$4 sm:$0xff]  }
  0x82   :  { %1739 = vmatmul.mubr.bf16.vlgmr.msra.gmra.mxu0 %v4083_v31 }
  0x83   :  { %1780 = vmatmul.mubr.bf16.vlgmr.msra.gmra.mxu1 %v4087_v32  ;;  %1789 = vmatpush1.bf16.msra.mxu0 %v3268_v33  ;;  %v3355_v33 = vld [vmem:[%s4776_s1 + $0x328] ss:$16 sps:$4 sm:$0xff]  }
  0x84   :  { %1830 = vmatpush1.bf16.msra.mxu1 %v3271_v34  ;;  %1790 = vmatprep.subr.bf16.mxu0 %v3276_v35  ;;  %v3360_v34 = vld [vmem:[%s4776_s1 + $0x10c] ss:$16 sps:$4 sm:$0xff]  }
  0x85   :  { %1831 = vmatprep.subr.bf16.mxu1 %v3279_v36  ;;  %1820 = vmatprep.mubr.bf16.mxu0 %v3813_v62  ;;  %v3291_v62 = vld [vmem:[%s4776_s1 + $0x28c] ss:$16 sps:$4 sm:$0xff]   ;;  %v3358_v36 = vld [vmem:[%s4776_s1 + $0x108] ss:$16 sps:$4 sm:$0xff]  }
  0x86   :  { %1861 = vmatprep.mubr.bf16.mxu1 %v3824_v3  ;;  %v3286_v3 = vld [vmem:[%s4776_s1 + $0x88] ss:$16 sps:$4 sm:$0xff]   ;;  %v3363_v35 = vld [vmem:[%s4776_s1 + $0x30c] ss:$16 sps:$4 sm:$0xff]  }
  0x87   :  { %1791 = vmatpush1.bf16.msra.mxu0 %v3274_v37  ;;  %v3361_v37 = vld [vmem:[%s4776_s1 + $0x308] ss:$16 sps:$4 sm:$0xff]  }
  0x88   :  { %1832 = vmatpush1.bf16.msra.mxu1 %v3277_v38  ;;  %1792 = vmatprep.subr.bf16.mxu0 %v3282_v39  ;;  %v3366_v38 = vld [vmem:[%s4776_s1 + $0x4ec] ss:$16 sps:$4 sm:$0xff]  }
  0x89   :  { %1833 = vmatprep.subr.bf16.mxu1 %v3285_v40  ;;  %v3369_v39 = vld [vmem:[%s4776_s1 + $0x6ec] ss:$16 sps:$4 sm:$0xff]   ;;  %v3364_v40 = vld [vmem:[%s4776_s1 + $0x4e8] ss:$16 sps:$4 sm:$0xff]  }
  0x8b   :  { %1793 = vmatpush1.bf16.msra.mxu0 %v3280_v41  ;;  %v3367_v41 = vld [vmem:[%s4776_s1 + $0x6e8] ss:$16 sps:$4 sm:$0xff]  }
  0x8c   :  { %1834 = vmatpush1.bf16.msra.mxu1 %v3283_v42  ;;  %1794 = vmatprep.subr.bf16.mxu0 %v3288_v44  ;;  %v3372_v42 = vld [vmem:[%s4776_s1 + $0x4cc] ss:$16 sps:$4 sm:$0xff]  }
  0x8d   :  { %1835 = vmatprep.subr.bf16.mxu1 %v3291_v62  ;;  %v3375_v44 = vld [vmem:[%s4776_s1 + $0x6cc] ss:$16 sps:$4 sm:$0xff]   ;;  %v3370_v62 = vld [vmem:[%s4776_s1 + $0x4c8] ss:$16 sps:$4 sm:$0xff]  }
  0x8f   :  { %1795 = vmatpush1.bf16.msra.mxu0 %v3286_v3  ;;  %v3373_v3 = vld [vmem:[%s4776_s1 + $0x6c8] ss:$16 sps:$4 sm:$0xff]  }
  0x90   :  { %1836 = vmatpush1.bf16.msra.mxu1 %v3289_v45  ;;  %1796 = vmatprep.subr.bf16.mxu0 %v3294_v46  ;;  %v3378_v45 = vld [vmem:[%s4776_s1 + $0x4ac] ss:$16 sps:$4 sm:$0xff]  }
  0x91   :  { %1837 = vmatprep.subr.bf16.mxu1 %v3297_v47  ;;  %v3381_v46 = vld [vmem:[%s4776_s1 + $0x6ac] ss:$16 sps:$4 sm:$0xff]   ;;  %v3376_v47 = vld [vmem:[%s4776_s1 + $0x4a8] ss:$16 sps:$4 sm:$0xff]  }
  0x93   :  { %1797 = vmatpush1.bf16.msra.mxu0 %v3292_v48  ;;  %v3387_v48 = vld [vmem:[%s4776_s1 + $0x68c] ss:$16 sps:$4 sm:$0xff]  }
  0x94   :  { %1838 = vmatpush1.bf16.msra.mxu1 %v3295_v50  ;;  %1798 = vmatprep.subr.bf16.mxu0 %v3300_v51  ;;  %v3382_v50 = vld [vmem:[%s4776_s1 + $0x488] ss:$16 sps:$4 sm:$0xff]   ;;  %v3393_v51 = vld [vmem:[%s4776_s1 + $0x66c] ss:$16 sps:$4 sm:$0xff]  }
  0x95   :  { %1839 = vmatprep.subr.bf16.mxu1 %v3303_v52  ;;  %v3388_v52 = vld [vmem:[%s4776_s1 + $0x468] ss:$16 sps:$4 sm:$0xff]  }
  0x97   :  { %1799 = vmatpush1.bf16.msra.mxu0 %v3298_v54  ;;  %v3391_v54 = vld [vmem:[%s4776_s1 + $0x668] ss:$16 sps:$4 sm:$0xff]  }
  0x98   :  { %1840 = vmatpush1.bf16.msra.mxu1 %v3301_v49  ;;  %1800 = vmatprep.subr.bf16.mxu0 %v3306_v55  ;;  %v3396_v49 = vld [vmem:[%s4776_s1 + $0x44c] ss:$16 sps:$4 sm:$0xff]  }
  0x99   :  { %1841 = vmatprep.subr.bf16.mxu1 %v3309_v57  ;;  %v3399_v55 = vld [vmem:[%s4776_s1 + $0x64c] ss:$16 sps:$4 sm:$0xff]   ;;  %v3394_v57 = vld [vmem:[%s4776_s1 + $0x448] ss:$16 sps:$4 sm:$0xff]  }
  0x9b   :  { %1801 = vmatpush1.bf16.msra.mxu0 %v3304_v58  ;;  %v3397_v58 = vld [vmem:[%s4776_s1 + $0x648] ss:$16 sps:$4 sm:$0xff]  }
  0x9c   :  { %1842 = vmatpush1.bf16.msra.mxu1 %v3307_v59  ;;  %1802 = vmatprep.subr.bf16.mxu0 %v3312_v60  ;;  %v3402_v59 = vld [vmem:[%s4776_s1 + $0x42c] ss:$16 sps:$4 sm:$0xff]  }
  0x9d   :  { %1843 = vmatprep.subr.bf16.mxu1 %v3315_v61  ;;  %v3405_v60 = vld [vmem:[%s4776_s1 + $0x62c] ss:$16 sps:$4 sm:$0xff]  }
  0x9f   :  { %1803 = vmatpush1.bf16.msra.mxu0 %v3310_v63 }
  0xa0   :  { %1844 = vmatpush1.bf16.msra.mxu1 %v3313_v0  ;;  %1804 = vmatprep.subr.bf16.mxu0 %v3318_v1 }
  0xa1   :  { %1845 = vmatprep.subr.bf16.mxu1 %v3321_v2 }
  0xa3   :  { %1805 = vmatpush2.bf16.msra.mxu0 %v3316_v4 }
  0xa4   :  { %1846 = vmatpush2.bf16.msra.mxu1 %v3319_v5  ;;  %1806 = vmatprep.subr.bf16.mxu0 %v3324_v6 }
  0xa5   :  { %1847 = vmatprep.subr.bf16.mxu1 %v3327_v7 }
  0xa7   :  { %1807 = vmatpush2.bf16.msra.mxu0 %v3322_v8 }
  0xa8   :  { %1848 = vmatpush2.bf16.msra.mxu1 %v3325_v9  ;;  %1808 = vmatprep.subr.bf16.mxu0 %v3330_v10 }
  0xa9   :  { %1849 = vmatprep.subr.bf16.mxu1 %v3333_v11 }
  0xab   :  { %1809 = vmatpush2.bf16.msra.mxu0 %v3328_v12 }
  0xac   :  { %1850 = vmatpush2.bf16.msra.mxu1 %v3331_v13  ;;  %1810 = vmatprep.subr.bf16.mxu0 %v3336_v14 }
  0xad   :  { %1851 = vmatprep.subr.bf16.mxu1 %v3339_v15 }
  0xaf   :  { %1811 = vmatpush2.bf16.msra.mxu0 %v3334_v18 }
  0xb0   :  { %1852 = vmatpush2.bf16.msra.mxu1 %v3337_v19  ;;  %1812 = vmatprep.subr.bf16.mxu0 %v3342_v20 }
  0xb1   :  { %1853 = vmatprep.subr.bf16.mxu1 %v3345_v21 }
  0xb3   :  { %1813 = vmatpush2.bf16.msra.mxu0 %v3340_v22 }
  0xb4   :  { %1854 = vmatpush2.bf16.msra.mxu1 %v3343_v23  ;;  %1814 = vmatprep.subr.bf16.mxu0 %v3348_v24 }
  0xb5   :  { %1855 = vmatprep.subr.bf16.mxu1 %v3351_v25 }
  0xb7   :  { %1815 = vmatpush2.bf16.msra.mxu0 %v3346_v26 }
  0xb8   :  { %1856 = vmatpush2.bf16.msra.mxu1 %v3349_v27  ;;  %1816 = vmatprep.subr.bf16.mxu0 %v3354_v28 }
  0xb9   :  { %1857 = vmatprep.subr.bf16.mxu1 %v3357_v29 }
  0xbb   :  { %1817 = vmatpush2.bf16.msra.mxu0 %v3352_v30 }
  0xbc   :  { %1858 = vmatpush2.bf16.msra.mxu1 %v3355_v33  ;;  %1818 = vmatprep.subr.bf16.mxu0 %v3360_v34 }
  0xbd   :  { %1859 = vmatprep.subr.bf16.mxu1 %v3363_v35 }
  0xbf   :  { %1819 = vmatpush2.bf16.msra.mxu0 %v3358_v36 }
  0xc0   :  { %1860 = vmatpush2.bf16.msra.mxu1 %v3361_v37  ;;  %1870 = vmatprep.subr.bf16.mxu0 %v3366_v38 }
  0xc1   :  { %1911 = vmatprep.subr.bf16.mxu1 %v3369_v39 }
  0xc2   :  { %1821 = vmatmul.mubr.bf16.vlgmr.msra.gmra.mxu0 %v3864_v16  ;;  %v3379_v16 = vld [vmem:[%s4776_s1 + $0x6a8] ss:$16 sps:$4 sm:$0xff]  }
  0xc3   :  { %1862 = vmatmul.mubr.bf16.vlgmr.msra.gmra.mxu1 %v3866_v17  ;;  %1871 = vmatpush1.bf16.msra.mxu0 %v3364_v40  ;;  %v3384_v17 = vld [vmem:[%s4776_s1 + $0x48c] ss:$16 sps:$4 sm:$0xff]  }
  0xc4   :  { %1912 = vmatpush1.bf16.msra.mxu1 %v3367_v41  ;;  %1872 = vmatprep.subr.bf16.mxu0 %v3372_v42 }
  0xc5   :  { %1913 = vmatprep.subr.bf16.mxu1 %v3375_v44  ;;  %1902 = vmatprep.mubr.bf16.mxu0 %v3965_v53  ;;  %v3385_v53 = vld [vmem:[%s4776_s1 + $0x688] ss:$16 sps:$4 sm:$0xff]  }
  0xc6   :  { %1943 = vmatprep.mubr.bf16.mxu1 %v3975_v56  ;;  %v3390_v56 = vld [vmem:[%s4776_s1 + $0x46c] ss:$16 sps:$4 sm:$0xff]  }
  0xc7   :  { %1873 = vmatpush1.bf16.msra.mxu0 %v3370_v62 }
  0xc8   :  { %1914 = vmatpush1.bf16.msra.mxu1 %v3373_v3  ;;  %1874 = vmatprep.subr.bf16.mxu0 %v3378_v45 }
  0xc9   :  { %1915 = vmatprep.subr.bf16.mxu1 %v3381_v46 }
  0xcb   :  { %1875 = vmatpush1.bf16.msra.mxu0 %v3376_v47 }
  0xcc   :  { %1916 = vmatpush1.bf16.msra.mxu1 %v3379_v16  ;;  %1876 = vmatprep.subr.bf16.mxu0 %v3384_v17 }
  0xcd   :  { %1917 = vmatprep.subr.bf16.mxu1 %v3387_v48 }
  0xcf   :  { %1877 = vmatpush1.bf16.msra.mxu0 %v3382_v50 }
  0xd0   :  { %1918 = vmatpush1.bf16.msra.mxu1 %v3385_v53  ;;  %1878 = vmatprep.subr.bf16.mxu0 %v3390_v56 }
  0xd1   :  { %1919 = vmatprep.subr.bf16.mxu1 %v3393_v51 }
  0xd3   :  { %1879 = vmatpush1.bf16.msra.mxu0 %v3388_v52 }
  0xd4   :  { %1920 = vmatpush1.bf16.msra.mxu1 %v3391_v54  ;;  %1880 = vmatprep.subr.bf16.mxu0 %v3396_v49 }
  0xd5   :  { %1921 = vmatprep.subr.bf16.mxu1 %v3399_v55 }
  0xd6   :  { %14 = vsyncpa [#allocation3], 0  ;;  %v3400_v61 = vld [vmem:[%s4776_s1 + $0x428] ss:$16 sps:$4 sm:$0xff]   ;;  %v3408_v0 = vld [vmem:[%s4776_s1 + $0x40c] ss:$16 sps:$4 sm:$0xff]  }
  0xd7   :  { %1881 = vmatpush1.bf16.msra.mxu0 %v3394_v57  ;;  %v3403_v63 = vld [vmem:[%s4776_s1 + $0x628] ss:$16 sps:$4 sm:$0xff]   ;;  %v3411_v1 = vld [vmem:[%s4776_s1 + $0x60c] ss:$16 sps:$4 sm:$0xff]   ;;  %vm2685_vm0 = vcmask 320512  }
  0xd8   :  { %1922 = vmatpush1.bf16.msra.mxu1 %v3397_v58  ;;  %1882 = vmatprep.subr.bf16.mxu0 %v3402_v59  ;;  %v3406_v2 = vld [vmem:[%s4776_s1 + $0x408] ss:$16 sps:$4 sm:$0xff]   ;;  %v3414_v5 = vld [vmem:[%s4776_s1 + $0x5ec] ss:$16 sps:$4 sm:$0xff]  }
  0xd9   :  { %1923 = vmatprep.subr.bf16.mxu1 %v3405_v60  ;;  %v3409_v4 = vld [vmem:[%s4776_s1 + $0x608] ss:$16 sps:$4 sm:$0xff]   ;;  %v3417_v6 = vld [vmem:[%s4776_s1 + $0x7ec] ss:$16 sps:$4 sm:$0xff]  }
  0xda   :  { %v3412_v7 = vld [vmem:[%s4776_s1 + $0x5e8] ss:$16 sps:$4 sm:$0xff]   ;;  %v3420_v9 = vld [vmem:[%s4776_s1 + $0x5cc] ss:$16 sps:$4 sm:$0xff]  }
  0xdb   :  { %1883 = vmatpush1.bf16.msra.mxu0 %v3400_v61  ;;  %v3415_v8 = vld [vmem:[%s4776_s1 + $0x7e8] ss:$16 sps:$4 sm:$0xff]   ;;  %v3423_v10 = vld [vmem:[%s4776_s1 + $0x7cc] ss:$16 sps:$4 sm:$0xff]  }
  0xdc   :  { %1924 = vmatpush1.bf16.msra.mxu1 %v3403_v63  ;;  %1884 = vmatprep.subr.bf16.mxu0 %v3408_v0  ;;  %v3418_v11 = vld [vmem:[%s4776_s1 + $0x5c8] ss:$16 sps:$4 sm:$0xff]   ;;  %v3426_v13 = vld [vmem:[%s4776_s1 + $0x5ac] ss:$16 sps:$4 sm:$0xff]  }
  0xdd   :  { %1925 = vmatprep.subr.bf16.mxu1 %v3411_v1  ;;  %v3421_v12 = vld [vmem:[%s4776_s1 + $0x7c8] ss:$16 sps:$4 sm:$0xff]   ;;  %v3429_v14 = vld [vmem:[%s4776_s1 + $0x7ac] ss:$16 sps:$4 sm:$0xff]  }
  0xde   :  { %v3424_v15 = vld [vmem:[%s4776_s1 + $0x5a8] ss:$16 sps:$4 sm:$0xff]   ;;  %v3432_v19 = vld [vmem:[%s4776_s1 + $0x58c] ss:$16 sps:$4 sm:$0xff]  }
  0xdf   :  { %1885 = vmatpush1.bf16.msra.mxu0 %v3406_v2  ;;  %v3427_v18 = vld [vmem:[%s4776_s1 + $0x7a8] ss:$16 sps:$4 sm:$0xff]   ;;  %v3435_v20 = vld [vmem:[%s4776_s1 + $0x78c] ss:$16 sps:$4 sm:$0xff]  }
  0xe0   :  { %1926 = vmatpush1.bf16.msra.mxu1 %v3409_v4  ;;  %1886 = vmatprep.subr.bf16.mxu0 %v3414_v5  ;;  %v3430_v21 = vld [vmem:[%s4776_s1 + $0x588] ss:$16 sps:$4 sm:$0xff]   ;;  %v3438_v23 = vld [vmem:[%s4776_s1 + $0x56c] ss:$16 sps:$4 sm:$0xff]  }
  0xe1   :  { %1927 = vmatprep.subr.bf16.mxu1 %v3417_v6  ;;  %v3433_v22 = vld [vmem:[%s4776_s1 + $0x788] ss:$16 sps:$4 sm:$0xff]   ;;  %v3441_v24 = vld [vmem:[%s4776_s1 + $0x76c] ss:$16 sps:$4 sm:$0xff]  }
  0xe2   :  { %v3436_v25 = vld [vmem:[%s4776_s1 + $0x568] ss:$16 sps:$4 sm:$0xff]   ;;  %v3444_v27 = vld [vmem:[%s4776_s1 + $0x54c] ss:$16 sps:$4 sm:$0xff]  }
  0xe3   :  { %1887 = vmatpush2.bf16.msra.mxu0 %v3412_v7  ;;  %v3439_v26 = vld [vmem:[%s4776_s1 + $0x768] ss:$16 sps:$4 sm:$0xff]   ;;  %v3447_v28 = vld [vmem:[%s4776_s1 + $0x74c] ss:$16 sps:$4 sm:$0xff]  }
  0xe4   :  { %1928 = vmatpush2.bf16.msra.mxu1 %v3415_v8  ;;  %1888 = vmatprep.subr.bf16.mxu0 %v3420_v9  ;;  %v3442_v29 = vld [vmem:[%s4776_s1 + $0x548] ss:$16 sps:$4 sm:$0xff]   ;;  %v3450_v33 = vld [vmem:[%s4776_s1 + $0x52c] ss:$16 sps:$4 sm:$0xff]  }
  0xe5   :  { %1929 = vmatprep.subr.bf16.mxu1 %v3423_v10  ;;  %v3445_v30 = vld [vmem:[%s4776_s1 + $0x748] ss:$16 sps:$4 sm:$0xff]   ;;  %v3453_v34 = vld [vmem:[%s4776_s1 + $0x72c] ss:$16 sps:$4 sm:$0xff]  }
  0xe6   :  { %v3448_v35 = vld [vmem:[%s4776_s1 + $0x528] ss:$16 sps:$4 sm:$0xff]   ;;  %v3456_v37 = vld [vmem:[%s4776_s1 + $0x50c] ss:$16 sps:$4 sm:$0xff]  }
  0xe7   :  { %1889 = vmatpush2.bf16.msra.mxu0 %v3418_v11  ;;  %v3451_v36 = vld [vmem:[%s4776_s1 + $0x728] ss:$16 sps:$4 sm:$0xff]   ;;  %v3459_v38 = vld [vmem:[%s4776_s1 + $0x70c] ss:$16 sps:$4 sm:$0xff]  }
  0xe8   :  { %1930 = vmatpush2.bf16.msra.mxu1 %v3421_v12  ;;  %1890 = vmatprep.subr.bf16.mxu0 %v3426_v13  ;;  %v3454_v39 = vld [vmem:[%s4776_s1 + $0x508] ss:$16 sps:$4 sm:$0xff]   ;;  %v3462_v41 = vld [vmem:[%s4779_s4 + $0x74] ss:$8 sps:$4 sm:$0xff]   ;;  %v3465_v44 = vld [vmem:[%s4779_s4 + $0x64] ss:$8 sps:$4 sm:$0xff]  }
  0xe9   :  { %1931 = vmatprep.subr.bf16.mxu1 %v3429_v14  ;;  %v3457_v40 = vld [vmem:[%s4776_s1 + $0x708] ss:$16 sps:$4 sm:$0xff]   ;;  %v3468_v17 = vld [vmem:[%s4779_s4 + $0x54] ss:$8 sps:$4 sm:$0xff]   ;;  %v3471_v56 = vld [vmem:[%s4779_s4 + $0x44] ss:$8 sps:$4 sm:$0xff]  }
  0xea   :  { %v3460_v42 = vld [vmem:[%s4779_s4 + $0x70] ss:$8 sps:$4 sm:$0xff]   ;;  %v3463_v46 = vld [vmem:[%s4779_s4 + $0x60] ss:$8 sps:$4 sm:$0xff]   ;;  %v3510_v52 = vld [vmem:[%s4779_s4 + $0x174] ss:$8 sps:$4 sm:$0xff]  }
  0xeb   :  { %1891 = vmatpush2.bf16.msra.mxu0 %v3424_v15  ;;  %v3508_v51 = vld [vmem:[%s4779_s4 + $0x170] ss:$8 sps:$4 sm:$0xff]   ;;  %v3513_v54 = vld [vmem:[%s4779_s4 + $0x164] ss:$8 sps:$4 sm:$0xff]   ;;  %v3469_v49 = vld [vmem:[%s4779_s4 + $0x40] ss:$8 sps:$4 sm:$0xff]  }
  0xec   :  { %1932 = vmatpush2.bf16.msra.mxu1 %v3427_v18  ;;  %1892 = vmatprep.subr.bf16.mxu0 %v3432_v19  ;;  %v3511_v55 = vld [vmem:[%s4779_s4 + $0x160] ss:$8 sps:$4 sm:$0xff]   ;;  %v3474_v57 = vld [vmem:[%s4779_s4 + $0x34] ss:$8 sps:$4 sm:$0xff]   ;;  %v3472_v59 = vld [vmem:[%s4779_s4 + $0x30] ss:$8 sps:$4 sm:$0xff]  }
  0xed   :  { %1933 = vmatprep.subr.bf16.mxu1 %v3435_v20  ;;  %v3516_v58 = vld [vmem:[%s4779_s4 + $0x154] ss:$8 sps:$4 sm:$0xff]   ;;  %v3514_v60 = vld [vmem:[%s4779_s4 + $0x150] ss:$8 sps:$4 sm:$0xff]   ;;  %v3477_v61 = vld [vmem:[%s4779_s4 + $0x24] ss:$8 sps:$4 sm:$0xff]  }
  0xee   :  { %v3519_v63 = vld [vmem:[%s4779_s4 + $0x144] ss:$8 sps:$4 sm:$0xff]   ;;  %v3475_v0 = vld [vmem:[%s4779_s4 + $0x20] ss:$8 sps:$4 sm:$0xff]   ;;  %v3480_v2 = vld [vmem:[%s4779_s4 + $0x14] ss:$8 sps:$4 sm:$0xff]  }
  0xef   :  { %1893 = vmatpush2.bf16.msra.mxu0 %v3430_v21  ;;  %v3517_v1 = vld [vmem:[%s4779_s4 + $0x140] ss:$8 sps:$4 sm:$0xff]   ;;  %v3522_v4 = vld [vmem:[%s4779_s4 + $0x134] ss:$8 sps:$4 sm:$0xff]   ;;  %v3478_v5 = vld [vmem:[%s4779_s4 + $0x10] ss:$8 sps:$4 sm:$0xff]  }
  0xf0   :  { %1934 = vmatpush2.bf16.msra.mxu1 %v3433_v22  ;;  %1894 = vmatprep.subr.bf16.mxu0 %v3438_v23  ;;  %v3520_v6 = vld [vmem:[%s4779_s4 + $0x130] ss:$8 sps:$4 sm:$0xff]   ;;  %v3483_v7 = vld [vmem:[%s4779_s4 + $0x4] ss:$8 sps:$4 sm:$0xff]   ;;  %v3481_v9 = vld [vmem:[%s4779_s4] ss:$8 sps:$4 sm:$0xff]  }
  0xf1   :  { %1935 = vmatprep.subr.bf16.mxu1 %v3441_v24  ;;  %v3525_v8 = vld [vmem:[%s4779_s4 + $0x124] ss:$8 sps:$4 sm:$0xff]   ;;  %v3523_v10 = vld [vmem:[%s4779_s4 + $0x120] ss:$8 sps:$4 sm:$0xff]   ;;  %v3486_v11 = vld [vmem:[%s4779_s4 + $0xf4] ss:$8 sps:$4 sm:$0xff]  }
  0xf2   :  { %v3528_v12 = vld [vmem:[%s4779_s4 + $0x114] ss:$8 sps:$4 sm:$0xff]   ;;  %v3484_v13 = vld [vmem:[%s4779_s4 + $0xf0] ss:$8 sps:$4 sm:$0xff]   ;;  %v3489_v15 = vld [vmem:[%s4779_s4 + $0xe4] ss:$8 sps:$4 sm:$0xff]  }
  0xf3   :  { %1895 = vmatpush2.bf16.msra.mxu0 %v3436_v25  ;;  %v3526_v14 = vld [vmem:[%s4779_s4 + $0x110] ss:$8 sps:$4 sm:$0xff]   ;;  %v3531_v18 = vld [vmem:[%s4779_s4 + $0x104] ss:$8 sps:$4 sm:$0xff]   ;;  %v3487_v19 = vld [vmem:[%s4779_s4 + $0xe0] ss:$8 sps:$4 sm:$0xff]  }
  0xf4   :  { %1936 = vmatpush2.bf16.msra.mxu1 %v3439_v26  ;;  %1896 = vmatprep.subr.bf16.mxu0 %v3444_v27  ;;  %v3529_v20 = vld [vmem:[%s4779_s4 + $0x100] ss:$8 sps:$4 sm:$0xff]   ;;  %v3492_v21 = vld [vmem:[%s4779_s4 + $0xd4] ss:$8 sps:$4 sm:$0xff]   ;;  %v3490_v23 = vld [vmem:[%s4779_s4 + $0xd0] ss:$8 sps:$4 sm:$0xff]  }
  0xf5   :  { %1937 = vmatprep.subr.bf16.mxu1 %v3447_v28  ;;  %v3534_v22 = vld [vmem:[%s4779_s4 + $0x1f4] ss:$8 sps:$4 sm:$0xff]   ;;  %v3532_v24 = vld [vmem:[%s4779_s4 + $0x1f0] ss:$8 sps:$4 sm:$0xff]   ;;  %v3495_v25 = vld [vmem:[%s4779_s4 + $0xc4] ss:$8 sps:$4 sm:$0xff]  }
  0xf6   :  { %v3537_v26 = vld [vmem:[%s4779_s4 + $0x1e4] ss:$8 sps:$4 sm:$0xff]   ;;  %v3493_v27 = vld [vmem:[%s4779_s4 + $0xc0] ss:$8 sps:$4 sm:$0xff]  }
  0xf7   :  { %1897 = vmatpush2.bf16.msra.mxu0 %v3442_v29  ;;  %v3535_v28 = vld [vmem:[%s4779_s4 + $0x1e0] ss:$8 sps:$4 sm:$0xff]   ;;  %v3498_v29 = vld [vmem:[%s4779_s4 + $0xb4] ss:$8 sps:$4 sm:$0xff]  }
  0xf8   :  { %1938 = vmatpush2.bf16.msra.mxu1 %v3445_v30  ;;  %1898 = vmatprep.subr.bf16.mxu0 %v3450_v33  ;;  %v3540_v30 = vld [vmem:[%s4779_s4 + $0x1d4] ss:$8 sps:$4 sm:$0xff]   ;;  %v3496_v33 = vld [vmem:[%s4779_s4 + $0xb0] ss:$8 sps:$4 sm:$0xff]  }
  0xf9   :  { %1939 = vmatprep.subr.bf16.mxu1 %v3453_v34  ;;  %v3538_v34 = vld [vmem:[%s4779_s4 + $0x1d0] ss:$8 sps:$4 sm:$0xff]  }
  0xfb   :  { %1899 = vmatpush2.bf16.msra.mxu0 %v3448_v35  ;;  %v3501_v35 = vld [vmem:[%s4779_s4 + $0xa4] ss:$8 sps:$4 sm:$0xff]  }
  0xfc   :  { %1940 = vmatpush2.bf16.msra.mxu1 %v3451_v36  ;;  %1900 = vmatprep.subr.bf16.mxu0 %v3456_v37  ;;  %v3543_v36 = vld [vmem:[%s4779_s4 + $0x1c4] ss:$8 sps:$4 sm:$0xff]   ;;  %v3499_v37 = vld [vmem:[%s4779_s4 + $0xa0] ss:$8 sps:$4 sm:$0xff]  }
  0xfd   :  { %1941 = vmatprep.subr.bf16.mxu1 %v3459_v38  ;;  %v3541_v38 = vld [vmem:[%s4779_s4 + $0x1c0] ss:$8 sps:$4 sm:$0xff]  }
  0xff   :  { %1901 = vmatpush2.bf16.msra.mxu0 %v3454_v39  ;;  %v3504_v39 = vld [vmem:[%s4779_s4 + $0x94] ss:$8 sps:$4 sm:$0xff]  }
 0x100   :  { %1942 = vmatpush2.bf16.msra.mxu1 %v3457_v40  ;;  %2396 = vmatprep.subr.bf16.mxu0 %v3462_v41  ;;  %v3502_v40 = vld [vmem:[%s4779_s4 + $0x90] ss:$8 sps:$4 sm:$0xff]   ;;  %v3507_v41 = vld [vmem:[%s4779_s4 + $0x84] ss:$8 sps:$4 sm:$0xff]  }
 0x101   :  { %2437 = vmatprep.subr.bf16.mxu1 %v3510_v52 }
 0x102   :  { %v1658_v62 = vpop.f32.mrf.mxu0  ;;  %1903 = vmatmul.mubr.bf16.vlgmr.msra.gmra.mxu0 %v4083_v31 }
 0x103   :  { %v1699_v3 = vpop.f32.mrf.mxu1  ;;  %1944 = vmatmul.mubr.bf16.vlgmr.msra.gmra.mxu1 %v4087_v32  ;;  %2397 = vmatpush1.bf16.msra.mxu0 %v3460_v42  ;;  %v3466_v32 = vld [vmem:[%s4779_s4 + $0x50] ss:$8 sps:$4 sm:$0xff]   ;;  %v3505_v42 = vld [vmem:[%s4779_s4 + $0x80] ss:$8 sps:$4 sm:$0xff]  }
 0x104   :  { %v4486_v45 = vadd.f32 %v1699_v3, %v1658_v62  ;;  %v4491_v47 = vpop.f32.mrf.mxu0  ;;  %2398 = vmatprep.subr.bf16.mxu0 %v3465_v44  ;;  %2438 = vmatpush1.bf16.msra.mxu1 %v3508_v51  ;;  %v4652_v44 = vsub.s32 0, %v3767_v43  ;;  %v4657_v62 = vld [vmem:[%s4777_s2] sm:$0xf]  ;;  %v3546_v3 = vld [vmem:[%s4779_s4 + $0x1b4] ss:$8 sps:$4 sm:$0xff]  }
 0x105   :  { %v4493_v16 = vpop.f32.mrf.mxu1  ;;  %2439 = vmatprep.subr.bf16.mxu1 %v3513_v54  ;;  %v3549_v54 = vld [vmem:[%s4779_s4 + $0x1a4] ss:$8 sps:$4 sm:$0xff]  }
 0x106   :  { %v1662_v48 = vpop.f32.mrf.mxu0 }
 0x107   :  { %v1703_v31 = vpop.f32.mrf.mxu1  ;;  %2399 = vmatpush1.bf16.msra.mxu0 %v3463_v46  ;;  %v4663_v46 = vsub.s32 1, %v3767_v43 }
 0x108   :  { %v1663_v50 = vpop.f32.mrf.mxu0  ;;  %2400 = vmatprep.subr.bf16.mxu0 %v3468_v17  ;;  %2440 = vmatpush1.bf16.msra.mxu1 %v3511_v55  ;;  %v3544_v17 = vld [vmem:[%s4779_s4 + $0x1b0] ss:$8 sps:$4 sm:$0xff]  }
 0x109   :  { %v1704_v53 = vpop.f32.mrf.mxu1  ;;  %2441 = vmatprep.subr.bf16.mxu1 %v3516_v58  ;;  %v1702_v50 = vadd.f32 %v4493_v16, %v4491_v47  ;;  %v1961_v47 = vrot.slane %v4657_v62, %v4663_v46 }
 0x10b   :  { %2401 = vmatpush1.bf16.msra.mxu0 %v3466_v32  ;;  %v4671_v32 = vld [vmem:[%s4778_s3] sm:$0xf] }
 0x10c   :  { %2402 = vmatprep.subr.bf16.mxu0 %v3471_v56  ;;  %2442 = vmatpush1.bf16.msra.mxu1 %v3514_v60  ;;  %v1957_v56 = vrot.slane %v4657_v62, %v4652_v44  ;;  %v1983_v55 = vrot.slane %v4671_v32, %v4652_v44 }
 0x10d   :  { %2443 = vmatprep.subr.bf16.mxu1 %v3519_v63 }
 0x10f   :  { %2403 = vmatpush1.bf16.msra.mxu0 %v3469_v49 }
 0x110   :  { %2404 = vmatprep.subr.bf16.mxu0 %v3474_v57  ;;  %2444 = vmatpush1.bf16.msra.mxu1 %v3517_v1  ;;  %v3552_v1 = vld [vmem:[%s4779_s4 + $0x194] ss:$8 sps:$4 sm:$0xff]  }
 0x111   :  { %2445 = vmatprep.subr.bf16.mxu1 %v3522_v4 }
 0x113   :  { %2405 = vmatpush1.bf16.msra.mxu0 %v3472_v59 }
 0x114   :  { %2406 = vmatprep.subr.bf16.mxu0 %v3477_v61  ;;  %2446 = vmatpush1.bf16.msra.mxu1 %v3520_v6  ;;  %v1987_v61 = vrot.slane %v4671_v32, %v4663_v46 }
 0x115   :  { %2447 = vmatprep.subr.bf16.mxu1 %v3525_v8  ;;  %v3555_v8 = vld [vmem:[%s4779_s4 + $0x184] ss:$8 sps:$4 sm:$0xff]  }
 0x117   :  { %2407 = vmatpush1.bf16.msra.mxu0 %v3475_v0 }
 0x118   :  { %2408 = vmatprep.subr.bf16.mxu0 %v3480_v2  ;;  %2448 = vmatpush1.bf16.msra.mxu1 %v3523_v10  ;;  %v3553_v10 = vld [vmem:[%s4779_s4 + $0x180] ss:$8 sps:$4 sm:$0xff]  }
 0x119   :  { %2449 = vmatprep.subr.bf16.mxu1 %v3528_v12 }
 0x11b   :  { %2409 = vmatpush1.bf16.msra.mxu0 %v3478_v5  ;;  %v3550_v5 = vld [vmem:[%s4779_s4 + $0x190] ss:$8 sps:$4 sm:$0xff]  }
 0x11c   :  { %2410 = vmatprep.subr.bf16.mxu0 %v3483_v7  ;;  %2450 = vmatpush1.bf16.msra.mxu1 %v3526_v14 }
 0x11d   :  { %2451 = vmatprep.subr.bf16.mxu1 %v3531_v18 }
 0x11f   :  { %2411 = vmatpush1.bf16.msra.mxu0 %v3481_v9 }
 0x120   :  { %2412 = vmatprep.subr.bf16.mxu0 %v3486_v11  ;;  %2452 = vmatpush1.bf16.msra.mxu1 %v3529_v20 }
 0x121   :  { %2453 = vmatprep.subr.bf16.mxu1 %v3534_v22 }
 0x123   :  { %2413 = vmatpush2.bf16.msra.mxu0 %v3484_v13 }
 0x124   :  { %2414 = vmatprep.subr.bf16.mxu0 %v3489_v15  ;;  %2454 = vmatpush2.bf16.msra.mxu1 %v3532_v24  ;;  %v3556_v24 = vld [vmem:[%s4782_s7 + $0x78] sm:$0xff]  }
 0x125   :  { %2455 = vmatprep.subr.bf16.mxu1 %v3537_v26  ;;  %v3558_v26 = vld [vmem:[%s4782_s7 + $0x70] sm:$0xff]  }
 0x127   :  { %2415 = vmatpush2.bf16.msra.mxu0 %v3487_v19 }
 0x128   :  { %2416 = vmatprep.subr.bf16.mxu0 %v3492_v21  ;;  %2456 = vmatpush2.bf16.msra.mxu1 %v3535_v28  ;;  %v3560_v28 = vld [vmem:[%s4782_s7 + $0x68] sm:$0xff]  }
 0x129   :  { %2457 = vmatprep.subr.bf16.mxu1 %v3540_v30  ;;  %v3562_v30 = vld [vmem:[%s4782_s7 + $0x60] sm:$0xff]  }
 0x12b   :  { %2417 = vmatpush2.bf16.msra.mxu0 %v3490_v23 }
 0x12c   :  { %2418 = vmatprep.subr.bf16.mxu0 %v3495_v25  ;;  %2458 = vmatpush2.bf16.msra.mxu1 %v3538_v34  ;;  %v3557_v25 = vld [vmem:[%s4782_s7 + $0x38] sm:$0xff]  }
 0x12d   :  { %2459 = vmatprep.subr.bf16.mxu1 %v3543_v36  ;;  %v3564_v34 = vld [vmem:[%s4782_s7 + $0x58] sm:$0xff]   ;;  %v1964_v36 = vsub.s32 2, %v3767_v43 }
 0x12f   :  { %2419 = vmatpush2.bf16.msra.mxu0 %v3493_v27  ;;  %v3559_v27 = vld [vmem:[%s4782_s7 + $0x30] sm:$0xff]  }
 0x130   :  { %2420 = vmatprep.subr.bf16.mxu0 %v3498_v29  ;;  %2460 = vmatpush2.bf16.msra.mxu1 %v3541_v38  ;;  %v3561_v29 = vld [vmem:[%s4782_s7 + $0x28] sm:$0xff]  }
 0x131   :  { %2461 = vmatprep.subr.bf16.mxu1 %v3546_v3 }
 0x133   :  { %2421 = vmatpush2.bf16.msra.mxu0 %v3496_v33  ;;  %v3563_v33 = vld [vmem:[%s4782_s7 + $0x20] sm:$0xff]  }
 0x134   :  { %2422 = vmatprep.subr.bf16.mxu0 %v3501_v35  ;;  %2462 = vmatpush2.bf16.msra.mxu1 %v3544_v17  ;;  %v3565_v35 = vld [vmem:[%s4782_s7 + $0x18] sm:$0xff]  }
 0x135   :  { %2463 = vmatprep.subr.bf16.mxu1 %v3549_v54 }
 0x137   :  { %2423 = vmatpush2.bf16.msra.mxu0 %v3499_v37  ;;  %v1968_v37 = vsub.s32 3, %v3767_v43 }
 0x138   :  { %2424 = vmatprep.subr.bf16.mxu0 %v3504_v39 }
 0x139   :  { %v1995_v43 = vrot.slane %v4671_v32, %v1968_v37 }
 0x13b   :  { %2425 = vmatpush2.bf16.msra.mxu0 %v3502_v40 }
 0x13c   :  { %2426 = vmatprep.subr.bf16.mxu0 %v3507_v41 }
 0x13f   :  { %2427 = vmatpush2.bf16.msra.mxu0 %v3505_v42  ;;  %v1965_v42 = vrot.slane %v4657_v62, %v1964_v36 }
 0x140   :  { %3050 = vmatprep.subr.bf16.mxu0 %v3556_v24 }
 0x142   :  { %v1740_v48 = vpop.f32.mrf.mxu0 }
 0x143   :  { %v1781_v31 = vpop.f32.mrf.mxu1  ;;  %v1741_v53 = vadd.f32 %v1740_v48, %v4486_v45  ;;  %v3547_v45 = vld [vmem:[%s4779_s4 + $0x1a0] ss:$8 sps:$4 sm:$0xff]  }
 0x144   :  { %v1742_v51 = vpop.f32.mrf.mxu0  ;;  %2464 = vmatpush2.bf16.msra.mxu1 %v3547_v45 }
 0x145   :  { %v1783_v52 = vpop.f32.mrf.mxu1  ;;  %v1782_v49 = vadd.f32 %v1781_v31, %v1741_v53  ;;  %v1743_v57 = vadd.f32 %v1742_v51, %v1702_v50  ;;  %2465 = vmatprep.subr.bf16.mxu1 %v3552_v1  ;;  %v1991_v31 = vrot.slane %v4671_v32, %v1964_v36  ;;  %v1969_v53 = vrot.slane %v4657_v62, %v1968_v37  ;;  %v3566_v62 = vld [vmem:[%s4782_s7 + $0x50] sm:$0xff]   ;;  %v3568_v1 = vld [vmem:[%s4782_s7 + $0x48] sm:$0xff]  }
 0x146   :  { %v1744_v16 = vpop.f32.mrf.mxu0  ;;  %v3567_v32 = vld [vmem:[%s4782_s7 + $0x10] sm:$0xff]  }
 0x147   :  { %v1785_v58 = vpop.f32.mrf.mxu1  ;;  %v1974_v59 = vmul.f32 %v1957_v56, %v1782_v49  ;;  %v1784_v60 = vadd.f32 %v1783_v52, %v1743_v57 }
 0x148   :  { %v1745_v63 = vpop.f32.mrf.mxu0  ;;  %2466 = vmatpush2.bf16.msra.mxu1 %v3550_v5  ;;  %v3570_v5 = vld [vmem:[%s4782_s7 + $0x40] sm:$0xff]  }
 0x149   :  { %v1786_v0 = vpop.f32.mrf.mxu1  ;;  %v2000_v2 = vadd.f32 %v1983_v55, %v1974_v59  ;;  %v1975_v4 = vmul.f32 %v1961_v47, %v1784_v60  ;;  %2467 = vmatprep.subr.bf16.mxu1 %v3555_v8  ;;  %v2492_v8 = vld [vmem:[%s4781_s6] sm:$0x3] }
 0x14b   :  { %v2001_v6 = vadd.f32 %v1987_v61, %v1975_v4  ;;  %v2004_v7 = vmax.f32 %v2000_v2, 0.0  ;;  %v3569_v2 = vld [vmem:[%s4782_s7 + $0x8] sm:$0xff]  }
 0x14c   :  { %2468 = vmatpush2.bf16.msra.mxu1 %v3553_v10 }
 0x14d   :  { %v2005_v9 = vmax.f32 %v2001_v6, 0.0  ;;  %v2008_v12 = vpack.c.bf16 %v2004_v7, %v2004_v7  ;;  %v3571_v6 = vld [vmem:[%s4782_s7] sm:$0xff]   ;;  %s3599_s7 = smov [#allocation2]  }
 0x14e   :  { %v2478_v7 = vld [vmem:[%s4780_s5] sm:$0x3] }
 0x14f   :  { %v2009_v11 = vpack.c.bf16 %v2005_v9, %v2005_v9  ;;  %v2483_v9 = vrot.slane %v2478_v7, %v4652_v44 }
 0x151   :  { %2428 = vmatprep.mubr.bf16.mxu0 %v2009_v11 }
 0x152   :  { %2429 = vmatmul.mubr.bf16.vlgmr.msra.gmra.mxu0 %v2008_v12  ;;  %v2497_v12 = vrot.slane %v2492_v8, %v4652_v44 }
 0x153   :  { %3051 = vmatpush3.bf16.msra.mxu0 %v3557_v25 }
 0x154   :  { %3052 = vmatprep.subr.bf16.mxu0 %v3558_v26 }
 0x157   :  { %3053 = vmatpush3.bf16.msra.mxu0 %v3559_v27 }
 0x158   :  { %3054 = vmatprep.subr.bf16.mxu0 %v3560_v28 }
 0x15b   :  { %3055 = vmatpush3.bf16.msra.mxu0 %v3561_v29 }
 0x15c   :  { %3056 = vmatprep.subr.bf16.mxu0 %v3562_v30  ;;  %v3033_v30 = vld [vmem:[%s4783_s8] ss:$0 sm:$0xff]  ;;  %s2705_s8 = sshll.u32 %s3599_s7, 4  ;;  %s2706_s8 = int_to_ptr.vmem [resolvable:$true] %s2705_s8 }
 0x15d   :  { %s3576_s28 = scalar_lea.vmem %s2706_s8, 32  ;;  %p3581_p1 = scmp.lt.s32.totalorder %s2706_s8, %s2706_s8 }
 0x15e   :  { %p3577_p0 = scmp.ne.s32.totalorder %s2706_s8, %s3576_s28  ;;  %p3582_p2 = scmp.lt.s32.totalorder %s3576_s28, %s3576_s28 }
 0x15f   :  { %3057 = vmatpush3.bf16.msra.mxu0 %v3563_v33 }
 0x160   :  { %3058 = vmatprep.subr.bf16.mxu0 %v3564_v34  ;;  %p3583_p3 = por %p3582_p2, %p3581_p1 }
 0x162   :  { %p3584_p4 = pnand %p3583_p3, %p3577_p0 }
 0x163   :  { %3059 = vmatpush3.bf16.msra.mxu0 %v3565_v35 }
 0x164   :  { %3060 = vmatprep.subr.bf16.mxu0 %v3566_v62 }
 0x167   :  { %3061 = vmatpush3.bf16.msra.mxu0 %v3567_v32 }
 0x168   :  { %3062 = vmatprep.subr.bf16.mxu0 %v3568_v1 }
 0x16b   :  { %3063 = vmatpush3.bf16.msra.mxu0 %v3569_v2 }
 0x16c   :  { %3064 = vmatprep.subr.bf16.mxu0 %v3570_v5 }
 0x16f   :  { %3065 = vmatpush3.bf16.msra.mxu0 %v3571_v6 }
 0x182   :  { %v1822_v13 = vpop.f32.mrf.mxu0 }
 0x183   :  { %v1863_v14 = vpop.f32.mrf.mxu1 }
 0x184   :  { %v1864_v15 = vadd.f32 %v1863_v14, %v1822_v13  ;;  %v1824_v18 = vpop.f32.mrf.mxu0  ;;  %v2487_v13 = vrot.slane %v2478_v7, %v4663_v46 }
 0x185   :  { %v1865_v19 = vpop.f32.mrf.mxu1 }
 0x186   :  { %v1826_v20 = vpop.f32.mrf.mxu0  ;;  %v1866_v40 = vadd.f32 %v1865_v19, %v1824_v18  ;;  %v2501_v19 = vrot.slane %v2492_v8, %v4663_v46 }
 0x187   :  { %v1867_v21 = vpop.f32.mrf.mxu1 }
 0x188   :  { %v1827_v22 = vpop.f32.mrf.mxu0 }
 0x189   :  { %v1868_v23 = vpop.f32.mrf.mxu1 }
 0x1c2   :  { %v1904_v38 = vpop.f32.mrf.mxu0 }
 0x1c3   :  { %v1945_v39 = vpop.f32.mrf.mxu1  ;;  %v1905_v41 = vadd.f32 %v1904_v38, %v1864_v15 }
 0x1c4   :  { %v1906_v3 = vpop.f32.mrf.mxu0 }
 0x1c5   :  { %v1947_v17 = vpop.f32.mrf.mxu1  ;;  %v1946_v48 = vadd.f32 %v1945_v39, %v1905_v41  ;;  %v1907_v50 = vadd.f32 %v1906_v3, %v1866_v40 }
 0x1c6   :  { %v1908_v56 = vpop.f32.mrf.mxu0 }
 0x1c7   :  { %v1949_v51 = vpop.f32.mrf.mxu1  ;;  %v1976_v52 = vmul.f32 %v1965_v42, %v1946_v48  ;;  %v1948_v54 = vadd.f32 %v1947_v17, %v1907_v50 }
 0x1c8   :  { %v1909_v49 = vpop.f32.mrf.mxu0 }
 0x1c9   :  { %v1950_v55 = vpop.f32.mrf.mxu1  ;;  %v2002_v57 = vadd.f32 %v1991_v31, %v1976_v52  ;;  %v1977_v47 = vmul.f32 %v1969_v53, %v1948_v54 }
 0x1cb   :  { %v2003_v45 = vadd.f32 %v1995_v43, %v1977_v47  ;;  %v2006_v16 = vmax.f32 %v2002_v57, 0.0 }
 0x1cd   :  { %v2007_v58 = vmax.f32 %v2003_v45, 0.0  ;;  %v2010_v60 = vpack.c.bf16 %v2006_v16, %v2006_v16 }
 0x1cf   :  { %v2011_v59 = vpack.c.bf16 %v2007_v58, %v2007_v58 }
 0x1d1   :  { %2469 = vmatprep.mubr.bf16.mxu1 %v2011_v59 }
 0x1d2   :  { %2470 = vmatmul.mubr.bf16.vlgmr.msra.gmra.mxu1 %v2010_v60 }
 0x212   :  { %v2430_v61 = vpop.f32.mrf.mxu0 }
 0x214   :  { %v2432_v63 = vpop.f32.mrf.mxu0 }
 0x216   :  { %v2434_v0 = vpop.f32.mrf.mxu0 }
 0x218   :  { %v2435_v4 = vpop.f32.mrf.mxu0 }
 0x292   :  { %v2471_v10 = vpop.f32.mrf.mxu1 }
 0x293   :  { %v2472_v11 = vadd.f32 %v2471_v10, %v2430_v61 }
 0x294   :  { %v2473_v14 = vpop.f32.mrf.mxu1 }
 0x295   :  { %v2490_v15 = vmul.f32 %v2483_v9, %v2472_v11  ;;  %v2474_v18 = vadd.f32 %v2473_v14, %v2432_v63 }
 0x296   :  { %v2475_v20 = vpop.f32.mrf.mxu1 }
 0x297   :  { %v2504_v21 = vadd.f32 %v2497_v12, %v2490_v15  ;;  %v2491_v22 = vmul.f32 %v2487_v13, %v2474_v18 }
 0x298   :  { %v2476_v23 = vpop.f32.mrf.mxu1 }
 0x299   :  { %v2505_v24 = vadd.f32 %v2501_v19, %v2491_v22  ;;  %v2506_v25 = vmax.f32 %v2504_v21, 0.0 }
 0x29b   :  { %v2507_v26 = vmax.f32 %v2505_v24, 0.0  ;;  %v2508_v28 = vpack.c.bf16 %v2506_v25, %v2506_v25 }
 0x29d   :  { %v2509_v27 = vpack.c.bf16 %v2507_v26, %v2507_v26 }
 0x29f   :  { %2677 = vmatprep.mubr.bf16.mxu0 %v2509_v27 }
 0x2a0   :  { %2678 = vmatmul.mubr.bf16.vlgmr.msra.gmra.mxu0 %v2508_v28 }
 0x360   :  { %v3066_v29 = vpop.f32.mrf.mxu0 }
 0x362   :  { %v3067_v44 = vpop.f32.mrf.mxu0 }
 0x363   :  { %v3068_v33 = vadd.f32 %v3067_v44, %v3066_v29 }
 0x364   :  { %v3069_v34 = vpop.f32.mrf.mxu0 }
 0x365   :  { %v2680_v46 = vadd.f32 %v3068_v33, %v3033_v30 }
 0x366   :  { %v3070_v35 = vpop.f32.mrf.mxu0 }
 0x367   :  { %v2686_v36 = vsel %vm2685_vm0, %v2680_v46, -inf }
 0x368   :  { %2687 = vmax.xlane.f32.xlu0 %v2686_v36 }
 0x3f1   :  { %v2688_v37 = vpop.xlane.xlu0 %2687 }
 0x3f2   :  { %v2689_v38 = vsub.f32 %v2680_v46, %v2688_v37 }
 0x3f4   :  { %v2690_v39 = vmul.f32 1.442695, %v2689_v38 }
 0x3f6   :  { %3572 = vpow2.f32 %v2690_v39 }
 0x403   :  { %v3573_v40 = vpop.eup %3572 }
 0x404   :  { %v2692_v41 = vsel %vm2685_vm0, %v3573_v40, 0.0 }
 0x405   :  { %2693 = vadd.xlane.f32.xlu0 %v2692_v41 }
 0x48e   :  { %v2694_v42 = vpop.xlane.xlu0 %2693 }
 0x48f   :  { %3574 = vlog2.f32 %v2694_v42 }
 0x49c   :  { %v3575_v3 = vpop.eup %3574 }
 0x49d   :  { %v2696_v17 = vmul.f32 0.6931472, %v3575_v3 }
 0x49f   :  { %v2697_v48 = vsub.f32 %v2689_v38, %v2696_v17 }
 0x4a1   :  { %2698 = vst.msk [vmem:[#allocation2] sm:$0x3] %vm2685_vm0, %v2697_v48 }
 0x4a2   :  { %3587 = shalt.err (!%p3584_p4)
}
 0x4a3   :  { %2708 = dma.vmem_to_hbm [thread:$0]  %s2706_s8, 32, %s4784_s9, [#allocation3]  }
 0x4a4   :  { %3596 = dma.done.wait [#allocation3], 32  }
 0x4a5   :  { %3597 = vsyncadd [#allocation3], 4294967264 }
 0x4a6   :  { %2712 = vsyncpa [#allocation3], 1 }

// kernel: get_model_forward.11
= control target key start
LH: loop header
LB: loop body
LE: loop exit
PB: predicated region body
PF: predicated region fallthrough
CT: control target
= control target key end

     0   :  { %v8110_v36 = vmov 1983009808   ;;  %v43_v38 = vlaneseq  ;;  %s11011_s1 = inlined_call_operand.vmem [shape: bf16[1024,512], index: 1, kind: input, shape index: {}]   ;;  %s11012_s0 = inlined_call_operand.vmem [shape: f32[2,1024], index: 0, kind: input, shape index: {}]   ;;  %s11013_s4 = inlined_call_operand.vmem [shape: bf16[512,256], index: 4, kind: input, shape index: {}]   ;;  %s11014_s2 = inlined_call_operand.vmem [shape: f32[1,512], index: 2, kind: input, shape index: {}]   ;;  %s11015_s3 = inlined_call_operand.vmem [shape: f32[1,512], index: 3, kind: input, shape index: {}]   ;;  %s11016_s7 = inlined_call_operand.vmem [shape: bf16[256,4096], index: 7, kind: input, shape index: {}]   ;;  %s11017_s5 = inlined_call_operand.vmem [shape: f32[1,256], index: 5, kind: input, shape index: {}]   ;;  %s11018_s6 = inlined_call_operand.vmem [shape: f32[1,256], index: 6, kind: input, shape index: {}]   ;;  %s11019_s8 = inlined_call_operand.vmem [shape: f32[1,4096], index: 8, kind: input, shape index: {}]   ;;  %s11020_s9 = inlined_call_operand.vmem [shape: f32[1,4096], index: 9, kind: input, shape index: {}]   ;;  %s11021_s10 = inlined_call_operand.vmem [shape: f32[2,4096], index: 10, kind: output, shape index: {}]  }
   0x1   :  { %v7628_v0 = vld [vmem:[%s11011_s1 + $0xe4] ss:$16 sps:$4 sm:$0xff]   ;;  %v7632_v2 = vld [vmem:[%s11011_s1 + $0xe0] ss:$16 sps:$4 sm:$0xff]   ;;  %v41_v37 = vunpack.c.l.s4 %v8110_v36 }
   0x2   :  { %v7630_v1 = vld [vmem:[%s11011_s1 + $0x2e4] ss:$16 sps:$4 sm:$0xff]   ;;  %1625 = vmatprep.subr.bf16.mxu0 %v7628_v0  ;;  %v7633_v3 = vld [vmem:[%s11011_s1 + $0x2e0] ss:$16 sps:$4 sm:$0xff]   ;;  %v8283_v43 = vshrl.u32 %v43_v38, 7 }
   0x3   :  { %1666 = vmatprep.subr.bf16.mxu1 %v7630_v1  ;;  %v7634_v4 = vld [vmem:[%s11011_s1 + $0xc4] ss:$16 sps:$4 sm:$0xff]   ;;  %1626 = vmatpush1.bf16.msra.mxu0 %v7632_v2  ;;  %v7638_v6 = vld [vmem:[%s11011_s1 + $0xc0] ss:$16 sps:$4 sm:$0xff]   ;;  %v42_v42 = vunpack.c.0.s8 %v41_v37 }
   0x4   :  { %1667 = vmatpush1.bf16.msra.mxu1 %v7633_v3  ;;  %v7636_v5 = vld [vmem:[%s11011_s1 + $0x2c4] ss:$16 sps:$4 sm:$0xff]   ;;  %1627 = vmatprep.subr.bf16.mxu0 %v7634_v4  ;;  %v7639_v7 = vld [vmem:[%s11011_s1 + $0x2c0] ss:$16 sps:$4 sm:$0xff]   ;;  %v36_v4 = vld [vmem:[%s11012_s0 + $0x8] sm:$0xff] }
   0x5   :  { %1668 = vmatprep.subr.bf16.mxu1 %v7636_v5  ;;  %v7640_v8 = vld [vmem:[%s11011_s1 + $0xa4] ss:$16 sps:$4 sm:$0xff]   ;;  %v7644_v10 = vld [vmem:[%s11011_s1 + $0xa0] ss:$16 sps:$4 sm:$0xff]   ;;  %v8301_v49 = vsub.s32 %v42_v42, %v8283_v43 }
   0x6   :  { %v7642_v9 = vld [vmem:[%s11011_s1 + $0x2a4] ss:$16 sps:$4 sm:$0xff]   ;;  %v7645_v11 = vld [vmem:[%s11011_s1 + $0x2a0] ss:$16 sps:$4 sm:$0xff]  }
   0x7   :  { %1628 = vmatpush1.bf16.msra.mxu0 %v7638_v6  ;;  %v7646_v12 = vld [vmem:[%s11011_s1 + $0x84] ss:$16 sps:$4 sm:$0xff]   ;;  %v7650_v14 = vld [vmem:[%s11011_s1 + $0x80] ss:$16 sps:$4 sm:$0xff]  }
   0x8   :  { %1669 = vmatpush1.bf16.msra.mxu1 %v7639_v7  ;;  %1629 = vmatprep.subr.bf16.mxu0 %v7640_v8  ;;  %v7648_v13 = vld [vmem:[%s11011_s1 + $0x284] ss:$16 sps:$4 sm:$0xff]   ;;  %v7651_v15 = vld [vmem:[%s11011_s1 + $0x280] ss:$16 sps:$4 sm:$0xff]  }
   0x9   :  { %1670 = vmatprep.subr.bf16.mxu1 %v7642_v9  ;;  %v7652_v16 = vld [vmem:[%s11011_s1 + $0x64] ss:$16 sps:$4 sm:$0xff]   ;;  %v7656_v18 = vld [vmem:[%s11011_s1 + $0x60] ss:$16 sps:$4 sm:$0xff]   ;;  %v56_v9 = vcombine.high %v36_v4, %v36_v4 }
   0xa   :  { %v7654_v17 = vld [vmem:[%s11011_s1 + $0x264] ss:$16 sps:$4 sm:$0xff]   ;;  %v7657_v19 = vld [vmem:[%s11011_s1 + $0x260] ss:$16 sps:$4 sm:$0xff]  }
   0xb   :  { %1630 = vmatpush1.bf16.msra.mxu0 %v7644_v10  ;;  %v7658_v20 = vld [vmem:[%s11011_s1 + $0x44] ss:$16 sps:$4 sm:$0xff]   ;;  %v7662_v22 = vld [vmem:[%s11011_s1 + $0x40] ss:$16 sps:$4 sm:$0xff]  }
   0xc   :  { %1671 = vmatpush1.bf16.msra.mxu1 %v7645_v11  ;;  %1631 = vmatprep.subr.bf16.mxu0 %v7646_v12  ;;  %v7660_v21 = vld [vmem:[%s11011_s1 + $0x244] ss:$16 sps:$4 sm:$0xff]   ;;  %v7663_v23 = vld [vmem:[%s11011_s1 + $0x240] ss:$16 sps:$4 sm:$0xff]  }
   0xd   :  { %1672 = vmatprep.subr.bf16.mxu1 %v7648_v13  ;;  %v7664_v24 = vld [vmem:[%s11011_s1 + $0x24] ss:$16 sps:$4 sm:$0xff]   ;;  %v7668_v26 = vld [vmem:[%s11011_s1 + $0x20] ss:$16 sps:$4 sm:$0xff]  }
   0xe   :  { %v7666_v25 = vld [vmem:[%s11011_s1 + $0x224] ss:$16 sps:$4 sm:$0xff]   ;;  %v7669_v27 = vld [vmem:[%s11011_s1 + $0x220] ss:$16 sps:$4 sm:$0xff]  }
   0xf   :  { %1632 = vmatpush1.bf16.msra.mxu0 %v7650_v14  ;;  %v7670_v28 = vld [vmem:[%s11011_s1 + $0x4] ss:$16 sps:$4 sm:$0xff]   ;;  %v7674_v30 = vld [vmem:[%s11011_s1] ss:$16 sps:$4 sm:$0xff]   ;;  %v8372_v14 = vrot.slane %v36_v4, %v8301_v49 }
  0x10   :  { %1673 = vmatpush1.bf16.msra.mxu1 %v7651_v15  ;;  %1633 = vmatprep.subr.bf16.mxu0 %v7652_v16  ;;  %v7672_v29 = vld [vmem:[%s11011_s1 + $0x204] ss:$16 sps:$4 sm:$0xff]   ;;  %v7675_v31 = vld [vmem:[%s11011_s1 + $0x200] ss:$16 sps:$4 sm:$0xff]   ;;  %v8375_v15 = vrot.slane %v56_v9, %v8301_v49 }
  0x11   :  { %1674 = vmatprep.subr.bf16.mxu1 %v7654_v17  ;;  %v7676_v32 = vld [vmem:[%s11011_s1 + $0x1e4] ss:$16 sps:$4 sm:$0xff]   ;;  %v7680_v34 = vld [vmem:[%s11011_s1 + $0x1e0] ss:$16 sps:$4 sm:$0xff]  }
  0x12   :  { %v7678_v33 = vld [vmem:[%s11011_s1 + $0x3e4] ss:$16 sps:$4 sm:$0xff]   ;;  %v7681_v35 = vld [vmem:[%s11011_s1 + $0x3e0] ss:$16 sps:$4 sm:$0xff]  }
  0x13   :  { %1634 = vmatpush1.bf16.msra.mxu0 %v7656_v18  ;;  %v7682_v39 = vld [vmem:[%s11011_s1 + $0x1c4] ss:$16 sps:$4 sm:$0xff]   ;;  %v7686_v41 = vld [vmem:[%s11011_s1 + $0x1c0] ss:$16 sps:$4 sm:$0xff]  }
  0x14   :  { %1675 = vmatpush1.bf16.msra.mxu1 %v7657_v19  ;;  %1635 = vmatprep.subr.bf16.mxu0 %v7658_v20  ;;  %v7684_v40 = vld [vmem:[%s11011_s1 + $0x3c4] ss:$16 sps:$4 sm:$0xff]   ;;  %v7687_v44 = vld [vmem:[%s11011_s1 + $0x3c0] ss:$16 sps:$4 sm:$0xff]   ;;  %v71_v20 = vcombine.high %v8372_v14, %v8372_v14 }
  0x15   :  { %1676 = vmatprep.subr.bf16.mxu1 %v7660_v21  ;;  %v7688_v45 = vld [vmem:[%s11011_s1 + $0x1a4] ss:$16 sps:$4 sm:$0xff]   ;;  %v7692_v47 = vld [vmem:[%s11011_s1 + $0x1a0] ss:$16 sps:$4 sm:$0xff]   ;;  %v72_v21 = vcombine.high %v8375_v15, %v8375_v15 }
  0x16   :  { %v7690_v46 = vld [vmem:[%s11011_s1 + $0x3a4] ss:$16 sps:$4 sm:$0xff]   ;;  %v7693_v48 = vld [vmem:[%s11011_s1 + $0x3a0] ss:$16 sps:$4 sm:$0xff]  }
  0x17   :  { %1636 = vmatpush1.bf16.msra.mxu0 %v7662_v22  ;;  %v7694_v50 = vld [vmem:[%s11011_s1 + $0x184] ss:$16 sps:$4 sm:$0xff]   ;;  %v7698_v55 = vld [vmem:[%s11011_s1 + $0x180] ss:$16 sps:$4 sm:$0xff]  }
  0x18   :  { %1677 = vmatpush1.bf16.msra.mxu1 %v7663_v23  ;;  %1637 = vmatprep.subr.bf16.mxu0 %v7664_v24  ;;  %v7696_v51 = vld [vmem:[%s11011_s1 + $0x384] ss:$16 sps:$4 sm:$0xff]   ;;  %v7699_v56 = vld [vmem:[%s11011_s1 + $0x380] ss:$16 sps:$4 sm:$0xff]  }
  0x19   :  { %1678 = vmatprep.subr.bf16.mxu1 %v7666_v25  ;;  %v35_v52 = vld [vmem:[%s11012_s0] sm:$0xff] }
  0x1a   :  { %v46_v53 = vrot.slane %v35_v52, %v8301_v49  ;;  %v39_v54 = vcombine.high %v35_v52, %v35_v52  ;;  %v7700_v57 = vld [vmem:[%s11011_s1 + $0x164] ss:$16 sps:$4 sm:$0xff]   ;;  %v7704_v63 = vld [vmem:[%s11011_s1 + $0x160] ss:$16 sps:$4 sm:$0xff]  }
  0x1b   :  { %1638 = vmatpush1.bf16.msra.mxu0 %v7668_v26  ;;  %v7702_v58 = vld [vmem:[%s11011_s1 + $0x364] ss:$16 sps:$4 sm:$0xff]   ;;  %v7705_v0 = vld [vmem:[%s11011_s1 + $0x360] ss:$16 sps:$4 sm:$0xff]  }
  0x1c   :  { %1679 = vmatpush1.bf16.msra.mxu1 %v7669_v27  ;;  %1639 = vmatprep.subr.bf16.mxu0 %v7670_v28  ;;  %v54_v59 = vcombine.high %v46_v53, %v46_v53  ;;  %v53_v60 = vrot.slane %v39_v54, %v8301_v49  ;;  %v7706_v1 = vld [vmem:[%s11011_s1 + $0x144] ss:$16 sps:$4 sm:$0xff]   ;;  %v7710_v5 = vld [vmem:[%s11011_s1 + $0x140] ss:$16 sps:$4 sm:$0xff]   ;;  %v8393_v22 = vpack.c.bf16 %v46_v53, %v46_v53 }
  0x1d   :  { %1680 = vmatprep.subr.bf16.mxu1 %v7672_v29  ;;  %v7708_v2 = vld [vmem:[%s11011_s1 + $0x344] ss:$16 sps:$4 sm:$0xff]   ;;  %v7711_v6 = vld [vmem:[%s11011_s1 + $0x340] ss:$16 sps:$4 sm:$0xff]   ;;  %v8409_v28 = vpack.c.bf16 %v71_v20, %v71_v20  ;;  %v8411_v29 = vpack.c.bf16 %v72_v21, %v72_v21 }
  0x1e   :  { %v8326_v61 = vpack.c.bf16 %v54_v59, %v54_v59  ;;  %v55_v62 = vcombine.high %v53_v60, %v53_v60  ;;  %v7712_v7 = vld [vmem:[%s11011_s1 + $0x124] ss:$16 sps:$4 sm:$0xff]   ;;  %v7716_v10 = vld [vmem:[%s11011_s1 + $0x120] ss:$16 sps:$4 sm:$0xff]   ;;  %v8395_v23 = vpack.c.bf16 %v53_v60, %v53_v60 }
  0x1f   :  { %1640 = vmatpush1.bf16.msra.mxu0 %v7674_v30  ;;  %v7714_v8 = vld [vmem:[%s11011_s1 + $0x324] ss:$16 sps:$4 sm:$0xff]   ;;  %v7717_v11 = vld [vmem:[%s11011_s1 + $0x320] ss:$16 sps:$4 sm:$0xff]  }
  0x20   :  { %1681 = vmatpush1.bf16.msra.mxu1 %v7675_v31  ;;  %1641 = vmatprep.subr.bf16.mxu0 %v7676_v32  ;;  %v8340_v3 = vpack.c.bf16 %v55_v62, %v55_v62  ;;  %v7718_v12 = vld [vmem:[%s11011_s1 + $0x104] ss:$16 sps:$4 sm:$0xff]   ;;  %v7722_v16 = vld [vmem:[%s11011_s1 + $0x100] ss:$16 sps:$4 sm:$0xff]  }
  0x21   :  { %1682 = vmatprep.subr.bf16.mxu1 %v7678_v33  ;;  %1657 = vmatprep.mubr.bf16.mxu0 %v8326_v61  ;;  %v7720_v13 = vld [vmem:[%s11011_s1 + $0x304] ss:$16 sps:$4 sm:$0xff]   ;;  %v7723_v17 = vld [vmem:[%s11011_s1 + $0x300] ss:$16 sps:$4 sm:$0xff]  }
  0x22   :  { %1698 = vmatprep.mubr.bf16.mxu1 %v8340_v3  ;;  %v7728_v18 = vld [vmem:[%s11011_s1 + $0x4e4] ss:$16 sps:$4 sm:$0xff]   ;;  %v7726_v24 = vld [vmem:[%s11011_s1 + $0x4e0] ss:$16 sps:$4 sm:$0xff]  }
  0x23   :  { %1642 = vmatpush2.bf16.msra.mxu0 %v7680_v34  ;;  %v7731_v19 = vld [vmem:[%s11011_s1 + $0x6e4] ss:$16 sps:$4 sm:$0xff]   ;;  %v7729_v25 = vld [vmem:[%s11011_s1 + $0x6e0] ss:$16 sps:$4 sm:$0xff]  }
  0x24   :  { %1683 = vmatpush2.bf16.msra.mxu1 %v7681_v35  ;;  %1643 = vmatprep.subr.bf16.mxu0 %v7682_v39  ;;  %v7734_v26 = vld [vmem:[%s11011_s1 + $0x4c4] ss:$16 sps:$4 sm:$0xff]   ;;  %v7732_v30 = vld [vmem:[%s11011_s1 + $0x4c0] ss:$16 sps:$4 sm:$0xff]  }
  0x25   :  { %1684 = vmatprep.subr.bf16.mxu1 %v7684_v40  ;;  %v7737_v27 = vld [vmem:[%s11011_s1 + $0x6c4] ss:$16 sps:$4 sm:$0xff]   ;;  %v7735_v31 = vld [vmem:[%s11011_s1 + $0x6c0] ss:$16 sps:$4 sm:$0xff]  }
  0x26   :  { %v7740_v32 = vld [vmem:[%s11011_s1 + $0x4a4] ss:$16 sps:$4 sm:$0xff]   ;;  %v7738_v34 = vld [vmem:[%s11011_s1 + $0x4a0] ss:$16 sps:$4 sm:$0xff]  }
  0x27   :  { %1644 = vmatpush2.bf16.msra.mxu0 %v7686_v41  ;;  %v7743_v33 = vld [vmem:[%s11011_s1 + $0x6a4] ss:$16 sps:$4 sm:$0xff]   ;;  %v7741_v35 = vld [vmem:[%s11011_s1 + $0x6a0] ss:$16 sps:$4 sm:$0xff]  }
  0x28   :  { %1685 = vmatpush2.bf16.msra.mxu1 %v7687_v44  ;;  %1645 = vmatprep.subr.bf16.mxu0 %v7688_v45  ;;  %v7746_v36 = vld [vmem:[%s11011_s1 + $0x484] ss:$16 sps:$4 sm:$0xff]   ;;  %v7744_v38 = vld [vmem:[%s11011_s1 + $0x480] ss:$16 sps:$4 sm:$0xff]  }
  0x29   :  { %1686 = vmatprep.subr.bf16.mxu1 %v7690_v46  ;;  %v7749_v37 = vld [vmem:[%s11011_s1 + $0x684] ss:$16 sps:$4 sm:$0xff]   ;;  %v7747_v39 = vld [vmem:[%s11011_s1 + $0x680] ss:$16 sps:$4 sm:$0xff]  }
  0x2a   :  { %v7752_v40 = vld [vmem:[%s11011_s1 + $0x464] ss:$16 sps:$4 sm:$0xff]   ;;  %v7750_v42 = vld [vmem:[%s11011_s1 + $0x460] ss:$16 sps:$4 sm:$0xff]  }
  0x2b   :  { %1646 = vmatpush2.bf16.msra.mxu0 %v7692_v47  ;;  %v7755_v41 = vld [vmem:[%s11011_s1 + $0x664] ss:$16 sps:$4 sm:$0xff]   ;;  %v7753_v44 = vld [vmem:[%s11011_s1 + $0x660] ss:$16 sps:$4 sm:$0xff]  }
  0x2c   :  { %1687 = vmatpush2.bf16.msra.mxu1 %v7693_v48  ;;  %1647 = vmatprep.subr.bf16.mxu0 %v7694_v50  ;;  %v7758_v45 = vld [vmem:[%s11011_s1 + $0x444] ss:$16 sps:$4 sm:$0xff]   ;;  %v7756_v47 = vld [vmem:[%s11011_s1 + $0x440] ss:$16 sps:$4 sm:$0xff]  }
  0x2d   :  { %1688 = vmatprep.subr.bf16.mxu1 %v7696_v51  ;;  %v7761_v46 = vld [vmem:[%s11011_s1 + $0x644] ss:$16 sps:$4 sm:$0xff]   ;;  %v7759_v48 = vld [vmem:[%s11011_s1 + $0x640] ss:$16 sps:$4 sm:$0xff]  }
  0x2e   :  { %v7764_v50 = vld [vmem:[%s11011_s1 + $0x424] ss:$16 sps:$4 sm:$0xff]   ;;  %v7762_v52 = vld [vmem:[%s11011_s1 + $0x420] ss:$16 sps:$4 sm:$0xff]  }
  0x2f   :  { %1648 = vmatpush2.bf16.msra.mxu0 %v7698_v55  ;;  %v7767_v51 = vld [vmem:[%s11011_s1 + $0x624] ss:$16 sps:$4 sm:$0xff]   ;;  %v7765_v53 = vld [vmem:[%s11011_s1 + $0x620] ss:$16 sps:$4 sm:$0xff]  }
  0x30   :  { %1689 = vmatpush2.bf16.msra.mxu1 %v7699_v56  ;;  %1649 = vmatprep.subr.bf16.mxu0 %v7700_v57  ;;  %v7770_v54 = vld [vmem:[%s11011_s1 + $0x404] ss:$16 sps:$4 sm:$0xff]   ;;  %v7768_v56 = vld [vmem:[%s11011_s1 + $0x400] ss:$16 sps:$4 sm:$0xff]  }
  0x31   :  { %1690 = vmatprep.subr.bf16.mxu1 %v7702_v58  ;;  %v7773_v55 = vld [vmem:[%s11011_s1 + $0x604] ss:$16 sps:$4 sm:$0xff]   ;;  %v7771_v57 = vld [vmem:[%s11011_s1 + $0x600] ss:$16 sps:$4 sm:$0xff]  }
  0x32   :  { %v7776_v58 = vld [vmem:[%s11011_s1 + $0x5e4] ss:$16 sps:$4 sm:$0xff]   ;;  %v7774_v60 = vld [vmem:[%s11011_s1 + $0x5e0] ss:$16 sps:$4 sm:$0xff]  }
  0x33   :  { %1650 = vmatpush2.bf16.msra.mxu0 %v7704_v63  ;;  %v7779_v59 = vld [vmem:[%s11011_s1 + $0x7e4] ss:$16 sps:$4 sm:$0xff]   ;;  %v7777_v62 = vld [vmem:[%s11011_s1 + $0x7e0] ss:$16 sps:$4 sm:$0xff]  }
  0x34   :  { %1691 = vmatpush2.bf16.msra.mxu1 %v7705_v0  ;;  %1651 = vmatprep.subr.bf16.mxu0 %v7706_v1  ;;  %v7782_v63 = vld [vmem:[%s11011_s1 + $0x5c4] ss:$16 sps:$4 sm:$0xff]   ;;  %v7780_v1 = vld [vmem:[%s11011_s1 + $0x5c0] ss:$16 sps:$4 sm:$0xff]  }
  0x35   :  { %1692 = vmatprep.subr.bf16.mxu1 %v7708_v2  ;;  %v7785_v0 = vld [vmem:[%s11011_s1 + $0x7c4] ss:$16 sps:$4 sm:$0xff]   ;;  %v7783_v2 = vld [vmem:[%s11011_s1 + $0x7c0] ss:$16 sps:$4 sm:$0xff]  }
  0x36   :  { %v7788_v4 = vld [vmem:[%s11011_s1 + $0x5a4] ss:$16 sps:$4 sm:$0xff]   ;;  %v7804_v20 = vld [vmem:[%s11011_s1 + $0x540] ss:$16 sps:$4 sm:$0xff]  }
  0x37   :  { %1652 = vmatpush2.bf16.msra.mxu0 %v7710_v5  ;;  %v7791_v5 = vld [vmem:[%s11011_s1 + $0x7a4] ss:$16 sps:$4 sm:$0xff]   ;;  %v7807_v21 = vld [vmem:[%s11011_s1 + $0x740] ss:$16 sps:$4 sm:$0xff]  }
  0x38   :  { %1693 = vmatpush2.bf16.msra.mxu1 %v7711_v6  ;;  %1653 = vmatprep.subr.bf16.mxu0 %v7712_v7  ;;  %v7786_v6 = vld [vmem:[%s11011_s1 + $0x5a0] ss:$16 sps:$4 sm:$0xff]   ;;  %v7797_v9 = vld [vmem:[%s11011_s1 + $0x784] ss:$16 sps:$4 sm:$0xff]  }
  0x39   :  { %1694 = vmatprep.subr.bf16.mxu1 %v7714_v8  ;;  %v7789_v7 = vld [vmem:[%s11011_s1 + $0x7a0] ss:$16 sps:$4 sm:$0xff]   ;;  %v7794_v8 = vld [vmem:[%s11011_s1 + $0x584] ss:$16 sps:$4 sm:$0xff]  }
  0x3b   :  { %1654 = vmatpush2.bf16.msra.mxu0 %v7716_v10  ;;  %v7792_v10 = vld [vmem:[%s11011_s1 + $0x580] ss:$16 sps:$4 sm:$0xff]  }
  0x3c   :  { %1695 = vmatpush2.bf16.msra.mxu1 %v7717_v11  ;;  %1655 = vmatprep.subr.bf16.mxu0 %v7718_v12  ;;  %v7795_v11 = vld [vmem:[%s11011_s1 + $0x780] ss:$16 sps:$4 sm:$0xff]   ;;  %v7800_v12 = vld [vmem:[%s11011_s1 + $0x564] ss:$16 sps:$4 sm:$0xff]  }
  0x3d   :  { %1696 = vmatprep.subr.bf16.mxu1 %v7720_v13  ;;  %v7803_v13 = vld [vmem:[%s11011_s1 + $0x764] ss:$16 sps:$4 sm:$0xff]  }
  0x3f   :  { %1656 = vmatpush2.bf16.msra.mxu0 %v7722_v16  ;;  %v7798_v16 = vld [vmem:[%s11011_s1 + $0x560] ss:$16 sps:$4 sm:$0xff]  }
  0x40   :  { %1697 = vmatpush2.bf16.msra.mxu1 %v7723_v17  ;;  %1707 = vmatprep.subr.bf16.mxu0 %v7728_v18  ;;  %v7801_v17 = vld [vmem:[%s11011_s1 + $0x760] ss:$16 sps:$4 sm:$0xff]   ;;  %v7806_v18 = vld [vmem:[%s11011_s1 + $0x544] ss:$16 sps:$4 sm:$0xff]  }
  0x41   :  { %1748 = vmatprep.subr.bf16.mxu1 %v7731_v19  ;;  %v7809_v19 = vld [vmem:[%s11011_s1 + $0x744] ss:$16 sps:$4 sm:$0xff]  }
  0x42   :  { %1658 = vmatmul.mubr.bf16.vlgmr.msra.gmra.mxu0 %v8393_v22 }
  0x43   :  { %1699 = vmatmul.mubr.bf16.vlgmr.msra.gmra.mxu1 %v8395_v23  ;;  %1708 = vmatpush1.bf16.msra.mxu0 %v7726_v24  ;;  %v7812_v24 = vld [vmem:[%s11011_s1 + $0x524] ss:$16 sps:$4 sm:$0xff]  }
  0x44   :  { %1749 = vmatpush1.bf16.msra.mxu1 %v7729_v25  ;;  %1709 = vmatprep.subr.bf16.mxu0 %v7734_v26  ;;  %v7815_v25 = vld [vmem:[%s11011_s1 + $0x724] ss:$16 sps:$4 sm:$0xff]   ;;  %v7810_v26 = vld [vmem:[%s11011_s1 + $0x520] ss:$16 sps:$4 sm:$0xff]  }
  0x45   :  { %1750 = vmatprep.subr.bf16.mxu1 %v7737_v27  ;;  %1739 = vmatprep.mubr.bf16.mxu0 %v8409_v28  ;;  %v7813_v27 = vld [vmem:[%s11011_s1 + $0x720] ss:$16 sps:$4 sm:$0xff]  }
  0x46   :  { %1780 = vmatprep.mubr.bf16.mxu1 %v8411_v29 }
  0x47   :  { %1710 = vmatpush1.bf16.msra.mxu0 %v7732_v30  ;;  %v7818_v30 = vld [vmem:[%s11011_s1 + $0x504] ss:$16 sps:$4 sm:$0xff]  }
  0x48   :  { %1751 = vmatpush1.bf16.msra.mxu1 %v7735_v31  ;;  %1711 = vmatprep.subr.bf16.mxu0 %v7740_v32  ;;  %v7821_v31 = vld [vmem:[%s11011_s1 + $0x704] ss:$16 sps:$4 sm:$0xff]   ;;  %v7816_v32 = vld [vmem:[%s11011_s1 + $0x500] ss:$16 sps:$4 sm:$0xff]  }
  0x49   :  { %1752 = vmatprep.subr.bf16.mxu1 %v7743_v33  ;;  %v7819_v33 = vld [vmem:[%s11011_s1 + $0x700] ss:$16 sps:$4 sm:$0xff]  }
  0x4b   :  { %1712 = vmatpush1.bf16.msra.mxu0 %v7738_v34  ;;  %v7824_v34 = vld [vmem:[%s11011_s1 + $0xec] ss:$16 sps:$4 sm:$0xff]  }
  0x4c   :  { %1753 = vmatpush1.bf16.msra.mxu1 %v7741_v35  ;;  %1713 = vmatprep.subr.bf16.mxu0 %v7746_v36  ;;  %v7827_v35 = vld [vmem:[%s11011_s1 + $0x2ec] ss:$16 sps:$4 sm:$0xff]   ;;  %v8599_v36 = vpack.c.bf16 %v8372_v14, %v8372_v14 }
  0x4d   :  { %1754 = vmatprep.subr.bf16.mxu1 %v7749_v37  ;;  %v8603_v37 = vpack.c.bf16 %v8375_v15, %v8375_v15  ;;  %v7830_v14 = vld [vmem:[%s11011_s1 + $0xcc] ss:$16 sps:$4 sm:$0xff]  }
  0x4e   :  { %v7833_v15 = vld [vmem:[%s11011_s1 + $0x2cc] ss:$16 sps:$4 sm:$0xff]  }
  0x4f   :  { %1714 = vmatpush1.bf16.msra.mxu0 %v7744_v38  ;;  %v7822_v38 = vld [vmem:[%s11011_s1 + $0xe8] ss:$16 sps:$4 sm:$0xff]  }
  0x50   :  { %1755 = vmatpush1.bf16.msra.mxu1 %v7747_v39  ;;  %1715 = vmatprep.subr.bf16.mxu0 %v7752_v40  ;;  %v7825_v39 = vld [vmem:[%s11011_s1 + $0x2e8] ss:$16 sps:$4 sm:$0xff]  }
  0x51   :  { %1756 = vmatprep.subr.bf16.mxu1 %v7755_v41  ;;  %v7828_v40 = vld [vmem:[%s11011_s1 + $0xc8] ss:$16 sps:$4 sm:$0xff]  }
  0x52   :  { %v7831_v41 = vld [vmem:[%s11011_s1 + $0x2c8] ss:$16 sps:$4 sm:$0xff]  }
  0x53   :  { %1716 = vmatpush1.bf16.msra.mxu0 %v7750_v42  ;;  %v7836_v42 = vld [vmem:[%s11011_s1 + $0xac] ss:$16 sps:$4 sm:$0xff]  }
  0x54   :  { %1757 = vmatpush1.bf16.msra.mxu1 %v7753_v44  ;;  %1717 = vmatprep.subr.bf16.mxu0 %v7758_v45  ;;  %v7839_v44 = vld [vmem:[%s11011_s1 + $0x2ac] ss:$16 sps:$4 sm:$0xff]   ;;  %v7834_v45 = vld [vmem:[%s11011_s1 + $0xa8] ss:$16 sps:$4 sm:$0xff]  }
  0x55   :  { %1758 = vmatprep.subr.bf16.mxu1 %v7761_v46  ;;  %v7837_v46 = vld [vmem:[%s11011_s1 + $0x2a8] ss:$16 sps:$4 sm:$0xff]  }
  0x57   :  { %1718 = vmatpush1.bf16.msra.mxu0 %v7756_v47  ;;  %v7842_v47 = vld [vmem:[%s11011_s1 + $0x8c] ss:$16 sps:$4 sm:$0xff]  }
  0x58   :  { %1759 = vmatpush1.bf16.msra.mxu1 %v7759_v48  ;;  %1719 = vmatprep.subr.bf16.mxu0 %v7764_v50  ;;  %v7843_v48 = vld [vmem:[%s11011_s1 + $0x288] ss:$16 sps:$4 sm:$0xff]   ;;  %v7848_v50 = vld [vmem:[%s11011_s1 + $0x6c] ss:$16 sps:$4 sm:$0xff]  }
  0x59   :  { %1760 = vmatprep.subr.bf16.mxu1 %v7767_v51  ;;  %v7851_v51 = vld [vmem:[%s11011_s1 + $0x26c] ss:$16 sps:$4 sm:$0xff]  }
  0x5b   :  { %1720 = vmatpush1.bf16.msra.mxu0 %v7762_v52  ;;  %v7846_v52 = vld [vmem:[%s11011_s1 + $0x68] ss:$16 sps:$4 sm:$0xff]  }
  0x5c   :  { %1761 = vmatpush1.bf16.msra.mxu1 %v7765_v53  ;;  %1721 = vmatprep.subr.bf16.mxu0 %v7770_v54  ;;  %v7849_v53 = vld [vmem:[%s11011_s1 + $0x268] ss:$16 sps:$4 sm:$0xff]   ;;  %v7854_v54 = vld [vmem:[%s11011_s1 + $0x4c] ss:$16 sps:$4 sm:$0xff]  }
  0x5d   :  { %1762 = vmatprep.subr.bf16.mxu1 %v7773_v55  ;;  %v7857_v55 = vld [vmem:[%s11011_s1 + $0x24c] ss:$16 sps:$4 sm:$0xff]  }
  0x5f   :  { %1722 = vmatpush1.bf16.msra.mxu0 %v7768_v56  ;;  %v7852_v56 = vld [vmem:[%s11011_s1 + $0x48] ss:$16 sps:$4 sm:$0xff]  }
  0x60   :  { %1763 = vmatpush1.bf16.msra.mxu1 %v7771_v57  ;;  %1723 = vmatprep.subr.bf16.mxu0 %v7776_v58  ;;  %v7855_v57 = vld [vmem:[%s11011_s1 + $0x248] ss:$16 sps:$4 sm:$0xff]   ;;  %v7860_v58 = vld [vmem:[%s11011_s1 + $0x2c] ss:$16 sps:$4 sm:$0xff]  }
  0x61   :  { %1764 = vmatprep.subr.bf16.mxu1 %v7779_v59  ;;  %v7863_v59 = vld [vmem:[%s11011_s1 + $0x22c] ss:$16 sps:$4 sm:$0xff]  }
  0x63   :  { %1724 = vmatpush2.bf16.msra.mxu0 %v7774_v60  ;;  %v7858_v60 = vld [vmem:[%s11011_s1 + $0x28] ss:$16 sps:$4 sm:$0xff]  }
  0x64   :  { %1765 = vmatpush2.bf16.msra.mxu1 %v7777_v62  ;;  %1725 = vmatprep.subr.bf16.mxu0 %v7782_v63  ;;  %v7861_v62 = vld [vmem:[%s11011_s1 + $0x228] ss:$16 sps:$4 sm:$0xff]   ;;  %v7866_v63 = vld [vmem:[%s11011_s1 + $0xc] ss:$16 sps:$4 sm:$0xff]  }
  0x65   :  { %1766 = vmatprep.subr.bf16.mxu1 %v7785_v0  ;;  %v7869_v0 = vld [vmem:[%s11011_s1 + $0x20c] ss:$16 sps:$4 sm:$0xff]  }
  0x67   :  { %1726 = vmatpush2.bf16.msra.mxu0 %v7780_v1  ;;  %v7864_v1 = vld [vmem:[%s11011_s1 + $0x8] ss:$16 sps:$4 sm:$0xff]  }
  0x68   :  { %1767 = vmatpush2.bf16.msra.mxu1 %v7783_v2  ;;  %1727 = vmatprep.subr.bf16.mxu0 %v7788_v4  ;;  %v7867_v2 = vld [vmem:[%s11011_s1 + $0x208] ss:$16 sps:$4 sm:$0xff]   ;;  %v7872_v4 = vld [vmem:[%s11011_s1 + $0x1ec] ss:$16 sps:$4 sm:$0xff]  }
  0x69   :  { %1768 = vmatprep.subr.bf16.mxu1 %v7791_v5  ;;  %v7875_v5 = vld [vmem:[%s11011_s1 + $0x3ec] ss:$16 sps:$4 sm:$0xff]  }
  0x6b   :  { %1728 = vmatpush2.bf16.msra.mxu0 %v7786_v6  ;;  %v7870_v6 = vld [vmem:[%s11011_s1 + $0x1e8] ss:$16 sps:$4 sm:$0xff]  }
  0x6c   :  { %1769 = vmatpush2.bf16.msra.mxu1 %v7789_v7  ;;  %1729 = vmatprep.subr.bf16.mxu0 %v7794_v8  ;;  %v7873_v7 = vld [vmem:[%s11011_s1 + $0x3e8] ss:$16 sps:$4 sm:$0xff]   ;;  %v7878_v8 = vld [vmem:[%s11011_s1 + $0x1cc] ss:$16 sps:$4 sm:$0xff]  }
  0x6d   :  { %1770 = vmatprep.subr.bf16.mxu1 %v7797_v9  ;;  %v7881_v9 = vld [vmem:[%s11011_s1 + $0x3cc] ss:$16 sps:$4 sm:$0xff]  }
  0x6f   :  { %1730 = vmatpush2.bf16.msra.mxu0 %v7792_v10  ;;  %v7876_v10 = vld [vmem:[%s11011_s1 + $0x1c8] ss:$16 sps:$4 sm:$0xff]  }
  0x70   :  { %1771 = vmatpush2.bf16.msra.mxu1 %v7795_v11  ;;  %1731 = vmatprep.subr.bf16.mxu0 %v7800_v12  ;;  %v7879_v11 = vld [vmem:[%s11011_s1 + $0x3c8] ss:$16 sps:$4 sm:$0xff]   ;;  %v7884_v12 = vld [vmem:[%s11011_s1 + $0x1ac] ss:$16 sps:$4 sm:$0xff]  }
  0x71   :  { %1772 = vmatprep.subr.bf16.mxu1 %v7803_v13  ;;  %v7887_v13 = vld [vmem:[%s11011_s1 + $0x3ac] ss:$16 sps:$4 sm:$0xff]  }
  0x73   :  { %1732 = vmatpush2.bf16.msra.mxu0 %v7798_v16  ;;  %v7882_v16 = vld [vmem:[%s11011_s1 + $0x1a8] ss:$16 sps:$4 sm:$0xff]  }
  0x74   :  { %1773 = vmatpush2.bf16.msra.mxu1 %v7801_v17  ;;  %1733 = vmatprep.subr.bf16.mxu0 %v7806_v18  ;;  %v7885_v17 = vld [vmem:[%s11011_s1 + $0x3a8] ss:$16 sps:$4 sm:$0xff]   ;;  %v7890_v18 = vld [vmem:[%s11011_s1 + $0x18c] ss:$16 sps:$4 sm:$0xff]  }
  0x75   :  { %1774 = vmatprep.subr.bf16.mxu1 %v7809_v19  ;;  %v7893_v19 = vld [vmem:[%s11011_s1 + $0x38c] ss:$16 sps:$4 sm:$0xff]  }
  0x77   :  { %1734 = vmatpush2.bf16.msra.mxu0 %v7804_v20  ;;  %v7888_v20 = vld [vmem:[%s11011_s1 + $0x188] ss:$16 sps:$4 sm:$0xff]  }
  0x78   :  { %1775 = vmatpush2.bf16.msra.mxu1 %v7807_v21  ;;  %1735 = vmatprep.subr.bf16.mxu0 %v7812_v24  ;;  %v7891_v21 = vld [vmem:[%s11011_s1 + $0x388] ss:$16 sps:$4 sm:$0xff]   ;;  %v7896_v24 = vld [vmem:[%s11011_s1 + $0x16c] ss:$16 sps:$4 sm:$0xff]  }
  0x79   :  { %1776 = vmatprep.subr.bf16.mxu1 %v7815_v25  ;;  %v7899_v25 = vld [vmem:[%s11011_s1 + $0x36c] ss:$16 sps:$4 sm:$0xff]  }
  0x7b   :  { %1736 = vmatpush2.bf16.msra.mxu0 %v7810_v26  ;;  %v7894_v26 = vld [vmem:[%s11011_s1 + $0x168] ss:$16 sps:$4 sm:$0xff]  }
  0x7c   :  { %1777 = vmatpush2.bf16.msra.mxu1 %v7813_v27  ;;  %1737 = vmatprep.subr.bf16.mxu0 %v7818_v30  ;;  %v7897_v27 = vld [vmem:[%s11011_s1 + $0x368] ss:$16 sps:$4 sm:$0xff]   ;;  %v7902_v30 = vld [vmem:[%s11011_s1 + $0x14c] ss:$16 sps:$4 sm:$0xff]  }
  0x7d   :  { %1778 = vmatprep.subr.bf16.mxu1 %v7821_v31  ;;  %v7905_v31 = vld [vmem:[%s11011_s1 + $0x34c] ss:$16 sps:$4 sm:$0xff]  }
  0x7f   :  { %1738 = vmatpush2.bf16.msra.mxu0 %v7816_v32  ;;  %v7900_v32 = vld [vmem:[%s11011_s1 + $0x148] ss:$16 sps:$4 sm:$0xff]  }
  0x80   :  { %1779 = vmatpush2.bf16.msra.mxu1 %v7819_v33  ;;  %1789 = vmatprep.subr.bf16.mxu0 %v7824_v34  ;;  %v7903_v33 = vld [vmem:[%s11011_s1 + $0x348] ss:$16 sps:$4 sm:$0xff]   ;;  %v7908_v34 = vld [vmem:[%s11011_s1 + $0x12c] ss:$16 sps:$4 sm:$0xff]  }
  0x81   :  { %1830 = vmatprep.subr.bf16.mxu1 %v7827_v35  ;;  %v7911_v35 = vld [vmem:[%s11011_s1 + $0x32c] ss:$16 sps:$4 sm:$0xff]  }
  0x82   :  { %1740 = vmatmul.mubr.bf16.vlgmr.msra.gmra.mxu0 %v8599_v36 }
  0x83   :  { %1781 = vmatmul.mubr.bf16.vlgmr.msra.gmra.mxu1 %v8603_v37  ;;  %1790 = vmatpush1.bf16.msra.mxu0 %v7822_v38  ;;  %v7906_v38 = vld [vmem:[%s11011_s1 + $0x128] ss:$16 sps:$4 sm:$0xff]  }
  0x84   :  { %1831 = vmatpush1.bf16.msra.mxu1 %v7825_v39  ;;  %1791 = vmatprep.subr.bf16.mxu0 %v7830_v14  ;;  %v7909_v39 = vld [vmem:[%s11011_s1 + $0x328] ss:$16 sps:$4 sm:$0xff]   ;;  %v7914_v14 = vld [vmem:[%s11011_s1 + $0x10c] ss:$16 sps:$4 sm:$0xff]  }
  0x85   :  { %1832 = vmatprep.subr.bf16.mxu1 %v7833_v15  ;;  %1821 = vmatprep.mubr.bf16.mxu0 %v8326_v61  ;;  %v7845_v61 = vld [vmem:[%s11011_s1 + $0x28c] ss:$16 sps:$4 sm:$0xff]  }
  0x86   :  { %1862 = vmatprep.mubr.bf16.mxu1 %v8340_v3  ;;  %v7840_v3 = vld [vmem:[%s11011_s1 + $0x88] ss:$16 sps:$4 sm:$0xff]   ;;  %v7917_v15 = vld [vmem:[%s11011_s1 + $0x30c] ss:$16 sps:$4 sm:$0xff]  }
  0x87   :  { %1792 = vmatpush1.bf16.msra.mxu0 %v7828_v40  ;;  %v7912_v40 = vld [vmem:[%s11011_s1 + $0x108] ss:$16 sps:$4 sm:$0xff]  }
  0x88   :  { %1833 = vmatpush1.bf16.msra.mxu1 %v7831_v41  ;;  %1793 = vmatprep.subr.bf16.mxu0 %v7836_v42  ;;  %v7915_v41 = vld [vmem:[%s11011_s1 + $0x308] ss:$16 sps:$4 sm:$0xff]   ;;  %v7920_v42 = vld [vmem:[%s11011_s1 + $0x4ec] ss:$16 sps:$4 sm:$0xff]  }
  0x89   :  { %1834 = vmatprep.subr.bf16.mxu1 %v7839_v44  ;;  %v7923_v44 = vld [vmem:[%s11011_s1 + $0x6ec] ss:$16 sps:$4 sm:$0xff]  }
  0x8b   :  { %1794 = vmatpush1.bf16.msra.mxu0 %v7834_v45  ;;  %v7918_v45 = vld [vmem:[%s11011_s1 + $0x4e8] ss:$16 sps:$4 sm:$0xff]  }
  0x8c   :  { %1835 = vmatpush1.bf16.msra.mxu1 %v7837_v46  ;;  %1795 = vmatprep.subr.bf16.mxu0 %v7842_v47  ;;  %v7921_v46 = vld [vmem:[%s11011_s1 + $0x6e8] ss:$16 sps:$4 sm:$0xff]   ;;  %v7926_v47 = vld [vmem:[%s11011_s1 + $0x4cc] ss:$16 sps:$4 sm:$0xff]  }
  0x8d   :  { %1836 = vmatprep.subr.bf16.mxu1 %v7845_v61  ;;  %v7929_v61 = vld [vmem:[%s11011_s1 + $0x6cc] ss:$16 sps:$4 sm:$0xff]  }
  0x8f   :  { %1796 = vmatpush1.bf16.msra.mxu0 %v7840_v3  ;;  %v7924_v3 = vld [vmem:[%s11011_s1 + $0x4c8] ss:$16 sps:$4 sm:$0xff]  }
  0x90   :  { %1837 = vmatpush1.bf16.msra.mxu1 %v7843_v48  ;;  %1797 = vmatprep.subr.bf16.mxu0 %v7848_v50  ;;  %v7927_v48 = vld [vmem:[%s11011_s1 + $0x6c8] ss:$16 sps:$4 sm:$0xff]   ;;  %v7932_v50 = vld [vmem:[%s11011_s1 + $0x4ac] ss:$16 sps:$4 sm:$0xff]  }
  0x91   :  { %1838 = vmatprep.subr.bf16.mxu1 %v7851_v51  ;;  %v7935_v51 = vld [vmem:[%s11011_s1 + $0x6ac] ss:$16 sps:$4 sm:$0xff]  }
  0x93   :  { %1798 = vmatpush1.bf16.msra.mxu0 %v7846_v52  ;;  %v7930_v52 = vld [vmem:[%s11011_s1 + $0x4a8] ss:$16 sps:$4 sm:$0xff]  }
  0x94   :  { %1839 = vmatpush1.bf16.msra.mxu1 %v7849_v53  ;;  %1799 = vmatprep.subr.bf16.mxu0 %v7854_v54  ;;  %v7941_v53 = vld [vmem:[%s11011_s1 + $0x68c] ss:$16 sps:$4 sm:$0xff]  }
  0x95   :  { %1840 = vmatprep.subr.bf16.mxu1 %v7857_v55  ;;  %v7944_v54 = vld [vmem:[%s11011_s1 + $0x46c] ss:$16 sps:$4 sm:$0xff]  }
  0x96   :  { %v7947_v55 = vld [vmem:[%s11011_s1 + $0x66c] ss:$16 sps:$4 sm:$0xff]  }
  0x97   :  { %1800 = vmatpush1.bf16.msra.mxu0 %v7852_v56  ;;  %v7942_v56 = vld [vmem:[%s11011_s1 + $0x468] ss:$16 sps:$4 sm:$0xff]  }
  0x98   :  { %1841 = vmatpush1.bf16.msra.mxu1 %v7855_v57  ;;  %1801 = vmatprep.subr.bf16.mxu0 %v7860_v58  ;;  %v7945_v57 = vld [vmem:[%s11011_s1 + $0x668] ss:$16 sps:$4 sm:$0xff]   ;;  %v7950_v58 = vld [vmem:[%s11011_s1 + $0x44c] ss:$16 sps:$4 sm:$0xff]  }
  0x99   :  { %1842 = vmatprep.subr.bf16.mxu1 %v7863_v59  ;;  %v7953_v59 = vld [vmem:[%s11011_s1 + $0x64c] ss:$16 sps:$4 sm:$0xff]  }
  0x9b   :  { %1802 = vmatpush1.bf16.msra.mxu0 %v7858_v60  ;;  %v7948_v60 = vld [vmem:[%s11011_s1 + $0x448] ss:$16 sps:$4 sm:$0xff]  }
  0x9c   :  { %1843 = vmatpush1.bf16.msra.mxu1 %v7861_v62  ;;  %1803 = vmatprep.subr.bf16.mxu0 %v7866_v63  ;;  %v7951_v62 = vld [vmem:[%s11011_s1 + $0x648] ss:$16 sps:$4 sm:$0xff]   ;;  %v7956_v63 = vld [vmem:[%s11011_s1 + $0x42c] ss:$16 sps:$4 sm:$0xff]  }
  0x9d   :  { %1844 = vmatprep.subr.bf16.mxu1 %v7869_v0  ;;  %v7959_v0 = vld [vmem:[%s11011_s1 + $0x62c] ss:$16 sps:$4 sm:$0xff]  }
  0x9f   :  { %1804 = vmatpush1.bf16.msra.mxu0 %v7864_v1  ;;  %v7954_v1 = vld [vmem:[%s11011_s1 + $0x428] ss:$16 sps:$4 sm:$0xff]  }
  0xa0   :  { %1845 = vmatpush1.bf16.msra.mxu1 %v7867_v2  ;;  %1805 = vmatprep.subr.bf16.mxu0 %v7872_v4  ;;  %v7957_v2 = vld [vmem:[%s11011_s1 + $0x628] ss:$16 sps:$4 sm:$0xff]   ;;  %v7962_v4 = vld [vmem:[%s11011_s1 + $0x40c] ss:$16 sps:$4 sm:$0xff]  }
  0xa1   :  { %1846 = vmatprep.subr.bf16.mxu1 %v7875_v5  ;;  %v7965_v5 = vld [vmem:[%s11011_s1 + $0x60c] ss:$16 sps:$4 sm:$0xff]  }
  0xa3   :  { %1806 = vmatpush2.bf16.msra.mxu0 %v7870_v6  ;;  %v7960_v6 = vld [vmem:[%s11011_s1 + $0x408] ss:$16 sps:$4 sm:$0xff]  }
  0xa4   :  { %1847 = vmatpush2.bf16.msra.mxu1 %v7873_v7  ;;  %1807 = vmatprep.subr.bf16.mxu0 %v7878_v8  ;;  %v7963_v7 = vld [vmem:[%s11011_s1 + $0x608] ss:$16 sps:$4 sm:$0xff]   ;;  %v7968_v8 = vld [vmem:[%s11011_s1 + $0x5ec] ss:$16 sps:$4 sm:$0xff]  }
  0xa5   :  { %1848 = vmatprep.subr.bf16.mxu1 %v7881_v9  ;;  %v7971_v9 = vld [vmem:[%s11011_s1 + $0x7ec] ss:$16 sps:$4 sm:$0xff]  }
  0xa7   :  { %1808 = vmatpush2.bf16.msra.mxu0 %v7876_v10  ;;  %v7966_v10 = vld [vmem:[%s11011_s1 + $0x5e8] ss:$16 sps:$4 sm:$0xff]  }
  0xa8   :  { %1849 = vmatpush2.bf16.msra.mxu1 %v7879_v11  ;;  %1809 = vmatprep.subr.bf16.mxu0 %v7884_v12  ;;  %v7969_v11 = vld [vmem:[%s11011_s1 + $0x7e8] ss:$16 sps:$4 sm:$0xff]   ;;  %v7974_v12 = vld [vmem:[%s11011_s1 + $0x5cc] ss:$16 sps:$4 sm:$0xff]  }
  0xa9   :  { %1850 = vmatprep.subr.bf16.mxu1 %v7887_v13  ;;  %v7977_v13 = vld [vmem:[%s11011_s1 + $0x7cc] ss:$16 sps:$4 sm:$0xff]  }
  0xab   :  { %1810 = vmatpush2.bf16.msra.mxu0 %v7882_v16  ;;  %v7972_v16 = vld [vmem:[%s11011_s1 + $0x5c8] ss:$16 sps:$4 sm:$0xff]  }
  0xac   :  { %1851 = vmatpush2.bf16.msra.mxu1 %v7885_v17  ;;  %1811 = vmatprep.subr.bf16.mxu0 %v7890_v18  ;;  %v7975_v17 = vld [vmem:[%s11011_s1 + $0x7c8] ss:$16 sps:$4 sm:$0xff]   ;;  %v7980_v18 = vld [vmem:[%s11011_s1 + $0x5ac] ss:$16 sps:$4 sm:$0xff]  }
  0xad   :  { %1852 = vmatprep.subr.bf16.mxu1 %v7893_v19  ;;  %v7983_v19 = vld [vmem:[%s11011_s1 + $0x7ac] ss:$16 sps:$4 sm:$0xff]  }
  0xaf   :  { %1812 = vmatpush2.bf16.msra.mxu0 %v7888_v20  ;;  %v7978_v20 = vld [vmem:[%s11011_s1 + $0x5a8] ss:$16 sps:$4 sm:$0xff]  }
  0xb0   :  { %1853 = vmatpush2.bf16.msra.mxu1 %v7891_v21  ;;  %1813 = vmatprep.subr.bf16.mxu0 %v7896_v24  ;;  %v7981_v21 = vld [vmem:[%s11011_s1 + $0x7a8] ss:$16 sps:$4 sm:$0xff]   ;;  %v7986_v24 = vld [vmem:[%s11011_s1 + $0x58c] ss:$16 sps:$4 sm:$0xff]  }
  0xb1   :  { %1854 = vmatprep.subr.bf16.mxu1 %v7899_v25  ;;  %v7989_v25 = vld [vmem:[%s11011_s1 + $0x78c] ss:$16 sps:$4 sm:$0xff]  }
  0xb3   :  { %1814 = vmatpush2.bf16.msra.mxu0 %v7894_v26  ;;  %v7984_v26 = vld [vmem:[%s11011_s1 + $0x588] ss:$16 sps:$4 sm:$0xff]  }
  0xb4   :  { %1855 = vmatpush2.bf16.msra.mxu1 %v7897_v27  ;;  %1815 = vmatprep.subr.bf16.mxu0 %v7902_v30  ;;  %v7987_v27 = vld [vmem:[%s11011_s1 + $0x788] ss:$16 sps:$4 sm:$0xff]   ;;  %v7992_v30 = vld [vmem:[%s11011_s1 + $0x56c] ss:$16 sps:$4 sm:$0xff]  }
  0xb5   :  { %1856 = vmatprep.subr.bf16.mxu1 %v7905_v31  ;;  %v7995_v31 = vld [vmem:[%s11011_s1 + $0x76c] ss:$16 sps:$4 sm:$0xff]  }
  0xb7   :  { %1816 = vmatpush2.bf16.msra.mxu0 %v7900_v32  ;;  %v7990_v32 = vld [vmem:[%s11011_s1 + $0x568] ss:$16 sps:$4 sm:$0xff]  }
  0xb8   :  { %1857 = vmatpush2.bf16.msra.mxu1 %v7903_v33  ;;  %1817 = vmatprep.subr.bf16.mxu0 %v7908_v34  ;;  %v7993_v33 = vld [vmem:[%s11011_s1 + $0x768] ss:$16 sps:$4 sm:$0xff]   ;;  %v7998_v34 = vld [vmem:[%s11011_s1 + $0x54c] ss:$16 sps:$4 sm:$0xff]  }
  0xb9   :  { %1858 = vmatprep.subr.bf16.mxu1 %v7911_v35  ;;  %v8001_v35 = vld [vmem:[%s11011_s1 + $0x74c] ss:$16 sps:$4 sm:$0xff]  }
  0xbb   :  { %1818 = vmatpush2.bf16.msra.mxu0 %v7906_v38  ;;  %v7996_v38 = vld [vmem:[%s11011_s1 + $0x548] ss:$16 sps:$4 sm:$0xff]  }
  0xbc   :  { %1859 = vmatpush2.bf16.msra.mxu1 %v7909_v39  ;;  %1819 = vmatprep.subr.bf16.mxu0 %v7914_v14  ;;  %v7999_v39 = vld [vmem:[%s11011_s1 + $0x748] ss:$16 sps:$4 sm:$0xff]   ;;  %v8004_v14 = vld [vmem:[%s11011_s1 + $0x52c] ss:$16 sps:$4 sm:$0xff]  }
  0xbd   :  { %1860 = vmatprep.subr.bf16.mxu1 %v7917_v15  ;;  %v8007_v15 = vld [vmem:[%s11011_s1 + $0x72c] ss:$16 sps:$4 sm:$0xff]  }
  0xbf   :  { %1820 = vmatpush2.bf16.msra.mxu0 %v7912_v40  ;;  %v8002_v40 = vld [vmem:[%s11011_s1 + $0x528] ss:$16 sps:$4 sm:$0xff]  }
  0xc0   :  { %1861 = vmatpush2.bf16.msra.mxu1 %v7915_v41  ;;  %1871 = vmatprep.subr.bf16.mxu0 %v7920_v42  ;;  %v8005_v41 = vld [vmem:[%s11011_s1 + $0x728] ss:$16 sps:$4 sm:$0xff]   ;;  %v8010_v42 = vld [vmem:[%s11011_s1 + $0x50c] ss:$16 sps:$4 sm:$0xff]  }
  0xc1   :  { %1912 = vmatprep.subr.bf16.mxu1 %v7923_v44  ;;  %v8013_v44 = vld [vmem:[%s11011_s1 + $0x70c] ss:$16 sps:$4 sm:$0xff]  }
  0xc2   :  { %1822 = vmatmul.mubr.bf16.vlgmr.msra.gmra.mxu0 %v8393_v22  ;;  %v7933_v22 = vld [vmem:[%s11011_s1 + $0x6a8] ss:$16 sps:$4 sm:$0xff]  }
  0xc3   :  { %1863 = vmatmul.mubr.bf16.vlgmr.msra.gmra.mxu1 %v8395_v23  ;;  %1872 = vmatpush1.bf16.msra.mxu0 %v7918_v45  ;;  %v7938_v23 = vld [vmem:[%s11011_s1 + $0x48c] ss:$16 sps:$4 sm:$0xff]   ;;  %v8008_v45 = vld [vmem:[%s11011_s1 + $0x508] ss:$16 sps:$4 sm:$0xff]  }
  0xc4   :  { %1913 = vmatpush1.bf16.msra.mxu1 %v7921_v46  ;;  %1873 = vmatprep.subr.bf16.mxu0 %v7926_v47  ;;  %v8011_v46 = vld [vmem:[%s11011_s1 + $0x708] ss:$16 sps:$4 sm:$0xff]   ;;  %v8016_v47 = vld [vmem:[%s11013_s4 + $0x74] ss:$8 sps:$4 sm:$0xff]  }
  0xc5   :  { %1914 = vmatprep.subr.bf16.mxu1 %v7929_v61  ;;  %1903 = vmatprep.mubr.bf16.mxu0 %v8409_v28  ;;  %v7936_v28 = vld [vmem:[%s11011_s1 + $0x488] ss:$16 sps:$4 sm:$0xff]  }
  0xc6   :  { %1944 = vmatprep.mubr.bf16.mxu1 %v8411_v29  ;;  %v7939_v29 = vld [vmem:[%s11011_s1 + $0x688] ss:$16 sps:$4 sm:$0xff]  }
  0xc7   :  { %1874 = vmatpush1.bf16.msra.mxu0 %v7924_v3  ;;  %v8014_v61 = vld [vmem:[%s11013_s4 + $0x70] ss:$8 sps:$4 sm:$0xff]   ;;  %v8019_v3 = vld [vmem:[%s11013_s4 + $0x64] ss:$8 sps:$4 sm:$0xff]  }
  0xc8   :  { %1915 = vmatpush1.bf16.msra.mxu1 %v7927_v48  ;;  %1875 = vmatprep.subr.bf16.mxu0 %v7932_v50 }
  0xc9   :  { %1916 = vmatprep.subr.bf16.mxu1 %v7935_v51 }
  0xcb   :  { %1876 = vmatpush1.bf16.msra.mxu0 %v7930_v52  ;;  %v8017_v52 = vld [vmem:[%s11013_s4 + $0x60] ss:$8 sps:$4 sm:$0xff]  }
  0xcc   :  { %1917 = vmatpush1.bf16.msra.mxu1 %v7933_v22  ;;  %1877 = vmatprep.subr.bf16.mxu0 %v7938_v23 }
  0xcd   :  { %1918 = vmatprep.subr.bf16.mxu1 %v7941_v53  ;;  %v8022_v53 = vld [vmem:[%s11013_s4 + $0x54] ss:$8 sps:$4 sm:$0xff]  }
  0xcf   :  { %1878 = vmatpush1.bf16.msra.mxu0 %v7936_v28 }
  0xd0   :  { %1919 = vmatpush1.bf16.msra.mxu1 %v7939_v29  ;;  %1879 = vmatprep.subr.bf16.mxu0 %v7944_v54 }
  0xd1   :  { %1920 = vmatprep.subr.bf16.mxu1 %v7947_v55  ;;  %v8025_v55 = vld [vmem:[%s11013_s4 + $0x44] ss:$8 sps:$4 sm:$0xff]  }
  0xd3   :  { %1880 = vmatpush1.bf16.msra.mxu0 %v7942_v56  ;;  %v8062_v56 = vld [vmem:[%s11013_s4 + $0x170] ss:$8 sps:$4 sm:$0xff]  }
  0xd4   :  { %1921 = vmatpush1.bf16.msra.mxu1 %v7945_v57  ;;  %1881 = vmatprep.subr.bf16.mxu0 %v7950_v58  ;;  %v8064_v57 = vld [vmem:[%s11013_s4 + $0x174] ss:$8 sps:$4 sm:$0xff]   ;;  %v8067_v58 = vld [vmem:[%s11013_s4 + $0x164] ss:$8 sps:$4 sm:$0xff]  }
  0xd5   :  { %1922 = vmatprep.subr.bf16.mxu1 %v7953_v59  ;;  %v8023_v59 = vld [vmem:[%s11013_s4 + $0x40] ss:$8 sps:$4 sm:$0xff]  }
  0xd7   :  { %1882 = vmatpush1.bf16.msra.mxu0 %v7948_v60  ;;  %v8065_v60 = vld [vmem:[%s11013_s4 + $0x160] ss:$8 sps:$4 sm:$0xff]  }
  0xd8   :  { %1923 = vmatpush1.bf16.msra.mxu1 %v7951_v62  ;;  %1883 = vmatprep.subr.bf16.mxu0 %v7956_v63  ;;  %v8028_v62 = vld [vmem:[%s11013_s4 + $0x34] ss:$8 sps:$4 sm:$0xff]  }
  0xd9   :  { %1924 = vmatprep.subr.bf16.mxu1 %v7959_v0  ;;  %v8070_v63 = vld [vmem:[%s11013_s4 + $0x154] ss:$8 sps:$4 sm:$0xff]   ;;  %v8026_v0 = vld [vmem:[%s11013_s4 + $0x30] ss:$8 sps:$4 sm:$0xff]  }
  0xdb   :  { %1884 = vmatpush1.bf16.msra.mxu0 %v7954_v1  ;;  %v8068_v1 = vld [vmem:[%s11013_s4 + $0x150] ss:$8 sps:$4 sm:$0xff]  }
  0xdc   :  { %1925 = vmatpush1.bf16.msra.mxu1 %v7957_v2  ;;  %1885 = vmatprep.subr.bf16.mxu0 %v7962_v4  ;;  %v8031_v2 = vld [vmem:[%s11013_s4 + $0x24] ss:$8 sps:$4 sm:$0xff]  }
  0xdd   :  { %1926 = vmatprep.subr.bf16.mxu1 %v7965_v5  ;;  %v8073_v4 = vld [vmem:[%s11013_s4 + $0x144] ss:$8 sps:$4 sm:$0xff]   ;;  %v8029_v5 = vld [vmem:[%s11013_s4 + $0x20] ss:$8 sps:$4 sm:$0xff]  }
  0xdf   :  { %1886 = vmatpush1.bf16.msra.mxu0 %v7960_v6  ;;  %v8071_v6 = vld [vmem:[%s11013_s4 + $0x140] ss:$8 sps:$4 sm:$0xff]  }
  0xe0   :  { %1927 = vmatpush1.bf16.msra.mxu1 %v7963_v7  ;;  %1887 = vmatprep.subr.bf16.mxu0 %v7968_v8  ;;  %v8034_v7 = vld [vmem:[%s11013_s4 + $0x14] ss:$8 sps:$4 sm:$0xff]  }
  0xe1   :  { %1928 = vmatprep.subr.bf16.mxu1 %v7971_v9  ;;  %v8076_v8 = vld [vmem:[%s11013_s4 + $0x134] ss:$8 sps:$4 sm:$0xff]   ;;  %v8032_v9 = vld [vmem:[%s11013_s4 + $0x10] ss:$8 sps:$4 sm:$0xff]  }
  0xe3   :  { %1888 = vmatpush2.bf16.msra.mxu0 %v7966_v10  ;;  %v8074_v10 = vld [vmem:[%s11013_s4 + $0x130] ss:$8 sps:$4 sm:$0xff]  }
  0xe4   :  { %1929 = vmatpush2.bf16.msra.mxu1 %v7969_v11  ;;  %1889 = vmatprep.subr.bf16.mxu0 %v7974_v12  ;;  %v8037_v11 = vld [vmem:[%s11013_s4 + $0x4] ss:$8 sps:$4 sm:$0xff]  }
  0xe5   :  { %1930 = vmatprep.subr.bf16.mxu1 %v7977_v13  ;;  %v8079_v12 = vld [vmem:[%s11013_s4 + $0x124] ss:$8 sps:$4 sm:$0xff]   ;;  %v8035_v13 = vld [vmem:[%s11013_s4] ss:$8 sps:$4 sm:$0xff]  }
  0xe7   :  { %1890 = vmatpush2.bf16.msra.mxu0 %v7972_v16  ;;  %v8077_v16 = vld [vmem:[%s11013_s4 + $0x120] ss:$8 sps:$4 sm:$0xff]  }
  0xe8   :  { %1931 = vmatpush2.bf16.msra.mxu1 %v7975_v17  ;;  %1891 = vmatprep.subr.bf16.mxu0 %v7980_v18  ;;  %v8040_v17 = vld [vmem:[%s11013_s4 + $0xf4] ss:$8 sps:$4 sm:$0xff]  }
  0xe9   :  { %1932 = vmatprep.subr.bf16.mxu1 %v7983_v19  ;;  %v8082_v18 = vld [vmem:[%s11013_s4 + $0x114] ss:$8 sps:$4 sm:$0xff]   ;;  %v8038_v19 = vld [vmem:[%s11013_s4 + $0xf0] ss:$8 sps:$4 sm:$0xff]  }
  0xeb   :  { %1892 = vmatpush2.bf16.msra.mxu0 %v7978_v20  ;;  %v8080_v20 = vld [vmem:[%s11013_s4 + $0x110] ss:$8 sps:$4 sm:$0xff]  }
  0xec   :  { %1933 = vmatpush2.bf16.msra.mxu1 %v7981_v21  ;;  %1893 = vmatprep.subr.bf16.mxu0 %v7986_v24  ;;  %v8043_v21 = vld [vmem:[%s11013_s4 + $0xe4] ss:$8 sps:$4 sm:$0xff]  }
  0xed   :  { %1934 = vmatprep.subr.bf16.mxu1 %v7989_v25  ;;  %v8085_v24 = vld [vmem:[%s11013_s4 + $0x104] ss:$8 sps:$4 sm:$0xff]   ;;  %v8041_v25 = vld [vmem:[%s11013_s4 + $0xe0] ss:$8 sps:$4 sm:$0xff]  }
  0xef   :  { %1894 = vmatpush2.bf16.msra.mxu0 %v7984_v26  ;;  %v8083_v26 = vld [vmem:[%s11013_s4 + $0x100] ss:$8 sps:$4 sm:$0xff]  }
  0xf0   :  { %1935 = vmatpush2.bf16.msra.mxu1 %v7987_v27  ;;  %1895 = vmatprep.subr.bf16.mxu0 %v7992_v30  ;;  %v8046_v27 = vld [vmem:[%s11013_s4 + $0xd4] ss:$8 sps:$4 sm:$0xff]  }
  0xf1   :  { %1936 = vmatprep.subr.bf16.mxu1 %v7995_v31  ;;  %v8088_v30 = vld [vmem:[%s11013_s4 + $0x1f4] ss:$8 sps:$4 sm:$0xff]   ;;  %v8044_v31 = vld [vmem:[%s11013_s4 + $0xd0] ss:$8 sps:$4 sm:$0xff]  }
  0xf3   :  { %1896 = vmatpush2.bf16.msra.mxu0 %v7990_v32  ;;  %v8086_v32 = vld [vmem:[%s11013_s4 + $0x1f0] ss:$8 sps:$4 sm:$0xff]  }
  0xf4   :  { %1937 = vmatpush2.bf16.msra.mxu1 %v7993_v33  ;;  %1897 = vmatprep.subr.bf16.mxu0 %v7998_v34  ;;  %v8049_v33 = vld [vmem:[%s11013_s4 + $0xc4] ss:$8 sps:$4 sm:$0xff]  }
  0xf5   :  { %1938 = vmatprep.subr.bf16.mxu1 %v8001_v35  ;;  %v8091_v34 = vld [vmem:[%s11013_s4 + $0x1e4] ss:$8 sps:$4 sm:$0xff]   ;;  %v8047_v35 = vld [vmem:[%s11013_s4 + $0xc0] ss:$8 sps:$4 sm:$0xff]  }
  0xf7   :  { %1898 = vmatpush2.bf16.msra.mxu0 %v7996_v38  ;;  %v8089_v38 = vld [vmem:[%s11013_s4 + $0x1e0] ss:$8 sps:$4 sm:$0xff]  }
  0xf8   :  { %1939 = vmatpush2.bf16.msra.mxu1 %v7999_v39  ;;  %1899 = vmatprep.subr.bf16.mxu0 %v8004_v14  ;;  %v8052_v39 = vld [vmem:[%s11013_s4 + $0xb4] ss:$8 sps:$4 sm:$0xff]  }
  0xf9   :  { %1940 = vmatprep.subr.bf16.mxu1 %v8007_v15  ;;  %v8094_v14 = vld [vmem:[%s11013_s4 + $0x1d4] ss:$8 sps:$4 sm:$0xff]   ;;  %v8050_v15 = vld [vmem:[%s11013_s4 + $0xb0] ss:$8 sps:$4 sm:$0xff]  }
  0xfb   :  { %1900 = vmatpush2.bf16.msra.mxu0 %v8002_v40  ;;  %v8092_v40 = vld [vmem:[%s11013_s4 + $0x1d0] ss:$8 sps:$4 sm:$0xff]  }
  0xfc   :  { %1941 = vmatpush2.bf16.msra.mxu1 %v8005_v41  ;;  %1901 = vmatprep.subr.bf16.mxu0 %v8010_v42  ;;  %v8055_v41 = vld [vmem:[%s11013_s4 + $0xa4] ss:$8 sps:$4 sm:$0xff]  }
  0xfd   :  { %1942 = vmatprep.subr.bf16.mxu1 %v8013_v44  ;;  %v8097_v42 = vld [vmem:[%s11013_s4 + $0x1c4] ss:$8 sps:$4 sm:$0xff]   ;;  %v8053_v44 = vld [vmem:[%s11013_s4 + $0xa0] ss:$8 sps:$4 sm:$0xff]  }
  0xff   :  { %1902 = vmatpush2.bf16.msra.mxu0 %v8008_v45  ;;  %v8095_v45 = vld [vmem:[%s11013_s4 + $0x1c0] ss:$8 sps:$4 sm:$0xff]  }
 0x100   :  { %1943 = vmatpush2.bf16.msra.mxu1 %v8011_v46  ;;  %2397 = vmatprep.subr.bf16.mxu0 %v8016_v47  ;;  %v8058_v46 = vld [vmem:[%s11013_s4 + $0x94] ss:$8 sps:$4 sm:$0xff]   ;;  %v8056_v47 = vld [vmem:[%s11013_s4 + $0x90] ss:$8 sps:$4 sm:$0xff]  }
 0x101   :  { %2438 = vmatprep.subr.bf16.mxu1 %v8064_v57 }
 0x102   :  { %v1659_v48 = vpop.f32.mrf.mxu0  ;;  %1904 = vmatmul.mubr.bf16.vlgmr.msra.gmra.mxu0 %v8599_v36 }
 0x103   :  { %v1700_v50 = vpop.f32.mrf.mxu1  ;;  %1945 = vmatmul.mubr.bf16.vlgmr.msra.gmra.mxu1 %v8603_v37  ;;  %2398 = vmatpush1.bf16.msra.mxu0 %v8014_v61  ;;  %v8020_v37 = vld [vmem:[%s11013_s4 + $0x50] ss:$8 sps:$4 sm:$0xff]   ;;  %v8061_v61 = vld [vmem:[%s11013_s4 + $0x84] ss:$8 sps:$4 sm:$0xff]  }
 0x104   :  { %v9002_v51 = vadd.f32 %v1700_v50, %v1659_v48  ;;  %v9007_v22 = vpop.f32.mrf.mxu0  ;;  %2399 = vmatprep.subr.bf16.mxu0 %v8019_v3  ;;  %2439 = vmatpush1.bf16.msra.mxu1 %v8062_v56  ;;  %v8059_v3 = vld [vmem:[%s11013_s4 + $0x80] ss:$8 sps:$4 sm:$0xff]   ;;  %v9168_v48 = vsub.s32 0, %v8283_v43 }
 0x105   :  { %v9009_v23 = vpop.f32.mrf.mxu1  ;;  %2440 = vmatprep.subr.bf16.mxu1 %v8067_v58  ;;  %v9173_v50 = vld [vmem:[%s11014_s2] sm:$0xf] }
 0x106   :  { %v1663_v28 = vpop.f32.mrf.mxu0  ;;  %v1958_v56 = vrot.slane %v9173_v50, %v9168_v48 }
 0x107   :  { %v1704_v36 = vpop.f32.mrf.mxu1  ;;  %2400 = vmatpush1.bf16.msra.mxu0 %v8017_v52  ;;  %v8100_v52 = vld [vmem:[%s11013_s4 + $0x1b4] ss:$8 sps:$4 sm:$0xff]   ;;  %v8098_v28 = vld [vmem:[%s11013_s4 + $0x1b0] ss:$8 sps:$4 sm:$0xff]  }
 0x108   :  { %v1664_v29 = vpop.f32.mrf.mxu0  ;;  %2401 = vmatprep.subr.bf16.mxu0 %v8022_v53  ;;  %2441 = vmatpush1.bf16.msra.mxu1 %v8065_v60  ;;  %v9179_v53 = vsub.s32 1, %v8283_v43 }
 0x109   :  { %v1705_v54 = vpop.f32.mrf.mxu1  ;;  %2442 = vmatprep.subr.bf16.mxu1 %v8070_v63  ;;  %v9187_v29 = vld [vmem:[%s11015_s3] sm:$0xf] }
 0x10a   :  { %v1703_v54 = vadd.f32 %v9009_v23, %v9007_v22  ;;  %v1962_v22 = vrot.slane %v9173_v50, %v9179_v53 }
 0x10b   :  { %2402 = vmatpush1.bf16.msra.mxu0 %v8020_v37 }
 0x10c   :  { %2403 = vmatprep.subr.bf16.mxu0 %v8025_v55  ;;  %2443 = vmatpush1.bf16.msra.mxu1 %v8068_v1 }
 0x10d   :  { %2444 = vmatprep.subr.bf16.mxu1 %v8073_v4  ;;  %v1988_v4 = vrot.slane %v9187_v29, %v9179_v53 }
 0x10f   :  { %2404 = vmatpush1.bf16.msra.mxu0 %v8023_v59  ;;  %v8103_v59 = vld [vmem:[%s11013_s4 + $0x1a4] ss:$8 sps:$4 sm:$0xff]  }
 0x110   :  { %2405 = vmatprep.subr.bf16.mxu0 %v8028_v62  ;;  %2445 = vmatpush1.bf16.msra.mxu1 %v8071_v6  ;;  %v1984_v62 = vrot.slane %v9187_v29, %v9168_v48 }
 0x111   :  { %2446 = vmatprep.subr.bf16.mxu1 %v8076_v8 }
 0x113   :  { %2406 = vmatpush1.bf16.msra.mxu0 %v8026_v0 }
 0x114   :  { %2407 = vmatprep.subr.bf16.mxu0 %v8031_v2  ;;  %2447 = vmatpush1.bf16.msra.mxu1 %v8074_v10  ;;  %v8104_v10 = vld [vmem:[%s11013_s4 + $0x190] ss:$8 sps:$4 sm:$0xff]  }
 0x115   :  { %2448 = vmatprep.subr.bf16.mxu1 %v8079_v12 }
 0x117   :  { %2408 = vmatpush1.bf16.msra.mxu0 %v8029_v5 }
 0x118   :  { %2409 = vmatprep.subr.bf16.mxu0 %v8034_v7  ;;  %2449 = vmatpush1.bf16.msra.mxu1 %v8077_v16  ;;  %v8106_v7 = vld [vmem:[%s11013_s4 + $0x194] ss:$8 sps:$4 sm:$0xff]  }
 0x119   :  { %2450 = vmatprep.subr.bf16.mxu1 %v8082_v18 }
 0x11b   :  { %2410 = vmatpush1.bf16.msra.mxu0 %v8032_v9 }
 0x11c   :  { %2411 = vmatprep.subr.bf16.mxu0 %v8037_v11  ;;  %2451 = vmatpush1.bf16.msra.mxu1 %v8080_v20 }
 0x11d   :  { %2452 = vmatprep.subr.bf16.mxu1 %v8085_v24 }
 0x11f   :  { %2412 = vmatpush1.bf16.msra.mxu0 %v8035_v13  ;;  %v8109_v13 = vld [vmem:[%s11013_s4 + $0x184] ss:$8 sps:$4 sm:$0xff]  }
 0x120   :  { %2413 = vmatprep.subr.bf16.mxu0 %v8040_v17  ;;  %2453 = vmatpush1.bf16.msra.mxu1 %v8083_v26  ;;  %v8107_v17 = vld [vmem:[%s11013_s4 + $0x180] ss:$8 sps:$4 sm:$0xff]  }
 0x121   :  { %2454 = vmatprep.subr.bf16.mxu1 %v8088_v30 }
 0x123   :  { %2414 = vmatpush2.bf16.msra.mxu0 %v8038_v19 }
 0x124   :  { %2415 = vmatprep.subr.bf16.mxu0 %v8043_v21  ;;  %2455 = vmatpush2.bf16.msra.mxu1 %v8086_v32 }
 0x125   :  { %2456 = vmatprep.subr.bf16.mxu1 %v8091_v34  ;;  %v2751_v34 = vld [vmem:[%s11016_s7 + $0x780] sm:$0xff] }
 0x127   :  { %2416 = vmatpush2.bf16.msra.mxu0 %v8041_v25 }
 0x128   :  { %2417 = vmatprep.subr.bf16.mxu0 %v8046_v27  ;;  %2457 = vmatpush2.bf16.msra.mxu1 %v8089_v38 }
 0x129   :  { %2458 = vmatprep.subr.bf16.mxu1 %v8094_v14  ;;  %v9238_v14 = vld [vmem:[%s11016_s7 + $0x788] sm:$0xff] }
 0x12b   :  { %2418 = vmatpush2.bf16.msra.mxu0 %v8044_v31 }
 0x12c   :  { %2419 = vmatprep.subr.bf16.mxu0 %v8049_v33  ;;  %2459 = vmatpush2.bf16.msra.mxu1 %v8092_v40  ;;  %v2735_v33 = vld [vmem:[%s11016_s7 + $0x700] sm:$0xff] }
 0x12d   :  { %2460 = vmatprep.subr.bf16.mxu1 %v8097_v42  ;;  %v7339_v38 = vcombine.low %v2735_v33, %v2751_v34  ;;  %v2719_v40 = vld [vmem:[%s11016_s7 + $0x680] sm:$0xff] }
 0x12f   :  { %2420 = vmatpush2.bf16.msra.mxu0 %v8047_v35  ;;  %v9233_v35 = vld [vmem:[%s11016_s7 + $0x708] sm:$0xff] }
 0x130   :  { %2421 = vmatprep.subr.bf16.mxu0 %v8052_v39  ;;  %2461 = vmatpush2.bf16.msra.mxu1 %v8095_v45  ;;  %v7340_v39 = vcombine.high %v2735_v33, %v2751_v34  ;;  %v2687_v45 = vld [vmem:[%s11016_s7 + $0x580] sm:$0xff] }
 0x131   :  { %2462 = vmatprep.subr.bf16.mxu1 %v8100_v52 }
 0x133   :  { %2422 = vmatpush2.bf16.msra.mxu0 %v8050_v15  ;;  %v2703_v15 = vld [vmem:[%s11016_s7 + $0x600] sm:$0xff] }
 0x134   :  { %2423 = vmatprep.subr.bf16.mxu0 %v8055_v41  ;;  %2463 = vmatpush2.bf16.msra.mxu1 %v8098_v28  ;;  %v7342_v41 = vcombine.high %v9233_v35, %v9238_v14  ;;  %v7308_v42 = vcombine.high %v2703_v15, %v2719_v40 }
 0x135   :  { %2464 = vmatprep.subr.bf16.mxu1 %v8103_v59 }
 0x137   :  { %2424 = vmatpush2.bf16.msra.mxu0 %v8053_v44  ;;  %v2671_v44 = vld [vmem:[%s11016_s7 + $0x500] sm:$0xff] }
 0x138   :  { %2425 = vmatprep.subr.bf16.mxu0 %v8058_v46  ;;  %v7307_v46 = vcombine.low %v2703_v15, %v2719_v40  ;;  %v7275_v52 = vcombine.low %v2671_v44, %v2687_v45 }
 0x13b   :  { %2426 = vmatpush2.bf16.msra.mxu0 %v8056_v47  ;;  %v7276_v47 = vcombine.high %v2671_v44, %v2687_v45 }
 0x13c   :  { %2427 = vmatprep.subr.bf16.mxu0 %v8061_v61  ;;  %v2639_v61 = vld [vmem:[%s11016_s7 + $0x400] sm:$0xff] }
 0x13f   :  { %2428 = vmatpush2.bf16.msra.mxu0 %v8059_v3  ;;  %v2655_v3 = vld [vmem:[%s11016_s7 + $0x480] sm:$0xff] }
 0x140   :  { %5751 = vmatprep.subr.bf16.mxu0 %v7340_v39  ;;  %v7244_v28 = vcombine.high %v2639_v61, %v2655_v3  ;;  %v2879_v39 = vld [vmem:[%s11016_s7 + $0xb80] sm:$0xff] }
 0x142   :  { %v1741_v36 = vpop.f32.mrf.mxu0 }
 0x143   :  { %v1782_v37 = vpop.f32.mrf.mxu1  ;;  %v1742_v55 = vadd.f32 %v1741_v36, %v9002_v51  ;;  %v8101_v51 = vld [vmem:[%s11013_s4 + $0x1a0] ss:$8 sps:$4 sm:$0xff]  }
 0x144   :  { %v1743_v57 = vpop.f32.mrf.mxu0  ;;  %2465 = vmatpush2.bf16.msra.mxu1 %v8101_v51  ;;  %v2607_v36 = vld [vmem:[%s11016_s7 + $0x300] sm:$0xff] }
 0x145   :  { %v1784_v58 = vpop.f32.mrf.mxu1  ;;  %v1783_v60 = vadd.f32 %v1782_v37, %v1742_v55  ;;  %v1744_v63 = vadd.f32 %v1743_v57, %v1703_v54  ;;  %2466 = vmatprep.subr.bf16.mxu1 %v8106_v7  ;;  %v2623_v37 = vld [vmem:[%s11016_s7 + $0x380] sm:$0xff]  ;;  %v7243_v54 = vcombine.low %v2639_v61, %v2655_v3 }
 0x146   :  { %v1745_v23 = vpop.f32.mrf.mxu0  ;;  %v7212_v55 = vcombine.high %v2607_v36, %v2623_v37  ;;  %v2591_v57 = vld [vmem:[%s11016_s7 + $0x280] sm:$0xff] }
 0x147   :  { %v1786_v0 = vpop.f32.mrf.mxu1  ;;  %v1975_v1 = vmul.f32 %v1958_v56, %v1783_v60  ;;  %v1785_v2 = vadd.f32 %v1784_v58, %v1744_v63  ;;  %v2575_v56 = vld [vmem:[%s11016_s7 + $0x200] sm:$0xff]  ;;  %v7211_v58 = vcombine.low %v2607_v36, %v2623_v37 }
 0x148   :  { %v1746_v5 = vpop.f32.mrf.mxu0  ;;  %2467 = vmatpush2.bf16.msra.mxu1 %v8104_v10  ;;  %v7180_v59 = vcombine.high %v2575_v56, %v2591_v57  ;;  %v2543_v60 = vld [vmem:[%s11016_s7 + $0x100] sm:$0xff]  ;;  %v7179_v63 = vcombine.low %v2575_v56, %v2591_v57  ;;  %v2704_v57 = vld [vmem:[%s11016_s7 + $0x608] sm:$0xff] }
 0x149   :  { %v1787_v6 = vpop.f32.mrf.mxu1  ;;  %v2001_v8 = vadd.f32 %v1984_v62, %v1975_v1  ;;  %v1976_v9 = vmul.f32 %v1962_v22, %v1785_v2  ;;  %2468 = vmatprep.subr.bf16.mxu1 %v8109_v13  ;;  %v2559_v62 = vld [vmem:[%s11016_s7 + $0x180] sm:$0xff] }
 0x14a   :  { %v7148_v22 = vcombine.high %v2543_v60, %v2559_v62  ;;  %v2511_v51 = vld [vmem:[%s11016_s7] sm:$0xff]  ;;  %v7147_v0 = vcombine.low %v2543_v60, %v2559_v62 }
 0x14b   :  { %v2002_v11 = vadd.f32 %v1988_v4, %v1976_v9  ;;  %v2005_v12 = vmax.f32 %v2001_v8, 0.0  ;;  %v2527_v23 = vld [vmem:[%s11016_s7 + $0x80] sm:$0xff] }
 0x14c   :  { %2469 = vmatpush2.bf16.msra.mxu1 %v8107_v17  ;;  %v7116_v1 = vcombine.high %v2511_v51, %v2527_v23  ;;  %v2991_v2 = vld [vmem:[%s11016_s7 + $0xf00] sm:$0xff]  ;;  %v7115_v5 = vcombine.low %v2511_v51, %v2527_v23  ;;  %v9303_v17 = vsub.s32 2, %v8283_v43 }
 0x14d   :  { %v2006_v16 = vmax.f32 %v2002_v11, 0.0  ;;  %v2009_v19 = vpack.c.bf16 %v2005_v12, %v2005_v12  ;;  %5792 = vmatprep.subr.bf16.mxu1 %v7342_v41  ;;  %v3007_v4 = vld [vmem:[%s11016_s7 + $0xf80] sm:$0xff] }
 0x14e   :  { %v7596_v6 = vcombine.high %v2991_v2, %v3007_v4  ;;  %v2959_v7 = vld [vmem:[%s11016_s7 + $0xe00] sm:$0xff]  ;;  %v7595_v9 = vcombine.low %v2991_v2, %v3007_v4  ;;  %v1966_v34 = vrot.slane %v9173_v50, %v9303_v17  ;;  %v1992_v15 = vrot.slane %v9187_v29, %v9303_v17  ;;  %v2608_v2 = vld [vmem:[%s11016_s7 + $0x308] sm:$0xff] }
 0x14f   :  { %v2010_v18 = vpack.c.bf16 %v2006_v16, %v2006_v16  ;;  %v2975_v8 = vld [vmem:[%s11016_s7 + $0xe80] sm:$0xff]  ;;  %v2624_v4 = vld [vmem:[%s11016_s7 + $0x388] sm:$0xff] }
 0x150   :  { %v7564_v10 = vcombine.high %v2959_v7, %v2975_v8  ;;  %v2927_v11 = vld [vmem:[%s11016_s7 + $0xd00] sm:$0xff]  ;;  %v7563_v13 = vcombine.low %v2959_v7, %v2975_v8  ;;  %v2576_v7 = vld [vmem:[%s11016_s7 + $0x208] sm:$0xff] }
 0x151   :  { %2429 = vmatprep.mubr.bf16.mxu0 %v2010_v18  ;;  %v2943_v12 = vld [vmem:[%s11016_s7 + $0xd80] sm:$0xff]  ;;  %v2592_v8 = vld [vmem:[%s11016_s7 + $0x288] sm:$0xff] }
 0x152   :  { %2430 = vmatmul.mubr.bf16.vlgmr.msra.gmra.mxu0 %v2009_v19  ;;  %v7532_v16 = vcombine.high %v2927_v11, %v2943_v12  ;;  %v2895_v18 = vld [vmem:[%s11016_s7 + $0xc00] sm:$0xff] }
 0x153   :  { %5752 = vmatpush1.bf16.msra.mxu0 %v7339_v38  ;;  %v2911_v19 = vld [vmem:[%s11016_s7 + $0xc80] sm:$0xff] }
 0x154   :  { %5753 = vmatprep.subr.bf16.mxu0 %v7308_v42  ;;  %v2863_v38 = vld [vmem:[%s11016_s7 + $0xb00] sm:$0xff] }
 0x157   :  { %5754 = vmatpush1.bf16.msra.mxu0 %v7307_v46  ;;  %v7468_v46 = vcombine.high %v2863_v38, %v2879_v39 }
 0x158   :  { %5755 = vmatprep.subr.bf16.mxu0 %v7276_v47 }
 0x15b   :  { %5756 = vmatpush1.bf16.msra.mxu0 %v7275_v52 }
 0x15c   :  { %5757 = vmatprep.subr.bf16.mxu0 %v7244_v28 }
 0x15f   :  { %5758 = vmatpush1.bf16.msra.mxu0 %v7243_v54  ;;  %v7467_v54 = vcombine.low %v2863_v38, %v2879_v39  ;;  %v2976_v38 = vld [vmem:[%s11016_s7 + $0xe88] sm:$0xff] }
 0x160   :  { %5759 = vmatprep.subr.bf16.mxu0 %v7212_v55 }
 0x163   :  { %5760 = vmatpush1.bf16.msra.mxu0 %v7211_v58  ;;  %v2720_v58 = vld [vmem:[%s11016_s7 + $0x688] sm:$0xff] }
 0x164   :  { %5761 = vmatprep.subr.bf16.mxu0 %v7180_v59  ;;  %v7341_v59 = vcombine.low %v9233_v35, %v9238_v14  ;;  %v7310_v62 = vcombine.high %v2704_v57, %v2720_v58  ;;  %v7309_v51 = vcombine.low %v2704_v57, %v2720_v58  ;;  %v2640_v35 = vld [vmem:[%s11016_s7 + $0x408] sm:$0xff] }
 0x165   :  { %v2656_v14 = vld [vmem:[%s11016_s7 + $0x488] sm:$0xff] }
 0x167   :  { %5762 = vmatpush1.bf16.msra.mxu0 %v7179_v63  ;;  %v2672_v63 = vld [vmem:[%s11016_s7 + $0x508] sm:$0xff] }
 0x168   :  { %5763 = vmatprep.subr.bf16.mxu0 %v7148_v22  ;;  %v2688_v22 = vld [vmem:[%s11016_s7 + $0x588] sm:$0xff] }
 0x169   :  { %v7278_v23 = vcombine.high %v2672_v63, %v2688_v22 }
 0x16b   :  { %5764 = vmatpush1.bf16.msra.mxu0 %v7147_v0  ;;  %v7277_v0 = vcombine.low %v2672_v63, %v2688_v22  ;;  %v2800_v63 = vld [vmem:[%s11016_s7 + $0x908] sm:$0xff] }
 0x16c   :  { %5765 = vmatprep.subr.bf16.mxu0 %v7116_v1  ;;  %v7246_v1 = vcombine.high %v2640_v35, %v2656_v14  ;;  %v2816_v22 = vld [vmem:[%s11016_s7 + $0x988] sm:$0xff] }
 0x16f   :  { %5766 = vmatpush1.bf16.msra.mxu0 %v7115_v5  ;;  %v7245_v5 = vcombine.low %v2640_v35, %v2656_v14  ;;  %v7405_v35 = vcombine.low %v2800_v63, %v2816_v22  ;;  %v7406_v14 = vcombine.high %v2800_v63, %v2816_v22  ;;  %v2657_v63 = vld [vmem:[%s11016_s7 + $0x490] sm:$0xff]  ;;  %v2642_v22 = vld [vmem:[%s11016_s7 + $0x418] sm:$0xff] }
 0x170   :  { %5767 = vmatprep.subr.bf16.mxu0 %v7596_v6  ;;  %v7214_v6 = vcombine.high %v2608_v2, %v2624_v4 }
 0x173   :  { %5768 = vmatpush2.bf16.msra.mxu0 %v7595_v9  ;;  %v7213_v9 = vcombine.low %v2608_v2, %v2624_v4  ;;  %v2783_v2 = vld [vmem:[%s11016_s7 + $0x880] sm:$0xff]  ;;  %v2768_v4 = vld [vmem:[%s11016_s7 + $0x808] sm:$0xff] }
 0x174   :  { %5769 = vmatprep.subr.bf16.mxu0 %v7564_v10  ;;  %v7182_v10 = vcombine.high %v2576_v7, %v2592_v8 }
 0x177   :  { %5770 = vmatpush2.bf16.msra.mxu0 %v7563_v13  ;;  %v7181_v13 = vcombine.low %v2576_v7, %v2592_v8 }
 0x178   :  { %5771 = vmatprep.subr.bf16.mxu0 %v7532_v16 }
 0x182   :  { %v1823_v20 = vpop.f32.mrf.mxu0 }
 0x183   :  { %v1864_v21 = vpop.f32.mrf.mxu1 }
 0x184   :  { %v9218_v24 = vadd.f32 %v1864_v21, %v1823_v20  ;;  %v9220_v25 = vpop.f32.mrf.mxu0  ;;  %v9312_v20 = vsub.s32 3, %v8283_v43  ;;  %v7531_v21 = vcombine.low %v2927_v11, %v2943_v12  ;;  %v2544_v11 = vld [vmem:[%s11016_s7 + $0x108] sm:$0xff] }
 0x185   :  { %v9222_v26 = vpop.f32.mrf.mxu1  ;;  %v2560_v12 = vld [vmem:[%s11016_s7 + $0x188] sm:$0xff] }
 0x186   :  { %v1827_v27 = vpop.f32.mrf.mxu0  ;;  %5772 = vmatpush2.bf16.msra.mxu0 %v7531_v21  ;;  %v1996_v3 = vrot.slane %v9187_v29, %v9312_v20  ;;  %v7150_v16 = vcombine.high %v2544_v11, %v2560_v12  ;;  %v7149_v21 = vcombine.low %v2544_v11, %v2560_v12  ;;  %v2753_v11 = vld [vmem:[%s11016_s7 + $0x790] sm:$0xff]  ;;  %v2738_v12 = vld [vmem:[%s11016_s7 + $0x718] sm:$0xff] }
 0x187   :  { %v1868_v30 = vpop.f32.mrf.mxu1 }
 0x188   :  { %v1828_v31 = vpop.f32.mrf.mxu0 }
 0x189   :  { %v1869_v32 = vpop.f32.mrf.mxu1  ;;  %v7500_v31 = vcombine.high %v2895_v18, %v2911_v19 }
 0x18a   :  { %v1867_v32 = vadd.f32 %v9222_v26, %v9220_v25  ;;  %v7499_v26 = vcombine.low %v2895_v18, %v2911_v19  ;;  %v2512_v18 = vld [vmem:[%s11016_s7 + $0x8] sm:$0xff] }
 0x18b   :  { %5773 = vmatprep.subr.bf16.mxu0 %v7500_v31  ;;  %v2528_v19 = vld [vmem:[%s11016_s7 + $0x88] sm:$0xff] }
 0x18c   :  { %5774 = vmatpush2.bf16.msra.mxu0 %v7499_v26  ;;  %v3008_v31 = vld [vmem:[%s11016_s7 + $0xf88] sm:$0xff] }
 0x18d   :  { %5775 = vmatprep.subr.bf16.mxu0 %v7468_v46  ;;  %v2912_v26 = vld [vmem:[%s11016_s7 + $0xc88] sm:$0xff] }
 0x18e   :  { %v2864_v46 = vld [vmem:[%s11016_s7 + $0xb08] sm:$0xff] }
 0x190   :  { %5776 = vmatpush2.bf16.msra.mxu0 %v7467_v54 }
 0x1c2   :  { %v1905_v27 = vpop.f32.mrf.mxu0 }
 0x1c3   :  { %v1946_v30 = vpop.f32.mrf.mxu1  ;;  %v1906_v33 = vadd.f32 %v1905_v27, %v9218_v24  ;;  %v1970_v24 = vrot.slane %v9173_v50, %v9312_v20  ;;  %v7118_v27 = vcombine.high %v2512_v18, %v2528_v19 }
 0x1c4   :  { %v1907_v40 = vpop.f32.mrf.mxu0 }
 0x1c5   :  { %v1948_v41 = vpop.f32.mrf.mxu1  ;;  %v1947_v42 = vadd.f32 %v1946_v30, %v1906_v33  ;;  %v1908_v25 = vadd.f32 %v1907_v40, %v1867_v32  ;;  %v2992_v30 = vld [vmem:[%s11016_s7 + $0xf08] sm:$0xff]  ;;  %v7117_v32 = vcombine.low %v2512_v18, %v2528_v19 }
 0x1c6   :  { %v1909_v44 = vpop.f32.mrf.mxu0  ;;  %v7598_v33 = vcombine.high %v2992_v30, %v3008_v31  ;;  %v7597_v39 = vcombine.low %v2992_v30, %v3008_v31  ;;  %v2928_v40 = vld [vmem:[%s11016_s7 + $0xd08] sm:$0xff]  ;;  %v2493_v30 = vld [vmem:[%s11018_s6] sm:$0x3] }
 0x1c7   :  { %v1950_v45 = vpop.f32.mrf.mxu1  ;;  %v1977_v47 = vmul.f32 %v1966_v34, %v1947_v42  ;;  %v1949_v61 = vadd.f32 %v1948_v41, %v1908_v25  ;;  %v2960_v34 = vld [vmem:[%s11016_s7 + $0xe08] sm:$0xff] }
 0x1c8   :  { %v1910_v52 = vpop.f32.mrf.mxu0  ;;  %v2944_v41 = vld [vmem:[%s11016_s7 + $0xd88] sm:$0xff]  ;;  %v7565_v42 = vcombine.low %v2960_v34, %v2976_v38 }
 0x1c9   :  { %v1951_v28 = vpop.f32.mrf.mxu1  ;;  %v2003_v36 = vadd.f32 %v1992_v15, %v1977_v47  ;;  %v1978_v37 = vmul.f32 %v1970_v24, %v1949_v61  ;;  %v7566_v15 = vcombine.high %v2960_v34, %v2976_v38  ;;  %v7534_v25 = vcombine.high %v2928_v40, %v2944_v41  ;;  %v2896_v24 = vld [vmem:[%s11016_s7 + $0xc08] sm:$0xff] }
 0x1ca   :  { %v7533_v44 = vcombine.low %v2928_v40, %v2944_v41  ;;  %v7502_v45 = vcombine.high %v2896_v24, %v2912_v26  ;;  %v2880_v47 = vld [vmem:[%s11016_s7 + $0xb88] sm:$0xff]  ;;  %v7501_v61 = vcombine.low %v2896_v24, %v2912_v26  ;;  %v2831_v28 = vld [vmem:[%s11016_s7 + $0xa00] sm:$0xff]  ;;  %v2498_v34 = vrot.slane %v2493_v30, %v9168_v48 }
 0x1cb   :  { %v2004_v55 = vadd.f32 %v1996_v3, %v1978_v37  ;;  %v2007_v50 = vmax.f32 %v2003_v36, 0.0  ;;  %v7470_v3 = vcombine.high %v2864_v46, %v2880_v47  ;;  %v7469_v52 = vcombine.low %v2864_v46, %v2880_v47  ;;  %v2847_v36 = vld [vmem:[%s11016_s7 + $0xa80] sm:$0xff]  ;;  %v2832_v37 = vld [vmem:[%s11016_s7 + $0xa08] sm:$0xff]  ;;  %v2705_v47 = vld [vmem:[%s11016_s7 + $0x610] sm:$0xff] }
 0x1cc   :  { %v7436_v54 = vcombine.high %v2831_v28, %v2847_v36  ;;  %v2502_v41 = vrot.slane %v2493_v30, %v9179_v53  ;;  %v2561_v30 = vld [vmem:[%s11016_s7 + $0x190] sm:$0xff] }
 0x1cd   :  { %v2008_v56 = vmax.f32 %v2004_v55, 0.0  ;;  %v2011_v60 = vpack.c.bf16 %v2007_v50, %v2007_v50  ;;  %v2848_v55 = vld [vmem:[%s11016_s7 + $0xa88] sm:$0xff] }
 0x1ce   :  { %v7437_v57 = vcombine.low %v2832_v37, %v2848_v55  ;;  %v7438_v58 = vcombine.high %v2832_v37, %v2848_v55  ;;  %5777 = vmatprep.subr.bf16.mxu0 %v7436_v54  ;;  %v2673_v37 = vld [vmem:[%s11016_s7 + $0x510] sm:$0xff] }
 0x1cf   :  { %v2012_v29 = vpack.c.bf16 %v2008_v56, %v2008_v56  ;;  %v7435_v56 = vcombine.low %v2831_v28, %v2847_v36 }
 0x1d1   :  { %2470 = vmatprep.mubr.bf16.mxu1 %v2012_v29  ;;  %5778 = vmatpush2.bf16.msra.mxu0 %v7435_v56  ;;  %v2674_v56 = vld [vmem:[%s11016_s7 + $0x518] sm:$0xff] }
 0x1d2   :  { %2471 = vmatmul.mubr.bf16.vlgmr.msra.gmra.mxu1 %v2011_v60  ;;  %v2815_v60 = vld [vmem:[%s11016_s7 + $0x980] sm:$0xff] }
 0x1d3   :  { %5793 = vmatpush1.bf16.msra.mxu1 %v7341_v59  ;;  %v2799_v59 = vld [vmem:[%s11016_s7 + $0x900] sm:$0xff] }
 0x1d4   :  { %5794 = vmatprep.subr.bf16.mxu1 %v7310_v62  ;;  %v7404_v62 = vcombine.high %v2799_v59, %v2815_v60 }
 0x1d6   :  { %5779 = vmatprep.subr.bf16.mxu0 %v7404_v62  ;;  %v2641_v62 = vld [vmem:[%s11016_s7 + $0x410] sm:$0xff] }
 0x1d7   :  { %5795 = vmatpush1.bf16.msra.mxu1 %v7309_v51 }
 0x1d8   :  { %5796 = vmatprep.subr.bf16.mxu1 %v7278_v23  ;;  %v7403_v23 = vcombine.low %v2799_v59, %v2815_v60 }
 0x1da   :  { %5780 = vmatpush2.bf16.msra.mxu0 %v7403_v23 }
 0x1db   :  { %5797 = vmatpush1.bf16.msra.mxu1 %v7277_v0 }
 0x1dc   :  { %5798 = vmatprep.subr.bf16.mxu1 %v7246_v1  ;;  %v2767_v1 = vld [vmem:[%s11016_s7 + $0x800] sm:$0xff] }
 0x1dd   :  { %v7371_v7 = vcombine.low %v2767_v1, %v2783_v2 }
 0x1df   :  { %5799 = vmatpush1.bf16.msra.mxu1 %v7245_v5  ;;  %v7372_v5 = vcombine.high %v2767_v1, %v2783_v2  ;;  %v2609_v1 = vld [vmem:[%s11016_s7 + $0x310] sm:$0xff] }
 0x1e0   :  { %5800 = vmatprep.subr.bf16.mxu1 %v7214_v6  ;;  %v2784_v6 = vld [vmem:[%s11016_s7 + $0x888] sm:$0xff]  ;;  %v2625_v2 = vld [vmem:[%s11016_s7 + $0x390] sm:$0xff] }
 0x1e1   :  { %v7373_v8 = vcombine.low %v2768_v4, %v2784_v6  ;;  %5781 = vmatprep.subr.bf16.mxu0 %v7372_v5  ;;  %v2626_v5 = vld [vmem:[%s11016_s7 + $0x398] sm:$0xff] }
 0x1e2   :  { %5782 = vmatpush2.bf16.msra.mxu0 %v7371_v7 }
 0x1e3   :  { %5801 = vmatpush1.bf16.msra.mxu1 %v7213_v9  ;;  %v7374_v9 = vcombine.high %v2768_v4, %v2784_v6  ;;  %v2610_v4 = vld [vmem:[%s11016_s7 + $0x318] sm:$0xff]  ;;  %v7247_v6 = vcombine.low %v2641_v62, %v2657_v63 }
 0x1e4   :  { %5802 = vmatprep.subr.bf16.mxu1 %v7182_v10  ;;  %v2737_v10 = vld [vmem:[%s11016_s7 + $0x710] sm:$0xff] }
 0x1e5   :  { %v7343_v18 = vcombine.low %v2737_v10, %v2753_v11 }
 0x1e7   :  { %5803 = vmatpush1.bf16.msra.mxu1 %v7181_v13  ;;  %v7344_v13 = vcombine.high %v2737_v10, %v2753_v11  ;;  %v2577_v10 = vld [vmem:[%s11016_s7 + $0x210] sm:$0xff] }
 0x1e8   :  { %5804 = vmatprep.subr.bf16.mxu1 %v7150_v16  ;;  %v2754_v16 = vld [vmem:[%s11016_s7 + $0x798] sm:$0xff]  ;;  %v2593_v11 = vld [vmem:[%s11016_s7 + $0x290] sm:$0xff] }
 0x1e9   :  { %v7345_v19 = vcombine.low %v2738_v12, %v2754_v16  ;;  %5833 = vmatprep.subr.bf16.mxu0 %v7344_v13  ;;  %v2594_v13 = vld [vmem:[%s11016_s7 + $0x298] sm:$0xff] }
 0x1eb   :  { %5805 = vmatpush1.bf16.msra.mxu1 %v7149_v21  ;;  %v7346_v21 = vcombine.high %v2738_v12, %v2754_v16  ;;  %v2578_v12 = vld [vmem:[%s11016_s7 + $0x218] sm:$0xff]  ;;  %v7215_v16 = vcombine.low %v2609_v1, %v2625_v2 }
 0x1ec   :  { %5806 = vmatprep.subr.bf16.mxu1 %v7118_v27  ;;  %v2479_v27 = vld [vmem:[%s11017_s5] sm:$0x3] }
 0x1ed   :  { %v2484_v31 = vrot.slane %v2479_v27, %v9168_v48  ;;  %v2488_v38 = vrot.slane %v2479_v27, %v9179_v53  ;;  %v2545_v27 = vld [vmem:[%s11016_s7 + $0x110] sm:$0xff] }
 0x1ef   :  { %5807 = vmatpush1.bf16.msra.mxu1 %v7117_v32 }
 0x1f0   :  { %5808 = vmatprep.subr.bf16.mxu1 %v7598_v33 }
 0x1f3   :  { %5809 = vmatpush2.bf16.msra.mxu1 %v7597_v39 }
 0x1f4   :  { %5810 = vmatprep.subr.bf16.mxu1 %v7566_v15 }
 0x1f7   :  { %5811 = vmatpush2.bf16.msra.mxu1 %v7565_v42 }
 0x1f8   :  { %5812 = vmatprep.subr.bf16.mxu1 %v7534_v25 }
 0x1fb   :  { %5813 = vmatpush2.bf16.msra.mxu1 %v7533_v44 }
 0x1fc   :  { %5814 = vmatprep.subr.bf16.mxu1 %v7502_v45 }
 0x1ff   :  { %5815 = vmatpush2.bf16.msra.mxu1 %v7501_v61  ;;  %v2721_v61 = vld [vmem:[%s11016_s7 + $0x690] sm:$0xff] }
 0x200   :  { %5816 = vmatprep.subr.bf16.mxu1 %v7470_v3  ;;  %v2706_v3 = vld [vmem:[%s11016_s7 + $0x618] sm:$0xff]  ;;  %v7312_v54 = vcombine.high %v2705_v47, %v2721_v61 }
 0x203   :  { %5817 = vmatpush2.bf16.msra.mxu1 %v7469_v52  ;;  %v2722_v52 = vld [vmem:[%s11016_s7 + $0x698] sm:$0xff] }
 0x204   :  { %5818 = vmatprep.subr.bf16.mxu1 %v7438_v58  ;;  %v7314_v55 = vcombine.high %v2706_v3, %v2722_v52  ;;  %v7311_v58 = vcombine.low %v2705_v47, %v2721_v61  ;;  %v2994_v47 = vld [vmem:[%s11016_s7 + $0xf18] sm:$0xff] }
 0x205   :  { %v3010_v61 = vld [vmem:[%s11016_s7 + $0xf98] sm:$0xff] }
 0x207   :  { %5819 = vmatpush2.bf16.msra.mxu1 %v7437_v57  ;;  %v2690_v57 = vld [vmem:[%s11016_s7 + $0x598] sm:$0xff] }
 0x208   :  { %5820 = vmatprep.subr.bf16.mxu1 %v7406_v14  ;;  %v7282_v60 = vcombine.high %v2674_v56, %v2690_v57  ;;  %v7248_v14 = vcombine.high %v2641_v62, %v2657_v63  ;;  %v2929_v62 = vld [vmem:[%s11016_s7 + $0xd10] sm:$0xff] }
 0x209   :  { %v2945_v63 = vld [vmem:[%s11016_s7 + $0xd90] sm:$0xff] }
 0x20b   :  { %5821 = vmatpush2.bf16.msra.mxu1 %v7405_v35  ;;  %v7281_v35 = vcombine.low %v2674_v56, %v2690_v57  ;;  %v2962_v56 = vld [vmem:[%s11016_s7 + $0xe18] sm:$0xff] }
 0x20c   :  { %5822 = vmatprep.subr.bf16.mxu1 %v7374_v9  ;;  %v7218_v9 = vcombine.high %v2610_v4, %v2626_v5  ;;  %v2978_v57 = vld [vmem:[%s11016_s7 + $0xe98] sm:$0xff] }
 0x20f   :  { %5823 = vmatpush2.bf16.msra.mxu1 %v7373_v8  ;;  %v7216_v8 = vcombine.high %v2609_v1, %v2625_v2  ;;  %v2897_v1 = vld [vmem:[%s11016_s7 + $0xc10] sm:$0xff] }
 0x210   :  { %5874 = vmatprep.subr.bf16.mxu1 %v7346_v21  ;;  %v7186_v21 = vcombine.high %v2578_v12, %v2594_v13  ;;  %v2913_v2 = vld [vmem:[%s11016_s7 + $0xc90] sm:$0xff] }
 0x212   :  { %v2431_v50 = vpop.f32.mrf.mxu0 }
 0x214   :  { %v2433_v29 = vpop.f32.mrf.mxu0 }
 0x216   :  { %v2435_v51 = vpop.f32.mrf.mxu0 }
 0x217   :  { %v2658_v51 = vld [vmem:[%s11016_s7 + $0x498] sm:$0xff] }
 0x218   :  { %v2436_v0 = vpop.f32.mrf.mxu0  ;;  %v7249_v7 = vcombine.low %v2642_v22, %v2658_v51 }
 0x219   :  { %v7250_v0 = vcombine.high %v2642_v22, %v2658_v51  ;;  %v2930_v22 = vld [vmem:[%s11016_s7 + $0xd18] sm:$0xff] }
 0x21a   :  { %v2946_v51 = vld [vmem:[%s11016_s7 + $0xd98] sm:$0xff] }
 0x292   :  { %v2472_v32 = vpop.f32.mrf.mxu1 }
 0x293   :  { %v2473_v33 = vadd.f32 %v2472_v32, %v2431_v50  ;;  %v2689_v50 = vld [vmem:[%s11016_s7 + $0x590] sm:$0xff]  ;;  %v2562_v32 = vld [vmem:[%s11016_s7 + $0x198] sm:$0xff] }
 0x294   :  { %v2474_v39 = vpop.f32.mrf.mxu1  ;;  %v7280_v59 = vcombine.high %v2673_v37, %v2689_v50  ;;  %v7279_v23 = vcombine.low %v2673_v37, %v2689_v50  ;;  %v2977_v50 = vld [vmem:[%s11016_s7 + $0xe90] sm:$0xff] }
 0x295   :  { %v2491_v15 = vmul.f32 %v2484_v31, %v2473_v33  ;;  %v2475_v40 = vadd.f32 %v2474_v39, %v2433_v29  ;;  %v7313_v29 = vcombine.low %v2706_v3, %v2722_v52  ;;  %v2546_v31 = vld [vmem:[%s11016_s7 + $0x118] sm:$0xff]  ;;  %v7183_v33 = vcombine.low %v2577_v10, %v2593_v11 }
 0x296   :  { %v2476_v42 = vpop.f32.mrf.mxu1  ;;  %v7154_v39 = vcombine.high %v2546_v31, %v2562_v32 }
 0x297   :  { %v2505_v25 = vadd.f32 %v2498_v34, %v2491_v15  ;;  %v2492_v24 = vmul.f32 %v2488_v38, %v2475_v40  ;;  %v7185_v34 = vcombine.low %v2578_v12, %v2594_v13  ;;  %v7152_v38 = vcombine.high %v2545_v27, %v2561_v30  ;;  %v2513_v15 = vld [vmem:[%s11016_s7 + $0x10] sm:$0xff]  ;;  %v2530_v42 = vld [vmem:[%s11016_s7 + $0x98] sm:$0xff] }
 0x298   :  { %v2477_v26 = vpop.f32.mrf.mxu1  ;;  %v2529_v40 = vld [vmem:[%s11016_s7 + $0x90] sm:$0xff]  ;;  %v2866_v12 = vld [vmem:[%s11016_s7 + $0xb18] sm:$0xff] }
 0x299   :  { %v2506_v44 = vadd.f32 %v2502_v41, %v2492_v24  ;;  %v2507_v45 = vmax.f32 %v2505_v25, 0.0  ;;  %v2514_v41 = vld [vmem:[%s11016_s7 + $0x18] sm:$0xff]  ;;  %v7151_v25 = vcombine.low %v2545_v27, %v2561_v30  ;;  %v7153_v24 = vcombine.low %v2546_v31, %v2562_v32  ;;  %v2833_v27 = vld [vmem:[%s11016_s7 + $0xa10] sm:$0xff] }
 0x29a   :  { %v7120_v26 = vcombine.high %v2513_v15, %v2529_v40  ;;  %v7119_v3 = vcombine.low %v2513_v15, %v2529_v40  ;;  %v7121_v52 = vcombine.low %v2514_v41, %v2530_v42  ;;  %v2882_v13 = vld [vmem:[%s11016_s7 + $0xb98] sm:$0xff]  ;;  %v2849_v30 = vld [vmem:[%s11016_s7 + $0xa90] sm:$0xff] }
 0x29b   :  { %v2508_v46 = vmax.f32 %v2506_v44, 0.0  ;;  %v9477_v36 = vpack.c.bf16 %v2507_v45, %v2507_v45  ;;  %v7122_v44 = vcombine.high %v2514_v41, %v2530_v42  ;;  %v2993_v45 = vld [vmem:[%s11016_s7 + $0xf10] sm:$0xff]  ;;  %v2834_v31 = vld [vmem:[%s11016_s7 + $0xa18] sm:$0xff] }
 0x29c   :  { %v2850_v32 = vld [vmem:[%s11016_s7 + $0xa98] sm:$0xff]  ;;  %v2801_v15 = vld [vmem:[%s11016_s7 + $0x910] sm:$0xff] }
 0x29d   :  { %v9475_v28 = vpack.c.bf16 %v2508_v46, %v2508_v46  ;;  %v3009_v46 = vld [vmem:[%s11016_s7 + $0xf90] sm:$0xff]  ;;  %v2802_v41 = vld [vmem:[%s11016_s7 + $0x918] sm:$0xff] }
 0x29e   :  { %v7600_v37 = vcombine.high %v2993_v45, %v3009_v46  ;;  %v2817_v40 = vld [vmem:[%s11016_s7 + $0x990] sm:$0xff]  ;;  %v2818_v42 = vld [vmem:[%s11016_s7 + $0x998] sm:$0xff] }
 0x29f   :  { %5783 = vmatprep.mubr.bf16.mxu0 %v9475_v28  ;;  %5824 = vmatprep.mubr.bf16.mxu1 %v9475_v28 }
 0x2a0   :  { %5784 = vmatmul.mubr.bf16.vlgmr.msra.gmra.mxu0 %v9477_v36  ;;  %5825 = vmatmul.mubr.bf16.vlgmr.msra.gmra.mxu1 %v9477_v36 }
 0x2a1   :  { %5834 = vmatpush1.bf16.msra.mxu0 %v7343_v18  ;;  %5875 = vmatpush1.bf16.msra.mxu1 %v7345_v19  ;;  %v7217_v18 = vcombine.low %v2610_v4, %v2626_v5  ;;  %v7184_v19 = vcombine.high %v2577_v10, %v2593_v11  ;;  %v2898_v4 = vld [vmem:[%s11016_s7 + $0xc18] sm:$0xff]  ;;  %v2865_v10 = vld [vmem:[%s11016_s7 + $0xb10] sm:$0xff] }
 0x2a2   :  { %5865 = vmatprep.mubr.bf16.mxu0 %v9475_v28  ;;  %5906 = vmatprep.mubr.bf16.mxu1 %v9475_v28  ;;  %v2914_v5 = vld [vmem:[%s11016_s7 + $0xc98] sm:$0xff]  ;;  %v2881_v11 = vld [vmem:[%s11016_s7 + $0xb90] sm:$0xff] }
 0x2a3   :  { %5835 = vmatprep.subr.bf16.mxu0 %v7312_v54  ;;  %5876 = vmatprep.subr.bf16.mxu1 %v7314_v55  ;;  %v7602_v54 = vcombine.high %v2994_v47, %v3010_v61  ;;  %v2961_v55 = vld [vmem:[%s11016_s7 + $0xe10] sm:$0xff] }
 0x2a5   :  { %5836 = vmatpush1.bf16.msra.mxu0 %v7311_v58  ;;  %5877 = vmatpush1.bf16.msra.mxu1 %v7313_v29  ;;  %v7599_v58 = vcombine.low %v2993_v45, %v3009_v46  ;;  %v7601_v29 = vcombine.low %v2994_v47, %v3010_v61  ;;  %v2769_v45 = vld [vmem:[%s11016_s7 + $0x810] sm:$0xff]  ;;  %v2770_v47 = vld [vmem:[%s11016_s7 + $0x818] sm:$0xff] }
 0x2a6   :  { %5837 = vmatprep.subr.bf16.mxu0 %v7280_v59  ;;  %5878 = vmatprep.subr.bf16.mxu1 %v7282_v60  ;;  %v7568_v59 = vcombine.high %v2961_v55, %v2977_v50  ;;  %v7570_v60 = vcombine.high %v2962_v56, %v2978_v57  ;;  %v2785_v46 = vld [vmem:[%s11016_s7 + $0x890] sm:$0xff]  ;;  %v2786_v61 = vld [vmem:[%s11016_s7 + $0x898] sm:$0xff] }
 0x2a9   :  { %5838 = vmatpush1.bf16.msra.mxu0 %v7279_v23  ;;  %5879 = vmatpush1.bf16.msra.mxu1 %v7281_v35  ;;  %v7567_v23 = vcombine.low %v2961_v55, %v2977_v50  ;;  %v7569_v35 = vcombine.low %v2962_v56, %v2978_v57  ;;  %v2739_v55 = vld [vmem:[%s11016_s7 + $0x720] sm:$0xff]  ;;  %v2740_v56 = vld [vmem:[%s11016_s7 + $0x728] sm:$0xff] }
 0x2aa   :  { %5839 = vmatprep.subr.bf16.mxu0 %v7248_v14  ;;  %5880 = vmatprep.subr.bf16.mxu1 %v7250_v0  ;;  %v7536_v14 = vcombine.high %v2929_v62, %v2945_v63  ;;  %v7538_v0 = vcombine.high %v2930_v22, %v2946_v51  ;;  %v2755_v50 = vld [vmem:[%s11016_s7 + $0x7a0] sm:$0xff]  ;;  %v2756_v57 = vld [vmem:[%s11016_s7 + $0x7a8] sm:$0xff] }
 0x2ad   :  { %5840 = vmatpush1.bf16.msra.mxu0 %v7247_v6  ;;  %5881 = vmatpush1.bf16.msra.mxu1 %v7249_v7  ;;  %v7535_v6 = vcombine.low %v2929_v62, %v2945_v63  ;;  %v7537_v7 = vcombine.low %v2930_v22, %v2946_v51  ;;  %v2707_v62 = vld [vmem:[%s11016_s7 + $0x620] sm:$0xff]  ;;  %v2708_v22 = vld [vmem:[%s11016_s7 + $0x628] sm:$0xff] }
 0x2ae   :  { %5841 = vmatprep.subr.bf16.mxu0 %v7216_v8  ;;  %5882 = vmatprep.subr.bf16.mxu1 %v7218_v9  ;;  %v7504_v8 = vcombine.high %v2897_v1, %v2913_v2  ;;  %v7506_v9 = vcombine.high %v2898_v4, %v2914_v5  ;;  %v2723_v63 = vld [vmem:[%s11016_s7 + $0x6a0] sm:$0xff]  ;;  %v2724_v51 = vld [vmem:[%s11016_s7 + $0x6a8] sm:$0xff] }
 0x2b1   :  { %5842 = vmatpush1.bf16.msra.mxu0 %v7215_v16  ;;  %5883 = vmatpush1.bf16.msra.mxu1 %v7217_v18  ;;  %v7503_v16 = vcombine.low %v2897_v1, %v2913_v2  ;;  %v7505_v18 = vcombine.low %v2898_v4, %v2914_v5  ;;  %v2675_v1 = vld [vmem:[%s11016_s7 + $0x520] sm:$0xff]  ;;  %v2676_v4 = vld [vmem:[%s11016_s7 + $0x528] sm:$0xff] }
 0x2b2   :  { %5843 = vmatprep.subr.bf16.mxu0 %v7184_v19  ;;  %5884 = vmatprep.subr.bf16.mxu1 %v7186_v21  ;;  %v7472_v19 = vcombine.high %v2865_v10, %v2881_v11  ;;  %v7474_v21 = vcombine.high %v2866_v12, %v2882_v13  ;;  %v2691_v2 = vld [vmem:[%s11016_s7 + $0x5a0] sm:$0xff]  ;;  %v2692_v5 = vld [vmem:[%s11016_s7 + $0x5a8] sm:$0xff] }
 0x2b5   :  { %5844 = vmatpush1.bf16.msra.mxu0 %v7183_v33  ;;  %5885 = vmatpush1.bf16.msra.mxu1 %v7185_v34  ;;  %v7471_v33 = vcombine.low %v2865_v10, %v2881_v11  ;;  %v7473_v34 = vcombine.low %v2866_v12, %v2882_v13  ;;  %v2643_v10 = vld [vmem:[%s11016_s7 + $0x420] sm:$0xff]  ;;  %v2644_v12 = vld [vmem:[%s11016_s7 + $0x428] sm:$0xff] }
 0x2b6   :  { %5845 = vmatprep.subr.bf16.mxu0 %v7152_v38  ;;  %5886 = vmatprep.subr.bf16.mxu1 %v7154_v39  ;;  %v7440_v38 = vcombine.high %v2833_v27, %v2849_v30  ;;  %v7442_v39 = vcombine.high %v2834_v31, %v2850_v32  ;;  %v2659_v11 = vld [vmem:[%s11016_s7 + $0x4a0] sm:$0xff]  ;;  %v2660_v13 = vld [vmem:[%s11016_s7 + $0x4a8] sm:$0xff] }
 0x2b9   :  { %5846 = vmatpush1.bf16.msra.mxu0 %v7151_v25  ;;  %5887 = vmatpush1.bf16.msra.mxu1 %v7153_v24  ;;  %v7439_v25 = vcombine.low %v2833_v27, %v2849_v30  ;;  %v7441_v24 = vcombine.low %v2834_v31, %v2850_v32  ;;  %v2611_v27 = vld [vmem:[%s11016_s7 + $0x320] sm:$0xff]  ;;  %v2612_v31 = vld [vmem:[%s11016_s7 + $0x328] sm:$0xff] }
 0x2ba   :  { %5847 = vmatprep.subr.bf16.mxu0 %v7120_v26  ;;  %5888 = vmatprep.subr.bf16.mxu1 %v7122_v44  ;;  %v7408_v26 = vcombine.high %v2801_v15, %v2817_v40  ;;  %v7410_v44 = vcombine.high %v2802_v41, %v2818_v42  ;;  %v2627_v30 = vld [vmem:[%s11016_s7 + $0x3a0] sm:$0xff]  ;;  %v2628_v32 = vld [vmem:[%s11016_s7 + $0x3a8] sm:$0xff] }
 0x2bd   :  { %5848 = vmatpush1.bf16.msra.mxu0 %v7119_v3  ;;  %5889 = vmatpush1.bf16.msra.mxu1 %v7121_v52  ;;  %v7407_v3 = vcombine.low %v2801_v15, %v2817_v40  ;;  %v7409_v52 = vcombine.low %v2802_v41, %v2818_v42  ;;  %v2579_v15 = vld [vmem:[%s11016_s7 + $0x220] sm:$0xff]  ;;  %v2580_v41 = vld [vmem:[%s11016_s7 + $0x228] sm:$0xff] }
 0x2be   :  { %5849 = vmatprep.subr.bf16.mxu0 %v7600_v37  ;;  %5890 = vmatprep.subr.bf16.mxu1 %v7602_v54  ;;  %v7376_v37 = vcombine.high %v2769_v45, %v2785_v46  ;;  %v7378_v54 = vcombine.high %v2770_v47, %v2786_v61  ;;  %v2595_v40 = vld [vmem:[%s11016_s7 + $0x2a0] sm:$0xff]  ;;  %v2596_v42 = vld [vmem:[%s11016_s7 + $0x2a8] sm:$0xff] }
 0x2c1   :  { %5850 = vmatpush2.bf16.msra.mxu0 %v7599_v58  ;;  %5891 = vmatpush2.bf16.msra.mxu1 %v7601_v29  ;;  %v7375_v58 = vcombine.low %v2769_v45, %v2785_v46  ;;  %v7377_v29 = vcombine.low %v2770_v47, %v2786_v61  ;;  %v2547_v45 = vld [vmem:[%s11016_s7 + $0x120] sm:$0xff]  ;;  %v2548_v47 = vld [vmem:[%s11016_s7 + $0x128] sm:$0xff] }
 0x2c2   :  { %5851 = vmatprep.subr.bf16.mxu0 %v7568_v59  ;;  %5892 = vmatprep.subr.bf16.mxu1 %v7570_v60  ;;  %v7348_v59 = vcombine.high %v2739_v55, %v2755_v50  ;;  %v7350_v60 = vcombine.high %v2740_v56, %v2756_v57  ;;  %v2563_v46 = vld [vmem:[%s11016_s7 + $0x1a0] sm:$0xff]  ;;  %v2564_v61 = vld [vmem:[%s11016_s7 + $0x1a8] sm:$0xff] }
 0x2c5   :  { %5852 = vmatpush2.bf16.msra.mxu0 %v7567_v23  ;;  %5893 = vmatpush2.bf16.msra.mxu1 %v7569_v35  ;;  %v7347_v23 = vcombine.low %v2739_v55, %v2755_v50  ;;  %v7349_v35 = vcombine.low %v2740_v56, %v2756_v57  ;;  %v2515_v55 = vld [vmem:[%s11016_s7 + $0x20] sm:$0xff]  ;;  %v2516_v56 = vld [vmem:[%s11016_s7 + $0x28] sm:$0xff] }
 0x2c6   :  { %5853 = vmatprep.subr.bf16.mxu0 %v7536_v14  ;;  %5894 = vmatprep.subr.bf16.mxu1 %v7538_v0  ;;  %v7316_v14 = vcombine.high %v2707_v62, %v2723_v63  ;;  %v7318_v0 = vcombine.high %v2708_v22, %v2724_v51  ;;  %v2531_v50 = vld [vmem:[%s11016_s7 + $0xa0] sm:$0xff]  ;;  %v2532_v57 = vld [vmem:[%s11016_s7 + $0xa8] sm:$0xff] }
 0x2c9   :  { %5854 = vmatpush2.bf16.msra.mxu0 %v7535_v6  ;;  %5895 = vmatpush2.bf16.msra.mxu1 %v7537_v7  ;;  %v7315_v6 = vcombine.low %v2707_v62, %v2723_v63  ;;  %v7317_v7 = vcombine.low %v2708_v22, %v2724_v51  ;;  %v2995_v62 = vld [vmem:[%s11016_s7 + $0xf20] sm:$0xff]  ;;  %v2996_v22 = vld [vmem:[%s11016_s7 + $0xf28] sm:$0xff] }
 0x2ca   :  { %5855 = vmatprep.subr.bf16.mxu0 %v7504_v8  ;;  %5896 = vmatprep.subr.bf16.mxu1 %v7506_v9  ;;  %v7284_v8 = vcombine.high %v2675_v1, %v2691_v2  ;;  %v7286_v9 = vcombine.high %v2676_v4, %v2692_v5  ;;  %v3011_v63 = vld [vmem:[%s11016_s7 + $0xfa0] sm:$0xff]  ;;  %v3012_v51 = vld [vmem:[%s11016_s7 + $0xfa8] sm:$0xff] }
 0x2cd   :  { %5856 = vmatpush2.bf16.msra.mxu0 %v7503_v16  ;;  %5897 = vmatpush2.bf16.msra.mxu1 %v7505_v18  ;;  %v7283_v16 = vcombine.low %v2675_v1, %v2691_v2  ;;  %v7285_v18 = vcombine.low %v2676_v4, %v2692_v5  ;;  %v2963_v1 = vld [vmem:[%s11016_s7 + $0xe20] sm:$0xff]  ;;  %v2964_v4 = vld [vmem:[%s11016_s7 + $0xe28] sm:$0xff] }
 0x2ce   :  { %5857 = vmatprep.subr.bf16.mxu0 %v7472_v19  ;;  %5898 = vmatprep.subr.bf16.mxu1 %v7474_v21  ;;  %v7252_v19 = vcombine.high %v2643_v10, %v2659_v11  ;;  %v7254_v21 = vcombine.high %v2644_v12, %v2660_v13  ;;  %v2979_v2 = vld [vmem:[%s11016_s7 + $0xea0] sm:$0xff]  ;;  %v2980_v5 = vld [vmem:[%s11016_s7 + $0xea8] sm:$0xff] }
 0x2d1   :  { %5858 = vmatpush2.bf16.msra.mxu0 %v7471_v33  ;;  %5899 = vmatpush2.bf16.msra.mxu1 %v7473_v34  ;;  %v7251_v33 = vcombine.low %v2643_v10, %v2659_v11  ;;  %v7253_v34 = vcombine.low %v2644_v12, %v2660_v13  ;;  %v2931_v10 = vld [vmem:[%s11016_s7 + $0xd20] sm:$0xff]  ;;  %v2932_v12 = vld [vmem:[%s11016_s7 + $0xd28] sm:$0xff] }
 0x2d2   :  { %5859 = vmatprep.subr.bf16.mxu0 %v7440_v38  ;;  %5900 = vmatprep.subr.bf16.mxu1 %v7442_v39  ;;  %v7220_v38 = vcombine.high %v2611_v27, %v2627_v30  ;;  %v7222_v39 = vcombine.high %v2612_v31, %v2628_v32  ;;  %v2947_v11 = vld [vmem:[%s11016_s7 + $0xda0] sm:$0xff]  ;;  %v2948_v13 = vld [vmem:[%s11016_s7 + $0xda8] sm:$0xff] }
 0x2d5   :  { %5860 = vmatpush2.bf16.msra.mxu0 %v7439_v25  ;;  %5901 = vmatpush2.bf16.msra.mxu1 %v7441_v24  ;;  %v7219_v25 = vcombine.low %v2611_v27, %v2627_v30  ;;  %v7221_v24 = vcombine.low %v2612_v31, %v2628_v32  ;;  %v2899_v27 = vld [vmem:[%s11016_s7 + $0xc20] sm:$0xff]  ;;  %v2900_v31 = vld [vmem:[%s11016_s7 + $0xc28] sm:$0xff] }
 0x2d6   :  { %5861 = vmatprep.subr.bf16.mxu0 %v7408_v26  ;;  %5902 = vmatprep.subr.bf16.mxu1 %v7410_v44  ;;  %v7188_v26 = vcombine.high %v2579_v15, %v2595_v40  ;;  %v7190_v44 = vcombine.high %v2580_v41, %v2596_v42  ;;  %v2915_v30 = vld [vmem:[%s11016_s7 + $0xca0] sm:$0xff]  ;;  %v2916_v32 = vld [vmem:[%s11016_s7 + $0xca8] sm:$0xff] }
 0x2d9   :  { %5862 = vmatpush2.bf16.msra.mxu0 %v7407_v3  ;;  %5903 = vmatpush2.bf16.msra.mxu1 %v7409_v52  ;;  %v7187_v3 = vcombine.low %v2579_v15, %v2595_v40  ;;  %v7189_v52 = vcombine.low %v2580_v41, %v2596_v42  ;;  %v2867_v15 = vld [vmem:[%s11016_s7 + $0xb20] sm:$0xff]  ;;  %v2868_v41 = vld [vmem:[%s11016_s7 + $0xb28] sm:$0xff] }
 0x2da   :  { %5863 = vmatprep.subr.bf16.mxu0 %v7376_v37  ;;  %5904 = vmatprep.subr.bf16.mxu1 %v7378_v54  ;;  %v7156_v37 = vcombine.high %v2547_v45, %v2563_v46  ;;  %v7158_v54 = vcombine.high %v2548_v47, %v2564_v61  ;;  %v2883_v40 = vld [vmem:[%s11016_s7 + $0xba0] sm:$0xff]  ;;  %v2884_v42 = vld [vmem:[%s11016_s7 + $0xba8] sm:$0xff] }
 0x2dd   :  { %5864 = vmatpush2.bf16.msra.mxu0 %v7375_v58  ;;  %5905 = vmatpush2.bf16.msra.mxu1 %v7377_v29  ;;  %v7155_v58 = vcombine.low %v2547_v45, %v2563_v46  ;;  %v7157_v29 = vcombine.low %v2548_v47, %v2564_v61  ;;  %v2835_v45 = vld [vmem:[%s11016_s7 + $0xa20] sm:$0xff]  ;;  %v2836_v47 = vld [vmem:[%s11016_s7 + $0xa28] sm:$0xff] }
 0x2de   :  { %5915 = vmatprep.subr.bf16.mxu0 %v7348_v59  ;;  %5956 = vmatprep.subr.bf16.mxu1 %v7350_v60  ;;  %v7124_v59 = vcombine.high %v2515_v55, %v2531_v50  ;;  %v7126_v60 = vcombine.high %v2516_v56, %v2532_v57  ;;  %v2851_v46 = vld [vmem:[%s11016_s7 + $0xaa0] sm:$0xff]  ;;  %v2852_v61 = vld [vmem:[%s11016_s7 + $0xaa8] sm:$0xff] }
 0x2e0   :  { %5866 = vmatmul.mubr.bf16.vlgmr.msra.gmra.mxu0 %v9477_v36  ;;  %5907 = vmatmul.mubr.bf16.vlgmr.msra.gmra.mxu1 %v9477_v36 }
 0x2e1   :  { %5916 = vmatpush1.bf16.msra.mxu0 %v7347_v23  ;;  %5947 = vmatprep.mubr.bf16.mxu0 %v9475_v28  ;;  %v7123_v23 = vcombine.low %v2515_v55, %v2531_v50  ;;  %v2803_v55 = vld [vmem:[%s11016_s7 + $0x920] sm:$0xff] }
 0x2e2   :  { %5957 = vmatpush1.bf16.msra.mxu1 %v7349_v35  ;;  %5988 = vmatprep.mubr.bf16.mxu1 %v9475_v28  ;;  %v7125_v35 = vcombine.low %v2516_v56, %v2532_v57  ;;  %v2819_v50 = vld [vmem:[%s11016_s7 + $0x9a0] sm:$0xff]  ;;  %v2804_v56 = vld [vmem:[%s11016_s7 + $0x928] sm:$0xff] }
 0x2e3   :  { %5917 = vmatprep.subr.bf16.mxu0 %v7316_v14  ;;  %5958 = vmatprep.subr.bf16.mxu1 %v7318_v0  ;;  %v7604_v14 = vcombine.high %v2995_v62, %v3011_v63  ;;  %v7606_v0 = vcombine.high %v2996_v22, %v3012_v51  ;;  %v2820_v57 = vld [vmem:[%s11016_s7 + $0x9a8] sm:$0xff] }
 0x2e5   :  { %5918 = vmatpush1.bf16.msra.mxu0 %v7315_v6  ;;  %v7603_v6 = vcombine.low %v2995_v62, %v3011_v63  ;;  %v2771_v62 = vld [vmem:[%s11016_s7 + $0x820] sm:$0xff] }
 0x2e6   :  { %5959 = vmatpush1.bf16.msra.mxu1 %v7317_v7  ;;  %5919 = vmatprep.subr.bf16.mxu0 %v7284_v8  ;;  %v7605_v7 = vcombine.low %v2996_v22, %v3012_v51  ;;  %v7572_v8 = vcombine.high %v2963_v1, %v2979_v2  ;;  %v2787_v63 = vld [vmem:[%s11016_s7 + $0x8a0] sm:$0xff]  ;;  %v2772_v22 = vld [vmem:[%s11016_s7 + $0x828] sm:$0xff] }
 0x2e7   :  { %5960 = vmatprep.subr.bf16.mxu1 %v7286_v9  ;;  %v7574_v9 = vcombine.high %v2964_v4, %v2980_v5  ;;  %v2788_v51 = vld [vmem:[%s11016_s7 + $0x8a8] sm:$0xff] }
 0x2e9   :  { %5920 = vmatpush1.bf16.msra.mxu0 %v7283_v16  ;;  %v7571_v16 = vcombine.low %v2963_v1, %v2979_v2  ;;  %v2741_v1 = vld [vmem:[%s11016_s7 + $0x730] sm:$0xff] }
 0x2ea   :  { %5961 = vmatpush1.bf16.msra.mxu1 %v7285_v18  ;;  %5921 = vmatprep.subr.bf16.mxu0 %v7252_v19  ;;  %v7573_v18 = vcombine.low %v2964_v4, %v2980_v5  ;;  %v7540_v19 = vcombine.high %v2931_v10, %v2947_v11  ;;  %v2757_v2 = vld [vmem:[%s11016_s7 + $0x7b0] sm:$0xff]  ;;  %v2742_v4 = vld [vmem:[%s11016_s7 + $0x738] sm:$0xff] }
 0x2eb   :  { %5962 = vmatprep.subr.bf16.mxu1 %v7254_v21  ;;  %v7542_v21 = vcombine.high %v2932_v12, %v2948_v13  ;;  %v2758_v5 = vld [vmem:[%s11016_s7 + $0x7b8] sm:$0xff] }
 0x2ed   :  { %5922 = vmatpush1.bf16.msra.mxu0 %v7251_v33  ;;  %v7539_v33 = vcombine.low %v2931_v10, %v2947_v11  ;;  %v2709_v10 = vld [vmem:[%s11016_s7 + $0x630] sm:$0xff] }
 0x2ee   :  { %5963 = vmatpush1.bf16.msra.mxu1 %v7253_v34  ;;  %5923 = vmatprep.subr.bf16.mxu0 %v7220_v38  ;;  %v7541_v34 = vcombine.low %v2932_v12, %v2948_v13  ;;  %v7508_v38 = vcombine.high %v2899_v27, %v2915_v30  ;;  %v2725_v11 = vld [vmem:[%s11016_s7 + $0x6b0] sm:$0xff]  ;;  %v7351_v12 = vcombine.low %v2741_v1, %v2757_v2  ;;  %v2710_v13 = vld [vmem:[%s11016_s7 + $0x638] sm:$0xff] }
 0x2ef   :  { %5964 = vmatprep.subr.bf16.mxu1 %v7222_v39  ;;  %v7510_v39 = vcombine.high %v2900_v31, %v2916_v32 }
 0x2f1   :  { %5924 = vmatpush1.bf16.msra.mxu0 %v7219_v25  ;;  %v7507_v25 = vcombine.low %v2899_v27, %v2915_v30  ;;  %v2693_v27 = vld [vmem:[%s11016_s7 + $0x5b0] sm:$0xff] }
 0x2f2   :  { %5965 = vmatpush1.bf16.msra.mxu1 %v7221_v24  ;;  %5925 = vmatprep.subr.bf16.mxu0 %v7188_v26  ;;  %v7509_v24 = vcombine.low %v2900_v31, %v2916_v32  ;;  %v7476_v26 = vcombine.high %v2867_v15, %v2883_v40  ;;  %v2678_v31 = vld [vmem:[%s11016_s7 + $0x538] sm:$0xff] }
 0x2f3   :  { %5966 = vmatprep.subr.bf16.mxu1 %v7190_v44  ;;  %v7478_v44 = vcombine.high %v2868_v41, %v2884_v42  ;;  %v2694_v32 = vld [vmem:[%s11016_s7 + $0x5b8] sm:$0xff] }
 0x2f5   :  { %5926 = vmatpush1.bf16.msra.mxu0 %v7187_v3  ;;  %v7475_v3 = vcombine.low %v2867_v15, %v2883_v40  ;;  %v2645_v15 = vld [vmem:[%s11016_s7 + $0x430] sm:$0xff] }
 0x2f6   :  { %5967 = vmatpush1.bf16.msra.mxu1 %v7189_v52  ;;  %5927 = vmatprep.subr.bf16.mxu0 %v7156_v37  ;;  %v7477_v52 = vcombine.low %v2868_v41, %v2884_v42  ;;  %v7444_v37 = vcombine.high %v2835_v45, %v2851_v46  ;;  %v2661_v40 = vld [vmem:[%s11016_s7 + $0x4b0] sm:$0xff]  ;;  %v2646_v41 = vld [vmem:[%s11016_s7 + $0x438] sm:$0xff] }
 0x2f7   :  { %5968 = vmatprep.subr.bf16.mxu1 %v7158_v54  ;;  %v7446_v54 = vcombine.high %v2836_v47, %v2852_v61  ;;  %v2662_v42 = vld [vmem:[%s11016_s7 + $0x4b8] sm:$0xff] }
 0x2f9   :  { %5928 = vmatpush1.bf16.msra.mxu0 %v7155_v58  ;;  %v7443_v58 = vcombine.low %v2835_v45, %v2851_v46  ;;  %v2613_v45 = vld [vmem:[%s11016_s7 + $0x330] sm:$0xff] }
 0x2fa   :  { %5969 = vmatpush1.bf16.msra.mxu1 %v7157_v29  ;;  %5929 = vmatprep.subr.bf16.mxu0 %v7124_v59  ;;  %v7445_v29 = vcombine.low %v2836_v47, %v2852_v61  ;;  %v7412_v59 = vcombine.high %v2803_v55, %v2819_v50  ;;  %v2629_v46 = vld [vmem:[%s11016_s7 + $0x3b0] sm:$0xff]  ;;  %v2614_v47 = vld [vmem:[%s11016_s7 + $0x338] sm:$0xff] }
 0x2fb   :  { %5970 = vmatprep.subr.bf16.mxu1 %v7126_v60  ;;  %v7414_v60 = vcombine.high %v2804_v56, %v2820_v57  ;;  %v2630_v61 = vld [vmem:[%s11016_s7 + $0x3b8] sm:$0xff] }
 0x2fd   :  { %5930 = vmatpush1.bf16.msra.mxu0 %v7123_v23  ;;  %v7411_v23 = vcombine.low %v2803_v55, %v2819_v50  ;;  %v2581_v55 = vld [vmem:[%s11016_s7 + $0x230] sm:$0xff] }
 0x2fe   :  { %5971 = vmatpush1.bf16.msra.mxu1 %v7125_v35  ;;  %5931 = vmatprep.subr.bf16.mxu0 %v7604_v14  ;;  %v7413_v35 = vcombine.low %v2804_v56, %v2820_v57  ;;  %v7380_v14 = vcombine.high %v2771_v62, %v2787_v63  ;;  %v2597_v50 = vld [vmem:[%s11016_s7 + $0x2b0] sm:$0xff]  ;;  %v2582_v56 = vld [vmem:[%s11016_s7 + $0x238] sm:$0xff] }
 0x2ff   :  { %5972 = vmatprep.subr.bf16.mxu1 %v7606_v0  ;;  %v7382_v0 = vcombine.high %v2772_v22, %v2788_v51  ;;  %v2598_v57 = vld [vmem:[%s11016_s7 + $0x2b8] sm:$0xff] }
 0x301   :  { %5932 = vmatpush2.bf16.msra.mxu0 %v7603_v6  ;;  %v7379_v6 = vcombine.low %v2771_v62, %v2787_v63  ;;  %v2549_v62 = vld [vmem:[%s11016_s7 + $0x130] sm:$0xff] }
 0x302   :  { %5973 = vmatpush2.bf16.msra.mxu1 %v7605_v7  ;;  %5933 = vmatprep.subr.bf16.mxu0 %v7572_v8  ;;  %v7381_v7 = vcombine.low %v2772_v22, %v2788_v51  ;;  %v7352_v8 = vcombine.high %v2741_v1, %v2757_v2  ;;  %v2565_v63 = vld [vmem:[%s11016_s7 + $0x1b0] sm:$0xff]  ;;  %v2550_v22 = vld [vmem:[%s11016_s7 + $0x138] sm:$0xff] }
 0x303   :  { %5974 = vmatprep.subr.bf16.mxu1 %v7574_v9  ;;  %v7354_v9 = vcombine.high %v2742_v4, %v2758_v5  ;;  %v2566_v51 = vld [vmem:[%s11016_s7 + $0x1b8] sm:$0xff]  ;;  %v2517_v1 = vld [vmem:[%s11016_s7 + $0x30] sm:$0xff] }
 0x304   :  { %v2533_v2 = vld [vmem:[%s11016_s7 + $0xb0] sm:$0xff] }
 0x305   :  { %5934 = vmatpush2.bf16.msra.mxu0 %v7571_v16  ;;  %v2726_v16 = vld [vmem:[%s11016_s7 + $0x6b8] sm:$0xff] }
 0x306   :  { %5975 = vmatpush2.bf16.msra.mxu1 %v7573_v18  ;;  %5935 = vmatprep.subr.bf16.mxu0 %v7540_v19  ;;  %v7353_v18 = vcombine.low %v2742_v4, %v2758_v5  ;;  %v7320_v19 = vcombine.high %v2709_v10, %v2725_v11  ;;  %v7322_v30 = vcombine.high %v2710_v13, %v2726_v16  ;;  %v2518_v4 = vld [vmem:[%s11016_s7 + $0x38] sm:$0xff] }
 0x307   :  { %5976 = vmatprep.subr.bf16.mxu1 %v7542_v21  ;;  %v2677_v21 = vld [vmem:[%s11016_s7 + $0x530] sm:$0xff]  ;;  %v2534_v5 = vld [vmem:[%s11016_s7 + $0xb8] sm:$0xff] }
 0x309   :  { %5936 = vmatpush2.bf16.msra.mxu0 %v7539_v33  ;;  %v7319_v33 = vcombine.low %v2709_v10, %v2725_v11  ;;  %v2997_v10 = vld [vmem:[%s11016_s7 + $0xf30] sm:$0xff] }
 0x30a   :  { %5977 = vmatpush2.bf16.msra.mxu1 %v7541_v34  ;;  %5937 = vmatprep.subr.bf16.mxu0 %v7508_v38  ;;  %v7321_v34 = vcombine.low %v2710_v13, %v2726_v16  ;;  %v7288_v38 = vcombine.high %v2677_v21, %v2693_v27  ;;  %v3013_v11 = vld [vmem:[%s11016_s7 + $0xfb0] sm:$0xff]  ;;  %v3014_v13 = vld [vmem:[%s11016_s7 + $0xfb8] sm:$0xff]  ;;  %v7127_v16 = vcombine.low %v2517_v1, %v2533_v2 }
 0x30b   :  { %5978 = vmatprep.subr.bf16.mxu1 %v7510_v39  ;;  %v7290_v39 = vcombine.high %v2678_v31, %v2694_v32 }
 0x30d   :  { %5938 = vmatpush2.bf16.msra.mxu0 %v7507_v25  ;;  %v7287_v25 = vcombine.low %v2677_v21, %v2693_v27  ;;  %v2965_v27 = vld [vmem:[%s11016_s7 + $0xe30] sm:$0xff] }
 0x30e   :  { %5979 = vmatpush2.bf16.msra.mxu1 %v7509_v24  ;;  %5939 = vmatprep.subr.bf16.mxu0 %v7476_v26  ;;  %v7289_v24 = vcombine.low %v2678_v31, %v2694_v32  ;;  %v7256_v26 = vcombine.high %v2645_v15, %v2661_v40  ;;  %v2966_v31 = vld [vmem:[%s11016_s7 + $0xe38] sm:$0xff] }
 0x30f   :  { %5980 = vmatprep.subr.bf16.mxu1 %v7478_v44  ;;  %v7258_v44 = vcombine.high %v2646_v41, %v2662_v42  ;;  %v2982_v32 = vld [vmem:[%s11016_s7 + $0xeb8] sm:$0xff] }
 0x311   :  { %5940 = vmatpush2.bf16.msra.mxu0 %v7475_v3  ;;  %v7255_v3 = vcombine.low %v2645_v15, %v2661_v40  ;;  %v2933_v15 = vld [vmem:[%s11016_s7 + $0xd30] sm:$0xff] }
 0x312   :  { %5981 = vmatpush2.bf16.msra.mxu1 %v7477_v52  ;;  %5941 = vmatprep.subr.bf16.mxu0 %v7444_v37  ;;  %v7257_v52 = vcombine.low %v2646_v41, %v2662_v42  ;;  %v7224_v37 = vcombine.high %v2613_v45, %v2629_v46  ;;  %v2949_v40 = vld [vmem:[%s11016_s7 + $0xdb0] sm:$0xff]  ;;  %v2934_v41 = vld [vmem:[%s11016_s7 + $0xd38] sm:$0xff] }
 0x313   :  { %5982 = vmatprep.subr.bf16.mxu1 %v7446_v54  ;;  %v7226_v54 = vcombine.high %v2614_v47, %v2630_v61  ;;  %v2950_v42 = vld [vmem:[%s11016_s7 + $0xdb8] sm:$0xff] }
 0x315   :  { %5942 = vmatpush2.bf16.msra.mxu0 %v7443_v58  ;;  %v7223_v58 = vcombine.low %v2613_v45, %v2629_v46  ;;  %v2901_v45 = vld [vmem:[%s11016_s7 + $0xc30] sm:$0xff] }
 0x316   :  { %5983 = vmatpush2.bf16.msra.mxu1 %v7445_v29  ;;  %5943 = vmatprep.subr.bf16.mxu0 %v7412_v59  ;;  %v7225_v29 = vcombine.low %v2614_v47, %v2630_v61  ;;  %v7192_v59 = vcombine.high %v2581_v55, %v2597_v50  ;;  %v2917_v46 = vld [vmem:[%s11016_s7 + $0xcb0] sm:$0xff]  ;;  %v2902_v47 = vld [vmem:[%s11016_s7 + $0xc38] sm:$0xff] }
 0x317   :  { %5984 = vmatprep.subr.bf16.mxu1 %v7414_v60  ;;  %v7194_v60 = vcombine.high %v2582_v56, %v2598_v57  ;;  %v2918_v61 = vld [vmem:[%s11016_s7 + $0xcb8] sm:$0xff] }
 0x319   :  { %5944 = vmatpush2.bf16.msra.mxu0 %v7411_v23  ;;  %v7191_v23 = vcombine.low %v2581_v55, %v2597_v50  ;;  %v2869_v55 = vld [vmem:[%s11016_s7 + $0xb30] sm:$0xff] }
 0x31a   :  { %5985 = vmatpush2.bf16.msra.mxu1 %v7413_v35  ;;  %5945 = vmatprep.subr.bf16.mxu0 %v7380_v14  ;;  %v7193_v35 = vcombine.low %v2582_v56, %v2598_v57  ;;  %v7160_v14 = vcombine.high %v2549_v62, %v2565_v63  ;;  %v2885_v50 = vld [vmem:[%s11016_s7 + $0xbb0] sm:$0xff]  ;;  %v2870_v56 = vld [vmem:[%s11016_s7 + $0xb38] sm:$0xff] }
 0x31b   :  { %5986 = vmatprep.subr.bf16.mxu1 %v7382_v0  ;;  %v7162_v0 = vcombine.high %v2550_v22, %v2566_v51  ;;  %v2886_v57 = vld [vmem:[%s11016_s7 + $0xbb8] sm:$0xff] }
 0x31d   :  { %5946 = vmatpush2.bf16.msra.mxu0 %v7379_v6  ;;  %v7159_v6 = vcombine.low %v2549_v62, %v2565_v63  ;;  %v2837_v62 = vld [vmem:[%s11016_s7 + $0xa30] sm:$0xff] }
 0x31e   :  { %5987 = vmatpush2.bf16.msra.mxu1 %v7381_v7  ;;  %5997 = vmatprep.subr.bf16.mxu0 %v7352_v8  ;;  %v7161_v7 = vcombine.low %v2550_v22, %v2566_v51  ;;  %v7128_v8 = vcombine.high %v2517_v1, %v2533_v2  ;;  %v2853_v63 = vld [vmem:[%s11016_s7 + $0xab0] sm:$0xff]  ;;  %v2838_v22 = vld [vmem:[%s11016_s7 + $0xa38] sm:$0xff] }
 0x31f   :  { %6038 = vmatprep.subr.bf16.mxu1 %v7354_v9  ;;  %v7130_v9 = vcombine.high %v2518_v4, %v2534_v5  ;;  %v2854_v51 = vld [vmem:[%s11016_s7 + $0xab8] sm:$0xff]  ;;  %v2805_v1 = vld [vmem:[%s11016_s7 + $0x930] sm:$0xff] }
 0x320   :  { %5948 = vmatmul.mubr.bf16.vlgmr.msra.gmra.mxu0 %v9477_v36  ;;  %v2821_v2 = vld [vmem:[%s11016_s7 + $0x9b0] sm:$0xff] }
 0x321   :  { %5989 = vmatmul.mubr.bf16.vlgmr.msra.gmra.mxu1 %v9477_v36  ;;  %5998 = vmatpush1.bf16.msra.mxu0 %v7351_v12  ;;  %v2998_v12 = vld [vmem:[%s11016_s7 + $0xf38] sm:$0xff] }
 0x322   :  { %6029 = vmatprep.mubr.bf16.mxu0 %v9475_v28  ;;  %6039 = vmatpush1.bf16.msra.mxu1 %v7353_v18  ;;  %v7129_v18 = vcombine.low %v2518_v4, %v2534_v5  ;;  %v7610_v21 = vcombine.high %v2998_v12, %v3014_v13  ;;  %v2806_v4 = vld [vmem:[%s11016_s7 + $0x938] sm:$0xff] }
 0x323   :  { %6070 = vmatprep.mubr.bf16.mxu1 %v9475_v28  ;;  %5999 = vmatprep.subr.bf16.mxu0 %v7320_v19  ;;  %v7608_v19 = vcombine.high %v2997_v10, %v3013_v11  ;;  %v2822_v5 = vld [vmem:[%s11016_s7 + $0x9b8] sm:$0xff] }
 0x324   :  { %6040 = vmatprep.subr.bf16.mxu1 %v7322_v30  ;;  %v2981_v30 = vld [vmem:[%s11016_s7 + $0xeb0] sm:$0xff] }
 0x325   :  { %6000 = vmatpush1.bf16.msra.mxu0 %v7319_v33  ;;  %v7607_v33 = vcombine.low %v2997_v10, %v3013_v11  ;;  %v2773_v10 = vld [vmem:[%s11016_s7 + $0x830] sm:$0xff] }
 0x326   :  { %6041 = vmatpush1.bf16.msra.mxu1 %v7321_v34  ;;  %6001 = vmatprep.subr.bf16.mxu0 %v7288_v38  ;;  %v7609_v34 = vcombine.low %v2998_v12, %v3014_v13  ;;  %v7576_v38 = vcombine.high %v2965_v27, %v2981_v30  ;;  %v2789_v11 = vld [vmem:[%s11016_s7 + $0x8b0] sm:$0xff]  ;;  %v2774_v12 = vld [vmem:[%s11016_s7 + $0x838] sm:$0xff] }
 0x327   :  { %6042 = vmatprep.subr.bf16.mxu1 %v7290_v39  ;;  %v7578_v39 = vcombine.high %v2966_v31, %v2982_v32  ;;  %v2790_v13 = vld [vmem:[%s11016_s7 + $0x8b8] sm:$0xff] }
 0x329   :  { %6002 = vmatpush1.bf16.msra.mxu0 %v7287_v25  ;;  %v7575_v25 = vcombine.low %v2965_v27, %v2981_v30  ;;  %v2743_v27 = vld [vmem:[%s11016_s7 + $0x740] sm:$0xff] }
 0x32a   :  { %6043 = vmatpush1.bf16.msra.mxu1 %v7289_v24  ;;  %6003 = vmatprep.subr.bf16.mxu0 %v7256_v26  ;;  %v7577_v24 = vcombine.low %v2966_v31, %v2982_v32  ;;  %v7544_v26 = vcombine.high %v2933_v15, %v2949_v40  ;;  %v2759_v30 = vld [vmem:[%s11016_s7 + $0x7c0] sm:$0xff]  ;;  %v2744_v31 = vld [vmem:[%s11016_s7 + $0x748] sm:$0xff] }
 0x32b   :  { %6044 = vmatprep.subr.bf16.mxu1 %v7258_v44  ;;  %v7546_v44 = vcombine.high %v2934_v41, %v2950_v42  ;;  %v2760_v32 = vld [vmem:[%s11016_s7 + $0x7c8] sm:$0xff] }
 0x32d   :  { %6004 = vmatpush1.bf16.msra.mxu0 %v7255_v3  ;;  %v7543_v3 = vcombine.low %v2933_v15, %v2949_v40  ;;  %v7358_v15 = vcombine.high %v2744_v31, %v2760_v32  ;;  %v10065_v40 = vld [vmem:[%s11020_s9] sm:$0xff] }
 0x32e   :  { %6045 = vmatpush1.bf16.msra.mxu1 %v7257_v52  ;;  %6005 = vmatprep.subr.bf16.mxu0 %v7224_v37  ;;  %v7545_v52 = vcombine.low %v2934_v41, %v2950_v42  ;;  %v7512_v37 = vcombine.high %v2901_v45, %v2917_v46  ;;  %v2711_v41 = vld [vmem:[%s11016_s7 + $0x640] sm:$0xff]  ;;  %v7355_v42 = vcombine.low %v2743_v27, %v2759_v30 }
 0x32f   :  { %6046 = vmatprep.subr.bf16.mxu1 %v7226_v54  ;;  %v7514_v54 = vcombine.high %v2902_v47, %v2918_v61 }
 0x331   :  { %6006 = vmatpush1.bf16.msra.mxu0 %v7223_v58  ;;  %v7511_v58 = vcombine.low %v2901_v45, %v2917_v46  ;;  %v2728_v45 = vld [vmem:[%s11016_s7 + $0x6c8] sm:$0xff]  ;;  %v7357_v46 = vcombine.low %v2744_v31, %v2760_v32 }
 0x332   :  { %6047 = vmatpush1.bf16.msra.mxu1 %v7225_v29  ;;  %6007 = vmatprep.subr.bf16.mxu0 %v7192_v59  ;;  %v7513_v29 = vcombine.low %v2902_v47, %v2918_v61  ;;  %v7480_v59 = vcombine.high %v2869_v55, %v2885_v50  ;;  %v6418_v47 = vrot.slane %v10065_v40, %v9168_v48 }
 0x333   :  { %6048 = vmatprep.subr.bf16.mxu1 %v7194_v60  ;;  %v7482_v60 = vcombine.high %v2870_v56, %v2886_v57  ;;  %v6426_v61 = vrot.slane %v10065_v40, %v9303_v17 }
 0x335   :  { %6008 = vmatpush1.bf16.msra.mxu0 %v7191_v23  ;;  %v7479_v23 = vcombine.low %v2869_v55, %v2885_v50 }
 0x336   :  { %6049 = vmatpush1.bf16.msra.mxu1 %v7193_v35  ;;  %6009 = vmatprep.subr.bf16.mxu0 %v7160_v14  ;;  %v7481_v35 = vcombine.low %v2870_v56, %v2886_v57  ;;  %v7448_v14 = vcombine.high %v2837_v62, %v2853_v63  ;;  %v6422_v56 = vrot.slane %v10065_v40, %v9179_v53 }
 0x337   :  { %6050 = vmatprep.subr.bf16.mxu1 %v7162_v0  ;;  %v7450_v0 = vcombine.high %v2838_v22, %v2854_v51 }
 0x339   :  { %6010 = vmatpush1.bf16.msra.mxu0 %v7159_v6  ;;  %v7447_v6 = vcombine.low %v2837_v62, %v2853_v63 }
 0x33a   :  { %6051 = vmatpush1.bf16.msra.mxu1 %v7161_v7  ;;  %6011 = vmatprep.subr.bf16.mxu0 %v7128_v8  ;;  %v7449_v7 = vcombine.low %v2838_v22, %v2854_v51  ;;  %v7416_v8 = vcombine.high %v2805_v1, %v2821_v2  ;;  %v6430_v22 = vrot.slane %v10065_v40, %v9312_v20 }
 0x33b   :  { %6052 = vmatprep.subr.bf16.mxu1 %v7130_v9  ;;  %v7418_v9 = vcombine.high %v2806_v4, %v2822_v5 }
 0x33d   :  { %6012 = vmatpush1.bf16.msra.mxu0 %v7127_v16  ;;  %v7415_v16 = vcombine.low %v2805_v1, %v2821_v2 }
 0x33e   :  { %6053 = vmatpush1.bf16.msra.mxu1 %v7129_v18  ;;  %6013 = vmatprep.subr.bf16.mxu0 %v7608_v19  ;;  %v7417_v18 = vcombine.low %v2806_v4, %v2822_v5  ;;  %v7384_v19 = vcombine.high %v2773_v10, %v2789_v11  ;;  %v2647_v4 = vld [vmem:[%s11016_s7 + $0x440] sm:$0xff] }
 0x33f   :  { %6054 = vmatprep.subr.bf16.mxu1 %v7610_v21  ;;  %v7386_v21 = vcombine.high %v2774_v12, %v2790_v13  ;;  %v2663_v5 = vld [vmem:[%s11016_s7 + $0x4c0] sm:$0xff] }
 0x341   :  { %6014 = vmatpush2.bf16.msra.mxu0 %v7607_v33  ;;  %v7383_v33 = vcombine.low %v2773_v10, %v2789_v11  ;;  %v2664_v10 = vld [vmem:[%s11016_s7 + $0x4c8] sm:$0xff] }
 0x342   :  { %6055 = vmatpush2.bf16.msra.mxu1 %v7609_v34  ;;  %6015 = vmatprep.subr.bf16.mxu0 %v7576_v38  ;;  %v7385_v34 = vcombine.low %v2774_v12, %v2790_v13  ;;  %v7356_v38 = vcombine.high %v2743_v27, %v2759_v30  ;;  %v7260_v27 = vcombine.high %v2647_v4, %v2663_v5 }
 0x343   :  { %6056 = vmatprep.subr.bf16.mxu1 %v7578_v39  ;;  %v10060_v39 = vld [vmem:[%s11019_s8] sm:$0xff] }
 0x345   :  { %6016 = vmatpush2.bf16.msra.mxu0 %v7575_v25  ;;  %v3034_v25 = vrot.slane %v10060_v39, %v9168_v48 }
 0x346   :  { %6057 = vmatpush2.bf16.msra.mxu1 %v7577_v24  ;;  %6017 = vmatprep.subr.bf16.mxu0 %v7544_v26  ;;  %v3042_v24 = vrot.slane %v10060_v39, %v9303_v17  ;;  %v2727_v26 = vld [vmem:[%s11016_s7 + $0x6c0] sm:$0xff] }
 0x347   :  { %6058 = vmatprep.subr.bf16.mxu1 %v7546_v44  ;;  %v2712_v44 = vld [vmem:[%s11016_s7 + $0x648] sm:$0xff]  ;;  %v7323_v57 = vcombine.low %v2711_v41, %v2727_v26 }
 0x349   :  { %6018 = vmatpush2.bf16.msra.mxu0 %v7543_v3  ;;  %v3038_v3 = vrot.slane %v10060_v39, %v9179_v53 }
 0x34a   :  { %6059 = vmatpush2.bf16.msra.mxu1 %v7545_v52  ;;  %6019 = vmatprep.subr.bf16.mxu0 %v7512_v37  ;;  %v3046_v52 = vrot.slane %v10060_v39, %v9312_v20  ;;  %v2679_v37 = vld [vmem:[%s11016_s7 + $0x540] sm:$0xff] }
 0x34b   :  { %6060 = vmatprep.subr.bf16.mxu1 %v7514_v54  ;;  %v2695_v54 = vld [vmem:[%s11016_s7 + $0x5c0] sm:$0xff] }
 0x34d   :  { %6020 = vmatpush2.bf16.msra.mxu0 %v7511_v58  ;;  %v7324_v58 = vcombine.high %v2711_v41, %v2727_v26 }
 0x34e   :  { %6061 = vmatpush2.bf16.msra.mxu1 %v7513_v29  ;;  %6021 = vmatprep.subr.bf16.mxu0 %v7480_v59  ;;  %v7326_v29 = vcombine.high %v2712_v44, %v2728_v45  ;;  %v2680_v59 = vld [vmem:[%s11016_s7 + $0x548] sm:$0xff] }
 0x34f   :  { %6062 = vmatprep.subr.bf16.mxu1 %v7482_v60  ;;  %v2696_v60 = vld [vmem:[%s11016_s7 + $0x5c8] sm:$0xff] }
 0x350   :  { %v7294_v2 = vcombine.high %v2680_v59, %v2696_v60 }
 0x351   :  { %6022 = vmatpush2.bf16.msra.mxu0 %v7479_v23 }
 0x352   :  { %6063 = vmatpush2.bf16.msra.mxu1 %v7481_v35  ;;  %6023 = vmatprep.subr.bf16.mxu0 %v7448_v14  ;;  %v7325_v35 = vcombine.low %v2712_v44, %v2728_v45  ;;  %v7292_v14 = vcombine.high %v2679_v37, %v2695_v54 }
 0x353   :  { %6064 = vmatprep.subr.bf16.mxu1 %v7450_v0 }
 0x355   :  { %6024 = vmatpush2.bf16.msra.mxu0 %v7447_v6 }
 0x356   :  { %6065 = vmatpush2.bf16.msra.mxu1 %v7449_v7  ;;  %6025 = vmatprep.subr.bf16.mxu0 %v7416_v8  ;;  %v7291_v8 = vcombine.low %v2679_v37, %v2695_v54 }
 0x357   :  { %6066 = vmatprep.subr.bf16.mxu1 %v7418_v9  ;;  %v2648_v9 = vld [vmem:[%s11016_s7 + $0x448] sm:$0xff] }
 0x358   :  { %v7262_v32 = vcombine.high %v2648_v9, %v2664_v10 }
 0x359   :  { %6026 = vmatpush2.bf16.msra.mxu0 %v7415_v16 }
 0x35a   :  { %6067 = vmatpush2.bf16.msra.mxu1 %v7417_v18  ;;  %6027 = vmatprep.subr.bf16.mxu0 %v7384_v19 }
 0x35b   :  { %6068 = vmatprep.subr.bf16.mxu1 %v7386_v21  ;;  %v7293_v21 = vcombine.low %v2680_v59, %v2696_v60 }
 0x35d   :  { %6028 = vmatpush2.bf16.msra.mxu0 %v7383_v33  ;;  %v2615_v33 = vld [vmem:[%s11016_s7 + $0x340] sm:$0xff] }
 0x35e   :  { %6069 = vmatpush2.bf16.msra.mxu1 %v7385_v34  ;;  %6079 = vmatprep.subr.bf16.mxu0 %v7356_v38  ;;  %v2631_v34 = vld [vmem:[%s11016_s7 + $0x3c0] sm:$0xff]  ;;  %v2616_v38 = vld [vmem:[%s11016_s7 + $0x348] sm:$0xff] }
 0x35f   :  { %6120 = vmatprep.subr.bf16.mxu1 %v7358_v15  ;;  %v2632_v15 = vld [vmem:[%s11016_s7 + $0x3c8] sm:$0xff]  ;;  %v7228_v26 = vcombine.high %v2615_v33, %v2631_v34 }
 0x360   :  { %6030 = vmatmul.mubr.bf16.vlgmr.msra.gmra.mxu0 %v9477_v36  ;;  %v5785_v55 = vpop.f32.mrf.mxu0  ;;  %v5826_v50 = vpop.f32.mrf.mxu1  ;;  %v7230_v45 = vcombine.high %v2616_v38, %v2632_v15  ;;  %v7229_v37 = vcombine.low %v2616_v38, %v2632_v15 }
 0x361   :  { %6071 = vmatmul.mubr.bf16.vlgmr.msra.gmra.mxu1 %v9477_v36  ;;  %v5786_v62 = vadd.f32 %v5785_v55, %v3034_v25  ;;  %v5827_v63 = vadd.f32 %v5826_v50, %v3042_v24  ;;  %6080 = vmatpush1.bf16.msra.mxu0 %v7355_v42  ;;  %v7259_v25 = vcombine.low %v2647_v4, %v2663_v5  ;;  %v2551_v50 = vld [vmem:[%s11016_s7 + $0x140] sm:$0xff]  ;;  %v3000_v5 = vld [vmem:[%s11016_s7 + $0xf48] sm:$0xff] }
 0x362   :  { %6111 = vmatprep.mubr.bf16.mxu0 %v9475_v28  ;;  %6121 = vmatpush1.bf16.msra.mxu1 %v7357_v46  ;;  %v5787_v51 = vpop.f32.mrf.mxu0  ;;  %v5828_v23 = vpop.f32.mrf.mxu1  ;;  %v7261_v24 = vcombine.low %v2648_v9, %v2664_v10  ;;  %v2583_v46 = vld [vmem:[%s11016_s7 + $0x240] sm:$0xff] }
 0x363   :  { %6152 = vmatprep.mubr.bf16.mxu1 %v9475_v28  ;;  %v5788_v0 = vadd.f32 %v5787_v51, %v3038_v3  ;;  %v5829_v1 = vadd.f32 %v5828_v23, %v3046_v52  ;;  %6081 = vmatprep.subr.bf16.mxu0 %v7324_v58  ;;  %v6575_v11 = vadd.f32 %v6418_v47, %v5786_v62  ;;  %v2599_v47 = vld [vmem:[%s11016_s7 + $0x2c0] sm:$0xff]  ;;  %v2600_v3 = vld [vmem:[%s11016_s7 + $0x2c8] sm:$0xff] }
 0x364   :  { %6122 = vmatprep.subr.bf16.mxu1 %v7326_v29  ;;  %v5789_v6 = vpop.f32.mrf.mxu0  ;;  %v5830_v7 = vpop.f32.mrf.mxu1  ;;  %v6577_v12 = vadd.f32 %v6426_v61, %v5827_v63  ;;  %v2584_v61 = vld [vmem:[%s11016_s7 + $0x248] sm:$0xff]  ;;  %v7227_v52 = vcombine.low %v2615_v33, %v2631_v34  ;;  %v7196_v54 = vcombine.high %v2583_v46, %v2599_v47  ;;  %v7195_v29 = vcombine.low %v2583_v46, %v2599_v47  ;;  %v2519_v63 = vld [vmem:[%s11016_s7 + $0x40] sm:$0xff] }
 0x365   :  { %v6576_v13 = vadd.f32 %v6422_v56, %v5788_v0  ;;  %v6578_v16 = vadd.f32 %v6430_v22, %v5829_v1  ;;  %6082 = vmatpush1.bf16.msra.mxu0 %v7323_v57  ;;  %v7198_v55 = vcombine.high %v2584_v61, %v2600_v3  ;;  %v2567_v56 = vld [vmem:[%s11016_s7 + $0x1c0] sm:$0xff]  ;;  %v2552_v57 = vld [vmem:[%s11016_s7 + $0x148] sm:$0xff]  ;;  %v7197_v59 = vcombine.low %v2584_v61, %v2600_v3 }
 0x366   :  { %6123 = vmatpush1.bf16.msra.mxu1 %v7325_v35  ;;  %v5790_v18 = vpop.f32.mrf.mxu0  ;;  %v5831_v19 = vpop.f32.mrf.mxu1  ;;  %6083 = vmatprep.subr.bf16.mxu0 %v7292_v14  ;;  %v2568_v58 = vld [vmem:[%s11016_s7 + $0x1c8] sm:$0xff]  ;;  %v7164_v60 = vcombine.high %v2551_v50, %v2567_v56  ;;  %v2535_v22 = vld [vmem:[%s11016_s7 + $0xc0] sm:$0xff]  ;;  %v7163_v35 = vcombine.low %v2551_v50, %v2567_v56 }
 0x367   :  { %v6639_v30 = vcombine.low %v6575_v11, %v6576_v13  ;;  %v6640_v31 = vcombine.low %v6577_v12, %v6578_v16  ;;  %6124 = vmatprep.subr.bf16.mxu1 %v7294_v2  ;;  %v7166_v62 = vcombine.high %v2552_v57, %v2568_v58  ;;  %v2520_v51 = vld [vmem:[%s11016_s7 + $0x48] sm:$0xff]  ;;  %v7165_v14 = vcombine.low %v2552_v57, %v2568_v58  ;;  %v2999_v2 = vld [vmem:[%s11016_s7 + $0xf40] sm:$0xff] }
 0x368   :  { %v2536_v23 = vld [vmem:[%s11016_s7 + $0xc8] sm:$0xff]  ;;  %v7132_v0 = vcombine.high %v2519_v63, %v2535_v22  ;;  %v3015_v4 = vld [vmem:[%s11016_s7 + $0xfc0] sm:$0xff]  ;;  %v7131_v7 = vcombine.low %v2519_v63, %v2535_v22 }
 0x369   :  { %v6647_v41 = vrot.slane %v6639_v30, %v8301_v49  ;;  %v6654_v42 = vrot.slane %v6640_v31, %v8301_v49  ;;  %6084 = vmatpush1.bf16.msra.mxu0 %v7291_v8  ;;  %v7134_v1 = vcombine.high %v2520_v51, %v2536_v23  ;;  %v3016_v6 = vld [vmem:[%s11016_s7 + $0xfc8] sm:$0xff]  ;;  %v7133_v8 = vcombine.low %v2520_v51, %v2536_v23  ;;  %v2967_v11 = vld [vmem:[%s11016_s7 + $0xe40] sm:$0xff] }
 0x36a   :  { %6125 = vmatpush1.bf16.msra.mxu1 %v7293_v21  ;;  %6085 = vmatprep.subr.bf16.mxu0 %v7260_v27  ;;  %v7612_v9 = vcombine.high %v2999_v2, %v3015_v4  ;;  %v7614_v10 = vcombine.high %v3000_v5, %v3016_v6  ;;  %v2983_v12 = vld [vmem:[%s11016_s7 + $0xec0] sm:$0xff]  ;;  %v2968_v13 = vld [vmem:[%s11016_s7 + $0xe48] sm:$0xff]  ;;  %v7611_v18 = vcombine.low %v2999_v2, %v3015_v4 }
 0x36b   :  { %v6655_v44 = vcombine.low %v6647_v41, %v6654_v42  ;;  %6126 = vmatprep.subr.bf16.mxu1 %v7262_v32  ;;  %v2984_v16 = vld [vmem:[%s11016_s7 + $0xec8] sm:$0xff]  ;;  %v7613_v19 = vcombine.low %v3000_v5, %v3016_v6  ;;  %v7580_v21 = vcombine.high %v2967_v11, %v2983_v12  ;;  %v2935_v30 = vld [vmem:[%s11016_s7 + $0xd40] sm:$0xff]  ;;  %v7579_v34 = vcombine.low %v2967_v11, %v2983_v12 }
 0x36c   :  { %v7582_v27 = vcombine.high %v2968_v13, %v2984_v16  ;;  %v2951_v31 = vld [vmem:[%s11016_s7 + $0xdc0] sm:$0xff]  ;;  %v2936_v32 = vld [vmem:[%s11016_s7 + $0xd48] sm:$0xff]  ;;  %v7581_v38 = vcombine.low %v2968_v13, %v2984_v16  ;;  %v2745_v13 = vld [vmem:[%s11016_s7 + $0x750] sm:$0xff] }
 0x36d   :  { %6783 = vst [vmem:[%s11021_s10] sm:$0xff] %v6655_v44  ;;  %6086 = vmatpush1.bf16.msra.mxu0 %v7259_v25  ;;  %v2952_v33 = vld [vmem:[%s11016_s7 + $0xdc8] sm:$0xff]  ;;  %v7548_v15 = vcombine.high %v2935_v30, %v2951_v31  ;;  %v2903_v42 = vld [vmem:[%s11016_s7 + $0xc40] sm:$0xff]  ;;  %v7547_v44 = vcombine.low %v2935_v30, %v2951_v31  ;;  %v2761_v16 = vld [vmem:[%s11016_s7 + $0x7d0] sm:$0xff]  ;;  %v10288_v30 = vsub.s32 6, %v8283_v43 }
 0x36e   :  { %6127 = vmatpush1.bf16.msra.mxu1 %v7261_v24  ;;  %6087 = vmatprep.subr.bf16.mxu0 %v7228_v26  ;;  %v7550_v41 = vcombine.high %v2936_v32, %v2952_v33  ;;  %v2919_v25 = vld [vmem:[%s11016_s7 + $0xcc0] sm:$0xff]  ;;  %v2904_v24 = vld [vmem:[%s11016_s7 + $0xc48] sm:$0xff] }
 0x36f   :  { %6128 = vmatprep.subr.bf16.mxu1 %v7230_v45  ;;  %v2920_v26 = vld [vmem:[%s11016_s7 + $0xcc8] sm:$0xff]  ;;  %v7549_v45 = vcombine.low %v2936_v32, %v2952_v33  ;;  %v7516_v46 = vcombine.high %v2903_v42, %v2919_v25  ;;  %v2871_v61 = vld [vmem:[%s11016_s7 + $0xb40] sm:$0xff]  ;;  %v7360_v32 = vcombine.high %v2745_v13, %v2761_v16 }
 0x370   :  { %v7518_v47 = vcombine.high %v2904_v24, %v2920_v26  ;;  %v2887_v3 = vld [vmem:[%s11016_s7 + $0xbc0] sm:$0xff] }
 0x371   :  { %6088 = vmatpush1.bf16.msra.mxu0 %v7227_v52  ;;  %v2872_v52 = vld [vmem:[%s11016_s7 + $0xb48] sm:$0xff]  ;;  %v7484_v50 = vcombine.high %v2871_v61, %v2887_v3  ;;  %v2839_v57 = vld [vmem:[%s11016_s7 + $0xa40] sm:$0xff] }
 0x372   :  { %6129 = vmatpush1.bf16.msra.mxu1 %v7229_v37  ;;  %6089 = vmatprep.subr.bf16.mxu0 %v7196_v54  ;;  %v2888_v37 = vld [vmem:[%s11016_s7 + $0xbc8] sm:$0xff]  ;;  %v7515_v54 = vcombine.low %v2903_v42, %v2919_v25  ;;  %v2855_v58 = vld [vmem:[%s11016_s7 + $0xac0] sm:$0xff]  ;;  %v3058_v42 = vrot.slane %v10060_v39, %v10288_v30  ;;  %v7359_v25 = vcombine.low %v2745_v13, %v2761_v16 }
 0x373   :  { %6130 = vmatprep.subr.bf16.mxu1 %v7198_v55  ;;  %v7517_v55 = vcombine.low %v2904_v24, %v2920_v26  ;;  %v7486_v56 = vcombine.high %v2872_v52, %v2888_v37  ;;  %v7452_v63 = vcombine.high %v2839_v57, %v2855_v58  ;;  %v2807_v51 = vld [vmem:[%s11016_s7 + $0x940] sm:$0xff]  ;;  %v2729_v24 = vld [vmem:[%s11016_s7 + $0x6d0] sm:$0xff]  ;;  %v2730_v26 = vld [vmem:[%s11016_s7 + $0x6d8] sm:$0xff] }
 0x374   :  { %v2823_v23 = vld [vmem:[%s11016_s7 + $0x9c0] sm:$0xff] }
 0x375   :  { %6090 = vmatpush1.bf16.msra.mxu0 %v7195_v29  ;;  %v2840_v29 = vld [vmem:[%s11016_s7 + $0xa48] sm:$0xff]  ;;  %v7420_v2 = vcombine.high %v2807_v51, %v2823_v23  ;;  %v2775_v5 = vld [vmem:[%s11016_s7 + $0x840] sm:$0xff] }
 0x376   :  { %6131 = vmatpush1.bf16.msra.mxu1 %v7197_v59  ;;  %6091 = vmatprep.subr.bf16.mxu0 %v7164_v60  ;;  %v2856_v59 = vld [vmem:[%s11016_s7 + $0xac8] sm:$0xff]  ;;  %v7483_v60 = vcombine.low %v2871_v61, %v2887_v3  ;;  %v2791_v6 = vld [vmem:[%s11016_s7 + $0x8c0] sm:$0xff] }
 0x377   :  { %6132 = vmatprep.subr.bf16.mxu1 %v7166_v62  ;;  %v7485_v62 = vcombine.low %v2872_v52, %v2888_v37  ;;  %v7454_v22 = vcombine.high %v2840_v29, %v2856_v59  ;;  %v7388_v11 = vcombine.high %v2775_v5, %v2791_v6  ;;  %v2697_v52 = vld [vmem:[%s11016_s7 + $0x5d0] sm:$0xff]  ;;  %v2682_v37 = vld [vmem:[%s11016_s7 + $0x558] sm:$0xff] }
 0x379   :  { %6092 = vmatpush1.bf16.msra.mxu0 %v7163_v35  ;;  %v2808_v35 = vld [vmem:[%s11016_s7 + $0x948] sm:$0xff] }
 0x37a   :  { %6133 = vmatpush1.bf16.msra.mxu1 %v7165_v14  ;;  %6093 = vmatprep.subr.bf16.mxu0 %v7132_v0  ;;  %v2824_v14 = vld [vmem:[%s11016_s7 + $0x9c8] sm:$0xff]  ;;  %v7451_v0 = vcombine.low %v2839_v57, %v2855_v58 }
 0x37b   :  { %6134 = vmatprep.subr.bf16.mxu1 %v7134_v1  ;;  %v7453_v1 = vcombine.low %v2840_v29, %v2856_v59  ;;  %v7422_v4 = vcombine.high %v2808_v35, %v2824_v14 }
 0x37d   :  { %6094 = vmatpush1.bf16.msra.mxu0 %v7131_v7  ;;  %v2776_v7 = vld [vmem:[%s11016_s7 + $0x848] sm:$0xff] }
 0x37e   :  { %6135 = vmatpush1.bf16.msra.mxu1 %v7133_v8  ;;  %6095 = vmatprep.subr.bf16.mxu0 %v7612_v9  ;;  %v2792_v8 = vld [vmem:[%s11016_s7 + $0x8c8] sm:$0xff]  ;;  %v7419_v9 = vcombine.low %v2807_v51, %v2823_v23 }
 0x37f   :  { %6136 = vmatprep.subr.bf16.mxu1 %v7614_v10  ;;  %v7421_v10 = vcombine.low %v2808_v35, %v2824_v14  ;;  %v7390_v12 = vcombine.high %v2776_v7, %v2792_v8  ;;  %v7389_v31 = vcombine.low %v2776_v7, %v2792_v8  ;;  %v2666_v7 = vld [vmem:[%s11016_s7 + $0x4d8] sm:$0xff] }
 0x381   :  { %6096 = vmatpush2.bf16.msra.mxu0 %v7611_v18  ;;  %v2746_v18 = vld [vmem:[%s11016_s7 + $0x758] sm:$0xff] }
 0x382   :  { %6137 = vmatpush2.bf16.msra.mxu1 %v7613_v19  ;;  %6097 = vmatprep.subr.bf16.mxu0 %v7580_v21  ;;  %v2762_v19 = vld [vmem:[%s11016_s7 + $0x7d8] sm:$0xff]  ;;  %v7387_v21 = vcombine.low %v2775_v5, %v2791_v6 }
 0x383   :  { %6138 = vmatprep.subr.bf16.mxu1 %v7582_v27  ;;  %v10285_v27 = vsub.s32 4, %v8283_v43  ;;  %v7362_v33 = vcombine.high %v2746_v18, %v2762_v19  ;;  %v2650_v6 = vld [vmem:[%s11016_s7 + $0x458] sm:$0xff] }
 0x385   :  { %6098 = vmatpush2.bf16.msra.mxu0 %v7579_v34  ;;  %v10291_v34 = vsub.s32 5, %v8283_v43 }
 0x386   :  { %6139 = vmatpush2.bf16.msra.mxu1 %v7581_v38  ;;  %6099 = vmatprep.subr.bf16.mxu0 %v7548_v15  ;;  %v10294_v38 = vsub.s32 7, %v8283_v43  ;;  %v2713_v15 = vld [vmem:[%s11016_s7 + $0x650] sm:$0xff]  ;;  %v2714_v43 = vld [vmem:[%s11016_s7 + $0x658] sm:$0xff] }
 0x387   :  { %6140 = vmatprep.subr.bf16.mxu1 %v7550_v41  ;;  %v3050_v41 = vrot.slane %v10060_v39, %v10285_v27  ;;  %v3054_v61 = vrot.slane %v10060_v39, %v10291_v34  ;;  %v7328_v57 = vcombine.high %v2713_v15, %v2729_v24  ;;  %v7330_v58 = vcombine.high %v2714_v43, %v2730_v26 }
 0x388   :  { %v3062_v3 = vrot.slane %v10060_v39, %v10294_v38  ;;  %v6446_v39 = vrot.slane %v10065_v40, %v10294_v38 }
 0x389   :  { %6100 = vmatpush2.bf16.msra.mxu0 %v7547_v44  ;;  %v7361_v44 = vcombine.low %v2746_v18, %v2762_v19 }
 0x38a   :  { %6141 = vmatpush2.bf16.msra.mxu1 %v7549_v45  ;;  %6101 = vmatprep.subr.bf16.mxu0 %v7516_v46  ;;  %v2681_v45 = vld [vmem:[%s11016_s7 + $0x550] sm:$0xff]  ;;  %v6434_v46 = vrot.slane %v10065_v40, %v10285_v27 }
 0x38b   :  { %6142 = vmatprep.subr.bf16.mxu1 %v7518_v47  ;;  %v6442_v47 = vrot.slane %v10065_v40, %v10288_v30  ;;  %v7296_v51 = vcombine.high %v2681_v45, %v2697_v52 }
 0x38d   :  { %6102 = vmatpush2.bf16.msra.mxu0 %v7515_v54  ;;  %v2698_v54 = vld [vmem:[%s11016_s7 + $0x5d8] sm:$0xff] }
 0x38e   :  { %6143 = vmatpush2.bf16.msra.mxu1 %v7517_v55  ;;  %6103 = vmatprep.subr.bf16.mxu0 %v7484_v50  ;;  %v7298_v23 = vcombine.high %v2682_v37, %v2698_v54  ;;  %v7297_v13 = vcombine.low %v2682_v37, %v2698_v54 }
 0x38f   :  { %6144 = vmatprep.subr.bf16.mxu1 %v7486_v56  ;;  %v6438_v56 = vrot.slane %v10065_v40, %v10291_v34 }
 0x391   :  { %6104 = vmatpush2.bf16.msra.mxu0 %v7483_v60  ;;  %v7327_v60 = vcombine.low %v2713_v15, %v2729_v24  ;;  %v2634_v15 = vld [vmem:[%s11016_s7 + $0x3d8] sm:$0xff]  ;;  %v7265_v24 = vcombine.low %v2650_v6, %v2666_v7 }
 0x392   :  { %6145 = vmatpush2.bf16.msra.mxu1 %v7485_v62  ;;  %6105 = vmatprep.subr.bf16.mxu0 %v7452_v63 }
 0x393   :  { %6146 = vmatprep.subr.bf16.mxu1 %v7454_v22  ;;  %v7329_v22 = vcombine.low %v2714_v43, %v2730_v26 }
 0x395   :  { %6106 = vmatpush2.bf16.msra.mxu0 %v7451_v0 }
 0x396   :  { %6147 = vmatpush2.bf16.msra.mxu1 %v7453_v1  ;;  %6107 = vmatprep.subr.bf16.mxu0 %v7420_v2  ;;  %v2649_v1 = vld [vmem:[%s11016_s7 + $0x450] sm:$0xff] }
 0x397   :  { %6148 = vmatprep.subr.bf16.mxu1 %v7422_v4  ;;  %v2665_v2 = vld [vmem:[%s11016_s7 + $0x4d0] sm:$0xff] }
 0x398   :  { %v7264_v16 = vcombine.high %v2649_v1, %v2665_v2 }
 0x399   :  { %6108 = vmatpush2.bf16.msra.mxu0 %v7419_v9 }
 0x39a   :  { %6149 = vmatpush2.bf16.msra.mxu1 %v7421_v10  ;;  %6109 = vmatprep.subr.bf16.mxu0 %v7388_v11  ;;  %v7295_v10 = vcombine.low %v2681_v45, %v2697_v52  ;;  %v2585_v45 = vld [vmem:[%s11016_s7 + $0x250] sm:$0xff] }
 0x39b   :  { %6150 = vmatprep.subr.bf16.mxu1 %v7390_v12 }
 0x39d   :  { %6110 = vmatpush2.bf16.msra.mxu0 %v7387_v21  ;;  %v7266_v21 = vcombine.high %v2650_v6, %v2666_v7 }
 0x39e   :  { %6151 = vmatpush2.bf16.msra.mxu1 %v7389_v31  ;;  %6161 = vmatprep.subr.bf16.mxu0 %v7360_v32  ;;  %v2617_v31 = vld [vmem:[%s11016_s7 + $0x350] sm:$0xff] }
 0x39f   :  { %6202 = vmatprep.subr.bf16.mxu1 %v7362_v33  ;;  %v2633_v32 = vld [vmem:[%s11016_s7 + $0x3d0] sm:$0xff]  ;;  %v2618_v33 = vld [vmem:[%s11016_s7 + $0x358] sm:$0xff] }
 0x3a0   :  { %v5867_v55 = vpop.f32.mrf.mxu0  ;;  %v5908_v50 = vpop.f32.mrf.mxu1  ;;  %6112 = vmatmul.mubr.bf16.vlgmr.msra.gmra.mxu0 %v9477_v36  ;;  %v7232_v43 = vcombine.high %v2617_v31, %v2633_v32  ;;  %v7233_v52 = vcombine.low %v2618_v33, %v2634_v15 }
 0x3a1   :  { %v5868_v29 = vadd.f32 %v5867_v55, %v3050_v41  ;;  %v5909_v59 = vadd.f32 %v5908_v50, %v3058_v42  ;;  %6153 = vmatmul.mubr.bf16.vlgmr.msra.gmra.mxu1 %v9477_v36  ;;  %6162 = vmatpush1.bf16.msra.mxu0 %v7359_v25  ;;  %v7263_v25 = vcombine.low %v2649_v1, %v2665_v2  ;;  %v2553_v55 = vld [vmem:[%s11016_s7 + $0x150] sm:$0xff]  ;;  %v3002_v1 = vld [vmem:[%s11016_s7 + $0xf58] sm:$0xff] }
 0x3a2   :  { %6193 = vmatprep.mubr.bf16.mxu0 %v9475_v28  ;;  %6203 = vmatpush1.bf16.msra.mxu1 %v7361_v44  ;;  %v5869_v62 = vpop.f32.mrf.mxu0  ;;  %v5910_v63 = vpop.f32.mrf.mxu1  ;;  %v7234_v44 = vcombine.high %v2618_v33, %v2634_v15  ;;  %v2569_v50 = vld [vmem:[%s11016_s7 + $0x1d0] sm:$0xff]  ;;  %v3018_v2 = vld [vmem:[%s11016_s7 + $0xfd8] sm:$0xff] }
 0x3a3   :  { %v6579_v35 = vadd.f32 %v6434_v46, %v5868_v29  ;;  %v6581_v14 = vadd.f32 %v6442_v47, %v5909_v59  ;;  %6234 = vmatprep.mubr.bf16.mxu1 %v9475_v28  ;;  %v5870_v40 = vadd.f32 %v5869_v62, %v3054_v61  ;;  %v5911_v0 = vadd.f32 %v5910_v63, %v3062_v3  ;;  %v2601_v46 = vld [vmem:[%s11016_s7 + $0x2d0] sm:$0xff]  ;;  %v2586_v47 = vld [vmem:[%s11016_s7 + $0x258] sm:$0xff] }
 0x3a4   :  { %v5871_v4 = vpop.f32.mrf.mxu0  ;;  %v5912_v5 = vpop.f32.mrf.mxu1  ;;  %6163 = vmatprep.subr.bf16.mxu0 %v7328_v57  ;;  %6204 = vmatprep.subr.bf16.mxu1 %v7330_v58  ;;  %v2602_v61 = vld [vmem:[%s11016_s7 + $0x2d8] sm:$0xff]  ;;  %v7231_v3 = vcombine.low %v2617_v31, %v2633_v32  ;;  %v7200_v37 = vcombine.high %v2585_v45, %v2601_v46  ;;  %v7199_v57 = vcombine.low %v2585_v45, %v2601_v46  ;;  %v2537_v62 = vld [vmem:[%s11016_s7 + $0xd0] sm:$0xff] }
 0x3a5   :  { %v6580_v8 = vadd.f32 %v6438_v56, %v5870_v40  ;;  %v6582_v9 = vadd.f32 %v6446_v39, %v5911_v0  ;;  %6164 = vmatpush1.bf16.msra.mxu0 %v7327_v60  ;;  %v7202_v54 = vcombine.high %v2586_v47, %v2602_v61  ;;  %v2554_v56 = vld [vmem:[%s11016_s7 + $0x158] sm:$0xff]  ;;  %v7201_v58 = vcombine.low %v2586_v47, %v2602_v61  ;;  %v2521_v60 = vld [vmem:[%s11016_s7 + $0x50] sm:$0xff] }
 0x3a6   :  { %6205 = vmatpush1.bf16.msra.mxu1 %v7329_v22  ;;  %v5872_v11 = vpop.f32.mrf.mxu0  ;;  %v5913_v12 = vpop.f32.mrf.mxu1  ;;  %6165 = vmatprep.subr.bf16.mxu0 %v7296_v51  ;;  %v2570_v39 = vld [vmem:[%s11016_s7 + $0x1d8] sm:$0xff]  ;;  %v7168_v29 = vcombine.high %v2553_v55, %v2569_v50  ;;  %v7167_v51 = vcombine.low %v2553_v55, %v2569_v50  ;;  %v3001_v40 = vld [vmem:[%s11016_s7 + $0xf50] sm:$0xff]  ;;  %v7135_v4 = vcombine.low %v2521_v60, %v2537_v62 }
 0x3a7   :  { %v6656_v18 = vcombine.low %v6579_v35, %v6580_v8  ;;  %v6657_v19 = vcombine.low %v6581_v14, %v6582_v9  ;;  %6206 = vmatprep.subr.bf16.mxu1 %v7298_v23  ;;  %v7170_v59 = vcombine.high %v2554_v56, %v2570_v39  ;;  %v2522_v63 = vld [vmem:[%s11016_s7 + $0x58] sm:$0xff]  ;;  %v7169_v23 = vcombine.low %v2554_v56, %v2570_v39  ;;  %v3017_v0 = vld [vmem:[%s11016_s7 + $0xfd0] sm:$0xff] }
 0x3a8   :  { %v2538_v22 = vld [vmem:[%s11016_s7 + $0xd8] sm:$0xff]  ;;  %v7136_v35 = vcombine.high %v2521_v60, %v2537_v62  ;;  %v7616_v6 = vcombine.high %v3001_v40, %v3017_v0  ;;  %v7618_v7 = vcombine.high %v3002_v1, %v3018_v2  ;;  %v2969_v8 = vld [vmem:[%s11016_s7 + $0xe50] sm:$0xff]  ;;  %v7615_v12 = vcombine.low %v3001_v40, %v3017_v0 }
 0x3a9   :  { %v6664_v41 = vrot.slane %v6656_v18, %v8301_v49  ;;  %v6671_v42 = vrot.slane %v6657_v19, %v8301_v49  ;;  %6166 = vmatpush1.bf16.msra.mxu0 %v7295_v10  ;;  %v7138_v14 = vcombine.high %v2522_v63, %v2538_v22  ;;  %v7137_v5 = vcombine.low %v2522_v63, %v2538_v22  ;;  %v2985_v9 = vld [vmem:[%s11016_s7 + $0xed0] sm:$0xff]  ;;  %v2970_v10 = vld [vmem:[%s11016_s7 + $0xe58] sm:$0xff] }
 0x3aa   :  { %6207 = vmatpush1.bf16.msra.mxu1 %v7297_v13  ;;  %6167 = vmatprep.subr.bf16.mxu0 %v7264_v16  ;;  %v2986_v11 = vld [vmem:[%s11016_s7 + $0xed8] sm:$0xff]  ;;  %v7617_v13 = vcombine.low %v3002_v1, %v3018_v2  ;;  %v7584_v16 = vcombine.high %v2969_v8, %v2985_v9  ;;  %v2937_v19 = vld [vmem:[%s11016_s7 + $0xd50] sm:$0xff]  ;;  %v7583_v33 = vcombine.low %v2969_v8, %v2985_v9 }
 0x3ab   :  { %v6672_v26 = vcombine.low %v6664_v41, %v6671_v42  ;;  %6208 = vmatprep.subr.bf16.mxu1 %v7266_v21  ;;  %v7586_v18 = vcombine.high %v2970_v10, %v2986_v11  ;;  %v2953_v21 = vld [vmem:[%s11016_s7 + $0xdd0] sm:$0xff]  ;;  %v2938_v31 = vld [vmem:[%s11016_s7 + $0xd58] sm:$0xff]  ;;  %v7585_v15 = vcombine.low %v2970_v10, %v2986_v11  ;;  %v2747_v11 = vld [vmem:[%s11016_s7 + $0x760] sm:$0xff] }
 0x3ac   :  { %v2954_v32 = vld [vmem:[%s11016_s7 + $0xdd8] sm:$0xff]  ;;  %v7552_v41 = vcombine.high %v2937_v19, %v2953_v21  ;;  %v2873_v61 = vld [vmem:[%s11016_s7 + $0xb50] sm:$0xff] }
 0x3ad   :  { %6784 = vst [vmem:[%s11021_s10 + $0x8] sm:$0xff] %v6672_v26  ;;  %6168 = vmatpush1.bf16.msra.mxu0 %v7263_v25  ;;  %v7554_v42 = vcombine.high %v2938_v31, %v2954_v32  ;;  %v2905_v25 = vld [vmem:[%s11016_s7 + $0xc50] sm:$0xff]  ;;  %v2922_v26 = vld [vmem:[%s11016_s7 + $0xcd8] sm:$0xff]  ;;  %v7553_v45 = vcombine.low %v2938_v31, %v2954_v32 }
 0x3ae   :  { %6209 = vmatpush1.bf16.msra.mxu1 %v7265_v24  ;;  %6169 = vmatprep.subr.bf16.mxu0 %v7232_v43  ;;  %v2921_v24 = vld [vmem:[%s11016_s7 + $0xcd0] sm:$0xff]  ;;  %v2906_v43 = vld [vmem:[%s11016_s7 + $0xc58] sm:$0xff] }
 0x3af   :  { %6210 = vmatprep.subr.bf16.mxu1 %v7234_v44  ;;  %v7551_v44 = vcombine.low %v2937_v19, %v2953_v21  ;;  %v7520_v46 = vcombine.high %v2905_v25, %v2921_v24  ;;  %v7522_v47 = vcombine.high %v2906_v43, %v2922_v26  ;;  %v7521_v55 = vcombine.low %v2906_v43, %v2922_v26  ;;  %v2841_v39 = vld [vmem:[%s11016_s7 + $0xa50] sm:$0xff]  ;;  %v10516_v21 = vld [vmem:[%s11019_s8 + $0x8] sm:$0xff] }
 0x3b0   :  { %v2809_v22 = vld [vmem:[%s11016_s7 + $0x950] sm:$0xff]  ;;  %v2732_v43 = vld [vmem:[%s11016_s7 + $0x6e8] sm:$0xff]  ;;  %v3074_v26 = vrot.slane %v10516_v21, %v9303_v17 }
 0x3b1   :  { %6170 = vmatpush1.bf16.msra.mxu0 %v7231_v3  ;;  %v2889_v3 = vld [vmem:[%s11016_s7 + $0xbd0] sm:$0xff] }
 0x3b2   :  { %6211 = vmatpush1.bf16.msra.mxu1 %v7233_v52  ;;  %6171 = vmatprep.subr.bf16.mxu0 %v7200_v37  ;;  %v2874_v52 = vld [vmem:[%s11016_s7 + $0xb58] sm:$0xff]  ;;  %v7488_v50 = vcombine.high %v2873_v61, %v2889_v3  ;;  %v2777_v2 = vld [vmem:[%s11016_s7 + $0x850] sm:$0xff] }
 0x3b3   :  { %6212 = vmatprep.subr.bf16.mxu1 %v7202_v54  ;;  %v2890_v37 = vld [vmem:[%s11016_s7 + $0xbd8] sm:$0xff]  ;;  %v7519_v54 = vcombine.low %v2905_v25, %v2921_v24  ;;  %v2716_v24 = vld [vmem:[%s11016_s7 + $0x668] sm:$0xff] }
 0x3b4   :  { %v7490_v56 = vcombine.high %v2874_v52, %v2890_v37  ;;  %v7489_v60 = vcombine.low %v2874_v52, %v2890_v37 }
 0x3b5   :  { %6172 = vmatpush1.bf16.msra.mxu0 %v7199_v57  ;;  %v2857_v57 = vld [vmem:[%s11016_s7 + $0xad0] sm:$0xff] }
 0x3b6   :  { %6213 = vmatpush1.bf16.msra.mxu1 %v7201_v58  ;;  %6173 = vmatprep.subr.bf16.mxu0 %v7168_v29  ;;  %v2842_v58 = vld [vmem:[%s11016_s7 + $0xa58] sm:$0xff]  ;;  %v7456_v62 = vcombine.high %v2841_v39, %v2857_v57 }
 0x3b7   :  { %6214 = vmatprep.subr.bf16.mxu1 %v7170_v59  ;;  %v2858_v29 = vld [vmem:[%s11016_s7 + $0xad8] sm:$0xff]  ;;  %v7487_v59 = vcombine.low %v2873_v61, %v2889_v3  ;;  %v2683_v61 = vld [vmem:[%s11016_s7 + $0x560] sm:$0xff] }
 0x3b8   :  { %v7458_v63 = vcombine.high %v2842_v58, %v2858_v29  ;;  %v7457_v40 = vcombine.low %v2842_v58, %v2858_v29  ;;  %v2699_v3 = vld [vmem:[%s11016_s7 + $0x5e0] sm:$0xff] }
 0x3b9   :  { %6174 = vmatpush1.bf16.msra.mxu0 %v7167_v51  ;;  %v2825_v51 = vld [vmem:[%s11016_s7 + $0x9d0] sm:$0xff] }
 0x3ba   :  { %6215 = vmatpush1.bf16.msra.mxu1 %v7169_v23  ;;  %6175 = vmatprep.subr.bf16.mxu0 %v7136_v35  ;;  %v2810_v23 = vld [vmem:[%s11016_s7 + $0x958] sm:$0xff]  ;;  %v7424_v0 = vcombine.high %v2809_v22, %v2825_v51 }
 0x3bb   :  { %6216 = vmatprep.subr.bf16.mxu1 %v7138_v14  ;;  %v2826_v35 = vld [vmem:[%s11016_s7 + $0x9d8] sm:$0xff]  ;;  %v7455_v14 = vcombine.low %v2841_v39, %v2857_v57  ;;  %v2700_v39 = vld [vmem:[%s11016_s7 + $0x5e8] sm:$0xff] }
 0x3bc   :  { %v7426_v1 = vcombine.high %v2810_v23, %v2826_v35  ;;  %v7425_v8 = vcombine.low %v2810_v23, %v2826_v35 }
 0x3bd   :  { %6176 = vmatpush1.bf16.msra.mxu0 %v7135_v4  ;;  %v2793_v4 = vld [vmem:[%s11016_s7 + $0x8d0] sm:$0xff] }
 0x3be   :  { %6217 = vmatpush1.bf16.msra.mxu1 %v7137_v5  ;;  %6177 = vmatprep.subr.bf16.mxu0 %v7616_v6  ;;  %v2778_v5 = vld [vmem:[%s11016_s7 + $0x858] sm:$0xff]  ;;  %v7392_v9 = vcombine.high %v2777_v2, %v2793_v4 }
 0x3bf   :  { %6218 = vmatprep.subr.bf16.mxu1 %v7618_v7  ;;  %v2794_v6 = vld [vmem:[%s11016_s7 + $0x8d8] sm:$0xff]  ;;  %v7423_v7 = vcombine.low %v2809_v22, %v2825_v51  ;;  %v7300_v22 = vcombine.high %v2683_v61, %v2699_v3 }
 0x3c0   :  { %v7394_v10 = vcombine.high %v2778_v5, %v2794_v6  ;;  %v7393_v19 = vcombine.low %v2778_v5, %v2794_v6 }
 0x3c1   :  { %6178 = vmatpush2.bf16.msra.mxu0 %v7615_v12  ;;  %v2763_v12 = vld [vmem:[%s11016_s7 + $0x7e0] sm:$0xff] }
 0x3c2   :  { %6219 = vmatpush2.bf16.msra.mxu1 %v7617_v13  ;;  %6179 = vmatprep.subr.bf16.mxu0 %v7584_v16  ;;  %v2748_v13 = vld [vmem:[%s11016_s7 + $0x768] sm:$0xff]  ;;  %v7364_v31 = vcombine.high %v2747_v11, %v2763_v12  ;;  %v7363_v25 = vcombine.low %v2747_v11, %v2763_v12 }
 0x3c3   :  { %6220 = vmatprep.subr.bf16.mxu1 %v7586_v18  ;;  %v2764_v16 = vld [vmem:[%s11016_s7 + $0x7e8] sm:$0xff]  ;;  %v7391_v18 = vcombine.low %v2777_v2, %v2793_v4 }
 0x3c4   :  { %v7366_v32 = vcombine.high %v2748_v13, %v2764_v16  ;;  %v2652_v2 = vld [vmem:[%s11016_s7 + $0x468] sm:$0xff] }
 0x3c5   :  { %6180 = vmatpush2.bf16.msra.mxu0 %v7583_v33  ;;  %v10521_v33 = vld [vmem:[%s11020_s9 + $0x8] sm:$0xff] }
 0x3c6   :  { %6221 = vmatpush2.bf16.msra.mxu1 %v7585_v15  ;;  %6181 = vmatprep.subr.bf16.mxu0 %v7552_v41  ;;  %v2715_v15 = vld [vmem:[%s11016_s7 + $0x660] sm:$0xff]  ;;  %v6458_v37 = vrot.slane %v10521_v33, %v9303_v17  ;;  %v6462_v29 = vrot.slane %v10521_v33, %v9312_v20  ;;  %v2668_v4 = vld [vmem:[%s11016_s7 + $0x4e8] sm:$0xff] }
 0x3c7   :  { %6222 = vmatprep.subr.bf16.mxu1 %v7554_v42  ;;  %v2731_v41 = vld [vmem:[%s11016_s7 + $0x6e0] sm:$0xff]  ;;  %v3066_v42 = vrot.slane %v10516_v21, %v9168_v48 }
 0x3c9   :  { %6182 = vmatpush2.bf16.msra.mxu0 %v7551_v44  ;;  %v7365_v44 = vcombine.low %v2748_v13, %v2764_v16 }
 0x3ca   :  { %6223 = vmatpush2.bf16.msra.mxu1 %v7553_v45  ;;  %6183 = vmatprep.subr.bf16.mxu0 %v7520_v46  ;;  %v6450_v45 = vrot.slane %v10521_v33, %v9168_v48  ;;  %v3070_v46 = vrot.slane %v10516_v21, %v9179_v53 }
 0x3cb   :  { %6224 = vmatprep.subr.bf16.mxu1 %v7522_v47  ;;  %v7332_v47 = vcombine.high %v2715_v15, %v2731_v41 }
 0x3cd   :  { %6184 = vmatpush2.bf16.msra.mxu0 %v7519_v54  ;;  %v6454_v54 = vrot.slane %v10521_v33, %v9179_v53 }
 0x3ce   :  { %6225 = vmatpush2.bf16.msra.mxu1 %v7521_v55  ;;  %6185 = vmatprep.subr.bf16.mxu0 %v7488_v50  ;;  %v3078_v55 = vrot.slane %v10516_v21, %v9312_v20  ;;  %v7334_v50 = vcombine.high %v2716_v24, %v2732_v43 }
 0x3cf   :  { %6226 = vmatprep.subr.bf16.mxu1 %v7490_v56  ;;  %v2684_v56 = vld [vmem:[%s11016_s7 + $0x568] sm:$0xff] }
 0x3d0   :  { %v7302_v35 = vcombine.high %v2684_v56, %v2700_v39 }
 0x3d1   :  { %6186 = vmatpush2.bf16.msra.mxu0 %v7487_v59  ;;  %v7331_v59 = vcombine.low %v2715_v15, %v2731_v41  ;;  %v2620_v41 = vld [vmem:[%s11016_s7 + $0x368] sm:$0xff] }
 0x3d2   :  { %6227 = vmatpush2.bf16.msra.mxu1 %v7489_v60  ;;  %6187 = vmatprep.subr.bf16.mxu0 %v7456_v62 }
 0x3d3   :  { %6228 = vmatprep.subr.bf16.mxu1 %v7458_v63  ;;  %v7333_v63 = vcombine.low %v2716_v24, %v2732_v43 }
 0x3d5   :  { %6188 = vmatpush2.bf16.msra.mxu0 %v7455_v14  ;;  %v2651_v14 = vld [vmem:[%s11016_s7 + $0x460] sm:$0xff] }
 0x3d6   :  { %6229 = vmatpush2.bf16.msra.mxu1 %v7457_v40  ;;  %6189 = vmatprep.subr.bf16.mxu0 %v7424_v0  ;;  %v2667_v40 = vld [vmem:[%s11016_s7 + $0x4e0] sm:$0xff] }
 0x3d7   :  { %6230 = vmatprep.subr.bf16.mxu1 %v7426_v1  ;;  %v7268_v13 = vcombine.high %v2651_v14, %v2667_v40  ;;  %v7267_v24 = vcombine.low %v2651_v14, %v2667_v40 }
 0x3d9   :  { %6190 = vmatpush2.bf16.msra.mxu0 %v7423_v7 }
 0x3da   :  { %6231 = vmatpush2.bf16.msra.mxu1 %v7425_v8  ;;  %6191 = vmatprep.subr.bf16.mxu0 %v7392_v9  ;;  %v7299_v8 = vcombine.low %v2683_v61, %v2699_v3  ;;  %v7301_v9 = vcombine.low %v2684_v56, %v2700_v39  ;;  %v2588_v3 = vld [vmem:[%s11016_s7 + $0x268] sm:$0xff]  ;;  %v2555_v56 = vld [vmem:[%s11016_s7 + $0x160] sm:$0xff] }
 0x3db   :  { %6232 = vmatprep.subr.bf16.mxu1 %v7394_v10  ;;  %v2571_v39 = vld [vmem:[%s11016_s7 + $0x1e0] sm:$0xff] }
 0x3dd   :  { %6192 = vmatpush2.bf16.msra.mxu0 %v7391_v18 }
 0x3de   :  { %6233 = vmatpush2.bf16.msra.mxu1 %v7393_v19  ;;  %6243 = vmatprep.subr.bf16.mxu0 %v7364_v31  ;;  %v7270_v19 = vcombine.high %v2652_v2, %v2668_v4  ;;  %v2619_v31 = vld [vmem:[%s11016_s7 + $0x360] sm:$0xff] }
 0x3df   :  { %6284 = vmatprep.subr.bf16.mxu1 %v7366_v32  ;;  %v2635_v32 = vld [vmem:[%s11016_s7 + $0x3e0] sm:$0xff] }
 0x3e0   :  { %v5949_v52 = vpop.f32.mrf.mxu0  ;;  %6194 = vmatmul.mubr.bf16.vlgmr.msra.gmra.mxu0 %v9477_v36 }
 0x3e1   :  { %v5950_v57 = vadd.f32 %v5949_v52, %v3066_v42  ;;  %v5990_v58 = vpop.f32.mrf.mxu1  ;;  %6235 = vmatmul.mubr.bf16.vlgmr.msra.gmra.mxu1 %v9477_v36  ;;  %6244 = vmatpush1.bf16.msra.mxu0 %v7363_v25  ;;  %v2636_v42 = vld [vmem:[%s11016_s7 + $0x3e8] sm:$0xff] }
 0x3e2   :  { %v5991_v60 = vadd.f32 %v5990_v58, %v3074_v26  ;;  %6275 = vmatprep.mubr.bf16.mxu0 %v9475_v28  ;;  %6285 = vmatpush1.bf16.msra.mxu1 %v7365_v44  ;;  %v5951_v62 = vpop.f32.mrf.mxu0  ;;  %v7269_v26 = vcombine.low %v2652_v2, %v2668_v4  ;;  %v7236_v44 = vcombine.high %v2619_v31, %v2635_v32  ;;  %v2604_v52 = vld [vmem:[%s11016_s7 + $0x2e8] sm:$0xff]  ;;  %v3019_v2 = vld [vmem:[%s11016_s7 + $0xfe0] sm:$0xff] }
 0x3e3   :  { %6316 = vmatprep.mubr.bf16.mxu1 %v9475_v28  ;;  %v5952_v51 = vadd.f32 %v5951_v62, %v3070_v46  ;;  %v5992_v23 = vpop.f32.mrf.mxu1  ;;  %6245 = vmatprep.subr.bf16.mxu0 %v7332_v47  ;;  %v6583_v5 = vadd.f32 %v6450_v45, %v5950_v57  ;;  %v7238_v45 = vcombine.high %v2620_v41, %v2636_v42  ;;  %v2587_v46 = vld [vmem:[%s11016_s7 + $0x260] sm:$0xff]  ;;  %v2556_v57 = vld [vmem:[%s11016_s7 + $0x168] sm:$0xff] }
 0x3e4   :  { %v5993_v0 = vadd.f32 %v5992_v23, %v3078_v55  ;;  %v5953_v1 = vpop.f32.mrf.mxu0  ;;  %6286 = vmatprep.subr.bf16.mxu1 %v7334_v50  ;;  %v6585_v10 = vadd.f32 %v6458_v37, %v5991_v60  ;;  %v2603_v47 = vld [vmem:[%s11016_s7 + $0x2e0] sm:$0xff]  ;;  %v7235_v37 = vcombine.low %v2619_v31, %v2635_v32  ;;  %v7206_v50 = vcombine.high %v2588_v3, %v2604_v52  ;;  %v2572_v58 = vld [vmem:[%s11016_s7 + $0x1e8] sm:$0xff] }
 0x3e5   :  { %v6584_v6 = vadd.f32 %v6454_v54, %v5952_v51  ;;  %v5994_v7 = vpop.f32.mrf.mxu1  ;;  %6246 = vmatpush1.bf16.msra.mxu0 %v7331_v59  ;;  %v7237_v54 = vcombine.low %v2620_v41, %v2636_v42  ;;  %v7204_v55 = vcombine.high %v2587_v46, %v2603_v47  ;;  %v7205_v59 = vcombine.low %v2588_v3, %v2604_v52  ;;  %v2524_v51 = vld [vmem:[%s11016_s7 + $0x68] sm:$0xff]  ;;  %v3003_v1 = vld [vmem:[%s11016_s7 + $0xf60] sm:$0xff] }
 0x3e6   :  { %v6586_v11 = vadd.f32 %v6462_v29, %v5993_v0  ;;  %6287 = vmatpush1.bf16.msra.mxu1 %v7333_v63  ;;  %v5954_v12 = vpop.f32.mrf.mxu0  ;;  %6247 = vmatprep.subr.bf16.mxu0 %v7300_v22  ;;  %v7203_v29 = vcombine.low %v2587_v46, %v2603_v47  ;;  %v7172_v60 = vcombine.high %v2555_v56, %v2571_v39  ;;  %v2523_v63 = vld [vmem:[%s11016_s7 + $0x60] sm:$0xff]  ;;  %v2540_v23 = vld [vmem:[%s11016_s7 + $0xe8] sm:$0xff] }
 0x3e7   :  { %v6673_v16 = vcombine.low %v6583_v5, %v6584_v6  ;;  %v5995_v18 = vpop.f32.mrf.mxu1  ;;  %6288 = vmatprep.subr.bf16.mxu1 %v7302_v35  ;;  %v7174_v62 = vcombine.high %v2556_v57, %v2572_v58  ;;  %v2539_v22 = vld [vmem:[%s11016_s7 + $0xe0] sm:$0xff]  ;;  %v7171_v35 = vcombine.low %v2555_v56, %v2571_v39  ;;  %v7173_v14 = vcombine.low %v2556_v57, %v2572_v58  ;;  %v3004_v4 = vld [vmem:[%s11016_s7 + $0xf68] sm:$0xff] }
 0x3e8   :  { %v6674_v15 = vcombine.low %v6585_v10, %v6586_v11  ;;  %v7140_v40 = vcombine.high %v2523_v63, %v2539_v22  ;;  %v7142_v0 = vcombine.high %v2524_v51, %v2540_v23  ;;  %v3020_v5 = vld [vmem:[%s11016_s7 + $0xfe8] sm:$0xff]  ;;  %v7139_v6 = vcombine.low %v2523_v63, %v2539_v22  ;;  %v2971_v10 = vld [vmem:[%s11016_s7 + $0xe60] sm:$0xff] }
 0x3e9   :  { %v6681_v25 = vrot.slane %v6673_v16, %v8301_v49  ;;  %6248 = vmatpush1.bf16.msra.mxu0 %v7299_v8  ;;  %v7141_v7 = vcombine.low %v2524_v51, %v2540_v23  ;;  %v7620_v8 = vcombine.high %v3003_v1, %v3019_v2  ;;  %v2987_v11 = vld [vmem:[%s11016_s7 + $0xee0] sm:$0xff]  ;;  %v2972_v12 = vld [vmem:[%s11016_s7 + $0xe68] sm:$0xff]  ;;  %v7619_v16 = vcombine.low %v3003_v1, %v3019_v2 }
 0x3ea   :  { %v6688_v43 = vrot.slane %v6674_v15, %v8301_v49  ;;  %6289 = vmatpush1.bf16.msra.mxu1 %v7301_v9  ;;  %6249 = vmatprep.subr.bf16.mxu0 %v7268_v13  ;;  %v7622_v9 = vcombine.high %v3004_v4, %v3020_v5  ;;  %v2988_v13 = vld [vmem:[%s11016_s7 + $0xee8] sm:$0xff]  ;;  %v7621_v18 = vcombine.low %v3004_v4, %v3020_v5  ;;  %v2939_v32 = vld [vmem:[%s11016_s7 + $0xd60] sm:$0xff] }
 0x3eb   :  { %6290 = vmatprep.subr.bf16.mxu1 %v7270_v19  ;;  %v7588_v19 = vcombine.high %v2971_v10, %v2987_v11  ;;  %v7590_v31 = vcombine.high %v2972_v12, %v2988_v13  ;;  %v2955_v15 = vld [vmem:[%s11016_s7 + $0xde0] sm:$0xff]  ;;  %v2940_v41 = vld [vmem:[%s11016_s7 + $0xd68] sm:$0xff] }
 0x3ec   :  { %v6689_v61 = vcombine.low %v6681_v25, %v6688_v43  ;;  %v2956_v42 = vld [vmem:[%s11016_s7 + $0xde8] sm:$0xff]  ;;  %v7587_v25 = vcombine.low %v2971_v10, %v2987_v11  ;;  %v7556_v43 = vcombine.high %v2939_v32, %v2955_v15 }
 0x3ed   :  { %6250 = vmatpush1.bf16.msra.mxu0 %v7267_v24  ;;  %v7589_v24 = vcombine.low %v2972_v12, %v2988_v13  ;;  %v2908_v46 = vld [vmem:[%s11016_s7 + $0xc68] sm:$0xff]  ;;  %v7557_v3 = vcombine.low %v2940_v41, %v2956_v42 }
 0x3ee   :  { %6785 = vst [vmem:[%s11021_s10 + $0x10] sm:$0xff] %v6689_v61  ;;  %6291 = vmatpush1.bf16.msra.mxu1 %v7269_v26  ;;  %6251 = vmatprep.subr.bf16.mxu0 %v7236_v44  ;;  %v7558_v26 = vcombine.high %v2940_v41, %v2956_v42  ;;  %v2907_v44 = vld [vmem:[%s11016_s7 + $0xc60] sm:$0xff]  ;;  %v2924_v47 = vld [vmem:[%s11016_s7 + $0xce8] sm:$0xff]  ;;  %v7555_v61 = vcombine.low %v2939_v32, %v2955_v15  ;;  %v2766_v32 = vld [vmem:[%s11016_s7 + $0x7f8] sm:$0xff] }
 0x3ef   :  { %6292 = vmatprep.subr.bf16.mxu1 %v7238_v45  ;;  %v2923_v45 = vld [vmem:[%s11016_s7 + $0xce0] sm:$0xff]  ;;  %v2892_v56 = vld [vmem:[%s11016_s7 + $0xbe8] sm:$0xff]  ;;  %v7525_v57 = vcombine.low %v2908_v46, %v2924_v47 }
 0x3f0   :  { %v7524_v52 = vcombine.high %v2907_v44, %v2923_v45  ;;  %v7523_v39 = vcombine.low %v2907_v44, %v2923_v45  ;;  %v2860_v63 = vld [vmem:[%s11016_s7 + $0xae8] sm:$0xff]  ;;  %v2718_v45 = vld [vmem:[%s11016_s7 + $0x678] sm:$0xff] }
 0x3f1   :  { %6252 = vmatpush1.bf16.msra.mxu0 %v7235_v37  ;;  %v7526_v37 = vcombine.high %v2908_v46, %v2924_v47  ;;  %v2828_v1 = vld [vmem:[%s11016_s7 + $0x9e8] sm:$0xff]  ;;  %v2734_v46 = vld [vmem:[%s11016_s7 + $0x6f8] sm:$0xff]  ;;  %v3090_v47 = vrot.slane %v10516_v21, %v10288_v30 }
 0x3f2   :  { %6293 = vmatpush1.bf16.msra.mxu1 %v7237_v54  ;;  %6253 = vmatprep.subr.bf16.mxu0 %v7204_v55  ;;  %v2875_v54 = vld [vmem:[%s11016_s7 + $0xb60] sm:$0xff]  ;;  %v2796_v10 = vld [vmem:[%s11016_s7 + $0x8e8] sm:$0xff] }
 0x3f3   :  { %6294 = vmatprep.subr.bf16.mxu1 %v7206_v50  ;;  %v2891_v55 = vld [vmem:[%s11016_s7 + $0xbe0] sm:$0xff]  ;;  %v2876_v50 = vld [vmem:[%s11016_s7 + $0xb68] sm:$0xff] }
 0x3f4   :  { %v7492_v58 = vcombine.high %v2875_v54, %v2891_v55  ;;  %v7491_v22 = vcombine.low %v2875_v54, %v2891_v55  ;;  %v7493_v51 = vcombine.low %v2876_v50, %v2892_v56  ;;  %v2685_v54 = vld [vmem:[%s11016_s7 + $0x570] sm:$0xff] }
 0x3f5   :  { %6254 = vmatpush1.bf16.msra.mxu0 %v7203_v29  ;;  %v7494_v29 = vcombine.high %v2876_v50, %v2892_v56  ;;  %v2701_v55 = vld [vmem:[%s11016_s7 + $0x5f0] sm:$0xff]  ;;  %v6474_v56 = vrot.slane %v10521_v33, %v10288_v30 }
 0x3f6   :  { %6295 = vmatpush1.bf16.msra.mxu1 %v7205_v59  ;;  %6255 = vmatprep.subr.bf16.mxu0 %v7172_v60  ;;  %v2843_v59 = vld [vmem:[%s11016_s7 + $0xa60] sm:$0xff] }
 0x3f7   :  { %6296 = vmatprep.subr.bf16.mxu1 %v7174_v62  ;;  %v2859_v60 = vld [vmem:[%s11016_s7 + $0xae0] sm:$0xff]  ;;  %v2844_v62 = vld [vmem:[%s11016_s7 + $0xa68] sm:$0xff] }
 0x3f8   :  { %v7460_v23 = vcombine.high %v2843_v59, %v2859_v60  ;;  %v7459_v2 = vcombine.low %v2843_v59, %v2859_v60  ;;  %v7461_v4 = vcombine.low %v2844_v62, %v2860_v63  ;;  %v2702_v59 = vld [vmem:[%s11016_s7 + $0x5f8] sm:$0xff] }
 0x3f9   :  { %6256 = vmatpush1.bf16.msra.mxu0 %v7171_v35  ;;  %v7462_v35 = vcombine.high %v2844_v62, %v2860_v63  ;;  %v6478_v63 = vrot.slane %v10521_v33, %v10294_v38 }
 0x3fa   :  { %6297 = vmatpush1.bf16.msra.mxu1 %v7173_v14  ;;  %6257 = vmatprep.subr.bf16.mxu0 %v7140_v40  ;;  %v2811_v14 = vld [vmem:[%s11016_s7 + $0x960] sm:$0xff] }
 0x3fb   :  { %6298 = vmatprep.subr.bf16.mxu1 %v7142_v0  ;;  %v2827_v40 = vld [vmem:[%s11016_s7 + $0x9e0] sm:$0xff]  ;;  %v2812_v0 = vld [vmem:[%s11016_s7 + $0x968] sm:$0xff] }
 0x3fc   :  { %v7428_v5 = vcombine.high %v2811_v14, %v2827_v40  ;;  %v7427_v11 = vcombine.low %v2811_v14, %v2827_v40  ;;  %v7429_v12 = vcombine.low %v2812_v0, %v2828_v1 }
 0x3fd   :  { %6258 = vmatpush1.bf16.msra.mxu0 %v7139_v6  ;;  %v7430_v6 = vcombine.high %v2812_v0, %v2828_v1 }
 0x3fe   :  { %6299 = vmatpush1.bf16.msra.mxu1 %v7141_v7  ;;  %6259 = vmatprep.subr.bf16.mxu0 %v7620_v8  ;;  %v2779_v7 = vld [vmem:[%s11016_s7 + $0x860] sm:$0xff] }
 0x3ff   :  { %6300 = vmatprep.subr.bf16.mxu1 %v7622_v9  ;;  %v2795_v8 = vld [vmem:[%s11016_s7 + $0x8e0] sm:$0xff]  ;;  %v2780_v9 = vld [vmem:[%s11016_s7 + $0x868] sm:$0xff] }
 0x400   :  { %v7396_v13 = vcombine.high %v2779_v7, %v2795_v8  ;;  %v7395_v15 = vcombine.low %v2779_v7, %v2795_v8  ;;  %v7397_v41 = vcombine.low %v2780_v9, %v2796_v10  ;;  %v2670_v7 = vld [vmem:[%s11016_s7 + $0x4f8] sm:$0xff] }
 0x401   :  { %6260 = vmatpush2.bf16.msra.mxu0 %v7619_v16  ;;  %v7398_v16 = vcombine.high %v2780_v9, %v2796_v10  ;;  %v7303_v10 = vcombine.low %v2685_v54, %v2701_v55 }
 0x402   :  { %6301 = vmatpush2.bf16.msra.mxu1 %v7621_v18  ;;  %6261 = vmatprep.subr.bf16.mxu0 %v7588_v19  ;;  %v2749_v18 = vld [vmem:[%s11016_s7 + $0x770] sm:$0xff] }
 0x403   :  { %6302 = vmatprep.subr.bf16.mxu1 %v7590_v31  ;;  %v2765_v19 = vld [vmem:[%s11016_s7 + $0x7f0] sm:$0xff]  ;;  %v2750_v31 = vld [vmem:[%s11016_s7 + $0x778] sm:$0xff] }
 0x404   :  { %v7368_v42 = vcombine.high %v2749_v18, %v2765_v19  ;;  %v7367_v44 = vcombine.low %v2749_v18, %v2765_v19 }
 0x405   :  { %6262 = vmatpush2.bf16.msra.mxu0 %v7587_v25  ;;  %v7370_v25 = vcombine.high %v2750_v31, %v2766_v32 }
 0x406   :  { %6303 = vmatpush2.bf16.msra.mxu1 %v7589_v24  ;;  %6263 = vmatprep.subr.bf16.mxu0 %v7556_v43  ;;  %v2717_v24 = vld [vmem:[%s11016_s7 + $0x670] sm:$0xff] }
 0x407   :  { %6304 = vmatprep.subr.bf16.mxu1 %v7558_v26  ;;  %v2733_v43 = vld [vmem:[%s11016_s7 + $0x6f0] sm:$0xff]  ;;  %v3082_v26 = vrot.slane %v10516_v21, %v10285_v27 }
 0x409   :  { %6264 = vmatpush2.bf16.msra.mxu0 %v7555_v61  ;;  %v7369_v61 = vcombine.low %v2750_v31, %v2766_v32  ;;  %v2621_v32 = vld [vmem:[%s11016_s7 + $0x370] sm:$0xff] }
 0x40a   :  { %6305 = vmatpush2.bf16.msra.mxu1 %v7557_v3  ;;  %6265 = vmatprep.subr.bf16.mxu0 %v7524_v52  ;;  %v6466_v3 = vrot.slane %v10521_v33, %v10285_v27  ;;  %v3086_v52 = vrot.slane %v10516_v21, %v10291_v34 }
 0x40b   :  { %6306 = vmatprep.subr.bf16.mxu1 %v7526_v37  ;;  %v7336_v37 = vcombine.high %v2717_v24, %v2733_v43 }
 0x40d   :  { %6266 = vmatpush2.bf16.msra.mxu0 %v7523_v39  ;;  %v6470_v39 = vrot.slane %v10521_v33, %v10291_v34  ;;  %v2669_v33 = vld [vmem:[%s11016_s7 + $0x4f0] sm:$0xff] }
 0x40e   :  { %6307 = vmatpush2.bf16.msra.mxu1 %v7525_v57  ;;  %6267 = vmatprep.subr.bf16.mxu0 %v7492_v58  ;;  %v3094_v57 = vrot.slane %v10516_v21, %v10294_v38  ;;  %v7338_v58 = vcombine.high %v2718_v45, %v2734_v46 }
 0x40f   :  { %6308 = vmatprep.subr.bf16.mxu1 %v7494_v29  ;;  %v2686_v29 = vld [vmem:[%s11016_s7 + $0x578] sm:$0xff] }
 0x410   :  { %v7306_v1 = vcombine.high %v2686_v29, %v2702_v59 }
 0x411   :  { %6268 = vmatpush2.bf16.msra.mxu0 %v7491_v22  ;;  %v7335_v22 = vcombine.low %v2717_v24, %v2733_v43 }
 0x412   :  { %6309 = vmatpush2.bf16.msra.mxu1 %v7493_v51  ;;  %6269 = vmatprep.subr.bf16.mxu0 %v7460_v23  ;;  %v7337_v23 = vcombine.low %v2718_v45, %v2734_v46 }
 0x413   :  { %6310 = vmatprep.subr.bf16.mxu1 %v7462_v35  ;;  %v7304_v35 = vcombine.high %v2685_v54, %v2701_v55 }
 0x415   :  { %6270 = vmatpush2.bf16.msra.mxu0 %v7459_v2  ;;  %v2653_v2 = vld [vmem:[%s11016_s7 + $0x470] sm:$0xff] }
 0x416   :  { %6311 = vmatpush2.bf16.msra.mxu1 %v7461_v4  ;;  %6271 = vmatprep.subr.bf16.mxu0 %v7428_v5  ;;  %v7271_v43 = vcombine.low %v2653_v2, %v2669_v33 }
 0x417   :  { %6312 = vmatprep.subr.bf16.mxu1 %v7430_v6 }
 0x419   :  { %6272 = vmatpush2.bf16.msra.mxu0 %v7427_v11 }
 0x41a   :  { %6313 = vmatpush2.bf16.msra.mxu1 %v7429_v12  ;;  %6273 = vmatprep.subr.bf16.mxu0 %v7396_v13  ;;  %v7305_v13 = vcombine.low %v2686_v29, %v2702_v59  ;;  %v2574_v29 = vld [vmem:[%s11016_s7 + $0x1f8] sm:$0xff] }
 0x41b   :  { %6314 = vmatprep.subr.bf16.mxu1 %v7398_v16  ;;  %v7272_v16 = vcombine.high %v2653_v2, %v2669_v33  ;;  %v3021_v2 = vld [vmem:[%s11016_s7 + $0xff0] sm:$0xff]  ;;  %v3006_v33 = vld [vmem:[%s11016_s7 + $0xf78] sm:$0xff] }
 0x41d   :  { %6274 = vmatpush2.bf16.msra.mxu0 %v7395_v15  ;;  %v2637_v15 = vld [vmem:[%s11016_s7 + $0x3f0] sm:$0xff] }
 0x41e   :  { %6315 = vmatpush2.bf16.msra.mxu1 %v7397_v41  ;;  %6325 = vmatprep.subr.bf16.mxu0 %v7368_v42  ;;  %v2622_v42 = vld [vmem:[%s11016_s7 + $0x378] sm:$0xff]  ;;  %v7240_v45 = vcombine.high %v2621_v32, %v2637_v15  ;;  %v7239_v54 = vcombine.low %v2621_v32, %v2637_v15 }
 0x41f   :  { %6366 = vmatprep.subr.bf16.mxu1 %v7370_v25  ;;  %v2638_v25 = vld [vmem:[%s11016_s7 + $0x3f8] sm:$0xff] }
 0x420   :  { %v6031_v50 = vpop.f32.mrf.mxu0  ;;  %6276 = vmatmul.mubr.bf16.vlgmr.msra.gmra.mxu0 %v9477_v36  ;;  %v7242_v46 = vcombine.high %v2622_v42, %v2638_v25  ;;  %v7241_v55 = vcombine.low %v2622_v42, %v2638_v25  ;;  %v2942_v32 = vld [vmem:[%s11016_s7 + $0xd78] sm:$0xff] }
 0x421   :  { %v6032_v60 = vadd.f32 %v6031_v50, %v3082_v26  ;;  %v6072_v62 = vpop.f32.mrf.mxu1  ;;  %6317 = vmatmul.mubr.bf16.vlgmr.msra.gmra.mxu1 %v9477_v36  ;;  %6326 = vmatpush1.bf16.msra.mxu0 %v7367_v44  ;;  %v2958_v15 = vld [vmem:[%s11016_s7 + $0xdf8] sm:$0xff] }
 0x422   :  { %v6073_v51 = vadd.f32 %v6072_v62, %v3090_v47  ;;  %6357 = vmatprep.mubr.bf16.mxu0 %v9475_v28  ;;  %6367 = vmatpush1.bf16.msra.mxu1 %v7369_v61  ;;  %v6033_v21 = vpop.f32.mrf.mxu0  ;;  %v2589_v47 = vld [vmem:[%s11016_s7 + $0x270] sm:$0xff] }
 0x423   :  { %v6587_v14 = vadd.f32 %v6466_v3, %v6032_v60  ;;  %6398 = vmatprep.mubr.bf16.mxu1 %v9475_v28  ;;  %v6034_v40 = vadd.f32 %v6033_v21, %v3086_v52  ;;  %v6074_v0 = vpop.f32.mrf.mxu1  ;;  %6327 = vmatprep.subr.bf16.mxu0 %v7336_v37  ;;  %v2654_v28 = vld [vmem:[%s11016_s7 + $0x478] sm:$0xff]  ;;  %v2605_v61 = vld [vmem:[%s11016_s7 + $0x2f0] sm:$0xff] }
 0x424   :  { %v6589_v4 = vadd.f32 %v6474_v56, %v6073_v51  ;;  %v6075_v5 = vadd.f32 %v6074_v0, %v3094_v57  ;;  %v6035_v6 = vpop.f32.mrf.mxu0  ;;  %6368 = vmatprep.subr.bf16.mxu1 %v7338_v58  ;;  %v7274_v31 = vcombine.high %v2654_v28, %v2670_v7  ;;  %v7273_v44 = vcombine.low %v2654_v28, %v2670_v7  ;;  %v2590_v52 = vld [vmem:[%s11016_s7 + $0x278] sm:$0xff]  ;;  %v2573_v57 = vld [vmem:[%s11016_s7 + $0x1f0] sm:$0xff] }
 0x425   :  { %v6588_v8 = vadd.f32 %v6470_v39, %v6034_v40  ;;  %v6076_v9 = vpop.f32.mrf.mxu1  ;;  %6328 = vmatpush1.bf16.msra.mxu0 %v7335_v22  ;;  %v2606_v37 = vld [vmem:[%s11016_s7 + $0x2f8] sm:$0xff]  ;;  %v7208_v50 = vcombine.high %v2589_v47, %v2605_v61  ;;  %v2557_v39 = vld [vmem:[%s11016_s7 + $0x170] sm:$0xff]  ;;  %v7207_v59 = vcombine.low %v2589_v47, %v2605_v61  ;;  %v7561_v47 = vcombine.low %v2942_v32, %v2958_v15 }
 0x426   :  { %v6590_v11 = vadd.f32 %v6478_v63, %v6075_v5  ;;  %6369 = vmatpush1.bf16.msra.mxu1 %v7337_v23  ;;  %v6036_v12 = vpop.f32.mrf.mxu0  ;;  %6329 = vmatprep.subr.bf16.mxu0 %v7304_v35  ;;  %v7210_v56 = vcombine.high %v2590_v52, %v2606_v37  ;;  %v2558_v58 = vld [vmem:[%s11016_s7 + $0x178] sm:$0xff]  ;;  %v7209_v60 = vcombine.low %v2590_v52, %v2606_v37  ;;  %v2525_v22 = vld [vmem:[%s11016_s7 + $0x70] sm:$0xff] }
 0x427   :  { %v6690_v18 = vcombine.low %v6587_v14, %v6588_v8  ;;  %v6077_v19 = vpop.f32.mrf.mxu1  ;;  %6370 = vmatprep.subr.bf16.mxu1 %v7306_v1  ;;  %v7176_v62 = vcombine.high %v2557_v39, %v2573_v57  ;;  %v7178_v63 = vcombine.high %v2558_v58, %v2574_v29  ;;  %v2541_v51 = vld [vmem:[%s11016_s7 + $0xf0] sm:$0xff]  ;;  %v2526_v21 = vld [vmem:[%s11016_s7 + $0x78] sm:$0xff]  ;;  %v7175_v35 = vcombine.low %v2557_v39, %v2573_v57 }
 0x428   :  { %v6691_v41 = vcombine.low %v6589_v4, %v6590_v11  ;;  %v2542_v23 = vld [vmem:[%s11016_s7 + $0xf8] sm:$0xff]  ;;  %v7177_v14 = vcombine.low %v2558_v58, %v2574_v29  ;;  %v7144_v40 = vcombine.high %v2525_v22, %v2541_v51  ;;  %v3005_v1 = vld [vmem:[%s11016_s7 + $0xf70] sm:$0xff]  ;;  %v7143_v5 = vcombine.low %v2525_v22, %v2541_v51 }
 0x429   :  { %v6698_v24 = vrot.slane %v6690_v18, %v8301_v49  ;;  %6330 = vmatpush1.bf16.msra.mxu0 %v7303_v10  ;;  %v7146_v0 = vcombine.high %v2526_v21, %v2542_v23  ;;  %v3022_v4 = vld [vmem:[%s11016_s7 + $0xff8] sm:$0xff]  ;;  %v7145_v6 = vcombine.low %v2526_v21, %v2542_v23  ;;  %v7624_v28 = vcombine.high %v3005_v1, %v3021_v2  ;;  %v2973_v8 = vld [vmem:[%s11016_s7 + $0xe70] sm:$0xff] }
 0x42a   :  { %v6705_v26 = vrot.slane %v6691_v41, %v8301_v49  ;;  %6371 = vmatpush1.bf16.msra.mxu1 %v7305_v13  ;;  %6331 = vmatprep.subr.bf16.mxu0 %v7272_v16  ;;  %v7626_v7 = vcombine.high %v3006_v33, %v3022_v4  ;;  %v2989_v9 = vld [vmem:[%s11016_s7 + $0xef0] sm:$0xff]  ;;  %v2974_v10 = vld [vmem:[%s11016_s7 + $0xe78] sm:$0xff]  ;;  %v7623_v12 = vcombine.low %v3005_v1, %v3021_v2 }
 0x42b   :  { %6372 = vmatprep.subr.bf16.mxu1 %v7274_v31  ;;  %v2990_v11 = vld [vmem:[%s11016_s7 + $0xef8] sm:$0xff]  ;;  %v7625_v13 = vcombine.low %v3006_v33, %v3022_v4  ;;  %v7592_v16 = vcombine.high %v2973_v8, %v2989_v9  ;;  %v2941_v19 = vld [vmem:[%s11016_s7 + $0xd70] sm:$0xff]  ;;  %v7591_v41 = vcombine.low %v2973_v8, %v2989_v9 }
 0x42c   :  { %v6706_v3 = vcombine.low %v6698_v24, %v6705_v26  ;;  %v7594_v18 = vcombine.high %v2974_v10, %v2990_v11  ;;  %v2957_v31 = vld [vmem:[%s11016_s7 + $0xdf0] sm:$0xff]  ;;  %v7593_v42 = vcombine.low %v2974_v10, %v2990_v11  ;;  %v7562_v24 = vcombine.high %v2942_v32, %v2958_v15 }
 0x42d   :  { %6332 = vmatpush1.bf16.msra.mxu0 %v7271_v43  ;;  %v7560_v25 = vcombine.high %v2941_v19, %v2957_v31  ;;  %v2909_v43 = vld [vmem:[%s11016_s7 + $0xc70] sm:$0xff] }
 0x42e   :  { %6786 = vst [vmem:[%s11021_s10 + $0x18] sm:$0xff] %v6706_v3  ;;  %6373 = vmatpush1.bf16.msra.mxu1 %v7273_v44  ;;  %6333 = vmatprep.subr.bf16.mxu0 %v7240_v45  ;;  %v2925_v26 = vld [vmem:[%s11016_s7 + $0xcf0] sm:$0xff]  ;;  %v2910_v44 = vld [vmem:[%s11016_s7 + $0xc78] sm:$0xff] }
 0x42f   :  { %6374 = vmatprep.subr.bf16.mxu1 %v7242_v46  ;;  %v2926_v45 = vld [vmem:[%s11016_s7 + $0xcf8] sm:$0xff]  ;;  %v7559_v46 = vcombine.low %v2941_v19, %v2957_v31  ;;  %v7528_v61 = vcombine.high %v2909_v43, %v2925_v26  ;;  %v2877_v52 = vld [vmem:[%s11016_s7 + $0xb70] sm:$0xff] }
 0x430   :  { %v7530_v3 = vcombine.high %v2910_v44, %v2926_v45  ;;  %v2893_v37 = vld [vmem:[%s11016_s7 + $0xbf0] sm:$0xff] }
 0x431   :  { %6334 = vmatpush1.bf16.msra.mxu0 %v7239_v54  ;;  %v2878_v54 = vld [vmem:[%s11016_s7 + $0xb78] sm:$0xff]  ;;  %v7496_v39 = vcombine.high %v2877_v52, %v2893_v37  ;;  %v2845_v58 = vld [vmem:[%s11016_s7 + $0xa70] sm:$0xff] }
 0x432   :  { %6375 = vmatpush1.bf16.msra.mxu1 %v7241_v55  ;;  %6335 = vmatprep.subr.bf16.mxu0 %v7208_v50  ;;  %v2894_v55 = vld [vmem:[%s11016_s7 + $0xbf8] sm:$0xff]  ;;  %v7527_v50 = vcombine.low %v2909_v43, %v2925_v26  ;;  %v2861_v29 = vld [vmem:[%s11016_s7 + $0xaf0] sm:$0xff] }
 0x433   :  { %6376 = vmatprep.subr.bf16.mxu1 %v7210_v56  ;;  %v7529_v56 = vcombine.low %v2910_v44, %v2926_v45  ;;  %v7498_v57 = vcombine.high %v2878_v54, %v2894_v55  ;;  %v7464_v22 = vcombine.high %v2845_v58, %v2861_v29  ;;  %v2813_v21 = vld [vmem:[%s11016_s7 + $0x970] sm:$0xff] }
 0x434   :  { %v2829_v23 = vld [vmem:[%s11016_s7 + $0x9f0] sm:$0xff] }
 0x435   :  { %6336 = vmatpush1.bf16.msra.mxu0 %v7207_v59  ;;  %v2846_v59 = vld [vmem:[%s11016_s7 + $0xa78] sm:$0xff]  ;;  %v7432_v1 = vcombine.high %v2813_v21, %v2829_v23  ;;  %v2781_v33 = vld [vmem:[%s11016_s7 + $0x870] sm:$0xff] }
 0x436   :  { %6377 = vmatpush1.bf16.msra.mxu1 %v7209_v60  ;;  %6337 = vmatprep.subr.bf16.mxu0 %v7176_v62  ;;  %v2862_v60 = vld [vmem:[%s11016_s7 + $0xaf8] sm:$0xff]  ;;  %v7495_v62 = vcombine.low %v2877_v52, %v2893_v37  ;;  %v2797_v4 = vld [vmem:[%s11016_s7 + $0x8f0] sm:$0xff] }
 0x437   :  { %6378 = vmatprep.subr.bf16.mxu1 %v7178_v63  ;;  %v7497_v63 = vcombine.low %v2878_v54, %v2894_v55  ;;  %v7466_v51 = vcombine.high %v2846_v59, %v2862_v60  ;;  %v7400_v8 = vcombine.high %v2781_v33, %v2797_v4  ;;  %v7399_v10 = vcombine.low %v2781_v33, %v2797_v4 }
 0x439   :  { %6338 = vmatpush1.bf16.msra.mxu0 %v7175_v35  ;;  %v2814_v35 = vld [vmem:[%s11016_s7 + $0x978] sm:$0xff] }
 0x43a   :  { %6379 = vmatpush1.bf16.msra.mxu1 %v7177_v14  ;;  %6339 = vmatprep.subr.bf16.mxu0 %v7144_v40  ;;  %v2830_v14 = vld [vmem:[%s11016_s7 + $0x9f8] sm:$0xff]  ;;  %v7463_v40 = vcombine.low %v2845_v58, %v2861_v29 }
 0x43b   :  { %6380 = vmatprep.subr.bf16.mxu1 %v7146_v0  ;;  %v7465_v0 = vcombine.low %v2846_v59, %v2862_v60  ;;  %v7434_v2 = vcombine.high %v2814_v35, %v2830_v14 }
 0x43d   :  { %6340 = vmatpush1.bf16.msra.mxu0 %v7143_v5  ;;  %v2782_v5 = vld [vmem:[%s11016_s7 + $0x878] sm:$0xff] }
 0x43e   :  { %6381 = vmatpush1.bf16.msra.mxu1 %v7145_v6  ;;  %6341 = vmatprep.subr.bf16.mxu0 %v7624_v28  ;;  %v2798_v6 = vld [vmem:[%s11016_s7 + $0x8f8] sm:$0xff]  ;;  %v7431_v28 = vcombine.low %v2813_v21, %v2829_v23 }
 0x43f   :  { %6382 = vmatprep.subr.bf16.mxu1 %v7626_v7  ;;  %v7433_v7 = vcombine.low %v2814_v35, %v2830_v14  ;;  %v7402_v9 = vcombine.high %v2782_v5, %v2798_v6  ;;  %v7401_v11 = vcombine.low %v2782_v5, %v2798_v6 }
 0x441   :  { %6342 = vmatpush2.bf16.msra.mxu0 %v7623_v12  ;;  %v3025_v12 = vld [vmem:[%s11019_s8 + $0x10] sm:$0xff] }
 0x442   :  { %6383 = vmatpush2.bf16.msra.mxu1 %v7625_v13  ;;  %6343 = vmatprep.subr.bf16.mxu0 %v7592_v16  ;;  %v3098_v13 = vrot.slane %v3025_v12, %v9168_v48  ;;  %v6409_v16 = vld [vmem:[%s11020_s9 + $0x10] sm:$0xff]  ;;  %v3102_v19 = vrot.slane %v3025_v12, %v9179_v53  ;;  %v3110_v32 = vrot.slane %v3025_v12, %v9312_v20 }
 0x443   :  { %6384 = vmatprep.subr.bf16.mxu1 %v7594_v18  ;;  %v3106_v18 = vrot.slane %v3025_v12, %v9303_v17  ;;  %v6490_v43 = vrot.slane %v6409_v16, %v9303_v17  ;;  %v6494_v44 = vrot.slane %v6409_v16, %v9312_v20  ;;  %v3114_v59 = vrot.slane %v3025_v12, %v10285_v27 }
 0x444   :  { %v3122_v60 = vrot.slane %v3025_v12, %v10288_v30  ;;  %v3126_v21 = vrot.slane %v3025_v12, %v10294_v38  ;;  %v6502_v14 = vrot.slane %v6409_v16, %v10291_v34 }
 0x445   :  { %6344 = vmatpush2.bf16.msra.mxu0 %v7591_v41  ;;  %v6482_v41 = vrot.slane %v6409_v16, %v9168_v48 }
 0x446   :  { %6385 = vmatpush2.bf16.msra.mxu1 %v7593_v42  ;;  %6345 = vmatprep.subr.bf16.mxu0 %v7560_v25  ;;  %v6486_v25 = vrot.slane %v6409_v16, %v9179_v53 }
 0x447   :  { %6386 = vmatprep.subr.bf16.mxu1 %v7562_v24 }
 0x449   :  { %6346 = vmatpush2.bf16.msra.mxu0 %v7559_v46 }
 0x44a   :  { %6387 = vmatpush2.bf16.msra.mxu1 %v7561_v47  ;;  %6347 = vmatprep.subr.bf16.mxu0 %v7528_v61 }
 0x44b   :  { %6388 = vmatprep.subr.bf16.mxu1 %v7530_v3 }
 0x44d   :  { %6348 = vmatpush2.bf16.msra.mxu0 %v7527_v50 }
 0x44e   :  { %6389 = vmatpush2.bf16.msra.mxu1 %v7529_v56  ;;  %6349 = vmatprep.subr.bf16.mxu0 %v7496_v39 }
 0x44f   :  { %6390 = vmatprep.subr.bf16.mxu1 %v7498_v57 }
 0x451   :  { %6350 = vmatpush2.bf16.msra.mxu0 %v7495_v62  ;;  %v6498_v62 = vrot.slane %v6409_v16, %v10285_v27 }
 0x452   :  { %6391 = vmatpush2.bf16.msra.mxu1 %v7497_v63  ;;  %6351 = vmatprep.subr.bf16.mxu0 %v7464_v22  ;;  %v3118_v63 = vrot.slane %v3025_v12, %v10291_v34 }
 0x453   :  { %6392 = vmatprep.subr.bf16.mxu1 %v7466_v51  ;;  %v6506_v51 = vrot.slane %v6409_v16, %v10288_v30 }
 0x455   :  { %6352 = vmatpush2.bf16.msra.mxu0 %v7463_v40 }
 0x456   :  { %6393 = vmatpush2.bf16.msra.mxu1 %v7465_v0  ;;  %6353 = vmatprep.subr.bf16.mxu0 %v7432_v1  ;;  %v6510_v1 = vrot.slane %v6409_v16, %v10294_v38  ;;  %v3026_v16 = vld [vmem:[%s11019_s8 + $0x18] sm:$0xff] }
 0x457   :  { %6394 = vmatprep.subr.bf16.mxu1 %v7434_v2 }
 0x459   :  { %6354 = vmatpush2.bf16.msra.mxu0 %v7431_v28 }
 0x45a   :  { %6395 = vmatpush2.bf16.msra.mxu1 %v7433_v7  ;;  %6355 = vmatprep.subr.bf16.mxu0 %v7400_v8 }
 0x45b   :  { %6396 = vmatprep.subr.bf16.mxu1 %v7402_v9 }
 0x45d   :  { %6356 = vmatpush2.bf16.msra.mxu0 %v7399_v10 }
 0x45e   :  { %6397 = vmatpush2.bf16.msra.mxu1 %v7401_v11 }
 0x460   :  { %v6113_v31 = vpop.f32.mrf.mxu0  ;;  %6358 = vmatmul.mubr.bf16.vlgmr.msra.gmra.mxu0 %v9477_v36 }
 0x461   :  { %v6114_v15 = vadd.f32 %v6113_v31, %v3098_v13  ;;  %v6154_v42 = vpop.f32.mrf.mxu1  ;;  %6399 = vmatmul.mubr.bf16.vlgmr.msra.gmra.mxu1 %v9477_v36 }
 0x462   :  { %v6155_v24 = vadd.f32 %v6154_v42, %v3106_v18  ;;  %v6115_v26 = vpop.f32.mrf.mxu0  ;;  %v3134_v42 = vrot.slane %v3026_v16, %v9179_v53 }
 0x463   :  { %v6116_v45 = vadd.f32 %v6115_v26, %v3102_v19  ;;  %v6156_v46 = vpop.f32.mrf.mxu1  ;;  %v6591_v3 = vadd.f32 %v6482_v41, %v6114_v15  ;;  %v6410_v15 = vld [vmem:[%s11020_s9 + $0x18] sm:$0xff]  ;;  %v3138_v41 = vrot.slane %v3026_v16, %v9303_v17 }
 0x464   :  { %v6157_v47 = vadd.f32 %v6156_v46, %v3110_v32  ;;  %v6117_v61 = vpop.f32.mrf.mxu0  ;;  %v6593_v54 = vadd.f32 %v6490_v43, %v6155_v24  ;;  %v3130_v32 = vrot.slane %v3026_v16, %v9168_v48  ;;  %v3142_v24 = vrot.slane %v3026_v16, %v9312_v20 }
 0x465   :  { %v6592_v52 = vadd.f32 %v6486_v25, %v6116_v45  ;;  %v6158_v37 = vpop.f32.mrf.mxu1  ;;  %v6514_v26 = vrot.slane %v6410_v15, %v9168_v48  ;;  %v6518_v45 = vrot.slane %v6410_v15, %v9179_v53 }
 0x466   :  { %v6594_v55 = vadd.f32 %v6494_v44, %v6157_v47  ;;  %v6118_v50 = vpop.f32.mrf.mxu0  ;;  %v6522_v47 = vrot.slane %v6410_v15, %v9303_v17 }
 0x467   :  { %v6707_v56 = vcombine.low %v6591_v3, %v6592_v52  ;;  %v6159_v36 = vpop.f32.mrf.mxu1  ;;  %v6526_v3 = vrot.slane %v6410_v15, %v9312_v20  ;;  %v3146_v20 = vrot.slane %v3026_v16, %v10285_v27 }
 0x468   :  { %v6708_v39 = vcombine.low %v6593_v54, %v6594_v55 }
 0x469   :  { %v6715_v57 = vrot.slane %v6707_v56, %v8301_v49 }
 0x46a   :  { %v6722_v58 = vrot.slane %v6708_v39, %v8301_v49 }
 0x46c   :  { %v6723_v29 = vcombine.low %v6715_v57, %v6722_v58 }
 0x46e   :  { %6787 = vst [vmem:[%s11021_s10 + $0x20] sm:$0xff] %v6723_v29 }
 0x4a0   :  { %v6195_v22 = vpop.f32.mrf.mxu0 }
 0x4a1   :  { %v6196_v23 = vadd.f32 %v6195_v22, %v3114_v59  ;;  %v6236_v35 = vpop.f32.mrf.mxu1  ;;  %v3150_v22 = vrot.slane %v3026_v16, %v10291_v34 }
 0x4a2   :  { %v6237_v40 = vadd.f32 %v6236_v35, %v3122_v60  ;;  %v6197_v0 = vpop.f32.mrf.mxu0 }
 0x4a3   :  { %v6595_v2 = vadd.f32 %v6498_v62, %v6196_v23  ;;  %v6198_v33 = vadd.f32 %v6197_v0, %v3118_v63  ;;  %v6238_v4 = vpop.f32.mrf.mxu1  ;;  %v3154_v62 = vrot.slane %v3026_v16, %v10288_v30  ;;  %v6530_v63 = vrot.slane %v6410_v15, %v10285_v27 }
 0x4a4   :  { %v6597_v5 = vadd.f32 %v6506_v51, %v6237_v40  ;;  %v6239_v6 = vadd.f32 %v6238_v4, %v3126_v21  ;;  %v6199_v28 = vpop.f32.mrf.mxu0  ;;  %v6538_v21 = vrot.slane %v6410_v15, %v10288_v30  ;;  %v3158_v23 = vrot.slane %v3026_v16, %v10294_v38 }
 0x4a5   :  { %v6596_v7 = vadd.f32 %v6502_v14, %v6198_v33  ;;  %v6240_v8 = vpop.f32.mrf.mxu1  ;;  %v6534_v40 = vrot.slane %v6410_v15, %v10291_v34 }
 0x4a6   :  { %v6598_v9 = vadd.f32 %v6510_v1, %v6239_v6  ;;  %v6200_v10 = vpop.f32.mrf.mxu0 }
 0x4a7   :  { %v6724_v11 = vcombine.low %v6595_v2, %v6596_v7  ;;  %v6241_v12 = vpop.f32.mrf.mxu1  ;;  %v6542_v2 = vrot.slane %v6410_v15, %v10294_v38 }
 0x4a8   :  { %v6725_v13 = vcombine.low %v6597_v5, %v6598_v9 }
 0x4a9   :  { %v6732_v18 = vrot.slane %v6724_v11, %v8301_v49 }
 0x4aa   :  { %v6739_v19 = vrot.slane %v6725_v13, %v8301_v49 }
 0x4ac   :  { %v6740_v31 = vcombine.low %v6732_v18, %v6739_v19 }
 0x4ae   :  { %6788 = vst [vmem:[%s11021_s10 + $0x28] sm:$0xff] %v6740_v31 }
 0x4e0   :  { %v6277_v25 = vpop.f32.mrf.mxu0 }
 0x4e1   :  { %v6278_v43 = vadd.f32 %v6277_v25, %v3130_v32  ;;  %v6318_v44 = vpop.f32.mrf.mxu1 }
 0x4e2   :  { %v6319_v46 = vadd.f32 %v6318_v44, %v3138_v41  ;;  %v6279_v61 = vpop.f32.mrf.mxu0 }
 0x4e3   :  { %v6280_v52 = vadd.f32 %v6279_v61, %v3134_v42  ;;  %v6320_v37 = vpop.f32.mrf.mxu1  ;;  %v6599_v50 = vadd.f32 %v6514_v26, %v6278_v43 }
 0x4e4   :  { %v6321_v54 = vadd.f32 %v6320_v37, %v3142_v24  ;;  %v6281_v55 = vpop.f32.mrf.mxu0  ;;  %v6601_v39 = vadd.f32 %v6522_v47, %v6319_v46 }
 0x4e5   :  { %v6600_v56 = vadd.f32 %v6518_v45, %v6280_v52  ;;  %v6322_v36 = vpop.f32.mrf.mxu1 }
 0x4e6   :  { %v6602_v57 = vadd.f32 %v6526_v3, %v6321_v54  ;;  %v6282_v58 = vpop.f32.mrf.mxu0 }
 0x4e7   :  { %v6741_v48 = vcombine.low %v6599_v50, %v6600_v56  ;;  %v6323_v29 = vpop.f32.mrf.mxu1 }
 0x4e8   :  { %v6742_v59 = vcombine.low %v6601_v39, %v6602_v57 }
 0x4e9   :  { %v6749_v53 = vrot.slane %v6741_v48, %v8301_v49 }
 0x4ea   :  { %v6756_v17 = vrot.slane %v6742_v59, %v8301_v49 }
 0x4ec   :  { %v6757_v60 = vcombine.low %v6749_v53, %v6756_v17 }
 0x4ee   :  { %6789 = vst [vmem:[%s11021_s10 + $0x30] sm:$0xff] %v6757_v60 }
 0x520   :  { %v6359_v51 = vpop.f32.mrf.mxu0 }
 0x521   :  { %v6360_v35 = vadd.f32 %v6359_v51, %v3146_v20  ;;  %v6400_v14 = vpop.f32.mrf.mxu1 }
 0x522   :  { %v6401_v0 = vadd.f32 %v6400_v14, %v3154_v62  ;;  %v6361_v1 = vpop.f32.mrf.mxu0 }
 0x523   :  { %v6603_v33 = vadd.f32 %v6530_v63, %v6360_v35  ;;  %v6362_v4 = vadd.f32 %v6361_v1, %v3150_v22  ;;  %v6402_v5 = vpop.f32.mrf.mxu1 }
 0x524   :  { %v6605_v6 = vadd.f32 %v6538_v21, %v6401_v0  ;;  %v6403_v27 = vadd.f32 %v6402_v5, %v3158_v23  ;;  %v6363_v28 = vpop.f32.mrf.mxu0 }
 0x525   :  { %v6604_v7 = vadd.f32 %v6534_v40, %v6362_v4  ;;  %v6404_v8 = vpop.f32.mrf.mxu1 }
 0x526   :  { %v6606_v9 = vadd.f32 %v6542_v2, %v6403_v27  ;;  %v6364_v30 = vpop.f32.mrf.mxu0 }
 0x527   :  { %v6758_v10 = vcombine.low %v6603_v33, %v6604_v7  ;;  %v6405_v11 = vpop.f32.mrf.mxu1 }
 0x528   :  { %v6759_v12 = vcombine.low %v6605_v6, %v6606_v9 }
 0x529   :  { %v6766_v13 = vrot.slane %v6758_v10, %v8301_v49 }
 0x52a   :  { %v6773_v34 = vrot.slane %v6759_v12, %v8301_v49 }
 0x52c   :  { %v6774_v18 = vcombine.low %v6766_v13, %v6773_v34 }
 0x52e   :  { %6790 = vst [vmem:[%s11021_s10 + $0x38] sm:$0xff] %v6774_v18 }

</bundles_post_ra>
